<compile_context>
chip_gen: v7x
topology: tpu7x:2x2x1
jax: 0.10.0
libtpu: 0.0.40
codegen_flags: <defaults>
</compile_context>

<pallas_src>
import functools

import numpy as np
import jax
import jax.numpy as jnp
from jax import lax
from jax.experimental import pallas as pl
from jax.experimental.pallas import tpu as pltpu

BN_EPS = 1e-3


def _round_up(x, m):
    return (x + m - 1) // m * m


def fold_bn(gamma, beta, mean, var):
    scale = gamma / jnp.sqrt(var + BN_EPS)
    bias = beta - mean * scale
    return scale, bias


# -----------------------------------------------------------------------------
# Kernel 1: fused (im2col) matmul + bias + ReLU, tiled over M, bf16 on the MXU
# -----------------------------------------------------------------------------
def _matmul_bias_relu_kernel(p_ref, w_ref, b_ref, o_ref):
    acc = jnp.dot(p_ref[...], w_ref[...], preferred_element_type=jnp.float32)
    o_ref[...] = jnp.maximum(acc + b_ref[...], 0.0)


def matmul_bias_relu(patches, w_mat, bias):
    """relu(patches @ w_mat + bias).  patches:(M,K) f32 -> (M,Cout) f32."""
    M, K = patches.shape
    Cout = w_mat.shape[1]
    assert Cout % 128 == 0, Cout
    tile_n = Cout                       # lane-dense output; weights stay resident
    tile_m = min(256, _round_up(M, 8))  # bounded VMEM per step, multiple of 8
    Mpad = _round_up(M, tile_m)
    if Mpad != M:
        patches = jnp.pad(patches, ((0, Mpad - M), (0, 0)))
    out = pl.pallas_call(
        _matmul_bias_relu_kernel,
        out_shape=jax.ShapeDtypeStruct((Mpad, Cout), jnp.float32),
        grid_spec=pltpu.PrefetchScalarGridSpec(
            num_scalar_prefetch=0,
            grid=(Mpad // tile_m, Cout // tile_n),
            in_specs=[
                # patches index constant along the (inner) Cout axis -> resident
                pl.BlockSpec((tile_m, K), lambda i, j: (i, 0)),
                pl.BlockSpec((K, tile_n), lambda i, j: (0, j)),
                pl.BlockSpec((1, tile_n), lambda i, j: (0, j)),
            ],
            out_specs=pl.BlockSpec((tile_m, tile_n), lambda i, j: (i, j)),
        ),
        compiler_params=pltpu.CompilerParams(
            dimension_semantics=("parallel", "parallel")),
    )(patches.astype(jnp.bfloat16), w_mat.astype(jnp.bfloat16),
      bias.reshape(1, Cout).astype(jnp.float32))
    return out[:M] if Mpad != M else out


# -----------------------------------------------------------------------------
# Kernel 2: 3x3 / stride-1 / pad-1 conv without a materialized im2col tensor.
# Padded NHWC activations are flattened to (N*Hp*Wp, Cin) rows in HBM; each grid
# step DMAs a row tile plus a (2*Wp+2)-row halo into a VMEM double buffer and
# accumulates the nine tap matmuls from shifted in-VMEM slices
# (tap offset = di*Wp + dj).  Manual double buffering overlaps the row DMA of
# step i+1 with the matmuls of step i.
# -----------------------------------------------------------------------------
def _conv3x3_s1_kernel(x_hbm, w_ref, b_ref, o_ref, xbuf, sem,
                       *, tile_m, rows_in, offsets):
    i = pl.program_id(0)
    nsteps = pl.num_programs(0)
    slot = lax.rem(i, 2)

    def start_copy(step, buf_slot):
        start = pl.multiple_of(step * tile_m, 8)
        pltpu.make_async_copy(x_hbm.at[pl.ds(start, rows_in)],
                              xbuf.at[buf_slot], sem.at[buf_slot]).start()

    @pl.when(i == 0)                                   # prime slot 0
    def _():
        start_copy(0, 0)

    @pl.when(i + 1 < nsteps)                           # prefetch next tile
    def _():
        start_copy(i + 1, 1 - slot)

    # Wait for this step's rows (started at step i-1, or just above for i==0).
    cur = pl.multiple_of(i * tile_m, 8)
    pltpu.make_async_copy(x_hbm.at[pl.ds(cur, rows_in)],
                          xbuf.at[slot], sem.at[slot]).wait()

    x_slot = xbuf.at[slot]
    acc = jnp.zeros(o_ref.shape, jnp.float32)
    for t, off in enumerate(offsets):                  # 9 static taps
        a = x_slot[pl.ds(off, tile_m), :].astype(jnp.bfloat16)
        acc = acc + jnp.dot(a, w_ref[t], preferred_element_type=jnp.float32)
    o_ref[...] = jnp.maximum(acc + b_ref[...], 0.0)


def conv3x3_s1_bn_relu(x_nhwc, p):
    """BasicConv2d with kernel 3x3, stride 1, padding 1 (branch1[1])."""
    N, H, W, Cin = x_nhwc.shape
    w = p["w"]                                  # (Cout, Cin, 3, 3) PyTorch layout
    Cout = w.shape[0]
    assert Cout % 128 == 0 and Cin % 128 == 0, (Cin, Cout)
    scale, bias = fold_bn(p["gamma"], p["beta"], p["mean"], p["var"])
    w_taps = (jnp.transpose(w, (2, 3, 1, 0)).reshape(9, Cin, Cout)
              * scale[None, None, :]).astype(jnp.bfloat16)

    Hp, Wp = H + 2, W + 2
    xp = jnp.pad(x_nhwc, ((0, 0), (1, 1), (1, 1), (0, 0)))
    M = N * Hp * Wp                             # flat (over-computed) output rows
    tile_m = min(256, _round_up(M, 8))
    Mpad = _round_up(M, tile_m)
    slack = _round_up(2 * Wp + 2, 8)            # halo >= largest tap offset
    rows_in = tile_m + slack
    x_flat = jnp.pad(xp.reshape(M, Cin).astype(jnp.float32),
                     ((0, Mpad + slack - M), (0, 0)))

    offsets = tuple(di * Wp + dj for di in range(3) for dj in range(3))
    kernel = functools.partial(_conv3x3_s1_kernel, tile_m=tile_m,
                               rows_in=rows_in, offsets=offsets)
    out = pl.pallas_call(
        kernel,
        out_shape=jax.ShapeDtypeStruct((Mpad, Cout), jnp.float32),
        grid_spec=pltpu.PrefetchScalarGridSpec(
            num_scalar_prefetch=0,
            grid=(Mpad // tile_m,),
            in_specs=[
                pl.BlockSpec(memory_space=pl.ANY),                # x stays in HBM
                pl.BlockSpec((9, Cin, Cout), lambda i: (0, 0, 0)),
                pl.BlockSpec((1, Cout), lambda i: (0, 0)),
            ],
            out_specs=pl.BlockSpec((tile_m, Cout), lambda i: (i, 0)),
            scratch_shapes=[pltpu.VMEM((2, rows_in, Cin), jnp.float32),
                            pltpu.SemaphoreType.DMA((2,))],
        ),
        compiler_params=pltpu.CompilerParams(
            # cross-step prefetch requires strictly sequential grid iteration
            dimension_semantics=("arbitrary",)),
    )(x_flat, w_taps, bias.reshape(1, Cout).astype(jnp.float32))
    # Valid outputs of the flat "shift conv" live at rows n*Hp*Wp + h*Wp + w.
    return out[:M].reshape(N, Hp, Wp, Cout)[:, :H, :W, :]


# -----------------------------------------------------------------------------
# JAX glue: im2col (for 1x1 and 3x3/stride-2 convs), maxpool, module wiring
# -----------------------------------------------------------------------------
def im2col(x_nhwc, k, stride, pad):
    if pad > 0:
        x_nhwc = jnp.pad(x_nhwc, ((0, 0), (pad, pad), (pad, pad), (0, 0)))
    N, H, W, C = x_nhwc.shape
    Ho = (H - k) // stride + 1
    Wo = (W - k) // stride + 1
    taps = [x_nhwc[:, i::stride, j::stride, :][:, :Ho, :Wo, :]
            for i in range(k) for j in range(k)]
    patches = jnp.stack(taps, axis=3)              # (N, Ho, Wo, k*k, C)
    return patches.reshape(N * Ho * Wo, k * k * C), (N, Ho, Wo)


def conv_bn_relu_im2col(x_nhwc, p, k, stride, pad=0):
    """BasicConv2d via im2col + fused matmul kernel (1x1 and 3x3/stride-2)."""
    cin = x_nhwc.shape[-1]
    w = p["w"]                                     # (Cout, Cin, k, k)
    cout = w.shape[0]
    scale, bias = fold_bn(p["gamma"], p["beta"], p["mean"], p["var"])
    w_mat = (jnp.transpose(w, (2, 3, 1, 0)).reshape(k * k * cin, cout)
             * scale[None, :])                     # BN scale folded into weights
    patches, (N, Ho, Wo) = im2col(x_nhwc, k, stride, pad)
    out = matmul_bias_relu(patches, w_mat, bias)
    return out.reshape(N, Ho, Wo, cout)


def maxpool3x3_s2(x_nhwc):
    # Memory-bound; fused shifted-slice max, no 9x tap stack in HBM.
    # TODO(synk): could be written straight into the concat slab by a Pallas epilogue.
    N, H, W, C = x_nhwc.shape
    Ho = (H - 3) // 2 + 1
    Wo = (W - 3) // 2 + 1
    out = None
    for i in range(3):
        for j in range(3):
            tap = x_nhwc[:, i::2, j::2, :][:, :Ho, :Wo, :]
            out = tap if out is None else jnp.maximum(out, tap)
    return out


def mixed_6a_forward(x_nchw, params):
    """Mixed_6a: NCHW (N, 320, H, W) -> NCHW (N, 1088, Ho, Wo)."""
    x = jnp.transpose(x_nchw, (0, 2, 3, 1))                    # -> NHWC
    x0 = conv_bn_relu_im2col(x, params["b0"], 3, 2, 0)         # 3x3 / stride 2
    y = conv_bn_relu_im2col(x, params["b1_0"], 1, 1, 0)        # 1x1
    y = conv3x3_s1_bn_relu(y, params["b1_1"])                  # 3x3 / s1 / pad 1
    x1 = conv_bn_relu_im2col(y, params["b1_2"], 3, 2, 0)       # 3x3 / stride 2
    x2 = maxpool3x3_s2(x)                                      # MaxPool2d(3, 2)
    out = jnp.concatenate([x0, x1, x2], axis=-1)
    return jnp.transpose(out, (0, 3, 1, 2))                    # -> NCHW


# -----------------------------------------------------------------------------
# Deterministic synthetic parameters (no checkpoint).  Running BN variance is
# matched to the pre-activation scale so post-BN activations stay O(1).
# -----------------------------------------------------------------------------
def make_conv_params(key, cout, cin, k):
    kw_, kg, kb, km, kv = jax.random.split(key, 5)
    fan_in = cin * k * k
    return {
        "w": jax.random.normal(kw_, (cout, cin, k, k), jnp.float32) * 0.05,
        "gamma": 1.0 + 0.1 * jax.random.normal(kg, (cout,), jnp.float32),
        "beta": 0.1 * jax.random.normal(kb, (cout,), jnp.float32),
        "mean": 0.1 * jax.random.normal(km, (cout,), jnp.float32),
        "var": (0.05 ** 2 * fan_in)
               * (0.5 + jax.random.uniform(kv, (cout,), jnp.float32)),
    }


def make_params(key):
    k0, k1, k2, k3 = jax.random.split(key, 4)
    return {
        "b0": make_conv_params(k0, 384, 320, 3),
        "b1_0": make_conv_params(k1, 256, 320, 1),
        "b1_1": make_conv_params(k2, 256, 256, 3),
        "b1_2": make_conv_params(k3, 384, 256, 3),
    }


# -----------------------------------------------------------------------------
# Pure-JAX reference (lax.conv / reduce_window) for a correctness spot-check
# -----------------------------------------------------------------------------
def reference_forward(x_nchw, params):
    def conv_bn_relu(x, p, stride, pad):
        y = lax.conv_general_dilated(
            x, p["w"], window_strides=(stride, stride),
            padding=((pad, pad), (pad, pad)),
            dimension_numbers=("NCHW", "OIHW", "NCHW"))
        scale, bias = fold_bn(p["gamma"], p["beta"], p["mean"], p["var"])
        y = y * scale[None, :, None, None] + bias[None, :, None, None]
        return jnp.maximum(y, 0.0)

    x0 = conv_bn_relu(x_nchw, params["b0"], 2, 0)
    y = conv_bn_relu(x_nchw, params["b1_0"], 1, 0)
    y = conv_bn_relu(y, params["b1_1"], 1, 1)
    x1 = conv_bn_relu(y, params["b1_2"], 2, 0)
    x2 = lax.reduce_window(x_nchw, -jnp.inf, lax.max,
                           (1, 1, 3, 3), (1, 1, 2, 2), "VALID")
    return jnp.concatenate([x0, x1, x2], axis=1)


if __name__ == "__main__":
    key = jax.random.PRNGKey(0)
    kx, kp = jax.random.split(key)

    # Small spatial size (9x9) with the module's true channel counts (320 in).
    N, C, H, W = 2, 320, 9, 9
    x = jax.random.normal(kx, (N, C, H, W), jnp.float32)
    params = make_params(kp)

    out = jax.block_until_ready(jax.jit(mixed_6a_forward)(x, params))

    # Shape check: 384 + 384 + 320 = 1088 channels, 4x4 spatial.
    assert out.shape == (N, 1088, 4, 4), out.shape

    # Numerical spot-check (bf16 inputs, f32 accumulation) vs pure-JAX f32 ref.
    ref = jax.block_until_ready(jax.jit(reference_forward)(x, params))
    np.testing.assert_allclose(np.asarray(out), np.asarray(ref),
                               rtol=5e-2, atol=5e-2)

    print("KERNEL_OK")
</pallas_src>

<mosaic_0001>
module attributes {stable_mosaic.version = 11 : i64} {
  func.func @_matmul_bias_relu_kernel(%arg0: i32, %arg1: i32, %arg2: memref<168x320xbf16, #tpu.memory_space<vmem>>, %arg3: memref<320x256xbf16, #tpu.memory_space<vmem>>, %arg4: memref<1x256xf32, #tpu.memory_space<vmem>>, %arg5: memref<168x256xf32, #tpu.memory_space<vmem>>) attributes {dimension_semantics = [#tpu.dimension_semantics<parallel>, #tpu.dimension_semantics<parallel>], iteration_bounds = array<i64: 1, 1>, scalar_prefetch = 0 : i64, scratch_operands = 0 : i64, tpu.core_type = #tpu.core_type<tc>, window_params = [{transform_indices = @transform_0, window_bounds = array<i64: 168, 320>}, {transform_indices = @transform_1, window_bounds = array<i64: 320, 256>}, {transform_indices = @transform_2, window_bounds = array<i64: 1, 256>}, {transform_indices = @transform_3, window_bounds = array<i64: 168, 256>}]} {
    %c0 = arith.constant 0 : index
    %c0_0 = arith.constant 0 : index
    %0 = vector.load %arg2[%c0, %c0_0] : memref<168x320xbf16, #tpu.memory_space<vmem>>, vector<168x320xbf16>
    %c0_1 = arith.constant 0 : index
    %c0_2 = arith.constant 0 : index
    %1 = vector.load %arg3[%c0_1, %c0_2] : memref<320x256xbf16, #tpu.memory_space<vmem>>, vector<320x256xbf16>
    %cst = arith.constant dense<0.000000e+00> : vector<168x256xf32>
    %2 = tpu.matmul %0, %1, %cst {dimension_numbers = #tpu.dot_dimension_numbers<[1], [0], [0], [1], [0, 0, 1, 1], [], []>} : vector<168x320xbf16>, vector<320x256xbf16>, vector<168x256xf32> -> vector<168x256xf32>
    %c0_3 = arith.constant 0 : index
    %c0_4 = arith.constant 0 : index
    %3 = vector.load %arg4[%c0_3, %c0_4] : memref<1x256xf32, #tpu.memory_space<vmem>>, vector<1x256xf32>
    %4 = vector.broadcast %3 : vector<1x256xf32> to vector<168x256xf32>
    %5 = arith.addf %2, %4 : vector<168x256xf32>
    %cst_5 = arith.constant 0.000000e+00 : f32
    %6 = vector.broadcast %cst_5 : f32 to vector<168x256xf32>
    %7 = arith.maximumf %5, %6 : vector<168x256xf32>
    %c0_6 = arith.constant 0 : index
    %c0_7 = arith.constant 0 : index
    %8 = vector.load %arg5[%c0_6, %c0_7] : memref<168x256xf32, #tpu.memory_space<vmem>>, vector<168x256xf32>
    tpu.vector_store %arg5[%c0_6, %c0_7], %7 {strides = array<i32>} : memref<168x256xf32, #tpu.memory_space<vmem>>, vector<168x256xf32>,
    return
  }
  func.func @transform_0(%arg0: i32, %arg1: i32) -> (i32, i32) {
    %c0_i32 = arith.constant 0 : i32
    %c0_i32_0 = arith.constant 0 : i32
    return %arg0, %c0_i32 : i32, i32
  }
  func.func @transform_1(%arg0: i32, %arg1: i32) -> (i32, i32) {
    %c0_i32 = arith.constant 0 : i32
    %c0_i32_0 = arith.constant 0 : i32
    return %c0_i32, %arg1 : i32, i32
  }
  func.func @transform_2(%arg0: i32, %arg1: i32) -> (i32, i32) {
    %c0_i32 = arith.constant 0 : i32
    %c0_i32_0 = arith.constant 0 : i32
    return %c0_i32, %arg1 : i32, i32
  }
  func.func @transform_3(%arg0: i32, %arg1: i32) -> (i32, i32) {
    %c0_i32 = arith.constant 0 : i32
    return %arg0, %arg1 : i32, i32
  }
}

module attributes {stable_mosaic.version = 11 : i64} {
  func.func @_conv3x3_s1_kernel(%arg0: i32, %arg1: memref<272x256xf32, #tpu.memory_space<any>>, %arg2: memref<9x256x256xbf16, #tpu.memory_space<vmem>>, %arg3: memref<1x256xf32, #tpu.memory_space<vmem>>, %arg4: memref<248x256xf32, #tpu.memory_space<vmem>>, %arg5: memref<2x272x256xf32, #tpu.memory_space<vmem>>, %arg6: memref<2x!tpu.dma_semaphore, #tpu.memory_space<semaphore_mem>>) attributes {dimension_semantics = [#tpu.dimension_semantics<arbitrary>], iteration_bounds = array<i64: 1>, scalar_prefetch = 0 : i64, scratch_operands = 2 : i64, tpu.core_type = #tpu.core_type<tc>, window_params = [{}, {pipeline_mode = #tpu.pipeline_mode<synchronous>, transform_indices = @transform_1, window_bounds = array<i64: 9, 256, 256>}, {pipeline_mode = #tpu.pipeline_mode<synchronous>, transform_indices = @transform_2, window_bounds = array<i64: 1, 256>}, {transform_indices = @transform_3, window_bounds = array<i64: 248, 256>}]} {
    %c2_i32 = arith.constant 2 : i32
    %0 = arith.remsi %arg0, %c2_i32 : i32
    %c0_i32 = arith.constant 0 : i32
    %1 = arith.cmpi eq, %arg0, %c0_i32 : i32
    %2 = arith.extui %1 : i1 to i32
    %c0_i32_0 = arith.constant 0 : i32
    %3 = arith.cmpi ne, %2, %c0_i32_0 : i32
    scf.if %3 {
      %c0_i32_68 = arith.constant 0 : i32
      %94 = tpu.assume_multiple %c0_i32_68, 8 : i32
      %c0_i32_69 = arith.constant 0 : i32
      %c0_i32_70 = arith.constant 0 : i32
      %c0_i32_71 = arith.constant 0 : i32
      %95 = tpu.memref_slice %arg1[%94, %c0_i32_71] : memref<272x256xf32, #tpu.memory_space<any>> -> memref<272x256xf32, #tpu.memory_space<any>>
      %c0_i32_72 = arith.constant 0 : i32
      %c0_i32_73 = arith.constant 0 : i32
      %96 = tpu.memref_slice %arg5[%c0_i32_69, %c0_i32_72, %c0_i32_73] : memref<2x272x256xf32, #tpu.memory_space<vmem>> -> memref<1x272x256xf32, #tpu.memory_space<vmem>>
      %97 = tpu.memref_squeeze %96 : memref<1x272x256xf32, #tpu.memory_space<vmem>> -> memref<272x256xf32, #tpu.memory_space<vmem>>
      %98 = tpu.memref_slice %arg6[%c0_i32_70] : memref<2x!tpu.dma_semaphore, #tpu.memory_space<semaphore_mem>> -> memref<1x!tpu.dma_semaphore, #tpu.memory_space<semaphore_mem>>
      %99 = tpu.memref_squeeze %98 : memref<1x!tpu.dma_semaphore, #tpu.memory_space<semaphore_mem>> -> memref<!tpu.dma_semaphore, #tpu.memory_space<semaphore_mem>>
      tpu.enqueue_dma source(%95 : memref<272x256xf32, #tpu.memory_space<any>>) target(%97 : memref<272x256xf32, #tpu.memory_space<vmem>>) target_semaphore(%99 : memref<!tpu.dma_semaphore, #tpu.memory_space<semaphore_mem>>)
    } else {
    }
    %c1_i32 = arith.constant 1 : i32
    %4 = arith.addi %arg0, %c1_i32 : i32
    %c1_i32_1 = arith.constant 1 : i32
    %5 = arith.cmpi slt, %4, %c1_i32_1 : i32
    %6 = arith.extui %5 : i1 to i32
    %c0_i32_2 = arith.constant 0 : i32
    %7 = arith.cmpi ne, %6, %c0_i32_2 : i32
    scf.if %7 {
      %c1_i32_68 = arith.constant 1 : i32
      %94 = arith.addi %arg0, %c1_i32_68 : i32
      %c1_i32_69 = arith.constant 1 : i32
      %95 = arith.subi %c1_i32_69, %0 : i32
      %c248_i32_70 = arith.constant 248 : i32
      %96 = arith.muli %94, %c248_i32_70 : i32
      %97 = tpu.assume_multiple %96, 8 : i32
      %c0_i32_71 = arith.constant 0 : i32
      %98 = tpu.memref_slice %arg1[%97, %c0_i32_71] : memref<272x256xf32, #tpu.memory_space<any>> -> memref<272x256xf32, #tpu.memory_space<any>>
      %c0_i32_72 = arith.constant 0 : i32
      %c0_i32_73 = arith.constant 0 : i32
      %99 = tpu.memref_slice %arg5[%95, %c0_i32_72, %c0_i32_73] : memref<2x272x256xf32, #tpu.memory_space<vmem>> -> memref<1x272x256xf32, #tpu.memory_space<vmem>>
      %100 = tpu.memref_squeeze %99 : memref<1x272x256xf32, #tpu.memory_space<vmem>> -> memref<272x256xf32, #tpu.memory_space<vmem>>
      %101 = tpu.memref_slice %arg6[%95] : memref<2x!tpu.dma_semaphore, #tpu.memory_space<semaphore_mem>> -> memref<1x!tpu.dma_semaphore, #tpu.memory_space<semaphore_mem>>
      %102 = tpu.memref_squeeze %101 : memref<1x!tpu.dma_semaphore, #tpu.memory_space<semaphore_mem>> -> memref<!tpu.dma_semaphore, #tpu.memory_space<semaphore_mem>>
      tpu.enqueue_dma source(%98 : memref<272x256xf32, #tpu.memory_space<any>>) target(%100 : memref<272x256xf32, #tpu.memory_space<vmem>>) target_semaphore(%102 : memref<!tpu.dma_semaphore, #tpu.memory_space<semaphore_mem>>)
    } else {
    }
    %c248_i32 = arith.constant 248 : i32
    %8 = arith.muli %arg0, %c248_i32 : i32
    %9 = tpu.assume_multiple %8, 8 : i32
    %c0_i32_3 = arith.constant 0 : i32
    %10 = tpu.memref_slice %arg1[%9, %c0_i32_3] : memref<272x256xf32, #tpu.memory_space<any>> -> memref<272x256xf32, #tpu.memory_space<any>>
    %c0_i32_4 = arith.constant 0 : i32
    %c0_i32_5 = arith.constant 0 : i32
    %11 = tpu.memref_slice %arg5[%0, %c0_i32_4, %c0_i32_5] : memref<2x272x256xf32, #tpu.memory_space<vmem>> -> memref<1x272x256xf32, #tpu.memory_space<vmem>>
    %12 = tpu.memref_squeeze %11 : memref<1x272x256xf32, #tpu.memory_space<vmem>> -> memref<272x256xf32, #tpu.memory_space<vmem>>
    %13 = tpu.memref_slice %arg6[%0] : memref<2x!tpu.dma_semaphore, #tpu.memory_space<semaphore_mem>> -> memref<1x!tpu.dma_semaphore, #tpu.memory_space<semaphore_mem>>
    %14 = tpu.memref_squeeze %13 : memref<1x!tpu.dma_semaphore, #tpu.memory_space<semaphore_mem>> -> memref<!tpu.dma_semaphore, #tpu.memory_space<semaphore_mem>>
    tpu.wait_dma2 semaphore(%14 : memref<!tpu.dma_semaphore, #tpu.memory_space<semaphore_mem>>) src(%10 : memref<272x256xf32, #tpu.memory_space<any>>) dst(%12 : memref<272x256xf32, #tpu.memory_space<vmem>>)
    %cst = arith.constant 0.000000e+00 : f32
    %15 = vector.broadcast %cst : f32 to vector<248x256xf32>
    %c0_i32_6 = arith.constant 0 : i32
    %c0_i32_7 = arith.constant 0 : i32
    %16 = tpu.memref_slice %arg5[%0, %c0_i32_6, %c0_i32_7] : memref<2x272x256xf32, #tpu.memory_space<vmem>> -> memref<1x272x256xf32, #tpu.memory_space<vmem>>
    %17 = tpu.memref_squeeze %16 : memref<1x272x256xf32, #tpu.memory_space<vmem>> -> memref<272x256xf32, #tpu.memory_space<vmem>>
    %c0 = arith.constant 0 : index
    %c0_8 = arith.constant 0 : index
    %18 = vector.load %17[%c0, %c0_8] : memref<272x256xf32, #tpu.memory_space<vmem>>, vector<248x256xf32>
    %19 = arith.truncf %18 : vector<248x256xf32> to vector<248x256xbf16>
    %c0_9 = arith.constant 0 : index
    %c0_10 = arith.constant 0 : index
    %c0_11 = arith.constant 0 : index
    %20 = vector.load %arg2[%c0_9, %c0_10, %c0_11] : memref<9x256x256xbf16, #tpu.memory_space<vmem>>, vector<1x256x256xbf16>
    %21 = vector.shape_cast %20 : vector<1x256x256xbf16> to vector<256x256xbf16>
    %cst_12 = arith.constant dense<0.000000e+00> : vector<248x256xf32>
    %22 = tpu.matmul %19, %21, %cst_12 {dimension_numbers = #tpu.dot_dimension_numbers<[1], [0], [0], [1], [0, 0, 1, 1], [], []>} : vector<248x256xbf16>, vector<256x256xbf16>, vector<248x256xf32> -> vector<248x256xf32>
    %23 = arith.addf %15, %22 : vector<248x256xf32>
    %c0_i32_13 = arith.constant 0 : i32
    %c0_i32_14 = arith.constant 0 : i32
    %24 = tpu.memref_slice %arg5[%0, %c0_i32_13, %c0_i32_14] : memref<2x272x256xf32, #tpu.memory_space<vmem>> -> memref<1x272x256xf32, #tpu.memory_space<vmem>>
    %25 = tpu.memref_squeeze %24 : memref<1x272x256xf32, #tpu.memory_space<vmem>> -> memref<272x256xf32, #tpu.memory_space<vmem>>
    %c1 = arith.constant 1 : index
    %c0_15 = arith.constant 0 : index
    %26 = vector.load %25[%c1, %c0_15] : memref<272x256xf32, #tpu.memory_space<vmem>>, vector<248x256xf32>
    %27 = arith.truncf %26 : vector<248x256xf32> to vector<248x256xbf16>
    %c1_16 = arith.constant 1 : index
    %c0_17 = arith.constant 0 : index
    %c0_18 = arith.constant 0 : index
    %28 = vector.load %arg2[%c1_16, %c0_17, %c0_18] : memref<9x256x256xbf16, #tpu.memory_space<vmem>>, vector<1x256x256xbf16>
    %29 = vector.shape_cast %28 : vector<1x256x256xbf16> to vector<256x256xbf16>
    %cst_19 = arith.constant dense<0.000000e+00> : vector<248x256xf32>
    %30 = tpu.matmul %27, %29, %cst_19 {dimension_numbers = #tpu.dot_dimension_numbers<[1], [0], [0], [1], [0, 0, 1, 1], [], []>} : vector<248x256xbf16>, vector<256x256xbf16>, vector<248x256xf32> -> vector<248x256xf32>
    %31 = arith.addf %23, %30 : vector<248x256xf32>
    %c0_i32_20 = arith.constant 0 : i32
    %c0_i32_21 = arith.constant 0 : i32
    %32 = tpu.memref_slice %arg5[%0, %c0_i32_20, %c0_i32_21] : memref<2x272x256xf32, #tpu.memory_space<vmem>> -> memref<1x272x256xf32, #tpu.memory_space<vmem>>
    %33 = tpu.memref_squeeze %32 : memref<1x272x256xf32, #tpu.memory_space<vmem>> -> memref<272x256xf32, #tpu.memory_space<vmem>>
    %c2 = arith.constant 2 : index
    %c0_22 = arith.constant 0 : index
    %34 = vector.load %33[%c2, %c0_22] : memref<272x256xf32, #tpu.memory_space<vmem>>, vector<248x256xf32>
    %35 = arith.truncf %34 : vector<248x256xf32> to vector<248x256xbf16>
    %c2_23 = arith.constant 2 : index
    %c0_24 = arith.constant 0 : index
    %c0_25 = arith.constant 0 : index
    %36 = vector.load %arg2[%c2_23, %c0_24, %c0_25] : memref<9x256x256xbf16, #tpu.memory_space<vmem>>, vector<1x256x256xbf16>
    %37 = vector.shape_cast %36 : vector<1x256x256xbf16> to vector<256x256xbf16>
    %cst_26 = arith.constant dense<0.000000e+00> : vector<248x256xf32>
    %38 = tpu.matmul %35, %37, %cst_26 {dimension_numbers = #tpu.dot_dimension_numbers<[1], [0], [0], [1], [0, 0, 1, 1], [], []>} : vector<248x256xbf16>, vector<256x256xbf16>, vector<248x256xf32> -> vector<248x256xf32>
    %39 = arith.addf %31, %38 : vector<248x256xf32>
    %c0_i32_27 = arith.constant 0 : i32
    %c0_i32_28 = arith.constant 0 : i32
    %40 = tpu.memref_slice %arg5[%0, %c0_i32_27, %c0_i32_28] : memref<2x272x256xf32, #tpu.memory_space<vmem>> -> memref<1x272x256xf32, #tpu.memory_space<vmem>>
    %41 = tpu.memref_squeeze %40 : memref<1x272x256xf32, #tpu.memory_space<vmem>> -> memref<272x256xf32, #tpu.memory_space<vmem>>
    %c11 = arith.constant 11 : index
    %c0_29 = arith.constant 0 : index
    %42 = vector.load %41[%c11, %c0_29] : memref<272x256xf32, #tpu.memory_space<vmem>>, vector<248x256xf32>
    %43 = arith.truncf %42 : vector<248x256xf32> to vector<248x256xbf16>
    %c3 = arith.constant 3 : index
    %c0_30 = arith.constant 0 : index
    %c0_31 = arith.constant 0 : index
    %44 = vector.load %arg2[%c3, %c0_30, %c0_31] : memref<9x256x256xbf16, #tpu.memory_space<vmem>>, vector<1x256x256xbf16>
    %45 = vector.shape_cast %44 : vector<1x256x256xbf16> to vector<256x256xbf16>
    %cst_32 = arith.constant dense<0.000000e+00> : vector<248x256xf32>
    %46 = tpu.matmul %43, %45, %cst_32 {dimension_numbers = #tpu.dot_dimension_numbers<[1], [0], [0], [1], [0, 0, 1, 1], [], []>} : vector<248x256xbf16>, vector<256x256xbf16>, vector<248x256xf32> -> vector<248x256xf32>
    %47 = arith.addf %39, %46 : vector<248x256xf32>
    %c0_i32_33 = arith.constant 0 : i32
    %c0_i32_34 = arith.constant 0 : i32
    %48 = tpu.memref_slice %arg5[%0, %c0_i32_33, %c0_i32_34] : memref<2x272x256xf32, #tpu.memory_space<vmem>> -> memref<1x272x256xf32, #tpu.memory_space<vmem>>
    %49 = tpu.memref_squeeze %48 : memref<1x272x256xf32, #tpu.memory_space<vmem>> -> memref<272x256xf32, #tpu.memory_space<vmem>>
    %c12 = arith.constant 12 : index
    %c0_35 = arith.constant 0 : index
    %50 = vector.load %49[%c12, %c0_35] : memref<272x256xf32, #tpu.memory_space<vmem>>, vector<248x256xf32>
    %51 = arith.truncf %50 : vector<248x256xf32> to vector<248x256xbf16>
    %c4 = arith.constant 4 : index
    %c0_36 = arith.constant 0 : index
    %c0_37 = arith.constant 0 : index
    %52 = vector.load %arg2[%c4, %c0_36, %c0_37] : memref<9x256x256xbf16, #tpu.memory_space<vmem>>, vector<1x256x256xbf16>
    %53 = vector.shape_cast %52 : vector<1x256x256xbf16> to vector<256x256xbf16>
    %cst_38 = arith.constant dense<0.000000e+00> : vector<248x256xf32>
    %54 = tpu.matmul %51, %53, %cst_38 {dimension_numbers = #tpu.dot_dimension_numbers<[1], [0], [0], [1], [0, 0, 1, 1], [], []>} : vector<248x256xbf16>, vector<256x256xbf16>, vector<248x256xf32> -> vector<248x256xf32>
    %55 = arith.addf %47, %54 : vector<248x256xf32>
    %c0_i32_39 = arith.constant 0 : i32
    %c0_i32_40 = arith.constant 0 : i32
    %56 = tpu.memref_slice %arg5[%0, %c0_i32_39, %c0_i32_40] : memref<2x272x256xf32, #tpu.memory_space<vmem>> -> memref<1x272x256xf32, #tpu.memory_space<vmem>>
    %57 = tpu.memref_squeeze %56 : memref<1x272x256xf32, #tpu.memory_space<vmem>> -> memref<272x256xf32, #tpu.memory_space<vmem>>
    %c13 = arith.constant 13 : index
    %c0_41 = arith.constant 0 : index
    %58 = vector.load %57[%c13, %c0_41] : memref<272x256xf32, #tpu.memory_space<vmem>>, vector<248x256xf32>
    %59 = arith.truncf %58 : vector<248x256xf32> to vector<248x256xbf16>
    %c5 = arith.constant 5 : index
    %c0_42 = arith.constant 0 : index
    %c0_43 = arith.constant 0 : index
    %60 = vector.load %arg2[%c5, %c0_42, %c0_43] : memref<9x256x256xbf16, #tpu.memory_space<vmem>>, vector<1x256x256xbf16>
    %61 = vector.shape_cast %60 : vector<1x256x256xbf16> to vector<256x256xbf16>
    %cst_44 = arith.constant dense<0.000000e+00> : vector<248x256xf32>
    %62 = tpu.matmul %59, %61, %cst_44 {dimension_numbers = #tpu.dot_dimension_numbers<[1], [0], [0], [1], [0, 0, 1, 1], [], []>} : vector<248x256xbf16>, vector<256x256xbf16>, vector<248x256xf32> -> vector<248x256xf32>
    %63 = arith.addf %55, %62 : vector<248x256xf32>
    %c0_i32_45 = arith.constant 0 : i32
    %c0_i32_46 = arith.constant 0 : i32
    %64 = tpu.memref_slice %arg5[%0, %c0_i32_45, %c0_i32_46] : memref<2x272x256xf32, #tpu.memory_space<vmem>> -> memref<1x272x256xf32, #tpu.memory_space<vmem>>
    %65 = tpu.memref_squeeze %64 : memref<1x272x256xf32, #tpu.memory_space<vmem>> -> memref<272x256xf32, #tpu.memory_space<vmem>>
    %c22 = arith.constant 22 : index
    %c0_47 = arith.constant 0 : index
    %66 = vector.load %65[%c22, %c0_47] : memref<272x256xf32, #tpu.memory_space<vmem>>, vector<248x256xf32>
    %67 = arith.truncf %66 : vector<248x256xf32> to vector<248x256xbf16>
    %c6 = arith.constant 6 : index
    %c0_48 = arith.constant 0 : index
    %c0_49 = arith.constant 0 : index
    %68 = vector.load %arg2[%c6, %c0_48, %c0_49] : memref<9x256x256xbf16, #tpu.memory_space<vmem>>, vector<1x256x256xbf16>
    %69 = vector.shape_cast %68 : vector<1x256x256xbf16> to vector<256x256xbf16>
    %cst_50 = arith.constant dense<0.000000e+00> : vector<248x256xf32>
    %70 = tpu.matmul %67, %69, %cst_50 {dimension_numbers = #tpu.dot_dimension_numbers<[1], [0], [0], [1], [0, 0, 1, 1], [], []>} : vector<248x256xbf16>, vector<256x256xbf16>, vector<248x256xf32> -> vector<248x256xf32>
    %71 = arith.addf %63, %70 : vector<248x256xf32>
    %c0_i32_51 = arith.constant 0 : i32
    %c0_i32_52 = arith.constant 0 : i32
    %72 = tpu.memref_slice %arg5[%0, %c0_i32_51, %c0_i32_52] : memref<2x272x256xf32, #tpu.memory_space<vmem>> -> memref<1x272x256xf32, #tpu.memory_space<vmem>>
    %73 = tpu.memref_squeeze %72 : memref<1x272x256xf32, #tpu.memory_space<vmem>> -> memref<272x256xf32, #tpu.memory_space<vmem>>
    %c23 = arith.constant 23 : index
    %c0_53 = arith.constant 0 : index
    %74 = vector.load %73[%c23, %c0_53] : memref<272x256xf32, #tpu.memory_space<vmem>>, vector<248x256xf32>
    %75 = arith.truncf %74 : vector<248x256xf32> to vector<248x256xbf16>
    %c7 = arith.constant 7 : index
    %c0_54 = arith.constant 0 : index
    %c0_55 = arith.constant 0 : index
    %76 = vector.load %arg2[%c7, %c0_54, %c0_55] : memref<9x256x256xbf16, #tpu.memory_space<vmem>>, vector<1x256x256xbf16>
    %77 = vector.shape_cast %76 : vector<1x256x256xbf16> to vector<256x256xbf16>
    %cst_56 = arith.constant dense<0.000000e+00> : vector<248x256xf32>
    %78 = tpu.matmul %75, %77, %cst_56 {dimension_numbers = #tpu.dot_dimension_numbers<[1], [0], [0], [1], [0, 0, 1, 1], [], []>} : vector<248x256xbf16>, vector<256x256xbf16>, vector<248x256xf32> -> vector<248x256xf32>
    %79 = arith.addf %71, %78 : vector<248x256xf32>
    %c0_i32_57 = arith.constant 0 : i32
    %c0_i32_58 = arith.constant 0 : i32
    %80 = tpu.memref_slice %arg5[%0, %c0_i32_57, %c0_i32_58] : memref<2x272x256xf32, #tpu.memory_space<vmem>> -> memref<1x272x256xf32, #tpu.memory_space<vmem>>
    %81 = tpu.memref_squeeze %80 : memref<1x272x256xf32, #tpu.memory_space<vmem>> -> memref<272x256xf32, #tpu.memory_space<vmem>>
    %c24 = arith.constant 24 : index
    %c0_59 = arith.constant 0 : index
    %82 = vector.load %81[%c24, %c0_59] : memref<272x256xf32, #tpu.memory_space<vmem>>, vector<248x256xf32>
    %83 = arith.truncf %82 : vector<248x256xf32> to vector<248x256xbf16>
    %c8 = arith.constant 8 : index
    %c0_60 = arith.constant 0 : index
    %c0_61 = arith.constant 0 : index
    %84 = vector.load %arg2[%c8, %c0_60, %c0_61] : memref<9x256x256xbf16, #tpu.memory_space<vmem>>, vector<1x256x256xbf16>
    %85 = vector.shape_cast %84 : vector<1x256x256xbf16> to vector<256x256xbf16>
    %cst_62 = arith.constant dense<0.000000e+00> : vector<248x256xf32>
    %86 = tpu.matmul %83, %85, %cst_62 {dimension_numbers = #tpu.dot_dimension_numbers<[1], [0], [0], [1], [0, 0, 1, 1], [], []>} : vector<248x256xbf16>, vector<256x256xbf16>, vector<248x256xf32> -> vector<248x256xf32>
    %87 = arith.addf %79, %86 : vector<248x256xf32>
    %c0_63 = arith.constant 0 : index
    %c0_64 = arith.constant 0 : index
    %88 = vector.load %arg3[%c0_63, %c0_64] : memref<1x256xf32, #tpu.memory_space<vmem>>, vector<1x256xf32>
    %89 = vector.broadcast %88 : vector<1x256xf32> to vector<248x256xf32>
    %90 = arith.addf %87, %89 : vector<248x256xf32>
    %cst_65 = arith.constant 0.000000e+00 : f32
    %91 = vector.broadcast %cst_65 : f32 to vector<248x256xf32>
    %92 = arith.maximumf %90, %91 : vector<248x256xf32>
    %c0_66 = arith.constant 0 : index
    %c0_67 = arith.constant 0 : index
    %93 = vector.load %arg4[%c0_66, %c0_67] : memref<248x256xf32, #tpu.memory_space<vmem>>, vector<248x256xf32>
    tpu.vector_store %arg4[%c0_66, %c0_67], %92 {strides = array<i32>} : memref<248x256xf32, #tpu.memory_space<vmem>>, vector<248x256xf32>,
    return
  }
  func.func @transform_1(%arg0: i32) -> (i32, i32, i32) {
    %c0_i32 = arith.constant 0 : i32
    %c0_i32_0 = arith.constant 0 : i32
    %c0_i32_1 = arith.constant 0 : i32
    %c0_i32_2 = arith.constant 0 : i32
    return %c0_i32, %c0_i32_0, %c0_i32_1 : i32, i32, i32
  }
  func.func @transform_2(%arg0: i32) -> (i32, i32) {
    %c0_i32 = arith.constant 0 : i32
    %c0_i32_0 = arith.constant 0 : i32
    %c0_i32_1 = arith.constant 0 : i32
    return %c0_i32, %c0_i32_0 : i32, i32
  }
  func.func @transform_3(%arg0: i32) -> (i32, i32) {
    %c0_i32 = arith.constant 0 : i32
    %c0_i32_0 = arith.constant 0 : i32
    return %arg0, %c0_i32 : i32, i32
  }
}

module attributes {stable_mosaic.version = 11 : i64} {
  func.func @_matmul_bias_relu_kernel(%arg0: i32, %arg1: i32, %arg2: memref<32x2304xbf16, #tpu.memory_space<vmem>>, %arg3: memref<2304x384xbf16, #tpu.memory_space<vmem>>, %arg4: memref<1x384xf32, #tpu.memory_space<vmem>>, %arg5: memref<32x384xf32, #tpu.memory_space<vmem>>) attributes {dimension_semantics = [#tpu.dimension_semantics<parallel>, #tpu.dimension_semantics<parallel>], iteration_bounds = array<i64: 1, 1>, scalar_prefetch = 0 : i64, scratch_operands = 0 : i64, tpu.core_type = #tpu.core_type<tc>, window_params = [{transform_indices = @transform_0, window_bounds = array<i64: 32, 2304>}, {transform_indices = @transform_1, window_bounds = array<i64: 2304, 384>}, {transform_indices = @transform_2, window_bounds = array<i64: 1, 384>}, {transform_indices = @transform_3, window_bounds = array<i64: 32, 384>}]} {
    %c0 = arith.constant 0 : index
    %c0_0 = arith.constant 0 : index
    %0 = vector.load %arg2[%c0, %c0_0] : memref<32x2304xbf16, #tpu.memory_space<vmem>>, vector<32x2304xbf16>
    %c0_1 = arith.constant 0 : index
    %c0_2 = arith.constant 0 : index
    %1 = vector.load %arg3[%c0_1, %c0_2] : memref<2304x384xbf16, #tpu.memory_space<vmem>>, vector<2304x384xbf16>
    %cst = arith.constant dense<0.000000e+00> : vector<32x384xf32>
    %2 = tpu.matmul %0, %1, %cst {dimension_numbers = #tpu.dot_dimension_numbers<[1], [0], [0], [1], [0, 0, 1, 1], [], []>} : vector<32x2304xbf16>, vector<2304x384xbf16>, vector<32x384xf32> -> vector<32x384xf32>
    %c0_3 = arith.constant 0 : index
    %c0_4 = arith.constant 0 : index
    %3 = vector.load %arg4[%c0_3, %c0_4] : memref<1x384xf32, #tpu.memory_space<vmem>>, vector<1x384xf32>
    %4 = vector.broadcast %3 : vector<1x384xf32> to vector<32x384xf32>
    %5 = arith.addf %2, %4 : vector<32x384xf32>
    %cst_5 = arith.constant 0.000000e+00 : f32
    %6 = vector.broadcast %cst_5 : f32 to vector<32x384xf32>
    %7 = arith.maximumf %5, %6 : vector<32x384xf32>
    %c0_6 = arith.constant 0 : index
    %c0_7 = arith.constant 0 : index
    %8 = vector.load %arg5[%c0_6, %c0_7] : memref<32x384xf32, #tpu.memory_space<vmem>>, vector<32x384xf32>
    tpu.vector_store %arg5[%c0_6, %c0_7], %7 {strides = array<i32>} : memref<32x384xf32, #tpu.memory_space<vmem>>, vector<32x384xf32>,
    return
  }
  func.func @transform_0(%arg0: i32, %arg1: i32) -> (i32, i32) {
    %c0_i32 = arith.constant 0 : i32
    %c0_i32_0 = arith.constant 0 : i32
    return %arg0, %c0_i32 : i32, i32
  }
  func.func @transform_1(%arg0: i32, %arg1: i32) -> (i32, i32) {
    %c0_i32 = arith.constant 0 : i32
    %c0_i32_0 = arith.constant 0 : i32
    return %c0_i32, %arg1 : i32, i32
  }
  func.func @transform_2(%arg0: i32, %arg1: i32) -> (i32, i32) {
    %c0_i32 = arith.constant 0 : i32
    %c0_i32_0 = arith.constant 0 : i32
    return %c0_i32, %arg1 : i32, i32
  }
  func.func @transform_3(%arg0: i32, %arg1: i32) -> (i32, i32) {
    %c0_i32 = arith.constant 0 : i32
    return %arg0, %arg1 : i32, i32
  }
}

module attributes {stable_mosaic.version = 11 : i64} {
  func.func @_matmul_bias_relu_kernel(%arg0: i32, %arg1: i32, %arg2: memref<32x2880xbf16, #tpu.memory_space<vmem>>, %arg3: memref<2880x384xbf16, #tpu.memory_space<vmem>>, %arg4: memref<1x384xf32, #tpu.memory_space<vmem>>, %arg5: memref<32x384xf32, #tpu.memory_space<vmem>>) attributes {dimension_semantics = [#tpu.dimension_semantics<parallel>, #tpu.dimension_semantics<parallel>], iteration_bounds = array<i64: 1, 1>, scalar_prefetch = 0 : i64, scratch_operands = 0 : i64, tpu.core_type = #tpu.core_type<tc>, window_params = [{transform_indices = @transform_0, window_bounds = array<i64: 32, 2880>}, {transform_indices = @transform_1, window_bounds = array<i64: 2880, 384>}, {transform_indices = @transform_2, window_bounds = array<i64: 1, 384>}, {transform_indices = @transform_3, window_bounds = array<i64: 32, 384>}]} {
    %c0 = arith.constant 0 : index
    %c0_0 = arith.constant 0 : index
    %0 = vector.load %arg2[%c0, %c0_0] : memref<32x2880xbf16, #tpu.memory_space<vmem>>, vector<32x2880xbf16>
    %c0_1 = arith.constant 0 : index
    %c0_2 = arith.constant 0 : index
    %1 = vector.load %arg3[%c0_1, %c0_2] : memref<2880x384xbf16, #tpu.memory_space<vmem>>, vector<2880x384xbf16>
    %cst = arith.constant dense<0.000000e+00> : vector<32x384xf32>
    %2 = tpu.matmul %0, %1, %cst {dimension_numbers = #tpu.dot_dimension_numbers<[1], [0], [0], [1], [0, 0, 1, 1], [], []>} : vector<32x2880xbf16>, vector<2880x384xbf16>, vector<32x384xf32> -> vector<32x384xf32>
    %c0_3 = arith.constant 0 : index
    %c0_4 = arith.constant 0 : index
    %3 = vector.load %arg4[%c0_3, %c0_4] : memref<1x384xf32, #tpu.memory_space<vmem>>, vector<1x384xf32>
    %4 = vector.broadcast %3 : vector<1x384xf32> to vector<32x384xf32>
    %5 = arith.addf %2, %4 : vector<32x384xf32>
    %cst_5 = arith.constant 0.000000e+00 : f32
    %6 = vector.broadcast %cst_5 : f32 to vector<32x384xf32>
    %7 = arith.maximumf %5, %6 : vector<32x384xf32>
    %c0_6 = arith.constant 0 : index
    %c0_7 = arith.constant 0 : index
    %8 = vector.load %arg5[%c0_6, %c0_7] : memref<32x384xf32, #tpu.memory_space<vmem>>, vector<32x384xf32>
    tpu.vector_store %arg5[%c0_6, %c0_7], %7 {strides = array<i32>} : memref<32x384xf32, #tpu.memory_space<vmem>>, vector<32x384xf32>,
    return
  }
  func.func @transform_0(%arg0: i32, %arg1: i32) -> (i32, i32) {
    %c0_i32 = arith.constant 0 : i32
    %c0_i32_0 = arith.constant 0 : i32
    return %arg0, %c0_i32 : i32, i32
  }
  func.func @transform_1(%arg0: i32, %arg1: i32) -> (i32, i32) {
    %c0_i32 = arith.constant 0 : i32
    %c0_i32_0 = arith.constant 0 : i32
    return %c0_i32, %arg1 : i32, i32
  }
  func.func @transform_2(%arg0: i32, %arg1: i32) -> (i32, i32) {
    %c0_i32 = arith.constant 0 : i32
    %c0_i32_0 = arith.constant 0 : i32
    return %c0_i32, %arg1 : i32, i32
  }
  func.func @transform_3(%arg0: i32, %arg1: i32) -> (i32, i32) {
    %c0_i32 = arith.constant 0 : i32
    return %arg0, %arg1 : i32, i32
  }
}

</mosaic_0001>

<bundles_post_ra>
// kernel: mixed_6a_forward.5
= control target key start
LH: loop header
LB: loop body
LE: loop exit
PB: predicated region body
PF: predicated region fallthrough
CT: control target
= control target key end

     0   :  { %v1145_v1 = vmov 0   ;;  %vm469_vm0 = vcmask 523264   ;;  %s1681_s1 = inlined_call_operand.vmem [shape: bf16[320,256], index: 1, kind: input, shape index: {}]   ;;  %s1682_s0 = inlined_call_operand.vmem [shape: bf16[168,320], index: 0, kind: input, shape index: {}]   ;;  %s1683_s2 = inlined_call_operand.vmem [shape: f32[1,256], index: 2, kind: input, shape index: {}]   ;;  %s1684_s3 = inlined_call_operand.vmem [shape: f32[168,256], index: 3, kind: output, shape index: {}]  }
   0x1   :  { %v1042_v0 = vld [vmem:[%s1681_s1 + $0x4] ss:$8 sps:$4 sm:$0xff]   ;;  %676 = vmatprep.mubr.bf16.mxu0 %v1145_v1  ;;  %v1044_v2 = vld [vmem:[%s1681_s1] ss:$8 sps:$4 sm:$0xff]   ;;  %v1045_v3 = vld [vmem:[%s1681_s1 + $0x14] ss:$8 sps:$4 sm:$0xff]  }
   0x2   :  { %503 = vmatprep.subr.bf16.mxu1 %v1042_v0  ;;  %v1047_v4 = vld [vmem:[%s1681_s1 + $0x10] ss:$8 sps:$4 sm:$0xff]   ;;  %v1048_v5 = vld [vmem:[%s1681_s1 + $0x24] ss:$8 sps:$4 sm:$0xff]   ;;  %v1050_v6 = vld [vmem:[%s1681_s1 + $0x20] ss:$8 sps:$4 sm:$0xff]  }
   0x3   :  { %504 = vmatpush1.bf16.msra.mxu1 %v1044_v2  ;;  %v1051_v7 = vld [vmem:[%s1681_s1 + $0x34] ss:$8 sps:$4 sm:$0xff]   ;;  %v1053_v8 = vld [vmem:[%s1681_s1 + $0x30] ss:$8 sps:$4 sm:$0xff]   ;;  %v1054_v9 = vld [vmem:[%s1681_s1 + $0x44] ss:$8 sps:$4 sm:$0xff]  }
   0x4   :  { %505 = vmatprep.subr.bf16.mxu1 %v1045_v3  ;;  %v1056_v10 = vld [vmem:[%s1681_s1 + $0x40] ss:$8 sps:$4 sm:$0xff]   ;;  %v1057_v11 = vld [vmem:[%s1681_s1 + $0x54] ss:$8 sps:$4 sm:$0xff]   ;;  %v1078_v12 = vld [vmem:[%s1681_s1 + $0x104] ss:$8 sps:$4 sm:$0xff]  }
   0x5   :  { %v1059_v13 = vld [vmem:[%s1681_s1 + $0x50] ss:$8 sps:$4 sm:$0xff]   ;;  %644 = vmatprep.subr.bf16.mxu0 %v1078_v12  ;;  %v1082_v14 = vld [vmem:[%s1681_s1 + $0x100] ss:$8 sps:$4 sm:$0xff]   ;;  %v1084_v15 = vld [vmem:[%s1681_s1 + $0x114] ss:$8 sps:$4 sm:$0xff]  }
   0x6   :  { %v1060_v16 = vld [vmem:[%s1681_s1 + $0x64] ss:$8 sps:$4 sm:$0xff]   ;;  %645 = vmatpush1.bf16.msra.mxu0 %v1082_v14  ;;  %v1088_v17 = vld [vmem:[%s1681_s1 + $0x110] ss:$8 sps:$4 sm:$0xff]   ;;  %v1062_v19 = vld [vmem:[%s1681_s1 + $0x60] ss:$8 sps:$4 sm:$0xff]  }
   0x7   :  { %506 = vmatpush1.bf16.msra.mxu1 %v1047_v4  ;;  %646 = vmatprep.subr.bf16.mxu0 %v1084_v15  ;;  %v1090_v18 = vld [vmem:[%s1681_s1 + $0x124] ss:$8 sps:$4 sm:$0xff]   ;;  %v1063_v20 = vld [vmem:[%s1681_s1 + $0x74] ss:$8 sps:$4 sm:$0xff]   ;;  %v1094_v21 = vld [vmem:[%s1681_s1 + $0x120] ss:$8 sps:$4 sm:$0xff]  }
   0x8   :  { %507 = vmatprep.subr.bf16.mxu1 %v1048_v5  ;;  %v1096_v22 = vld [vmem:[%s1681_s1 + $0x134] ss:$8 sps:$4 sm:$0xff]   ;;  %v1065_v23 = vld [vmem:[%s1681_s1 + $0x70] ss:$8 sps:$4 sm:$0xff]   ;;  %v1066_v24 = vld [vmem:[%s1681_s1 + $0x84] ss:$8 sps:$4 sm:$0xff]  }
   0x9   :  { %v1104_v25 = vld [vmem:[%s1682_s0 + $0x4] ss:$12 sps:$4 sm:$0xff]   ;;  %v1068_v27 = vld [vmem:[%s1681_s1 + $0x80] ss:$8 sps:$4 sm:$0xff]   ;;  %v1069_v29 = vld [vmem:[%s1681_s1 + $0x94] ss:$8 sps:$4 sm:$0xff]  }
   0xa   :  { %647 = vmatpush1.bf16.msra.mxu0 %v1088_v17  ;;  %v1100_v26 = vld [vmem:[%s1681_s1 + $0x130] ss:$8 sps:$4 sm:$0xff]   ;;  %535 = vmatprep.mubr.bf16.mxu1 %v1104_v25  ;;  %v1105_v28 = vld [vmem:[%s1682_s0 + $0x8] ss:$12 sps:$4 sm:$0xff]   ;;  %v1072_v31 = vld [vmem:[%s1681_s1 + $0xa4] ss:$8 sps:$4 sm:$0xff]  }
   0xb   :  { %508 = vmatpush1.bf16.msra.mxu1 %v1050_v6  ;;  %648 = vmatprep.subr.bf16.mxu0 %v1090_v18  ;;  %v1071_v30 = vld [vmem:[%s1681_s1 + $0x90] ss:$8 sps:$4 sm:$0xff]   ;;  %v1074_v32 = vld [vmem:[%s1681_s1 + $0xa0] ss:$8 sps:$4 sm:$0xff]   ;;  %v1075_v34 = vld [vmem:[%s1681_s1 + $0xb4] ss:$8 sps:$4 sm:$0xff]  }
   0xc   :  { %509 = vmatprep.subr.bf16.mxu1 %v1051_v7  ;;  %v1108_v33 = vld [vmem:[%s1682_s0 + $0x20] ss:$12 sps:$4 sm:$0xff]   ;;  %v1077_v35 = vld [vmem:[%s1681_s1 + $0xb0] ss:$8 sps:$4 sm:$0xff]   ;;  %v1086_v39 = vld [vmem:[%s1681_s1 + $0xd4] ss:$8 sps:$4 sm:$0xff]  }
   0xd   :  { %v1080_v36 = vld [vmem:[%s1681_s1 + $0xc4] ss:$8 sps:$4 sm:$0xff]   ;;  %v1083_v37 = vld [vmem:[%s1681_s1 + $0xc0] ss:$8 sps:$4 sm:$0xff]   ;;  %v1089_v40 = vld [vmem:[%s1681_s1 + $0xd0] ss:$8 sps:$4 sm:$0xff]  }
   0xe   :  { %649 = vmatpush1.bf16.msra.mxu0 %v1094_v21  ;;  %v1112_v38 = vld [vmem:[%s1682_s0 + $0x38] ss:$12 sps:$4 sm:$0xff]   ;;  %v1095_v42 = vld [vmem:[%s1681_s1 + $0xe0] ss:$8 sps:$4 sm:$0xff]   ;;  %v1116_v43 = vld [vmem:[%s1682_s0 + $0x50] ss:$12 sps:$4 sm:$0xff]  }
   0xf   :  { %510 = vmatpush1.bf16.msra.mxu1 %v1053_v8  ;;  %650 = vmatprep.subr.bf16.mxu0 %v1096_v22  ;;  %v1092_v41 = vld [vmem:[%s1681_s1 + $0xe4] ss:$8 sps:$4 sm:$0xff]   ;;  %v1098_v44 = vld [vmem:[%s1681_s1 + $0xf4] ss:$8 sps:$4 sm:$0xff]   ;;  %v1101_v45 = vld [vmem:[%s1681_s1 + $0xf0] ss:$8 sps:$4 sm:$0xff]  }
  0x10   :  { %511 = vmatprep.subr.bf16.mxu1 %v1054_v9  ;;  %v1102_v46 = vld [vmem:[%s1682_s0] ss:$12 sps:$4 sm:$0xff]   ;;  %v1106_v47 = vld [vmem:[%s1682_s0 + $0x1c] ss:$12 sps:$4 sm:$0xff]   ;;  %v1109_v49 = vld [vmem:[%s1682_s0 + $0x18] ss:$12 sps:$4 sm:$0xff]  }
  0x11   :  { %v1120_v48 = vld [vmem:[%s1682_s0 + $0x68] ss:$12 sps:$4 sm:$0xff]   ;;  %v1124_v51 = vld [vmem:[%s1682_s0 + $0x80] ss:$12 sps:$4 sm:$0xff]   ;;  %v1113_v52 = vld [vmem:[%s1682_s0 + $0x30] ss:$12 sps:$4 sm:$0xff]  }
  0x12   :  { %651 = vmatpush1.bf16.msra.mxu0 %v1100_v26  ;;  %v1110_v50 = vld [vmem:[%s1682_s0 + $0x34] ss:$12 sps:$4 sm:$0xff]   ;;  %v1114_v53 = vld [vmem:[%s1682_s0 + $0x4c] ss:$12 sps:$4 sm:$0xff]   ;;  %v1118_v56 = vld [vmem:[%s1682_s0 + $0x64] ss:$12 sps:$4 sm:$0xff]  }
  0x13   :  { %512 = vmatpush1.bf16.msra.mxu1 %v1056_v10  ;;  %v1128_v54 = vld [vmem:[%s1682_s0 + $0x98] ss:$12 sps:$4 sm:$0xff]   ;;  %v1117_v55 = vld [vmem:[%s1682_s0 + $0x48] ss:$12 sps:$4 sm:$0xff]   ;;  %v1132_v57 = vld [vmem:[%s1682_s0 + $0xb0] ss:$12 sps:$4 sm:$0xff]  }
  0x14   :  { %513 = vmatprep.subr.bf16.mxu1 %v1057_v11  ;;  %v1121_v58 = vld [vmem:[%s1682_s0 + $0x60] ss:$12 sps:$4 sm:$0xff]   ;;  %v1122_v59 = vld [vmem:[%s1682_s0 + $0x7c] ss:$12 sps:$4 sm:$0xff]   ;;  %v1125_v61 = vld [vmem:[%s1682_s0 + $0x78] ss:$12 sps:$4 sm:$0xff]  }
  0x15   :  { %946 = vmatmul.mubr.msk.bf16.vlgmr.msra.gmra.mrb[0].mxu0 %vm469_vm0, %v1105_v28  ;;  %v1136_v60 = vld [vmem:[%s1682_s0 + $0xc8] ss:$12 sps:$4 sm:$0xff]   ;;  %v1140_v63 = vld [vmem:[%s1682_s0 + $0xe0] ss:$12 sps:$4 sm:$0xff]   ;;  %v1129_v0 = vld [vmem:[%s1682_s0 + $0x90] ss:$12 sps:$4 sm:$0xff]  }
  0x16   :  { %686 = vmatprep.mubr.bf16.mxu0 %v1145_v1  ;;  %v1126_v62 = vld [vmem:[%s1682_s0 + $0x94] ss:$12 sps:$4 sm:$0xff]   ;;  %v1130_v2 = vld [vmem:[%s1682_s0 + $0xac] ss:$12 sps:$4 sm:$0xff]   ;;  %v1134_v4 = vld [vmem:[%s1682_s0 + $0xc4] ss:$12 sps:$4 sm:$0xff]  }
  0x17   :  { %514 = vmatpush1.bf16.msra.mxu1 %v1059_v13  ;;  %v1143_v3 = vld [vmem:[%s1682_s0 + $0xf8] ss:$0 sps:$4 sm:$0xff]   ;;  %v1137_v5 = vld [vmem:[%s1682_s0 + $0xc0] ss:$12 sps:$4 sm:$0xff]   ;;  %v1138_v6 = vld [vmem:[%s1682_s0 + $0xdc] ss:$12 sps:$4 sm:$0xff]  }
  0x18   :  { %515 = vmatprep.subr.bf16.mxu1 %v1060_v16  ;;  %v55_v7 = vld [vmem:[%s1682_s0 + $0xf0] sm:$0xff]  ;;  %v1141_v8 = vld [vmem:[%s1682_s0 + $0xd8] ss:$12 sps:$4 sm:$0xff]  }
  0x19   :  { %v904_v9 = vcombine.high %v55_v7, %v55_v7  ;;  %v903_v10 = vcombine.low %v55_v7, %v55_v7 }
  0x1b   :  { %516 = vmatpush1.bf16.msra.mxu1 %v1062_v19  ;;  %v99_v19 = vlaneseq }
  0x1c   :  { %517 = vmatprep.subr.bf16.mxu1 %v1063_v20 }
  0x1d   :  { %947 = vmatmul.mubr.msk.bf16.gmra.mrb[4].mxu0 %vm469_vm0, %v1108_v33 }
  0x1e   :  { %696 = vmatprep.mubr.bf16.mxu0 %v1145_v1 }
  0x1f   :  { %518 = vmatpush1.bf16.msra.mxu1 %v1065_v23 }
  0x20   :  { %519 = vmatprep.subr.bf16.mxu1 %v1066_v24  ;;  %v100_v24 = vshrl.u32 %v99_v19, 7 }
  0x22   :  { %v101_v25 = vsub.s32 0, %v100_v24  ;;  %v105_v28 = vsub.s32 1, %v100_v24 }
  0x23   :  { %520 = vmatpush1.bf16.msra.mxu1 %v1068_v27  ;;  %v97_v27 = vld [vmem:[%s1683_s2] sm:$0x3] }
  0x24   :  { %521 = vmatprep.subr.bf16.mxu1 %v1069_v29  ;;  %v1425_v33 = vrot.slane %v97_v27, %v105_v28 }
  0x25   :  { %948 = vmatmul.mubr.msk.bf16.gmra.mrb[8].mxu0 %vm469_vm0, %v1112_v38 }
  0x26   :  { %706 = vmatprep.mubr.bf16.mxu0 %v1145_v1 }
  0x27   :  { %522 = vmatpush1.bf16.msra.mxu1 %v1071_v30 }
  0x28   :  { %523 = vmatprep.subr.bf16.mxu1 %v1072_v31 }
  0x2b   :  { %524 = vmatpush1.bf16.msra.mxu1 %v1074_v32  ;;  %v1423_v32 = vrot.slane %v97_v27, %v101_v25 }
  0x2c   :  { %525 = vmatprep.subr.bf16.mxu1 %v1075_v34 }
  0x2d   :  { %949 = vmatmul.mubr.msk.bf16.gmra.mrb[12].mxu0 %vm469_vm0, %v1116_v43 }
  0x2e   :  { %716 = vmatprep.mubr.bf16.mxu0 %v1145_v1 }
  0x2f   :  { %526 = vmatpush1.bf16.msra.mxu1 %v1077_v35 }
  0x30   :  { %527 = vmatprep.subr.bf16.mxu1 %v1080_v36 }
  0x33   :  { %528 = vmatpush1.bf16.msra.mxu1 %v1083_v37 }
  0x34   :  { %529 = vmatprep.subr.bf16.mxu1 %v1086_v39 }
  0x35   :  { %950 = vmatmul.mubr.msk.bf16.gmra.mrb[16].mxu0 %vm469_vm0, %v1120_v48 }
  0x36   :  { %726 = vmatprep.mubr.bf16.mxu0 %v1145_v1 }
  0x37   :  { %530 = vmatpush1.bf16.msra.mxu1 %v1089_v40 }
  0x38   :  { %531 = vmatprep.subr.bf16.mxu1 %v1092_v41 }
  0x3b   :  { %532 = vmatpush1.bf16.msra.mxu1 %v1095_v42 }
  0x3c   :  { %533 = vmatprep.subr.bf16.mxu1 %v1098_v44 }
  0x3d   :  { %951 = vmatmul.mubr.msk.bf16.gmra.mrb[20].mxu0 %vm469_vm0, %v1124_v51 }
  0x3e   :  { %736 = vmatprep.mubr.bf16.mxu0 %v1145_v1 }
  0x3f   :  { %534 = vmatpush1.bf16.msra.mxu1 %v1101_v45 }
  0x42   :  { %536 = vmatmul.mubr.bf16.vlgmr.msra.gmra.mrb[0].mxu1 %v1102_v46 }
  0x43   :  { %545 = vmatprep.mubr.bf16.mxu1 %v1106_v47 }
  0x45   :  { %952 = vmatmul.mubr.msk.bf16.gmra.mrb[24].mxu0 %vm469_vm0, %v1128_v54 }
  0x46   :  { %746 = vmatprep.mubr.bf16.mxu0 %v1145_v1 }
  0x4a   :  { %546 = vmatmul.mubr.bf16.gmra.mrb[4].mxu1 %v1109_v49 }
  0x4b   :  { %555 = vmatprep.mubr.bf16.mxu1 %v1110_v50 }
  0x4d   :  { %953 = vmatmul.mubr.msk.bf16.gmra.mrb[28].mxu0 %vm469_vm0, %v1132_v57 }
  0x4e   :  { %756 = vmatprep.mubr.bf16.mxu0 %v1145_v1 }
  0x52   :  { %556 = vmatmul.mubr.bf16.gmra.mrb[8].mxu1 %v1113_v52 }
  0x53   :  { %565 = vmatprep.mubr.bf16.mxu1 %v1114_v53 }
  0x55   :  { %954 = vmatmul.mubr.msk.bf16.gmra.mrb[32].mxu0 %vm469_vm0, %v1136_v60 }
  0x56   :  { %766 = vmatprep.mubr.bf16.mxu0 %v1145_v1 }
  0x5a   :  { %566 = vmatmul.mubr.bf16.gmra.mrb[12].mxu1 %v1117_v55 }
  0x5b   :  { %575 = vmatprep.mubr.bf16.mxu1 %v1118_v56 }
  0x5d   :  { %955 = vmatmul.mubr.msk.bf16.gmra.mrb[36].mxu0 %vm469_vm0, %v1140_v63 }
  0x5e   :  { %776 = vmatprep.mubr.bf16.mxu0 %v1145_v1  ;;  %v1133_v1 = vld [vmem:[%s1682_s0 + $0xa8] ss:$12 sps:$4 sm:$0xff]  }
  0x62   :  { %576 = vmatmul.mubr.bf16.gmra.mrb[16].mxu1 %v1121_v58 }
  0x63   :  { %585 = vmatprep.mubr.bf16.mxu1 %v1122_v59 }
  0x65   :  { %956 = vmatmul.mubr.msk.bf16.gmra.mrb[40].mxu0 %vm469_vm0, %v1143_v3 }
  0x6a   :  { %586 = vmatmul.mubr.bf16.gmra.mrb[20].mxu1 %v1125_v61 }
  0x6b   :  { %595 = vmatprep.mubr.bf16.mxu1 %v1126_v62 }
  0x72   :  { %596 = vmatmul.mubr.bf16.gmra.mrb[24].mxu1 %v1129_v0 }
  0x73   :  { %605 = vmatprep.mubr.bf16.mxu1 %v1130_v2 }
  0x7a   :  { %606 = vmatmul.mubr.bf16.gmra.mrb[28].mxu1 %v1133_v1 }
  0x7b   :  { %615 = vmatprep.mubr.bf16.mxu1 %v1134_v4 }
  0x82   :  { %616 = vmatmul.mubr.bf16.gmra.mrb[32].mxu1 %v1137_v5 }
  0x83   :  { %625 = vmatprep.mubr.bf16.mxu1 %v1138_v6 }
  0x8a   :  { %626 = vmatmul.mubr.bf16.gmra.mrb[36].mxu1 %v1141_v8 }
  0x8b   :  { %635 = vmatprep.mubr.bf16.mxu1 %v904_v9 }
  0x92   :  { %636 = vmatmul.mubr.bf16.gmra.mrb[40].mxu1 %v903_v10 }
  0xe8   :  { %v678_v11 = vpop.f32.mrb[0].mxu0 }
  0xe9   :  { %v680_v12 = vpop.f32.mrb[1].mxu0 }
  0xea   :  { %v682_v13 = vpop.f32.mrb[2].mxu0 }
  0xeb   :  { %v684_v14 = vpop.f32.mrb[3].mxu0 }
  0xf0   :  { %v688_v15 = vpop.f32.mrb[4].mxu0 }
  0xf1   :  { %v690_v16 = vpop.f32.mrb[5].mxu0 }
  0xf2   :  { %v692_v17 = vpop.f32.mrb[6].mxu0 }
  0xf3   :  { %v694_v18 = vpop.f32.mrb[7].mxu0 }
  0xf8   :  { %v1404_v20 = vpop.f32.mrb[8].mxu0 }
  0xf9   :  { %v1406_v21 = vpop.f32.mrb[9].mxu0 }
  0xfa   :  { %v1408_v22 = vpop.f32.mrb[10].mxu0 }
  0xfb   :  { %v1410_v23 = vpop.f32.mrb[11].mxu0 }
 0x100   :  { %v1412_v26 = vpop.f32.mrb[12].mxu0 }
 0x101   :  { %v1417_v29 = vpop.f32.mrb[13].mxu0 }
 0x102   :  { %v1419_v30 = vpop.f32.mrb[14].mxu0 }
 0x103   :  { %v1421_v31 = vpop.f32.mrb[15].mxu0 }
 0x108   :  { %v1428_v37 = vpop.f32.mrb[16].mxu0 }
 0x109   :  { %v1431_v40 = vpop.f32.mrb[17].mxu0 }
 0x10a   :  { %v1434_v44 = vpop.f32.mrb[18].mxu0 }
 0x10b   :  { %v1437_v47 = vpop.f32.mrb[19].mxu0 }
 0x110   :  { %v1449_v57 = vpop.f32.mrb[20].mxu0 }
 0x111   :  { %v1455_v60 = vpop.f32.mrb[21].mxu0 }
 0x112   :  { %v1458_v0 = vpop.f32.mrb[22].mxu0 }
 0x113   :  { %v1461_v1 = vpop.f32.mrb[23].mxu0 }
 0x115   :  { %v537_v34 = vpop.f32.mrb[0].mxu1 }
 0x116   :  { %v538_v35 = vadd.f32 %v537_v34, %v1423_v32  ;;  %v539_v36 = vpop.f32.mrb[1].mxu1 }
 0x117   :  { %v540_v38 = vadd.f32 %v539_v36, %v1425_v33  ;;  %v541_v39 = vpop.f32.mrb[2].mxu1 }
 0x118   :  { %v679_v41 = vadd.f32 %v678_v11, %v538_v35  ;;  %v542_v42 = vadd.f32 %v541_v39, %v1423_v32  ;;  %v543_v43 = vpop.f32.mrb[3].mxu1 }
 0x119   :  { %v681_v45 = vadd.f32 %v680_v12, %v540_v38  ;;  %v544_v46 = vadd.f32 %v543_v43, %v1425_v33 }
 0x11a   :  { %v785_v48 = vmax.f32 %v679_v41, 0.0  ;;  %v683_v49 = vadd.f32 %v682_v13, %v542_v42  ;;  %v1473_v13 = vpop.f32.mrb[24].mxu0 }
 0x11b   :  { %v786_v50 = vmax.f32 %v681_v45, 0.0  ;;  %v685_v51 = vadd.f32 %v684_v14, %v544_v46 }
 0x11c   :  { %827 = vst [vmem:[%s1684_s3] sm:$0xff] %v785_v48  ;;  %v787_v52 = vmax.f32 %v683_v49, 0.0 }
 0x11d   :  { %828 = vst [vmem:[%s1684_s3 + $0x8] sm:$0xff] %v786_v50  ;;  %v788_v53 = vmax.f32 %v685_v51, 0.0  ;;  %v547_v54 = vpop.f32.mrb[4].mxu1 }
 0x11e   :  { %829 = vst [vmem:[%s1684_s3 + $0x10] sm:$0xff] %v787_v52  ;;  %v548_v55 = vadd.f32 %v547_v54, %v1423_v32  ;;  %v549_v56 = vpop.f32.mrb[5].mxu1 }
 0x11f   :  { %830 = vst [vmem:[%s1684_s3 + $0x18] sm:$0xff] %v788_v53  ;;  %v550_v58 = vadd.f32 %v549_v56, %v1425_v33  ;;  %v551_v59 = vpop.f32.mrb[6].mxu1 }
 0x120   :  { %v689_v61 = vadd.f32 %v688_v15, %v548_v55  ;;  %v552_v62 = vadd.f32 %v551_v59, %v1423_v32  ;;  %v553_v63 = vpop.f32.mrb[7].mxu1 }
 0x121   :  { %v691_v2 = vadd.f32 %v690_v16, %v550_v58  ;;  %v554_v3 = vadd.f32 %v553_v63, %v1425_v33  ;;  %v1479_v16 = vpop.f32.mrb[25].mxu0 }
 0x122   :  { %v789_v4 = vmax.f32 %v689_v61, 0.0  ;;  %v693_v5 = vadd.f32 %v692_v17, %v552_v62  ;;  %v1483_v24 = vpop.f32.mrb[26].mxu0 }
 0x123   :  { %v790_v6 = vmax.f32 %v691_v2, 0.0  ;;  %v695_v7 = vadd.f32 %v694_v18, %v554_v3  ;;  %v1487_v28 = vpop.f32.mrb[27].mxu0 }
 0x124   :  { %831 = vst [vmem:[%s1684_s3 + $0x20] sm:$0xff] %v789_v4  ;;  %v791_v8 = vmax.f32 %v693_v5, 0.0  ;;  %v1501_v42 = vpop.f32.mrb[28].mxu0 }
 0x125   :  { %832 = vst [vmem:[%s1684_s3 + $0x28] sm:$0xff] %v790_v6  ;;  %v792_v9 = vmax.f32 %v695_v7, 0.0  ;;  %v557_v10 = vpop.f32.mrb[8].mxu1  ;;  %v1507_v45 = vpop.f32.mrb[29].mxu0 }
 0x126   :  { %833 = vst [vmem:[%s1684_s3 + $0x30] sm:$0xff] %v791_v8  ;;  %v558_v11 = vadd.f32 %v557_v10, %v1423_v32  ;;  %v559_v12 = vpop.f32.mrb[9].mxu1  ;;  %v1511_v50 = vpop.f32.mrb[30].mxu0 }
 0x127   :  { %834 = vst [vmem:[%s1684_s3 + $0x38] sm:$0xff] %v792_v9  ;;  %v560_v14 = vadd.f32 %v559_v12, %v1425_v33  ;;  %v561_v15 = vpop.f32.mrb[10].mxu1  ;;  %v1515_v53 = vpop.f32.mrb[31].mxu0 }
 0x128   :  { %v699_v17 = vadd.f32 %v1404_v20, %v558_v11  ;;  %v562_v18 = vadd.f32 %v561_v15, %v1423_v32  ;;  %v563_v19 = vpop.f32.mrb[11].mxu1  ;;  %v1529_v62 = vpop.f32.mrb[32].mxu0 }
 0x129   :  { %v701_v25 = vadd.f32 %v1406_v21, %v560_v14  ;;  %v564_v27 = vadd.f32 %v563_v19, %v1425_v33  ;;  %v1535_v2 = vpop.f32.mrb[33].mxu0 }
 0x12a   :  { %v793_v34 = vmax.f32 %v699_v17, 0.0  ;;  %v703_v35 = vadd.f32 %v1408_v22, %v562_v18  ;;  %v1539_v6 = vpop.f32.mrb[34].mxu0 }
 0x12b   :  { %v794_v36 = vmax.f32 %v701_v25, 0.0  ;;  %v705_v38 = vadd.f32 %v1410_v23, %v564_v27  ;;  %v1543_v9 = vpop.f32.mrb[35].mxu0 }
 0x12c   :  { %835 = vst [vmem:[%s1684_s3 + $0x40] sm:$0xff] %v793_v34  ;;  %v795_v20 = vmax.f32 %v703_v35, 0.0 }
 0x12d   :  { %836 = vst [vmem:[%s1684_s3 + $0x48] sm:$0xff] %v794_v36  ;;  %v796_v21 = vmax.f32 %v705_v38, 0.0  ;;  %v567_v39 = vpop.f32.mrb[12].mxu1 }
 0x12e   :  { %837 = vst [vmem:[%s1684_s3 + $0x50] sm:$0xff] %v795_v20  ;;  %v568_v22 = vadd.f32 %v567_v39, %v1423_v32  ;;  %v569_v41 = vpop.f32.mrb[13].mxu1 }
 0x12f   :  { %838 = vst [vmem:[%s1684_s3 + $0x58] sm:$0xff] %v796_v21  ;;  %v570_v23 = vadd.f32 %v569_v41, %v1425_v33  ;;  %v571_v43 = vpop.f32.mrb[14].mxu1 }
 0x130   :  { %v709_v46 = vadd.f32 %v1412_v26, %v568_v22  ;;  %v572_v48 = vadd.f32 %v571_v43, %v1423_v32  ;;  %v573_v49 = vpop.f32.mrb[15].mxu1  ;;  %v1557_v18 = vpop.f32.mrb[36].mxu0 }
 0x131   :  { %v711_v51 = vadd.f32 %v1417_v29, %v570_v23  ;;  %v574_v52 = vadd.f32 %v573_v49, %v1425_v33  ;;  %v1563_v25 = vpop.f32.mrb[37].mxu0 }
 0x132   :  { %v797_v54 = vmax.f32 %v709_v46, 0.0  ;;  %v713_v55 = vadd.f32 %v1419_v30, %v572_v48  ;;  %v1567_v36 = vpop.f32.mrb[38].mxu0 }
 0x133   :  { %v798_v56 = vmax.f32 %v711_v51, 0.0  ;;  %v715_v58 = vadd.f32 %v1421_v31, %v574_v52  ;;  %v1571_v21 = vpop.f32.mrb[39].mxu0 }
 0x134   :  { %839 = vst [vmem:[%s1684_s3 + $0x60] sm:$0xff] %v797_v54  ;;  %v799_v26 = vmax.f32 %v713_v55, 0.0 }
 0x135   :  { %840 = vst [vmem:[%s1684_s3 + $0x68] sm:$0xff] %v798_v56  ;;  %v800_v29 = vmax.f32 %v715_v58, 0.0  ;;  %v577_v59 = vpop.f32.mrb[16].mxu1 }
 0x136   :  { %841 = vst [vmem:[%s1684_s3 + $0x70] sm:$0xff] %v799_v26  ;;  %v578_v30 = vadd.f32 %v577_v59, %v1423_v32  ;;  %v579_v61 = vpop.f32.mrb[17].mxu1 }
 0x137   :  { %842 = vst [vmem:[%s1684_s3 + $0x78] sm:$0xff] %v800_v29  ;;  %v580_v31 = vadd.f32 %v579_v61, %v1425_v33  ;;  %v581_v63 = vpop.f32.mrb[18].mxu1 }
 0x138   :  { %v719_v3 = vadd.f32 %v1428_v37, %v578_v30  ;;  %v582_v4 = vadd.f32 %v581_v63, %v1423_v32  ;;  %v583_v5 = vpop.f32.mrb[19].mxu1  ;;  %v1585_v48 = vpop.f32.mrb[40].mxu0 }
 0x139   :  { %v721_v7 = vadd.f32 %v1431_v40, %v580_v31  ;;  %v584_v8 = vadd.f32 %v583_v5, %v1425_v33  ;;  %v1591_v51 = vpop.f32.mrb[41].mxu0 }
 0x13a   :  { %v801_v10 = vmax.f32 %v719_v3, 0.0  ;;  %v723_v11 = vadd.f32 %v1434_v44, %v582_v4  ;;  %v782_v56 = vpop.f32.mrb[42].mxu0 }
 0x13b   :  { %v802_v12 = vmax.f32 %v721_v7, 0.0  ;;  %v725_v14 = vadd.f32 %v1437_v47, %v584_v8  ;;  %v783_v29 = vpop.f32.mrb[43].mxu0 }
 0x13c   :  { %843 = vst [vmem:[%s1684_s3 + $0x80] sm:$0xff] %v801_v10  ;;  %v803_v37 = vmax.f32 %v723_v11, 0.0 }
 0x13d   :  { %844 = vst [vmem:[%s1684_s3 + $0x88] sm:$0xff] %v802_v12  ;;  %v804_v40 = vmax.f32 %v725_v14, 0.0  ;;  %v587_v15 = vpop.f32.mrb[20].mxu1 }
 0x13e   :  { %845 = vst [vmem:[%s1684_s3 + $0x90] sm:$0xff] %v803_v37  ;;  %v588_v44 = vadd.f32 %v587_v15, %v1423_v32  ;;  %v589_v17 = vpop.f32.mrb[21].mxu1 }
 0x13f   :  { %846 = vst [vmem:[%s1684_s3 + $0x98] sm:$0xff] %v804_v40  ;;  %v590_v47 = vadd.f32 %v589_v17, %v1425_v33  ;;  %v591_v19 = vpop.f32.mrb[22].mxu1 }
 0x140   :  { %v729_v27 = vadd.f32 %v1449_v57, %v588_v44  ;;  %v592_v34 = vadd.f32 %v591_v19, %v1423_v32  ;;  %v593_v35 = vpop.f32.mrb[23].mxu1 }
 0x141   :  { %v731_v38 = vadd.f32 %v1455_v60, %v590_v47  ;;  %v594_v20 = vadd.f32 %v593_v35, %v1425_v33 }
 0x142   :  { %v805_v39 = vmax.f32 %v729_v27, 0.0  ;;  %v733_v22 = vadd.f32 %v1458_v0, %v592_v34 }
 0x143   :  { %v806_v41 = vmax.f32 %v731_v38, 0.0  ;;  %v735_v23 = vadd.f32 %v1461_v1, %v594_v20 }
 0x144   :  { %847 = vst [vmem:[%s1684_s3 + $0xa0] sm:$0xff] %v805_v39  ;;  %v807_v57 = vmax.f32 %v733_v22, 0.0 }
 0x145   :  { %848 = vst [vmem:[%s1684_s3 + $0xa8] sm:$0xff] %v806_v41  ;;  %v808_v60 = vmax.f32 %v735_v23, 0.0  ;;  %v597_v43 = vpop.f32.mrb[24].mxu1 }
 0x146   :  { %849 = vst [vmem:[%s1684_s3 + $0xb0] sm:$0xff] %v807_v57  ;;  %v598_v0 = vadd.f32 %v597_v43, %v1423_v32  ;;  %v599_v46 = vpop.f32.mrb[25].mxu1 }
 0x147   :  { %850 = vst [vmem:[%s1684_s3 + $0xb8] sm:$0xff] %v808_v60  ;;  %v600_v1 = vadd.f32 %v599_v46, %v1425_v33  ;;  %v601_v49 = vpop.f32.mrb[26].mxu1 }
 0x148   :  { %v739_v52 = vadd.f32 %v1473_v13, %v598_v0  ;;  %v602_v54 = vadd.f32 %v601_v49, %v1423_v32  ;;  %v603_v55 = vpop.f32.mrb[27].mxu1 }
 0x149   :  { %v741_v58 = vadd.f32 %v1479_v16, %v600_v1  ;;  %v604_v26 = vadd.f32 %v603_v55, %v1425_v33 }
 0x14a   :  { %v809_v59 = vmax.f32 %v739_v52, 0.0  ;;  %v743_v30 = vadd.f32 %v1483_v24, %v602_v54 }
 0x14b   :  { %v810_v61 = vmax.f32 %v741_v58, 0.0  ;;  %v745_v31 = vadd.f32 %v1487_v28, %v604_v26 }
 0x14c   :  { %851 = vst [vmem:[%s1684_s3 + $0xc0] sm:$0xff] %v809_v59  ;;  %v811_v13 = vmax.f32 %v743_v30, 0.0 }
 0x14d   :  { %852 = vst [vmem:[%s1684_s3 + $0xc8] sm:$0xff] %v810_v61  ;;  %v812_v63 = vmax.f32 %v745_v31, 0.0  ;;  %v607_v16 = vpop.f32.mrb[28].mxu1 }
 0x14e   :  { %853 = vst [vmem:[%s1684_s3 + $0xd0] sm:$0xff] %v811_v13  ;;  %v608_v24 = vadd.f32 %v607_v16, %v1423_v32  ;;  %v609_v3 = vpop.f32.mrb[29].mxu1 }
 0x14f   :  { %854 = vst [vmem:[%s1684_s3 + $0xd8] sm:$0xff] %v812_v63  ;;  %v610_v28 = vadd.f32 %v609_v3, %v1425_v33  ;;  %v611_v4 = vpop.f32.mrb[30].mxu1 }
 0x150   :  { %v749_v5 = vadd.f32 %v1501_v42, %v608_v24  ;;  %v612_v7 = vadd.f32 %v611_v4, %v1423_v32  ;;  %v613_v8 = vpop.f32.mrb[31].mxu1 }
 0x151   :  { %v751_v10 = vadd.f32 %v1507_v45, %v610_v28  ;;  %v614_v11 = vadd.f32 %v613_v8, %v1425_v33 }
 0x152   :  { %v813_v12 = vmax.f32 %v749_v5, 0.0  ;;  %v753_v14 = vadd.f32 %v1511_v50, %v612_v7 }
 0x153   :  { %v814_v37 = vmax.f32 %v751_v10, 0.0  ;;  %v755_v40 = vadd.f32 %v1515_v53, %v614_v11 }
 0x154   :  { %855 = vst [vmem:[%s1684_s3 + $0xe0] sm:$0xff] %v813_v12  ;;  %v815_v15 = vmax.f32 %v753_v14, 0.0 }
 0x155   :  { %856 = vst [vmem:[%s1684_s3 + $0xe8] sm:$0xff] %v814_v37  ;;  %v816_v42 = vmax.f32 %v755_v40, 0.0  ;;  %v617_v44 = vpop.f32.mrb[32].mxu1 }
 0x156   :  { %857 = vst [vmem:[%s1684_s3 + $0xf0] sm:$0xff] %v815_v15  ;;  %v618_v45 = vadd.f32 %v617_v44, %v1423_v32  ;;  %v619_v50 = vpop.f32.mrb[33].mxu1 }
 0x157   :  { %858 = vst [vmem:[%s1684_s3 + $0xf8] sm:$0xff] %v816_v42  ;;  %v620_v53 = vadd.f32 %v619_v50, %v1425_v33  ;;  %v621_v17 = vpop.f32.mrb[34].mxu1 }
 0x158   :  { %v759_v47 = vadd.f32 %v1529_v62, %v618_v45  ;;  %v622_v19 = vadd.f32 %v621_v17, %v1423_v32  ;;  %v623_v27 = vpop.f32.mrb[35].mxu1 }
 0x159   :  { %v761_v34 = vadd.f32 %v1535_v2, %v620_v53  ;;  %v624_v35 = vadd.f32 %v623_v27, %v1425_v33 }
 0x15a   :  { %v817_v38 = vmax.f32 %v759_v47, 0.0  ;;  %v763_v20 = vadd.f32 %v1539_v6, %v622_v19 }
 0x15b   :  { %v818_v39 = vmax.f32 %v761_v34, 0.0  ;;  %v765_v22 = vadd.f32 %v1543_v9, %v624_v35 }
 0x15c   :  { %859 = vst [vmem:[%s1684_s3 + $0x100] sm:$0xff] %v817_v38  ;;  %v819_v41 = vmax.f32 %v763_v20, 0.0 }
 0x15d   :  { %860 = vst [vmem:[%s1684_s3 + $0x108] sm:$0xff] %v818_v39  ;;  %v820_v62 = vmax.f32 %v765_v22, 0.0  ;;  %v627_v23 = vpop.f32.mrb[36].mxu1 }
 0x15e   :  { %861 = vst [vmem:[%s1684_s3 + $0x110] sm:$0xff] %v819_v41  ;;  %v628_v2 = vadd.f32 %v627_v23, %v1423_v32  ;;  %v629_v6 = vpop.f32.mrb[37].mxu1 }
 0x15f   :  { %862 = vst [vmem:[%s1684_s3 + $0x118] sm:$0xff] %v820_v62  ;;  %v630_v9 = vadd.f32 %v629_v6, %v1425_v33  ;;  %v631_v57 = vpop.f32.mrb[38].mxu1 }
 0x160   :  { %v769_v60 = vadd.f32 %v1557_v18, %v628_v2  ;;  %v632_v43 = vadd.f32 %v631_v57, %v1423_v32  ;;  %v633_v0 = vpop.f32.mrb[39].mxu1 }
 0x161   :  { %v771_v46 = vadd.f32 %v1563_v25, %v630_v9  ;;  %v634_v1 = vadd.f32 %v633_v0, %v1425_v33 }
 0x162   :  { %v821_v49 = vmax.f32 %v769_v60, 0.0  ;;  %v773_v52 = vadd.f32 %v1567_v36, %v632_v43 }
 0x163   :  { %v822_v54 = vmax.f32 %v771_v46, 0.0  ;;  %v775_v55 = vadd.f32 %v1571_v21, %v634_v1 }
 0x164   :  { %863 = vst [vmem:[%s1684_s3 + $0x120] sm:$0xff] %v821_v49  ;;  %v823_v56 = vmax.f32 %v773_v52, 0.0 }
 0x165   :  { %864 = vst [vmem:[%s1684_s3 + $0x128] sm:$0xff] %v822_v54  ;;  %v824_v18 = vmax.f32 %v775_v55, 0.0  ;;  %v637_v58 = vpop.f32.mrb[40].mxu1 }
 0x166   :  { %865 = vst [vmem:[%s1684_s3 + $0x130] sm:$0xff] %v823_v56  ;;  %v638_v25 = vadd.f32 %v637_v58, %v1423_v32  ;;  %v639_v36 = vpop.f32.mrb[41].mxu1 }
 0x167   :  { %866 = vst [vmem:[%s1684_s3 + $0x138] sm:$0xff] %v824_v18  ;;  %v640_v21 = vadd.f32 %v639_v36, %v1425_v33  ;;  %v641_v26 = vpop.f32.mrb[42].mxu1 }
 0x168   :  { %v779_v29 = vadd.f32 %v1585_v48, %v638_v25  ;;  %v642_v59 = vpop.f32.mrb[43].mxu1 }
 0x169   :  { %v781_v30 = vadd.f32 %v1591_v51, %v640_v21 }
 0x16a   :  { %v825_v61 = vmax.f32 %v779_v29, 0.0 }
 0x16b   :  { %v826_v31 = vmax.f32 %v781_v30, 0.0 }
 0x16c   :  { %867 = vst [vmem:[%s1684_s3 + $0x140] sm:$0xff] %v825_v61 }
 0x16d   :  { %868 = vst [vmem:[%s1684_s3 + $0x148] sm:$0xff] %v826_v31 }

// kernel: mixed_6a_forward.6
= control target key start
LH: loop header
LB: loop body
LE: loop exit
PB: predicated region body
PF: predicated region fallthrough
CT: control target
= control target key end

     0   :  { %s10696_s0 = inlined_call_operand.vmem [shape: f32[272,256], index: 0, kind: input, shape index: {}]   ;;  %s10697_s1 = inlined_call_operand.vmem [shape: bf16[9,256,256], index: 1, kind: input, shape index: {}]   ;;  %s10698_s2 = inlined_call_operand.vmem [shape: f32[1,256], index: 2, kind: input, shape index: {}]   ;;  %s10699_s3 = inlined_call_operand.vmem [shape: f32[248,256], index: 3, kind: output, shape index: {}]  }
   0x1   :  { %v53_v0 = vld [vmem:[%s10696_s0] sm:$0xff]  ;;  %v55_v1 = vld [vmem:[%s10696_s0 + $0x8] sm:$0xff]  ;;  %v57_v2 = vld [vmem:[%s10696_s0 + $0x10] sm:$0xff] }
   0x2   :  { %54 = vst [vmem:[#allocation2] sm:$0xff] %v53_v0  ;;  %56 = vst [vmem:[#allocation2 + $0x8] sm:$0xff] %v55_v1  ;;  %v59_v3 = vld [vmem:[%s10696_s0 + $0x18] sm:$0xff]  ;;  %v61_v4 = vld [vmem:[%s10696_s0 + $0x20] sm:$0xff] }
   0x3   :  { %58 = vst [vmem:[#allocation2 + $0x10] sm:$0xff] %v57_v2  ;;  %v63_v5 = vld [vmem:[%s10696_s0 + $0x28] sm:$0xff]  ;;  %60 = vst [vmem:[#allocation2 + $0x18] sm:$0xff] %v59_v3  ;;  %v65_v6 = vld [vmem:[%s10696_s0 + $0x30] sm:$0xff] }
   0x4   :  { %62 = vst [vmem:[#allocation2 + $0x20] sm:$0xff] %v61_v4  ;;  %64 = vst [vmem:[#allocation2 + $0x28] sm:$0xff] %v63_v5  ;;  %v67_v7 = vld [vmem:[%s10696_s0 + $0x38] sm:$0xff]  ;;  %v69_v8 = vld [vmem:[%s10696_s0 + $0x40] sm:$0xff] }
   0x5   :  { %66 = vst [vmem:[#allocation2 + $0x30] sm:$0xff] %v65_v6  ;;  %68 = vst [vmem:[#allocation2 + $0x38] sm:$0xff] %v67_v7  ;;  %v71_v9 = vld [vmem:[%s10696_s0 + $0x48] sm:$0xff]  ;;  %v73_v10 = vld [vmem:[%s10696_s0 + $0x50] sm:$0xff] }
   0x6   :  { %70 = vst [vmem:[#allocation2 + $0x40] sm:$0xff] %v69_v8  ;;  %v75_v11 = vld [vmem:[%s10696_s0 + $0x58] sm:$0xff]  ;;  %72 = vst [vmem:[#allocation2 + $0x48] sm:$0xff] %v71_v9  ;;  %v77_v12 = vld [vmem:[%s10696_s0 + $0x60] sm:$0xff] }
   0x7   :  { %74 = vst [vmem:[#allocation2 + $0x50] sm:$0xff] %v73_v10  ;;  %76 = vst [vmem:[#allocation2 + $0x58] sm:$0xff] %v75_v11  ;;  %v79_v13 = vld [vmem:[%s10696_s0 + $0x68] sm:$0xff]  ;;  %v81_v14 = vld [vmem:[%s10696_s0 + $0x70] sm:$0xff] }
   0x8   :  { %78 = vst [vmem:[#allocation2 + $0x60] sm:$0xff] %v77_v12  ;;  %80 = vst [vmem:[#allocation2 + $0x68] sm:$0xff] %v79_v13  ;;  %v83_v15 = vld [vmem:[%s10696_s0 + $0x78] sm:$0xff]  ;;  %v85_v16 = vld [vmem:[%s10696_s0 + $0x80] sm:$0xff] }
   0x9   :  { %82 = vst [vmem:[#allocation2 + $0x70] sm:$0xff] %v81_v14  ;;  %v87_v17 = vld [vmem:[%s10696_s0 + $0x88] sm:$0xff]  ;;  %84 = vst [vmem:[#allocation2 + $0x78] sm:$0xff] %v83_v15  ;;  %v89_v18 = vld [vmem:[%s10696_s0 + $0x90] sm:$0xff] }
   0xa   :  { %86 = vst [vmem:[#allocation2 + $0x80] sm:$0xff] %v85_v16  ;;  %88 = vst [vmem:[#allocation2 + $0x88] sm:$0xff] %v87_v17  ;;  %v91_v19 = vld [vmem:[%s10696_s0 + $0x98] sm:$0xff]  ;;  %v93_v20 = vld [vmem:[%s10696_s0 + $0xa0] sm:$0xff] }
   0xb   :  { %90 = vst [vmem:[#allocation2 + $0x90] sm:$0xff] %v89_v18  ;;  %92 = vst [vmem:[#allocation2 + $0x98] sm:$0xff] %v91_v19  ;;  %v95_v21 = vld [vmem:[%s10696_s0 + $0xa8] sm:$0xff]  ;;  %v97_v22 = vld [vmem:[%s10696_s0 + $0xb0] sm:$0xff] }
   0xc   :  { %94 = vst [vmem:[#allocation2 + $0xa0] sm:$0xff] %v93_v20  ;;  %v99_v23 = vld [vmem:[%s10696_s0 + $0xb8] sm:$0xff]  ;;  %96 = vst [vmem:[#allocation2 + $0xa8] sm:$0xff] %v95_v21  ;;  %v101_v24 = vld [vmem:[%s10696_s0 + $0xc0] sm:$0xff] }
   0xd   :  { %98 = vst [vmem:[#allocation2 + $0xb0] sm:$0xff] %v97_v22  ;;  %100 = vst [vmem:[#allocation2 + $0xb8] sm:$0xff] %v99_v23  ;;  %v103_v25 = vld [vmem:[%s10696_s0 + $0xc8] sm:$0xff]  ;;  %v105_v26 = vld [vmem:[%s10696_s0 + $0xd0] sm:$0xff] }
   0xe   :  { %102 = vst [vmem:[#allocation2 + $0xc0] sm:$0xff] %v101_v24  ;;  %104 = vst [vmem:[#allocation2 + $0xc8] sm:$0xff] %v103_v25  ;;  %v107_v27 = vld [vmem:[%s10696_s0 + $0xd8] sm:$0xff]  ;;  %v109_v28 = vld [vmem:[%s10696_s0 + $0xe0] sm:$0xff] }
   0xf   :  { %106 = vst [vmem:[#allocation2 + $0xd0] sm:$0xff] %v105_v26  ;;  %v111_v29 = vld [vmem:[%s10696_s0 + $0xe8] sm:$0xff]  ;;  %108 = vst [vmem:[#allocation2 + $0xd8] sm:$0xff] %v107_v27  ;;  %v113_v30 = vld [vmem:[%s10696_s0 + $0xf0] sm:$0xff] }
  0x10   :  { %110 = vst [vmem:[#allocation2 + $0xe0] sm:$0xff] %v109_v28  ;;  %112 = vst [vmem:[#allocation2 + $0xe8] sm:$0xff] %v111_v29  ;;  %v115_v31 = vld [vmem:[%s10696_s0 + $0xf8] sm:$0xff]  ;;  %v117_v32 = vld [vmem:[%s10696_s0 + $0x100] sm:$0xff] }
  0x11   :  { %114 = vst [vmem:[#allocation2 + $0xf0] sm:$0xff] %v113_v30  ;;  %116 = vst [vmem:[#allocation2 + $0xf8] sm:$0xff] %v115_v31  ;;  %v119_v33 = vld [vmem:[%s10696_s0 + $0x108] sm:$0xff]  ;;  %v121_v34 = vld [vmem:[%s10696_s0 + $0x110] sm:$0xff] }
  0x12   :  { %118 = vst [vmem:[#allocation2 + $0x100] sm:$0xff] %v117_v32  ;;  %v123_v35 = vld [vmem:[%s10696_s0 + $0x118] sm:$0xff]  ;;  %120 = vst [vmem:[#allocation2 + $0x108] sm:$0xff] %v119_v33  ;;  %v125_v36 = vld [vmem:[%s10696_s0 + $0x120] sm:$0xff] }
  0x13   :  { %122 = vst [vmem:[#allocation2 + $0x110] sm:$0xff] %v121_v34  ;;  %124 = vst [vmem:[#allocation2 + $0x118] sm:$0xff] %v123_v35  ;;  %v127_v37 = vld [vmem:[%s10696_s0 + $0x128] sm:$0xff]  ;;  %v129_v38 = vld [vmem:[%s10696_s0 + $0x130] sm:$0xff] }
  0x14   :  { %126 = vst [vmem:[#allocation2 + $0x120] sm:$0xff] %v125_v36  ;;  %128 = vst [vmem:[#allocation2 + $0x128] sm:$0xff] %v127_v37  ;;  %v131_v39 = vld [vmem:[%s10696_s0 + $0x138] sm:$0xff]  ;;  %v133_v40 = vld [vmem:[%s10696_s0 + $0x140] sm:$0xff] }
  0x15   :  { %130 = vst [vmem:[#allocation2 + $0x130] sm:$0xff] %v129_v38  ;;  %v135_v41 = vld [vmem:[%s10696_s0 + $0x148] sm:$0xff]  ;;  %132 = vst [vmem:[#allocation2 + $0x138] sm:$0xff] %v131_v39  ;;  %v137_v42 = vld [vmem:[%s10696_s0 + $0x150] sm:$0xff] }
  0x16   :  { %134 = vst [vmem:[#allocation2 + $0x140] sm:$0xff] %v133_v40  ;;  %136 = vst [vmem:[#allocation2 + $0x148] sm:$0xff] %v135_v41  ;;  %v139_v43 = vld [vmem:[%s10696_s0 + $0x158] sm:$0xff]  ;;  %v141_v44 = vld [vmem:[%s10696_s0 + $0x160] sm:$0xff] }
  0x17   :  { %138 = vst [vmem:[#allocation2 + $0x150] sm:$0xff] %v137_v42  ;;  %140 = vst [vmem:[#allocation2 + $0x158] sm:$0xff] %v139_v43  ;;  %v143_v45 = vld [vmem:[%s10696_s0 + $0x168] sm:$0xff]  ;;  %v145_v46 = vld [vmem:[%s10696_s0 + $0x170] sm:$0xff] }
  0x18   :  { %142 = vst [vmem:[#allocation2 + $0x160] sm:$0xff] %v141_v44  ;;  %v147_v47 = vld [vmem:[%s10696_s0 + $0x178] sm:$0xff]  ;;  %144 = vst [vmem:[#allocation2 + $0x168] sm:$0xff] %v143_v45  ;;  %v149_v48 = vld [vmem:[%s10696_s0 + $0x180] sm:$0xff] }
  0x19   :  { %146 = vst [vmem:[#allocation2 + $0x170] sm:$0xff] %v145_v46  ;;  %148 = vst [vmem:[#allocation2 + $0x178] sm:$0xff] %v147_v47  ;;  %v151_v49 = vld [vmem:[%s10696_s0 + $0x188] sm:$0xff]  ;;  %v153_v50 = vld [vmem:[%s10696_s0 + $0x190] sm:$0xff] }
  0x1a   :  { %150 = vst [vmem:[#allocation2 + $0x180] sm:$0xff] %v149_v48  ;;  %152 = vst [vmem:[#allocation2 + $0x188] sm:$0xff] %v151_v49  ;;  %v155_v51 = vld [vmem:[%s10696_s0 + $0x198] sm:$0xff]  ;;  %v157_v52 = vld [vmem:[%s10696_s0 + $0x1a0] sm:$0xff] }
  0x1b   :  { %154 = vst [vmem:[#allocation2 + $0x190] sm:$0xff] %v153_v50  ;;  %v159_v53 = vld [vmem:[%s10696_s0 + $0x1a8] sm:$0xff]  ;;  %156 = vst [vmem:[#allocation2 + $0x198] sm:$0xff] %v155_v51  ;;  %v161_v54 = vld [vmem:[%s10696_s0 + $0x1b0] sm:$0xff] }
  0x1c   :  { %158 = vst [vmem:[#allocation2 + $0x1a0] sm:$0xff] %v157_v52  ;;  %160 = vst [vmem:[#allocation2 + $0x1a8] sm:$0xff] %v159_v53  ;;  %v163_v55 = vld [vmem:[%s10696_s0 + $0x1b8] sm:$0xff]  ;;  %v165_v56 = vld [vmem:[%s10696_s0 + $0x1c0] sm:$0xff] }
  0x1d   :  { %162 = vst [vmem:[#allocation2 + $0x1b0] sm:$0xff] %v161_v54  ;;  %164 = vst [vmem:[#allocation2 + $0x1b8] sm:$0xff] %v163_v55  ;;  %v167_v57 = vld [vmem:[%s10696_s0 + $0x1c8] sm:$0xff]  ;;  %v169_v58 = vld [vmem:[%s10696_s0 + $0x1d0] sm:$0xff] }
  0x1e   :  { %166 = vst [vmem:[#allocation2 + $0x1c0] sm:$0xff] %v165_v56  ;;  %v171_v59 = vld [vmem:[%s10696_s0 + $0x1d8] sm:$0xff]  ;;  %168 = vst [vmem:[#allocation2 + $0x1c8] sm:$0xff] %v167_v57  ;;  %v173_v60 = vld [vmem:[%s10696_s0 + $0x1e0] sm:$0xff] }
  0x1f   :  { %170 = vst [vmem:[#allocation2 + $0x1d0] sm:$0xff] %v169_v58  ;;  %172 = vst [vmem:[#allocation2 + $0x1d8] sm:$0xff] %v171_v59  ;;  %v175_v61 = vld [vmem:[%s10696_s0 + $0x1e8] sm:$0xff]  ;;  %v177_v62 = vld [vmem:[%s10696_s0 + $0x1f0] sm:$0xff] }
  0x20   :  { %174 = vst [vmem:[#allocation2 + $0x1e0] sm:$0xff] %v173_v60  ;;  %176 = vst [vmem:[#allocation2 + $0x1e8] sm:$0xff] %v175_v61  ;;  %v179_v63 = vld [vmem:[%s10696_s0 + $0x1f8] sm:$0xff]  ;;  %v181_v0 = vld [vmem:[%s10696_s0 + $0x200] sm:$0xff] }
  0x21   :  { %178 = vst [vmem:[#allocation2 + $0x1f0] sm:$0xff] %v177_v62  ;;  %v183_v1 = vld [vmem:[%s10696_s0 + $0x208] sm:$0xff]  ;;  %180 = vst [vmem:[#allocation2 + $0x1f8] sm:$0xff] %v179_v63  ;;  %v185_v2 = vld [vmem:[%s10696_s0 + $0x210] sm:$0xff] }
  0x22   :  { %182 = vst [vmem:[#allocation2 + $0x200] sm:$0xff] %v181_v0  ;;  %184 = vst [vmem:[#allocation2 + $0x208] sm:$0xff] %v183_v1  ;;  %v187_v3 = vld [vmem:[%s10696_s0 + $0x218] sm:$0xff] }
  0x23   :  { %186 = vst [vmem:[#allocation2 + $0x210] sm:$0xff] %v185_v2  ;;  %188 = vst [vmem:[#allocation2 + $0x218] sm:$0xff] %v187_v3 }
  0x24   :  { %196 = vsyncadd [#allocation3], 8704 }
  0x25   :  { %8024 = dma.done.wait [#allocation3], 8704 }
  0x26   :  { %8025 = vsyncadd [#allocation3], 4294958592  ;;  %v7494_v4 = vld [vmem:[%s10697_s1 + $0x104] ss:$8 sps:$4 sm:$0xff]   ;;  %v7498_v6 = vld [vmem:[%s10697_s1 + $0x100] ss:$8 sps:$4 sm:$0xff]  }
  0x27   :  { %v7496_v5 = vld [vmem:[%s10697_s1 + $0x404] ss:$8 sps:$4 sm:$0xff]   ;;  %1011 = vmatprep.subr.bf16.mxu1 %v7494_v4  ;;  %v7499_v7 = vld [vmem:[%s10697_s1 + $0x400] ss:$8 sps:$4 sm:$0xff]   ;;  %v7500_v8 = vld [vmem:[%s10697_s1 + $0x114] ss:$8 sps:$4 sm:$0xff]  }
  0x28   :  { %3323 = vmatprep.subr.bf16.mxu0 %v7496_v5  ;;  %1012 = vmatpush1.bf16.msra.mxu1 %v7498_v6  ;;  %v7502_v9 = vld [vmem:[%s10697_s1 + $0x414] ss:$8 sps:$4 sm:$0xff]   ;;  %v7504_v10 = vld [vmem:[%s10697_s1 + $0x110] ss:$8 sps:$4 sm:$0xff]   ;;  %v7506_v12 = vld [vmem:[%s10697_s1 + $0x124] ss:$8 sps:$4 sm:$0xff]  }
  0x29   :  { %3324 = vmatpush1.bf16.msra.mxu0 %v7499_v7  ;;  %1013 = vmatprep.subr.bf16.mxu1 %v7500_v8  ;;  %v7505_v11 = vld [vmem:[%s10697_s1 + $0x410] ss:$8 sps:$4 sm:$0xff]   ;;  %v7508_v13 = vld [vmem:[%s10697_s1 + $0x424] ss:$8 sps:$4 sm:$0xff]   ;;  %v7510_v14 = vld [vmem:[%s10697_s1 + $0x120] ss:$8 sps:$4 sm:$0xff]  }
  0x2a   :  { %3325 = vmatprep.subr.bf16.mxu0 %v7502_v9  ;;  %v7511_v15 = vld [vmem:[%s10697_s1 + $0x420] ss:$8 sps:$4 sm:$0xff]   ;;  %v7512_v16 = vld [vmem:[%s10697_s1 + $0x134] ss:$8 sps:$4 sm:$0xff]   ;;  %v7516_v18 = vld [vmem:[%s10697_s1 + $0x130] ss:$8 sps:$4 sm:$0xff]  }
  0x2b   :  { %v7514_v17 = vld [vmem:[%s10697_s1 + $0x434] ss:$8 sps:$4 sm:$0xff]   ;;  %v7517_v19 = vld [vmem:[%s10697_s1 + $0x430] ss:$8 sps:$4 sm:$0xff]   ;;  %v7518_v20 = vld [vmem:[%s10697_s1 + $0x144] ss:$8 sps:$4 sm:$0xff]  }
  0x2c   :  { %1014 = vmatpush1.bf16.msra.mxu1 %v7504_v10  ;;  %v7520_v21 = vld [vmem:[%s10697_s1 + $0x444] ss:$8 sps:$4 sm:$0xff]   ;;  %v7522_v22 = vld [vmem:[%s10697_s1 + $0x140] ss:$8 sps:$4 sm:$0xff]   ;;  %v7524_v24 = vld [vmem:[%s10697_s1 + $0x154] ss:$8 sps:$4 sm:$0xff]  }
  0x2d   :  { %3326 = vmatpush1.bf16.msra.mxu0 %v7505_v11  ;;  %1015 = vmatprep.subr.bf16.mxu1 %v7506_v12  ;;  %v7523_v23 = vld [vmem:[%s10697_s1 + $0x440] ss:$8 sps:$4 sm:$0xff]   ;;  %v7526_v25 = vld [vmem:[%s10697_s1 + $0x454] ss:$8 sps:$4 sm:$0xff]   ;;  %v7528_v26 = vld [vmem:[%s10697_s1 + $0x150] ss:$8 sps:$4 sm:$0xff]  }
  0x2e   :  { %3327 = vmatprep.subr.bf16.mxu0 %v7508_v13  ;;  %v7529_v27 = vld [vmem:[%s10697_s1 + $0x450] ss:$8 sps:$4 sm:$0xff]   ;;  %v7530_v28 = vld [vmem:[%s10697_s1 + $0x164] ss:$8 sps:$4 sm:$0xff]   ;;  %v7534_v30 = vld [vmem:[%s10697_s1 + $0x160] ss:$8 sps:$4 sm:$0xff]  }
  0x2f   :  { %v7532_v29 = vld [vmem:[%s10697_s1 + $0x464] ss:$8 sps:$4 sm:$0xff]   ;;  %v7535_v31 = vld [vmem:[%s10697_s1 + $0x460] ss:$8 sps:$4 sm:$0xff]   ;;  %v7536_v32 = vld [vmem:[%s10697_s1 + $0x174] ss:$8 sps:$4 sm:$0xff]  }
  0x30   :  { %1016 = vmatpush1.bf16.msra.mxu1 %v7510_v14  ;;  %v7538_v33 = vld [vmem:[%s10697_s1 + $0x474] ss:$8 sps:$4 sm:$0xff]   ;;  %v7540_v34 = vld [vmem:[%s10697_s1 + $0x170] ss:$8 sps:$4 sm:$0xff]   ;;  %v7542_v36 = vld [vmem:[%s10697_s1 + $0x184] ss:$8 sps:$4 sm:$0xff]  }
  0x31   :  { %3328 = vmatpush1.bf16.msra.mxu0 %v7511_v15  ;;  %1017 = vmatprep.subr.bf16.mxu1 %v7512_v16  ;;  %v7541_v35 = vld [vmem:[%s10697_s1 + $0x470] ss:$8 sps:$4 sm:$0xff]   ;;  %v7544_v37 = vld [vmem:[%s10697_s1 + $0x484] ss:$8 sps:$4 sm:$0xff]   ;;  %v7546_v38 = vld [vmem:[%s10697_s1 + $0x180] ss:$8 sps:$4 sm:$0xff]  }
  0x32   :  { %3329 = vmatprep.subr.bf16.mxu0 %v7514_v17  ;;  %v7547_v39 = vld [vmem:[%s10697_s1 + $0x480] ss:$8 sps:$4 sm:$0xff]   ;;  %v7548_v40 = vld [vmem:[%s10697_s1 + $0x194] ss:$8 sps:$4 sm:$0xff]   ;;  %v7552_v42 = vld [vmem:[%s10697_s1 + $0x190] ss:$8 sps:$4 sm:$0xff]  }
  0x33   :  { %v7550_v41 = vld [vmem:[%s10697_s1 + $0x494] ss:$8 sps:$4 sm:$0xff]   ;;  %v7553_v43 = vld [vmem:[%s10697_s1 + $0x490] ss:$8 sps:$4 sm:$0xff]   ;;  %v7554_v44 = vld [vmem:[%s10697_s1 + $0x1a4] ss:$8 sps:$4 sm:$0xff]  }
  0x34   :  { %1018 = vmatpush1.bf16.msra.mxu1 %v7516_v18  ;;  %v7556_v45 = vld [vmem:[%s10697_s1 + $0x4a4] ss:$8 sps:$4 sm:$0xff]   ;;  %v7558_v46 = vld [vmem:[%s10697_s1 + $0x1a0] ss:$8 sps:$4 sm:$0xff]   ;;  %v7560_v48 = vld [vmem:[%s10697_s1 + $0x1b4] ss:$8 sps:$4 sm:$0xff]  }
  0x35   :  { %3330 = vmatpush1.bf16.msra.mxu0 %v7517_v19  ;;  %1019 = vmatprep.subr.bf16.mxu1 %v7518_v20  ;;  %v7559_v47 = vld [vmem:[%s10697_s1 + $0x4a0] ss:$8 sps:$4 sm:$0xff]   ;;  %v7562_v49 = vld [vmem:[%s10697_s1 + $0x4b4] ss:$8 sps:$4 sm:$0xff]   ;;  %v7564_v50 = vld [vmem:[%s10697_s1 + $0x1b0] ss:$8 sps:$4 sm:$0xff]  }
  0x36   :  { %3331 = vmatprep.subr.bf16.mxu0 %v7520_v21  ;;  %v400_v51 = vld [vmem:[#allocation2 + $0x18] sm:$0xff]  ;;  %v8391_v52 = vld [vmem:[#allocation2 + $0x28] sm:$0xff]  ;;  %v399_v0 = vld [vmem:[#allocation2 + $0x10] sm:$0xff]  ;;  %vm3068_vm0 = vcmask 1045504   ;;  %vm564_vm1 = vsmask.f32 7424 }
  0x37   :  { %v404_v53 = vld [vmem:[#allocation2 + $0x38] sm:$0xff]  ;;  %v524_v54 = vld [vmem:[#allocation2 + $0x8] sm:$0xfe]  ;;  %v523_v4 = vld [vmem:[#allocation2] sm:$0xfe]  ;;  %vm4370_vm3 = vcmask 1044480  }
  0x38   :  { %1020 = vmatpush1.bf16.msra.mxu1 %v7522_v22  ;;  %v7565_v55 = vld [vmem:[%s10697_s1 + $0x4b0] ss:$8 sps:$4 sm:$0xff]   ;;  %v8397_v56 = vpack.c.bf16 %v404_v53, %v8391_v52  ;;  %v528_v57 = vpack.c.bf16 %v400_v51, %v524_v54  ;;  %v2141_v58 = vld [vmem:[#allocation2 + $0x48] sm:$0xff]  ;;  %v2996_v59 = vld [vmem:[#allocation2 + $0x18] sm:$0xf0]  ;;  %v527_v13 = vpack.c.bf16 %v399_v0, %v523_v4  ;;  %vm1626_vm4 = vcmask 1046528  }
  0x39   :  { %3332 = vmatpush1.bf16.msra.mxu0 %v7523_v23  ;;  %1021 = vmatprep.subr.bf16.mxu1 %v7524_v24  ;;  %v7566_v60 = vld [vmem:[%s10697_s1 + $0x1c4] ss:$8 sps:$4 sm:$0xff]   ;;  %v8405_v62 = vpack.c.bf16 %v2141_v58, %v404_v53  ;;  %v3000_v63 = vpack.c.bf16 %v8391_v52, %v2996_v59  ;;  %v7570_v5 = vld [vmem:[%s10697_s1 + $0x1c0] ss:$8 sps:$4 sm:$0xff]   ;;  %v403_v12 = vld [vmem:[#allocation2 + $0x30] sm:$0xff] }
  0x3a   :  { %3333 = vmatprep.subr.bf16.mxu0 %v7526_v25  ;;  %v7568_v61 = vld [vmem:[%s10697_s1 + $0x4c4] ss:$8 sps:$4 sm:$0xff]   ;;  %v578_v1 = vshrl.u32 %v528_v57, 16  ;;  %v580_v2 = vshll.u32 %v528_v57, 16  ;;  %v585_v3 = vshll.u32 %v8397_v56, 16  ;;  %v568_v24 = vshll.u32 %v527_v13, 16 }
  0x3b   :  { %10853 = vst [vmem:[#allocation7_spill] sm:$0xff] %v8405_v62  ;;  %v3072_v6 = vrot.slane %v3000_v63, 2  ;;  %v3073_v7 = vrot.slane %v8405_v62, 2  ;;  %v7571_v8 = vld [vmem:[%s10697_s1 + $0x4c0] ss:$8 sps:$4 sm:$0xff]  }
  0x3c   :  { %1022 = vmatpush1.bf16.msra.mxu1 %v7528_v26  ;;  %v582_v9 = vrot.slane %v580_v2, 1  ;;  %v587_v10 = vrot.slane %v585_v3, 1  ;;  %v8416_v11 = vld [vmem:[#allocation2 + $0x20] sm:$0xff]  ;;  %v7572_v14 = vld [vmem:[%s10697_s1 + $0x1d4] ss:$8 sps:$4 sm:$0xff]  }
  0x3d   :  { %3334 = vmatpush1.bf16.msra.mxu0 %v7529_v27  ;;  %1023 = vmatprep.subr.bf16.mxu1 %v7530_v28  ;;  %v7574_v15 = vld [vmem:[%s10697_s1 + $0x4d4] ss:$8 sps:$4 sm:$0xff]   ;;  %v3074_v16 = vsel %vm3068_vm0, %v3072_v6, %v3073_v7  ;;  %v7576_v18 = vld [vmem:[%s10697_s1 + $0x1d0] ss:$8 sps:$4 sm:$0xff]   ;;  %v7578_v20 = vld [vmem:[%s10697_s1 + $0x1e4] ss:$8 sps:$4 sm:$0xff]   ;;  %v8437_v21 = vpack.c.bf16 %v403_v12, %v8416_v11 }
  0x3e   :  { %3335 = vmatprep.subr.bf16.mxu0 %v7532_v29  ;;  %v583_v17 = vor.u32 %v582_v9, %v578_v1  ;;  %3355 = vmatprep.mubr.bf16.mxu0 %v3074_v16  ;;  %v7577_v19 = vld [vmem:[%s10697_s1 + $0x4d0] ss:$8 sps:$4 sm:$0xff]   ;;  %v7580_v22 = vld [vmem:[%s10697_s1 + $0x4e4] ss:$8 sps:$4 sm:$0xff]   ;;  %v2995_v26 = vld [vmem:[#allocation2 + $0x10] sm:$0xf0] }
  0x3f   :  { %v2140_v25 = vld [vmem:[#allocation2 + $0x40] sm:$0xff]  ;;  %v408_v27 = vld [vmem:[#allocation2 + $0x58] sm:$0xff]  ;;  %v411_v9 = vld [vmem:[#allocation2 + $0x70] sm:$0xff]  ;;  %vm3617_vm2 = vsmask.f32 5376 }
  0x40   :  { %1024 = vmatpush1.bf16.msra.mxu1 %v7534_v30  ;;  %v588_v23 = vsel %vm564_vm1, %v583_v17, %v587_v10  ;;  %v7582_v28 = vld [vmem:[%s10697_s1 + $0x1e0] ss:$8 sps:$4 sm:$0xff]   ;;  %v8449_v30 = vpack.c.bf16 %v408_v27, %v2141_v58  ;;  %v7595_v53 = vld [vmem:[%s10697_s1 + $0x504] ss:$8 sps:$4 sm:$0xff]   ;;  %v7599_v17 = vld [vmem:[%s10697_s1 + $0x10] ss:$8 sps:$4 sm:$0xff]  }
  0x41   :  { %3336 = vmatpush1.bf16.msra.mxu0 %v7535_v31  ;;  %1025 = vmatprep.subr.bf16.mxu1 %v7536_v32  ;;  %v7583_v29 = vld [vmem:[%s10697_s1 + $0x4e0] ss:$8 sps:$4 sm:$0xff]   ;;  %v7584_v31 = vld [vmem:[%s10697_s1 + $0x1f4] ss:$8 sps:$4 sm:$0xff]   ;;  %vm4919_vm5 = vsmask.f32 4352 }
  0x42   :  { %3337 = vmatprep.subr.bf16.mxu0 %v7538_v33  ;;  %1043 = vmatprep.mubr.bf16.mxu1 %v588_v23  ;;  %v7586_v32 = vld [vmem:[%s10697_s1 + $0x4f4] ss:$8 sps:$4 sm:$0xff]   ;;  %v573_v33 = vshll.u32 %v8437_v21, 16  ;;  %v2144_v54 = vld [vmem:[#allocation2 + $0x60] sm:$0xff]  ;;  %v613_v6 = vshrl.u32 %v8449_v30, 16 }
  0x43   :  { %v7590_v0 = vld [vmem:[%s10697_s1] ss:$8 sps:$4 sm:$0xff]   ;;  %v8519_v23 = vpack.c.bf16 %v411_v9, %v2144_v54  ;;  %vm2263_vm6 = vsmask.f32 6400 }
  0x44   :  { %1026 = vmatpush1.bf16.msra.mxu1 %v7540_v34  ;;  %v566_v34 = vshrl.u32 %v527_v13, 16  ;;  %v7593_v2 = vld [vmem:[%s10697_s1 + $0x500] ss:$8 sps:$4 sm:$0xff]   ;;  %v7601_v13 = vld [vmem:[%s10697_s1 + $0x14] ss:$8 sps:$4 sm:$0xff]  }
  0x45   :  { %3338 = vmatpush1.bf16.msra.mxu0 %v7541_v35  ;;  %1027 = vmatprep.subr.bf16.mxu1 %v7542_v36  ;;  %v570_v35 = vrot.slane %v568_v24, 1  ;;  %v8458_v36 = vpack.c.bf16 %v2140_v25, %v403_v12 }
  0x46   :  { %3339 = vmatprep.subr.bf16.mxu0 %v7544_v37  ;;  %v2999_v37 = vpack.c.bf16 %v8416_v11, %v2995_v26  ;;  %v2148_v26 = vld [vmem:[#allocation2 + $0x80] sm:$0xff] }
  0x47   :  { %10854 = vst [vmem:[#allocation8_spill] sm:$0xff] %v8458_v36 }
  0x48   :  { %1028 = vmatpush1.bf16.msra.mxu1 %v7546_v38  ;;  %v2145_v38 = vld [vmem:[#allocation2 + $0x68] sm:$0xff] }
  0x49   :  { %3340 = vmatpush1.bf16.msra.mxu0 %v7547_v39  ;;  %1029 = vmatprep.subr.bf16.mxu1 %v7548_v40  ;;  %v407_v39 = vld [vmem:[#allocation2 + $0x50] sm:$0xff]  ;;  %v597_v40 = vshrl.u32 %v8397_v56, 16 }
  0x4a   :  { %3341 = vmatprep.subr.bf16.mxu0 %v7550_v41  ;;  %v601_v41 = vshll.u32 %v8449_v30, 16  ;;  %v8475_v51 = vpack.c.bf16 %v407_v39, %v2140_v25  ;;  %v8493_v4 = vpack.c.bf16 %v2144_v54, %v407_v39  ;;  %v7610_v25 = vld [vmem:[%s10697_s1 + $0x24] ss:$8 sps:$4 sm:$0xff]   ;;  %v8540_v39 = vpack.c.bf16 %v2148_v26, %v411_v9 }
  0x4b   :  { %v599_v57 = vor.u32 %v597_v40, %v587_v10  ;;  %v7596_v10 = vld [vmem:[%s10697_s1 + $0x510] ss:$8 sps:$4 sm:$0xff]  }
  0x4c   :  { %1030 = vmatpush1.bf16.msra.mxu1 %v7552_v42  ;;  %v7588_v42 = vld [vmem:[%s10697_s1 + $0x1f0] ss:$8 sps:$4 sm:$0xff]   ;;  %v603_v58 = vrot.slane %v601_v41, 1  ;;  %v593_v3 = vshll.u32 %v8475_v51, 16  ;;  %10856 = vst [vmem:[#allocation10_spill] sm:$0xff] %v8493_v4  ;;  %10859 = vst [vmem:[#allocation13_spill] sm:$0xff] %v8540_v39 }
  0x4d   :  { %3342 = vmatpush1.bf16.msra.mxu0 %v7553_v43  ;;  %1031 = vmatprep.subr.bf16.mxu1 %v7554_v44  ;;  %v7589_v43 = vld [vmem:[%s10697_s1 + $0x4f0] ss:$8 sps:$4 sm:$0xff]   ;;  %v575_v44 = vrot.slane %v573_v33, 1  ;;  %v3079_v54 = vrot.slane %v8540_v39, 2 }
  0x4e   :  { %3343 = vmatprep.subr.bf16.mxu0 %v7556_v45  ;;  %v8469_v45 = vpack.c.bf16 %v2145_v38, %v408_v27  ;;  %v604_v12 = vsel %vm564_vm1, %v599_v57, %v603_v58  ;;  %v615_v24 = vor.u32 %v613_v6, %v603_v58  ;;  %v7613_v57 = vld [vmem:[%s10697_s1 + $0x544] ss:$8 sps:$4 sm:$0xff]  }
  0x50   :  { %1032 = vmatpush1.bf16.msra.mxu1 %v7558_v46  ;;  %10855 = vst [vmem:[#allocation9_spill] sm:$0xff] %v8469_v45  ;;  %v412_v46 = vld [vmem:[#allocation2 + $0x78] sm:$0xff]  ;;  %v3077_v59 = vrot.slane %v8469_v45, 2 }
  0x51   :  { %3344 = vmatpush1.bf16.msra.mxu0 %v7559_v47  ;;  %1033 = vmatprep.subr.bf16.mxu1 %v7560_v48  ;;  %v571_v47 = vor.u32 %v570_v35, %v566_v34  ;;  %v7592_v48 = vld [vmem:[%s10697_s1 + $0x4] ss:$8 sps:$4 sm:$0xff]   ;;  %v7607_v35 = vld [vmem:[%s10697_s1 + $0x534] ss:$8 sps:$4 sm:$0xff]  }
  0x52   :  { %3345 = vmatprep.subr.bf16.mxu0 %v7562_v49  ;;  %v3069_v49 = vrot.slane %v2999_v37, 2  ;;  %v3078_v16 = vsel %vm3068_vm0, %v3073_v7, %v3077_v59  ;;  %v609_v37 = vshll.u32 %v8519_v23, 16 }
  0x53   :  { %v576_v63 = vsel %vm564_vm1, %v571_v47, %v575_v44  ;;  %v420_v47 = vld [vmem:[#allocation2 + $0xb8] sm:$0xff] }
  0x54   :  { %1034 = vmatpush1.bf16.msra.mxu1 %v7564_v50  ;;  %v3070_v50 = vrot.slane %v8458_v36, 2 }
  0x55   :  { %3346 = vmatpush1.bf16.msra.mxu0 %v7565_v55  ;;  %1035 = vmatprep.subr.bf16.mxu1 %v7566_v60  ;;  %v8480_v55 = vpack.c.bf16 %v412_v46, %v2145_v38  ;;  %v589_v60 = vshrl.u32 %v8437_v21, 16  ;;  %v7608_v38 = vld [vmem:[%s10697_s1 + $0x20] ss:$8 sps:$4 sm:$0xff]  }
  0x56   :  { %3347 = vmatprep.subr.bf16.mxu0 %v7568_v61  ;;  %v2149_v61 = vld [vmem:[#allocation2 + $0x88] sm:$0xff]  ;;  %v3071_v1 = vsel %vm3068_vm0, %v3069_v49, %v3070_v50  ;;  %v7605_v49 = vld [vmem:[%s10697_s1 + $0x530] ss:$8 sps:$4 sm:$0xff]  }
  0x57   :  { %v629_v41 = vshrl.u32 %v8480_v55, 16 }
  0x58   :  { %1036 = vmatpush1.bf16.msra.mxu1 %v7570_v5  ;;  %v7598_v5 = vld [vmem:[%s10697_s1 + $0x514] ss:$8 sps:$4 sm:$0xff]  }
  0x59   :  { %3348 = vmatpush1.bf16.msra.mxu0 %v7571_v8  ;;  %1037 = vmatprep.subr.bf16.mxu1 %v7572_v14  ;;  %v617_v8 = vshll.u32 %v8480_v55, 16  ;;  %v8507_v14 = vpack.c.bf16 %v2149_v61, %v412_v46 }
  0x5a   :  { %3349 = vmatprep.subr.bf16.mxu0 %v7574_v15  ;;  %v416_v15 = vld [vmem:[#allocation2 + $0x98] sm:$0xff] }
  0x5b   :  { %10857 = vst [vmem:[#allocation11_spill] sm:$0xff] %v8507_v14  ;;  %v619_v7 = vrot.slane %v617_v8, 1  ;;  %v8524_v27 = vpack.c.bf16 %v416_v15, %v2149_v61  ;;  %v2152_v61 = vld [vmem:[#allocation2 + $0xa0] sm:$0xff] }
  0x5c   :  { %1038 = vmatpush1.bf16.msra.mxu1 %v7576_v18  ;;  %v591_v18 = vor.u32 %v589_v60, %v575_v44  ;;  %v7611_v8 = vld [vmem:[%s10697_s1 + $0x540] ss:$8 sps:$4 sm:$0xff]  }
  0x5d   :  { %3350 = vmatpush1.bf16.msra.mxu0 %v7577_v19  ;;  %1039 = vmatprep.subr.bf16.mxu1 %v7578_v20  ;;  %v595_v19 = vrot.slane %v593_v3, 1  ;;  %v3075_v20 = vrot.slane %v8493_v4, 2  ;;  %10858 = vst [vmem:[#allocation12_spill] sm:$0xff] %v8524_v27  ;;  %v620_v40 = vsel %vm564_vm1, %v615_v24, %v619_v7  ;;  %v2157_v3 = vld [vmem:[#allocation2 + $0xc8] sm:$0xff]  ;;  %v7614_v24 = vld [vmem:[%s10697_s1 + $0x550] ss:$8 sps:$4 sm:$0xff]  }
  0x5e   :  { %3351 = vmatprep.subr.bf16.mxu0 %v7580_v22  ;;  %v7604_v22 = vld [vmem:[%s10697_s1 + $0x524] ss:$8 sps:$4 sm:$0xff]  }
  0x5f   :  { %v596_v33 = vsel %vm564_vm1, %v591_v18, %v595_v19  ;;  %v3076_v34 = vsel %vm3068_vm0, %v3070_v50, %v3075_v20  ;;  %v3080_v6 = vsel %vm3068_vm0, %v3075_v20, %v3079_v54  ;;  %v7628_v20 = vld [vmem:[%s10697_s1 + $0x44] ss:$8 sps:$4 sm:$0xff]  }
  0x60   :  { %1040 = vmatpush1.bf16.msra.mxu1 %v7582_v28  ;;  %v7602_v28 = vld [vmem:[%s10697_s1 + $0x520] ss:$8 sps:$4 sm:$0xff]  }
  0x61   :  { %3352 = vmatpush1.bf16.msra.mxu0 %v7583_v29  ;;  %1041 = vmatprep.subr.bf16.mxu1 %v7584_v31  ;;  %v3081_v29 = vrot.slane %v8507_v14, 2  ;;  %v605_v31 = vshrl.u32 %v8475_v51, 16 }
  0x62   :  { %3353 = vmatprep.subr.bf16.mxu0 %v7586_v32  ;;  %v2153_v32 = vld [vmem:[#allocation2 + $0xa8] sm:$0xff] }
  0x63   :  { %v3082_v44 = vsel %vm3068_vm0, %v3077_v59, %v3081_v29  ;;  %v8546_v46 = vpack.c.bf16 %v2153_v32, %v416_v15  ;;  %v607_v50 = vor.u32 %v605_v31, %v595_v19  ;;  %v631_v59 = vor.u32 %v629_v41, %v619_v7  ;;  %v7626_v7 = vld [vmem:[%s10697_s1 + $0x40] ss:$8 sps:$4 sm:$0xff]   ;;  %v7637_v31 = vld [vmem:[%s10697_s1 + $0x54] ss:$8 sps:$4 sm:$0xff]  }
  0x64   :  { %1042 = vmatpush1.bf16.msra.mxu1 %v7588_v42  ;;  %v633_v42 = vshll.u32 %v8524_v27, 16  ;;  %v645_v15 = vshrl.u32 %v8524_v27, 16  ;;  %v8582_v19 = vpack.c.bf16 %v2157_v3, %v420_v47 }
  0x65   :  { %3354 = vmatpush1.bf16.msra.mxu0 %v7589_v43  ;;  %1362 = vmatprep.subr.bf16.mxu1 %v7592_v48  ;;  %v415_v43 = vld [vmem:[#allocation2 + $0x90] sm:$0xff]  ;;  %10860 = vst [vmem:[#allocation14_spill] sm:$0xff] %v8546_v46 }
  0x66   :  { %3956 = vmatprep.subr.bf16.mxu0 %v7595_v53  ;;  %v7619_v48 = vld [vmem:[%s10697_s1 + $0x34] ss:$8 sps:$4 sm:$0xff]   ;;  %v611_v53 = vrot.slane %v609_v37, 1  ;;  %v8558_v58 = vpack.c.bf16 %v415_v43, %v2148_v26  ;;  %v635_v60 = vrot.slane %v633_v42, 1  ;;  %10864 = vst [vmem:[#allocation18_spill] sm:$0xff] %v8582_v19  ;;  %v2161_v42 = vld [vmem:[#allocation2 + $0xe8] sm:$0xff] }
  0x67   :  { %1044 = vmatmul.mubr.bf16.vlgmr.msra.gmra.mrb[0].mxu1 %v576_v63  ;;  %v8560_v63 = vpack.c.bf16 %v420_v47, %v2153_v32  ;;  %v7622_v32 = vld [vmem:[%s10697_s1 + $0x564] ss:$8 sps:$4 sm:$0xff]   ;;  %v7625_v47 = vld [vmem:[%s10697_s1 + $0x574] ss:$8 sps:$4 sm:$0xff]  }
  0x68   :  { %3356 = vmatmul.mubr.bf16.vlgmr.msra.gmra.mrb[0].mxu0 %v3071_v1  ;;  %1363 = vmatpush1.bf16.msra.mxu1 %v7590_v0  ;;  %10861 = vst [vmem:[#allocation15_spill] sm:$0xff] %v8558_v58  ;;  %v3085_v0 = vrot.slane %v8546_v46, 2  ;;  %v7617_v1 = vld [vmem:[%s10697_s1 + $0x30] ss:$8 sps:$4 sm:$0xff]   ;;  %v625_v9 = vshll.u32 %v8558_v58, 16  ;;  %v637_v41 = vshrl.u32 %v8558_v58, 16 }
  0x69   :  { %3957 = vmatpush1.bf16.msra.mxu0 %v7593_v2  ;;  %1053 = vmatprep.mubr.bf16.mxu1 %v604_v12  ;;  %10862 = vst [vmem:[#allocation16_spill] sm:$0xff] %v8560_v63  ;;  %v621_v2 = vshrl.u32 %v8519_v23, 16  ;;  %v7616_v12 = vld [vmem:[%s10697_s1 + $0x554] ss:$8 sps:$4 sm:$0xff]  }
  0x6a   :  { %3958 = vmatprep.subr.bf16.mxu0 %v7598_v5  ;;  %3365 = vmatprep.mubr.bf16.mxu0 %v3078_v16  ;;  %v612_v5 = vsel %vm564_vm1, %v607_v50, %v611_v53  ;;  %v649_v16 = vshll.u32 %v8560_v63, 16  ;;  %v3086_v18 = vsel %vm3068_vm0, %v3081_v29, %v3085_v0  ;;  %v627_v26 = vrot.slane %v625_v9, 1  ;;  %v7631_v9 = vld [vmem:[%s10697_s1 + $0x584] ss:$8 sps:$4 sm:$0xff]  }
  0x6b   :  { %1364 = vmatprep.subr.bf16.mxu1 %v7601_v13  ;;  %v636_v13 = vsel %vm564_vm1, %v631_v59, %v635_v60  ;;  %v423_v59 = vld [vmem:[#allocation2 + $0xd0] sm:$0xff] }
  0x6c   :  { %1365 = vmatpush1.bf16.msra.mxu1 %v7599_v17  ;;  %v419_v17 = vld [vmem:[#allocation2 + $0xb0] sm:$0xff] }
  0x6d   :  { %3959 = vmatpush1.bf16.msra.mxu0 %v7596_v10  ;;  %1366 = vmatprep.subr.bf16.mxu1 %v7610_v25  ;;  %v8573_v10 = vpack.c.bf16 %v2152_v61, %v415_v43  ;;  %v623_v25 = vor.u32 %v621_v2, %v611_v53  ;;  %v8594_v29 = vpack.c.bf16 %v419_v17, %v2152_v61  ;;  %v661_v53 = vshrl.u32 %v8560_v63, 16  ;;  %v7646_v2 = vld [vmem:[%s10697_s1 + $0x64] ss:$8 sps:$4 sm:$0xff]  }
  0x6e   :  { %3960 = vmatprep.subr.bf16.mxu0 %v7604_v22  ;;  %v424_v22 = vld [vmem:[#allocation2 + $0xd8] sm:$0xff] }
  0x6f   :  { %1054 = vmatmul.mubr.bf16.gmra.mrb[4].mxu1 %v596_v33  ;;  %10863 = vst [vmem:[#allocation17_spill] sm:$0xff] %v8573_v10  ;;  %10865 = vst [vmem:[#allocation19_spill] sm:$0xff] %v8594_v29  ;;  %v647_v33 = vor.u32 %v645_v15, %v635_v60  ;;  %v8602_v37 = vpack.c.bf16 %v424_v22, %v2157_v3  ;;  %v628_v43 = vsel %vm564_vm1, %v623_v25, %v627_v26  ;;  %v7623_v3 = vld [vmem:[%s10697_s1 + $0x570] ss:$8 sps:$4 sm:$0xff]   ;;  %v2160_v15 = vld [vmem:[#allocation2 + $0xe0] sm:$0xff] }
  0x70   :  { %3366 = vmatmul.mubr.bf16.gmra.mrb[4].mxu0 %v3076_v34  ;;  %1063 = vmatprep.mubr.bf16.mxu1 %v620_v40  ;;  %v651_v34 = vrot.slane %v649_v16, 1  ;;  %v7620_v40 = vld [vmem:[%s10697_s1 + $0x560] ss:$8 sps:$4 sm:$0xff]   ;;  %v8624_v61 = vpack.c.bf16 %v2161_v42, %v424_v22 }
  0x71   :  { %3961 = vmatpush1.bf16.msra.mxu0 %v7602_v28  ;;  %3375 = vmatprep.mubr.bf16.mxu0 %v3082_v44  ;;  %v3083_v28 = vrot.slane %v8573_v10, 2  ;;  %10866 = vst [vmem:[#allocation20_spill] sm:$0xff] %v8602_v37  ;;  %v2165_v22 = vld [vmem:[#allocation2 + $0x108] sm:$0xff] }
  0x72   :  { %3962 = vmatprep.subr.bf16.mxu0 %v7607_v35  ;;  %1367 = vmatpush1.bf16.msra.mxu1 %v7608_v38  ;;  %v2156_v35 = vld [vmem:[#allocation2 + $0xc0] sm:$0xff]  ;;  %v3089_v38 = vrot.slane %v8582_v19, 2  ;;  %v652_v50 = vsel %vm564_vm1, %v647_v33, %v651_v34  ;;  %10868 = vst [vmem:[#allocation22_spill] sm:$0xff] %v8624_v61  ;;  %v10906_v63 = vshll.u32 %v8624_v61, 16 }
  0x73   :  { %1368 = vmatprep.subr.bf16.mxu1 %v7619_v48  ;;  %v3084_v44 = vsel %vm3068_vm0, %v3079_v54, %v3083_v28  ;;  %v641_v48 = vshll.u32 %v8594_v29, 16  ;;  %v7635_v54 = vld [vmem:[%s10697_s1 + $0x50] ss:$8 sps:$4 sm:$0xff]   ;;  %v7629_v25 = vld [vmem:[%s10697_s1 + $0x580] ss:$8 sps:$4 sm:$0xff]  }
  0x74   :  { %v3090_v60 = vsel %vm3068_vm0, %v3085_v0, %v3089_v38  ;;  %v8633_v0 = vpack.c.bf16 %v423_v59, %v2156_v35  ;;  %v3679_v58 = vrot.slane %v10906_v63, 3 }
  0x75   :  { %3963 = vmatpush1.bf16.msra.mxu0 %v7605_v49  ;;  %v8615_v49 = vpack.c.bf16 %v2156_v35, %v419_v17  ;;  %v3093_v17 = vrot.slane %v8624_v61, 2 }
  0x76   :  { %3964 = vmatprep.subr.bf16.mxu0 %v7613_v57  ;;  %1369 = vmatpush1.bf16.msra.mxu1 %v7617_v1  ;;  %v665_v57 = vshll.u32 %v8602_v37, 16  ;;  %v428_v1 = vld [vmem:[#allocation2 + $0xf8] sm:$0xff]  ;;  %10869 = vst [vmem:[#allocation23_spill] sm:$0xff] %v8633_v0 }
  0x77   :  { %1064 = vmatmul.mubr.bf16.gmra.mrb[8].mxu1 %v612_v5  ;;  %1370 = vmatprep.subr.bf16.mxu1 %v7628_v20  ;;  %10867 = vst [vmem:[#allocation21_spill] sm:$0xff] %v8615_v49  ;;  %v639_v5 = vor.u32 %v637_v41, %v627_v26  ;;  %v8638_v16 = vpack.c.bf16 %v428_v1, %v2161_v42  ;;  %v653_v20 = vshrl.u32 %v8594_v29, 16  ;;  %v657_v26 = vshll.u32 %v8633_v0, 16 }
  0x78   :  { %3376 = vmatmul.mubr.bf16.gmra.mrb[8].mxu0 %v3080_v6  ;;  %1073 = vmatprep.mubr.bf16.mxu1 %v636_v13  ;;  %v643_v6 = vrot.slane %v641_v48, 1  ;;  %v667_v13 = vrot.slane %v665_v57, 1  ;;  %v3094_v41 = vsel %vm3068_vm0, %v3089_v38, %v3093_v17  ;;  %v8662_v42 = vpack.c.bf16 %v2165_v22, %v428_v1  ;;  %v7632_v48 = vld [vmem:[%s10697_s1 + $0x590] ss:$8 sps:$4 sm:$0xff]  }
  0x79   :  { %3965 = vmatpush1.bf16.msra.mxu0 %v7611_v8  ;;  %3385 = vmatprep.mubr.bf16.mxu0 %v3086_v18  ;;  %v3087_v8 = vrot.slane %v8615_v49, 2  ;;  %10870 = vst [vmem:[#allocation24_spill] sm:$0xff] %v8638_v16  ;;  %v7644_v18 = vld [vmem:[%s10697_s1 + $0x60] ss:$8 sps:$4 sm:$0xff]   ;;  %v681_v35 = vshll.u32 %v8638_v16, 16 }
  0x7a   :  { %3966 = vmatprep.subr.bf16.mxu0 %v7616_v12  ;;  %1371 = vmatpush1.bf16.msra.mxu1 %v7626_v7  ;;  %v663_v12 = vor.u32 %v661_v53, %v651_v34  ;;  %v677_v34 = vshrl.u32 %v8602_v37, 16  ;;  %10872 = vst [vmem:[#allocation26_spill] sm:$0xff] %v8662_v42  ;;  %v655_v38 = vor.u32 %v653_v20, %v643_v6 }
  0x7b   :  { %1372 = vmatprep.subr.bf16.mxu1 %v7637_v31  ;;  %v3088_v7 = vsel %vm3068_vm0, %v3083_v28, %v3087_v8  ;;  %v8651_v31 = vpack.c.bf16 %v2160_v15, %v423_v59  ;;  %v427_v28 = vld [vmem:[#allocation2 + $0xf0] sm:$0xff]  ;;  %v7664_v59 = vld [vmem:[%s10697_s1 + $0x84] ss:$8 sps:$4 sm:$0xff]   ;;  %v683_v1 = vrot.slane %v681_v35, 1  ;;  %v7662_v35 = vld [vmem:[%s10697_s1 + $0x80] ss:$8 sps:$4 sm:$0xff]  }
  0x7c   :  { %v668_v33 = vsel %vm564_vm1, %v663_v12, %v667_v13  ;;  %v8674_v57 = vpack.c.bf16 %v427_v28, %v2160_v15  ;;  %v2169_v12 = vld [vmem:[#allocation2 + $0x128] sm:$0xff] }
  0x7d   :  { %3967 = vmatpush1.bf16.msra.mxu0 %v7614_v24  ;;  %v644_v24 = vsel %vm564_vm1, %v639_v5, %v643_v6  ;;  %10871 = vst [vmem:[#allocation25_spill] sm:$0xff] %v8651_v31  ;;  %v3091_v53 = vrot.slane %v8651_v31, 2  ;;  %v3097_v5 = vrot.slane %v8662_v42, 2 }
  0x7e   :  { %3968 = vmatprep.subr.bf16.mxu0 %v7622_v32  ;;  %1373 = vmatpush1.bf16.msra.mxu1 %v7635_v54  ;;  %v7634_v32 = vld [vmem:[%s10697_s1 + $0x594] ss:$8 sps:$4 sm:$0xff]   ;;  %10873 = vst [vmem:[#allocation27_spill] sm:$0xff] %v8674_v57  ;;  %v7640_v54 = vld [vmem:[%s10697_s1 + $0x5a4] ss:$8 sps:$4 sm:$0xff]   ;;  %v673_v20 = vshll.u32 %v8674_v57, 16 }
  0x7f   :  { %1074 = vmatmul.mubr.bf16.gmra.mrb[12].mxu1 %v628_v43  ;;  %1374 = vmatprep.subr.bf16.mxu1 %v7646_v2  ;;  %v432_v43 = vld [vmem:[#allocation2 + $0x118] sm:$0xff]  ;;  %v2164_v2 = vld [vmem:[#allocation2 + $0x100] sm:$0xff] }
  0x80   :  { %3386 = vmatmul.mubr.bf16.gmra.mrb[12].mxu0 %v3084_v44  ;;  %1083 = vmatprep.mubr.bf16.mxu1 %v652_v50  ;;  %v7655_v44 = vld [vmem:[%s10697_s1 + $0x74] ss:$8 sps:$4 sm:$0xff]   ;;  %v659_v50 = vrot.slane %v657_v26, 1 }
  0x81   :  { %3969 = vmatpush1.bf16.msra.mxu0 %v7620_v40  ;;  %3395 = vmatprep.mubr.bf16.mxu0 %v3090_v60  ;;  %v3577_v40 = vld [vmem:[#allocation2 + $0x18] sm:$0xe0]  ;;  %v679_v60 = vor.u32 %v677_v34, %v667_v13  ;;  %v3092_v13 = vsel %vm3068_vm0, %v3087_v8, %v3091_v53  ;;  %v8710_v34 = vpack.c.bf16 %v2169_v12, %v432_v43 }
  0x82   :  { %3970 = vmatprep.subr.bf16.mxu0 %v7625_v47  ;;  %1375 = vmatpush1.bf16.msra.mxu1 %v7644_v18  ;;  %v7653_v47 = vld [vmem:[%s10697_s1 + $0x70] ss:$8 sps:$4 sm:$0xff]   ;;  %v3581_v6 = vpack.c.bf16 %v8391_v52, %v3577_v40  ;;  %v660_v15 = vsel %vm564_vm1, %v655_v38, %v659_v50  ;;  %v7638_v18 = vld [vmem:[%s10697_s1 + $0x5a0] ss:$8 sps:$4 sm:$0xff]   ;;  %v7643_v52 = vld [vmem:[%s10697_s1 + $0x5b4] ss:$8 sps:$4 sm:$0xff]  }
  0x83   :  { %1376 = vmatprep.subr.bf16.mxu1 %v7655_v44  ;;  %v8703_v26 = vld [vmem:[#allocation2 + $0x138] sm:$0xff]  ;;  %10876 = vst [vmem:[#allocation30_spill] sm:$0xff] %v8710_v34  ;;  %v675_v44 = vrot.slane %v673_v20, 1  ;;  %v2168_v38 = vld [vmem:[#allocation2 + $0x120] sm:$0xff]  ;;  %v685_v20 = vshrl.u32 %v8674_v57, 16 }
  0x84   :  { %v3631_v40 = vshrl.u32 %v3581_v6, 16  ;;  %v7691_v57 = vld [vmem:[%s10697_s1 + $0xd4] ss:$8 sps:$4 sm:$0xff]  }
  0x85   :  { %3971 = vmatpush1.bf16.msra.mxu0 %v7623_v3  ;;  %v8682_v3 = vpack.c.bf16 %v432_v43, %v2165_v22  ;;  %v8695_v22 = vpack.c.bf16 %v2164_v2, %v427_v28  ;;  %v10700_v28 = vshrl.u32 %v8405_v62, 16 }
  0x86   :  { %3972 = vmatprep.subr.bf16.mxu0 %v7631_v9  ;;  %v669_v9 = vshrl.u32 %v8633_v0, 16  ;;  %1377 = vmatpush1.bf16.msra.mxu1 %v7653_v47  ;;  %v10897_v0 = vshll.u32 %v8546_v46, 16 }
  0x87   :  { %1084 = vmatmul.mubr.bf16.gmra.mrb[16].mxu1 %v644_v24  ;;  %10874 = vst [vmem:[#allocation28_spill] sm:$0xff] %v8682_v3  ;;  %10875 = vst [vmem:[#allocation29_spill] sm:$0xff] %v8695_v22  ;;  %1378 = vmatprep.subr.bf16.mxu1 %v7664_v59  ;;  %v684_v24 = vsel %vm564_vm1, %v679_v60, %v683_v1  ;;  %v697_v8 = vshll.u32 %v8682_v3, 16  ;;  %v10701_v47 = vrot.slane %v8695_v22, 2  ;;  %v7649_v59 = vld [vmem:[%s10697_s1 + $0x5c4] ss:$8 sps:$4 sm:$0xff]  }
  0x88   :  { %3396 = vmatmul.mubr.bf16.gmra.mrb[16].mxu0 %v3088_v7  ;;  %1093 = vmatprep.mubr.bf16.mxu1 %v668_v33  ;;  %v693_v7 = vshrl.u32 %v8638_v16, 16  ;;  %v3098_v33 = vsel %vm3068_vm0, %v3093_v17, %v3097_v5  ;;  %v7641_v17 = vld [vmem:[%s10697_s1 + $0x5b0] ss:$8 sps:$4 sm:$0xff]   ;;  %v671_v43 = vor.u32 %v669_v9, %v659_v50  ;;  %v10702_v50 = vrot.slane %v8710_v34, 2 }
  0x89   :  { %3973 = vmatpush1.bf16.msra.mxu0 %v7629_v25  ;;  %3405 = vmatprep.mubr.bf16.mxu0 %v3094_v41  ;;  %v431_v25 = vld [vmem:[#allocation2 + $0x110] sm:$0xff]  ;;  %v699_v60 = vrot.slane %v697_v8, 1  ;;  %v10703_v9 = vshll.u32 %v8405_v62, 16  ;;  %v3663_v37 = vrot.slane %v10897_v0, 3 }
  0x8a   :  { %3974 = vmatprep.subr.bf16.mxu0 %v7634_v32  ;;  %v3576_v32 = vld [vmem:[#allocation2 + $0x10] sm:$0xe0]  ;;  %1379 = vmatpush1.bf16.msra.mxu1 %v7662_v35 }
  0x8b   :  { %v7667_v41 = vld [vmem:[%s10697_s1 + $0x94] ss:$8 sps:$4 sm:$0xff]  }
  0x8c   :  { %1380 = vmatprep.subr.bf16.mxu1 %v7667_v41  ;;  %v8753_v8 = vld [vmem:[#allocation2 + $0x130] sm:$0xff]  ;;  %v3102_v41 = vsel %vm3068_vm0, %v3097_v5, %v10702_v50 }
  0x8d   :  { %3975 = vmatpush1.bf16.msra.mxu0 %v7632_v48  ;;  %v8723_v48 = vpack.c.bf16 %v431_v25, %v2164_v2  ;;  %v7665_v2 = vld [vmem:[%s10697_s1 + $0x90] ss:$8 sps:$4 sm:$0xff]   ;;  %v8782_v5 = vpack.c.bf16 %v8753_v8, %v2168_v38 }
  0x8e   :  { %3976 = vmatprep.subr.bf16.mxu0 %v7640_v54  ;;  %v695_v54 = vor.u32 %v693_v7, %v683_v1  ;;  %v7647_v1 = vld [vmem:[%s10697_s1 + $0x5c0] ss:$8 sps:$4 sm:$0xff]   ;;  %v709_v7 = vshrl.u32 %v8682_v3, 16  ;;  %1381 = vmatpush1.bf16.msra.mxu1 %v7665_v2  ;;  %v7679_v2 = vld [vmem:[%s10697_s1 + $0xb4] ss:$8 sps:$4 sm:$0xff]  }
  0x8f   :  { %1094 = vmatmul.mubr.bf16.gmra.mrb[20].mxu1 %v660_v15  ;;  %10877 = vst [vmem:[#allocation31_spill] sm:$0xff] %v8723_v48  ;;  %v8729_v15 = vpack.c.bf16 %v8703_v26, %v2169_v12  ;;  %v8741_v12 = vpack.c.bf16 %v2168_v38, %v431_v25  ;;  %v7652_v25 = vld [vmem:[%s10697_s1 + $0x5d4] ss:$8 sps:$4 sm:$0xff]   ;;  %10880 = vst [vmem:[#allocation34_spill] sm:$0xff] %v8782_v5  ;;  %v7658_v38 = vld [vmem:[%s10697_s1 + $0x5e4] ss:$8 sps:$4 sm:$0xff]  }
  0x90   :  { %3406 = vmatmul.mubr.bf16.gmra.mrb[20].mxu0 %v3092_v13  ;;  %1103 = vmatprep.mubr.bf16.mxu1 %v684_v24  ;;  %v3634_v13 = vshll.u32 %v3581_v6, 16  ;;  %v8743_v6 = vrot.slane %v3631_v40, 2  ;;  %v689_v24 = vshll.u32 %v8723_v48, 16  ;;  %v3638_v40 = vrot.slane %v10700_v28, 2  ;;  %v8826_v3 = vld [vmem:[#allocation2 + $0x168] sm:$0xff] }
  0x91   :  { %3977 = vmatpush1.bf16.msra.mxu0 %v7638_v18  ;;  %3415 = vmatprep.mubr.bf16.mxu0 %v3098_v33  ;;  %10878 = vst [vmem:[#allocation32_spill] sm:$0xff] %v8729_v15  ;;  %v3580_v18 = vpack.c.bf16 %v8416_v11, %v3576_v32  ;;  %10879 = vst [vmem:[#allocation33_spill] sm:$0xff] %v8741_v12  ;;  %v3096_v11 = vsel %vm3068_vm0, %v3091_v53, %v10701_v47  ;;  %v713_v33 = vshll.u32 %v8729_v15, 16  ;;  %v7650_v53 = vld [vmem:[%s10697_s1 + $0x5d0] ss:$8 sps:$4 sm:$0xff]  }
  0x92   :  { %3978 = vmatprep.subr.bf16.mxu0 %v7643_v52  ;;  %v676_v52 = vsel %vm564_vm1, %v671_v43, %v675_v44  ;;  %v700_v32 = vsel %vm564_vm1, %v695_v54, %v699_v60  ;;  %v3636_v35 = vrot.slane %v3634_v13, 3  ;;  %v8775_v54 = vld [vmem:[#allocation2 + $0x158] sm:$0xff]  ;;  %v7673_v13 = vld [vmem:[%s10697_s1 + $0xa4] ss:$8 sps:$4 sm:$0xff]   ;;  %v687_v28 = vor.u32 %v685_v20, %v675_v44 }
  0x93   :  { %v3619_v44 = vshrl.u32 %v3580_v18, 16  ;;  %v3622_v20 = vshll.u32 %v3580_v18, 16  ;;  %v715_v50 = vrot.slane %v713_v33, 1  ;;  %1382 = vmatprep.subr.bf16.mxu1 %v7673_v13  ;;  %v10884_v47 = vshrl.u32 %v8458_v36, 16 }
  0x94   :  { %v3637_v18 = vor.u32 %v3636_v35, %v8743_v6  ;;  %v10885_v35 = vshll.u32 %v8458_v36, 16 }
  0x95   :  { %3979 = vmatpush1.bf16.msra.mxu0 %v7641_v17  ;;  %v3639_v17 = vrot.slane %v10703_v9, 3  ;;  %v7671_v9 = vld [vmem:[%s10697_s1 + $0xa0] ss:$8 sps:$4 sm:$0xff]   ;;  %v3626_v6 = vrot.slane %v10884_v47, 2  ;;  %v3621_v13 = vrot.slane %v3619_v44, 2  ;;  %v3624_v62 = vrot.slane %v3622_v20, 3 }
  0x96   :  { %3980 = vmatprep.subr.bf16.mxu0 %v7649_v59  ;;  %v8773_v59 = vld [vmem:[#allocation2 + $0x148] sm:$0xff]  ;;  %1383 = vmatpush1.bf16.msra.mxu1 %v7671_v9  ;;  %v10886_v9 = vshrl.u32 %v8469_v45, 16  ;;  %v8834_v20 = vld [vmem:[#allocation2 + $0x178] sm:$0xff] }
  0x97   :  { %1104 = vmatmul.mubr.bf16.gmra.mrb[24].mxu1 %v676_v52  ;;  %v691_v52 = vrot.slane %v689_v24, 1  ;;  %v8796_v43 = vpack.c.bf16 %v8775_v54, %v8773_v59  ;;  %v8804_v24 = vor.u32 %v3639_v17, %v3638_v40  ;;  %v3627_v40 = vrot.slane %v10885_v35, 3  ;;  %1384 = vmatprep.subr.bf16.mxu1 %v7679_v2  ;;  %v7677_v2 = vld [vmem:[%s10697_s1 + $0xb0] ss:$8 sps:$4 sm:$0xff]  }
  0x98   :  { %3416 = vmatmul.mubr.bf16.gmra.mrb[24].mxu0 %v3096_v11  ;;  %1113 = vmatprep.mubr.bf16.mxu1 %v700_v32  ;;  %v711_v11 = vor.u32 %v709_v7, %v699_v60  ;;  %v7656_v60 = vld [vmem:[%s10697_s1 + $0x5e0] ss:$8 sps:$4 sm:$0xff]   ;;  %v701_v7 = vshrl.u32 %v8723_v48, 16  ;;  %v10883_v32 = vrot.slane %v8695_v22, 2  ;;  %v8824_v48 = vld [vmem:[#allocation2 + $0x150] sm:$0xff] }
  0x99   :  { %3981 = vmatpush1.bf16.msra.mxu0 %v7647_v1  ;;  %3425 = vmatprep.mubr.bf16.mxu0 %v3102_v41  ;;  %10881 = vst [vmem:[#allocation35_spill] sm:$0xff] %v8796_v43  ;;  %v7661_v41 = vld [vmem:[%s10697_s1 + $0x5f4] ss:$8 sps:$4 sm:$0xff]   ;;  %v705_v1 = vshll.u32 %v8782_v5, 16  ;;  %v692_v17 = vsel %vm564_vm1, %v687_v28, %v691_v52  ;;  %v729_v35 = vshll.u32 %v8796_v43, 16  ;;  %v10887_v28 = vshll.u32 %v8469_v45, 16 }
  0x9a   :  { %3982 = vmatprep.subr.bf16.mxu0 %v7652_v25  ;;  %v10882_v25 = vrot.slane %v8741_v12, 2  ;;  %v716_v47 = vsel %vm564_vm1, %v711_v11, %v715_v50  ;;  %v3641_v36 = vsel %vm3617_vm2, %v3637_v18, %v8804_v24  ;;  %v7685_v18 = vld [vmem:[%s10697_s1 + $0xc4] ss:$8 sps:$4 sm:$0xff]   ;;  %1385 = vmatpush1.bf16.msra.mxu1 %v7677_v2  ;;  %v7676_v45 = vld [vmem:[%s10697_s1 + $0x614] ss:$8 sps:$4 sm:$0xff]  }
  0x9b   :  { %v3647_v44 = vrot.slane %v10887_v28, 3  ;;  %v707_v11 = vrot.slane %v705_v1, 1  ;;  %1386 = vmatprep.subr.bf16.mxu1 %v7685_v18 }
  0x9c   :  { %v3100_v33 = vsel %vm3068_vm0, %v10883_v32, %v10882_v25  ;;  %v725_v25 = vshrl.u32 %v8729_v15, 16  ;;  %v8822_v32 = vld [vmem:[#allocation2 + $0x140] sm:$0xff]  ;;  %v703_v15 = vor.u32 %v701_v7, %v691_v52  ;;  %v7659_v52 = vld [vmem:[%s10697_s1 + $0x5f0] ss:$8 sps:$4 sm:$0xff]   ;;  %v3625_v7 = vor.u32 %v3624_v62, %v3621_v13 }
  0x9d   :  { %3983 = vmatpush1.bf16.msra.mxu0 %v7650_v53  ;;  %v3646_v53 = vrot.slane %v10886_v9, 2  ;;  %v8845_v9 = vpack.c.bf16 %v8824_v48, %v8822_v32  ;;  %v717_v13 = vshrl.u32 %v8782_v5, 16  ;;  %v8900_v5 = vld [vmem:[#allocation2 + $0x198] sm:$0xff] }
  0x9e   :  { %3984 = vmatprep.subr.bf16.mxu0 %v7658_v38  ;;  %v8841_v38 = vor.u32 %v3627_v40, %v3626_v6  ;;  %v727_v1 = vor.u32 %v725_v25, %v715_v50  ;;  %v8857_v6 = vpack.c.bf16 %v8834_v20, %v8826_v3  ;;  %v731_v40 = vrot.slane %v729_v35, 1  ;;  %v7683_v50 = vld [vmem:[%s10697_s1 + $0xc0] ss:$8 sps:$4 sm:$0xff]  }
  0x9f   :  { %1114 = vmatmul.mubr.bf16.gmra.mrb[28].mxu1 %v692_v17  ;;  %10888 = vst [vmem:[#allocation36_spill] sm:$0xff] %v8845_v9  ;;  %v8859_v17 = vor.u32 %v3647_v44, %v3646_v53  ;;  %v741_v35 = vshrl.u32 %v8796_v43, 16  ;;  %v8877_v53 = vld [vmem:[#allocation2 + $0x160] sm:$0xff]  ;;  %v8879_v44 = vld [vmem:[#allocation2 + $0x170] sm:$0xff]  ;;  %v708_v2 = vsel %vm564_vm1, %v703_v15, %v707_v11  ;;  %v10891_v15 = vshrl.u32 %v8507_v14, 16 }
  0xa0   :  { %3426 = vmatmul.mubr.bf16.gmra.mrb[28].mxu0 %v3100_v33  ;;  %1123 = vmatprep.mubr.bf16.mxu1 %v716_v47  ;;  %v10720_v33 = vshll.u32 %v8493_v4, 16  ;;  %10889 = vst [vmem:[#allocation37_spill] sm:$0xff] %v8857_v6  ;;  %v7668_v47 = vld [vmem:[%s10697_s1 + $0x600] ss:$8 sps:$4 sm:$0xff]   ;;  %v3629_v62 = vsel %vm3617_vm2, %v3625_v7, %v8841_v38  ;;  %v745_v28 = vshll.u32 %v8857_v6, 16  ;;  %v732_v43 = vsel %vm564_vm1, %v727_v1, %v731_v40 }
  0xa1   :  { %3985 = vmatpush1.bf16.msra.mxu0 %v7656_v60  ;;  %3988 = vmatprep.mubr.bf16.mxu0 %v3641_v36  ;;  %v7670_v60 = vld [vmem:[%s10697_s1 + $0x604] ss:$8 sps:$4 sm:$0xff]   ;;  %v721_v36 = vshll.u32 %v8845_v9, 16  ;;  %v3649_v18 = vsel %vm3617_vm2, %v8804_v24, %v8859_v17  ;;  %v10892_v7 = vshll.u32 %v8507_v14, 16  ;;  %v7689_v24 = vld [vmem:[%s10697_s1 + $0xd0] ss:$8 sps:$4 sm:$0xff]   ;;  %v719_v1 = vor.u32 %v717_v13, %v707_v11 }
  0xa2   :  { %3986 = vmatprep.subr.bf16.mxu0 %v7661_v41  ;;  %v10890_v41 = vshrl.u32 %v8493_v4, 16  ;;  %1387 = vmatpush1.bf16.msra.mxu1 %v7683_v50  ;;  %v7697_v14 = vld [vmem:[%s10697_s1 + $0xe4] ss:$8 sps:$4 sm:$0xff]   ;;  %v7674_v11 = vld [vmem:[%s10697_s1 + $0x610] ss:$8 sps:$4 sm:$0xff]  }
  0xa3   :  { %v3655_v4 = vrot.slane %v10892_v7, 3  ;;  %v723_v50 = vrot.slane %v721_v36, 1  ;;  %v7682_v13 = vld [vmem:[%s10697_s1 + $0x624] ss:$8 sps:$4 sm:$0xff]   ;;  %1388 = vmatprep.subr.bf16.mxu1 %v7691_v57 }
  0xa4   :  { %v3642_v25 = vrot.slane %v10890_v41, 2  ;;  %v3643_v41 = vrot.slane %v10720_v33, 3  ;;  %v8898_v33 = vld [vmem:[#allocation2 + $0x188] sm:$0xff] }
  0xa5   :  { %3987 = vmatpush1.bf16.msra.mxu0 %v7659_v52  ;;  %v3654_v52 = vrot.slane %v10891_v15, 2  ;;  %v10729_v15 = vshrl.u32 %v8540_v39, 16 }
  0xa6   :  { %4625 = vmatprep.subr.bf16.mxu0 %v7670_v60  ;;  %v8910_v60 = vpack.c.bf16 %v8879_v44, %v8877_v53  ;;  %v8917_v16 = vor.u32 %v3643_v41, %v3642_v25  ;;  %v733_v25 = vshrl.u32 %v8845_v9, 16  ;;  %1389 = vmatpush1.bf16.msra.mxu1 %v7689_v24  ;;  %v8957_v9 = vld [vmem:[#allocation2 + $0x1b8] sm:$0xff] }
  0xa7   :  { %1124 = vmatmul.mubr.bf16.gmra.mrb[32].mxu1 %v708_v2  ;;  %v743_v2 = vor.u32 %v741_v35, %v731_v40  ;;  %v8925_v7 = vor.u32 %v3655_v4, %v3654_v52  ;;  %v8937_v35 = vld [vmem:[#allocation2 + $0x180] sm:$0xff]  ;;  %v8939_v4 = vld [vmem:[#allocation2 + $0x190] sm:$0xff]  ;;  %v3650_v41 = vrot.slane %v10729_v15, 2  ;;  %v8949_v40 = vld [vmem:[#allocation2 + $0x1a8] sm:$0xff]  ;;  %1390 = vmatprep.subr.bf16.mxu1 %v7697_v14  ;;  %v757_v15 = vshrl.u32 %v8857_v6, 16 }
  0xa8   :  { %3989 = vmatmul.mubr.bf16.vlgmr.msra.gmra.mrb[0].mxu0 %v3629_v62  ;;  %10893 = vst [vmem:[#allocation38_spill] sm:$0xff] %v8910_v60  ;;  %1133 = vmatprep.mubr.bf16.mxu1 %v732_v43  ;;  %v747_v62 = vrot.slane %v745_v28, 1  ;;  %v8929_v43 = vpack.c.bf16 %v8900_v5, %v8898_v33  ;;  %v7695_v28 = vld [vmem:[%s10697_s1 + $0xe0] ss:$8 sps:$4 sm:$0xff]   ;;  %v3645_v24 = vsel %vm3617_vm2, %v8841_v38, %v8917_v16  ;;  %v10896_v14 = vshrl.u32 %v8546_v46, 16 }
  0xa9   :  { %3998 = vmatprep.mubr.bf16.mxu0 %v3649_v18  ;;  %4626 = vmatpush1.bf16.msra.mxu0 %v7668_v47  ;;  %v737_v47 = vshll.u32 %v8910_v60, 16  ;;  %v10895_v18 = vshll.u32 %v8540_v39, 16  ;;  %v7680_v52 = vld [vmem:[%s10697_s1 + $0x620] ss:$8 sps:$4 sm:$0xff]   ;;  %v7703_v38 = vld [vmem:[%s10697_s1 + $0xf4] ss:$8 sps:$4 sm:$0xff]   ;;  %v8980_v0 = vpack.c.bf16 %v8939_v4, %v8937_v35 }
  0xaa   :  { %10894 = vst [vmem:[#allocation39_spill] sm:$0xff] %v8929_v43  ;;  %4627 = vmatprep.subr.bf16.mxu0 %v7676_v45  ;;  %v724_v45 = vsel %vm564_vm1, %v719_v1, %v723_v50  ;;  %v748_v36 = vsel %vm564_vm1, %v743_v2, %v747_v62  ;;  %v761_v39 = vshll.u32 %v8929_v43, 16  ;;  %v3662_v1 = vrot.slane %v10896_v14, 2  ;;  %v7688_v2 = vld [vmem:[%s10697_s1 + $0x634] ss:$8 sps:$4 sm:$0xff]   ;;  %1391 = vmatpush1.bf16.msra.mxu1 %v7695_v28 }
  0xab   :  { %v3651_v57 = vrot.slane %v10895_v18, 3  ;;  %v3657_v18 = vsel %vm3617_vm2, %v8859_v17, %v8925_v7  ;;  %v7701_v17 = vld [vmem:[%s10697_s1 + $0xf0] ss:$8 sps:$4 sm:$0xff]   ;;  %v739_v14 = vrot.slane %v737_v47, 1  ;;  %10898 = vst [vmem:[#allocation40_spill] sm:$0xff] %v8980_v0  ;;  %v759_v28 = vor.u32 %v757_v15, %v747_v62  ;;  %1392 = vmatprep.subr.bf16.mxu1 %v7703_v38  ;;  %v8998_v62 = vld [vmem:[#allocation2 + $0x1a0] sm:$0xff] }
  0xac   :  { %v10744_v6 = vshrl.u32 %v8573_v10, 16  ;;  %v763_v47 = vrot.slane %v761_v39, 1 }
  0xad   :  { %4628 = vmatpush1.bf16.msra.mxu0 %v7674_v11  ;;  %v735_v11 = vor.u32 %v733_v25, %v723_v50  ;;  %v8976_v46 = vor.u32 %v3651_v57, %v3650_v41  ;;  %v8989_v50 = vpack.c.bf16 %v8957_v9, %v8949_v40  ;;  %v7686_v25 = vld [vmem:[%s10697_s1 + $0x630] ss:$8 sps:$4 sm:$0xff]   ;;  %v8994_v41 = vor.u32 %v3663_v37, %v3662_v1  ;;  %v7694_v57 = vld [vmem:[%s10697_s1 + $0x644] ss:$8 sps:$4 sm:$0xff]  }
  0xae   :  { %4629 = vmatprep.subr.bf16.mxu0 %v7682_v13  ;;  %v7709_v13 = vld [vmem:[%s10697_s1 + $0x204] ss:$8 sps:$4 sm:$0xff]   ;;  %1393 = vmatpush1.bf16.msra.mxu1 %v7701_v17  ;;  %v749_v37 = vshrl.u32 %v8910_v60, 16  ;;  %v3658_v38 = vrot.slane %v10744_v6, 2  ;;  %v773_v17 = vshrl.u32 %v8929_v43, 16  ;;  %v764_v15 = vsel %vm564_vm1, %v759_v28, %v763_v47 }
  0xaf   :  { %1134 = vmatmul.mubr.bf16.gmra.mrb[36].mxu1 %v724_v45  ;;  %v10747_v45 = vshll.u32 %v8573_v10, 16  ;;  %10899 = vst [vmem:[#allocation41_spill] sm:$0xff] %v8989_v50  ;;  %v3653_v39 = vsel %vm3617_vm2, %v8917_v16, %v8976_v46  ;;  %v9011_v1 = vld [vmem:[#allocation2 + $0x1c8] sm:$0xff]  ;;  %1881 = vmatprep.subr.bf16.mxu1 %v7709_v13  ;;  %v9019_v16 = vld [vmem:[#allocation2 + $0x1d8] sm:$0xff]  ;;  %v10900_v13 = vshrl.u32 %v8582_v19, 16  ;;  %v10901_v6 = vshll.u32 %v8582_v19, 16 }
  0xb0   :  { %3999 = vmatmul.mubr.bf16.gmra.mrb[4].mxu0 %v3645_v24  ;;  %1143 = vmatprep.mubr.bf16.mxu1 %v748_v36  ;;  %v740_v24 = vsel %vm564_vm1, %v735_v11, %v739_v14  ;;  %v777_v11 = vshll.u32 %v8989_v50, 16  ;;  %v3665_v36 = vsel %vm3617_vm2, %v8925_v7, %v8994_v41  ;;  %v7700_v28 = vld [vmem:[%s10697_s1 + $0x654] ss:$8 sps:$4 sm:$0xff]   ;;  %v751_v10 = vor.u32 %v749_v37, %v739_v14  ;;  %v526_v14 = vld [vmem:[#allocation2 + $0x1f8] sm:$0x1] }
  0xb1   :  { %4008 = vmatprep.mubr.bf16.mxu0 %v3657_v18  ;;  %4630 = vmatpush1.bf16.msra.mxu0 %v7680_v52  ;;  %v753_v52 = vshll.u32 %v8980_v0, 16  ;;  %v9009_v18 = vld [vmem:[#allocation2 + $0x1b0] sm:$0xff]  ;;  %v3670_v60 = vrot.slane %v10900_v13, 2  ;;  %v3671_v29 = vrot.slane %v10901_v6, 3  ;;  %v10756_v13 = vshrl.u32 %v8615_v49, 16 }
  0xb2   :  { %4631 = vmatprep.subr.bf16.mxu0 %v7688_v2  ;;  %v3659_v2 = vrot.slane %v10747_v45, 3  ;;  %v7692_v45 = vld [vmem:[%s10697_s1 + $0x640] ss:$8 sps:$4 sm:$0xff]   ;;  %v9037_v7 = vpack.c.bf16 %v9009_v18, %v8998_v62  ;;  %v9043_v43 = vpack.c.bf16 %v9019_v16, %v9011_v1  ;;  %v7698_v6 = vld [vmem:[%s10697_s1 + $0x650] ss:$8 sps:$4 sm:$0xff]  }
  0xb4   :  { %10902 = vst [vmem:[#allocation42_spill] sm:$0xff] %v9037_v7  ;;  %v3660_v19 = vor.u32 %v3659_v2, %v3658_v38  ;;  %10903 = vst [vmem:[#allocation43_spill] sm:$0xff] %v9043_v43  ;;  %v9063_v2 = vld [vmem:[#allocation2 + $0x1e8] sm:$0xff]  ;;  %v793_v37 = vshll.u32 %v9043_v43, 16 }
  0xb5   :  { %4632 = vmatpush1.bf16.msra.mxu0 %v7686_v25  ;;  %v755_v25 = vrot.slane %v753_v52, 1  ;;  %v10904_v52 = vshll.u32 %v8615_v49, 16  ;;  %v10905_v49 = vshrl.u32 %v8624_v61, 16  ;;  %v9090_v61 = vpack.c.bf16 %v526_v14, %v9063_v2 }
  0xb6   :  { %4633 = vmatprep.subr.bf16.mxu0 %v7694_v57  ;;  %v775_v57 = vor.u32 %v773_v17, %v763_v47  ;;  %v7706_v47 = vld [vmem:[%s10697_s1 + $0x664] ss:$8 sps:$4 sm:$0xff]   ;;  %v795_v27 = vrot.slane %v793_v37, 1  ;;  %v781_v14 = vshrl.u32 %v9037_v7, 16  ;;  %v805_v37 = vshrl.u32 %v9043_v43, 16 }
  0xb7   :  { %1144 = vmatmul.mubr.bf16.gmra.mrb[40].mxu1 %v740_v24  ;;  %v779_v24 = vrot.slane %v777_v11, 1  ;;  %v3667_v38 = vrot.slane %v10904_v52, 3  ;;  %v756_v17 = vsel %vm564_vm1, %v751_v10, %v755_v25  ;;  %v3661_v11 = vsel %vm3617_vm2, %v8976_v46, %v3660_v19  ;;  %v7704_v46 = vld [vmem:[%s10697_s1 + $0x660] ss:$8 sps:$4 sm:$0xff]   ;;  %v7712_v10 = vld [vmem:[%s10697_s1 + $0x674] ss:$8 sps:$4 sm:$0xff]  }
  0xb8   :  { %4009 = vmatmul.mubr.bf16.gmra.mrb[8].mxu0 %v3653_v39  ;;  %1153 = vmatprep.mubr.bf16.mxu1 %v764_v15  ;;  %v3672_v39 = vor.u32 %v3671_v29, %v3670_v60  ;;  %v9050_v15 = vld [vmem:[#allocation2 + $0x1c0] sm:$0xff]  ;;  %v765_v29 = vshrl.u32 %v8980_v0, 16  ;;  %v769_v60 = vshll.u32 %v9037_v7, 16  ;;  %v3678_v52 = vrot.slane %v10905_v49, 2 }
  0xb9   :  { %4018 = vmatprep.mubr.bf16.mxu0 %v3665_v36  ;;  %4634 = vmatpush1.bf16.msra.mxu0 %v7692_v45  ;;  %v9052_v36 = vld [vmem:[#allocation2 + $0x1d0] sm:$0xff]  ;;  %v3666_v45 = vrot.slane %v10756_v13, 2  ;;  %v780_v0 = vsel %vm564_vm1, %v775_v57, %v779_v24  ;;  %v10808_v7 = vshrl.u32 %v8710_v34, 16 }
  0xba   :  { %4635 = vmatprep.subr.bf16.mxu0 %v7700_v28  ;;  %v789_v28 = vshrl.u32 %v8989_v50, 16  ;;  %v3673_v13 = vsel %vm3617_vm2, %v8994_v41, %v3672_v39  ;;  %v767_v57 = vor.u32 %v765_v29, %v755_v25  ;;  %v771_v41 = vrot.slane %v769_v60, 1  ;;  %v9104_v60 = vld [vmem:[#allocation2 + $0x1e0] sm:$0xff] }
  0xbb   :  { %v3668_v50 = vor.u32 %v3667_v38, %v3666_v45  ;;  %v9085_v49 = vpack.c.bf16 %v9052_v36, %v9050_v15  ;;  %v10773_v25 = vshrl.u32 %v8662_v42, 16  ;;  %v10774_v29 = vshll.u32 %v8662_v42, 16 }
  0xbc   :  { %v791_v63 = vor.u32 %v789_v28, %v779_v24  ;;  %v772_v24 = vsel %vm564_vm1, %v767_v57, %v771_v41  ;;  %v809_v28 = vshll.u32 %v9090_v61, 16  ;;  %v10810_v42 = vshrl.u32 %v8695_v22, 16 }
  0xbd   :  { %4636 = vmatpush1.bf16.msra.mxu0 %v7698_v6  ;;  %10907 = vst [vmem:[#allocation44_spill] sm:$0xff] %v9085_v49  ;;  %v10772_v6 = vshrl.u32 %v8651_v31, 16  ;;  %v3669_v45 = vsel %vm3617_vm2, %v3660_v19, %v3668_v50  ;;  %v3686_v57 = vrot.slane %v10773_v25, 2  ;;  %v3687_v43 = vrot.slane %v10774_v29, 3  ;;  %v7716_v19 = vld [vmem:[%s10697_s1 + $0x680] ss:$8 sps:$4 sm:$0xff]  }
  0xbe   :  { %4637 = vmatprep.subr.bf16.mxu0 %v7706_v47  ;;  %v10771_v47 = vshll.u32 %v8651_v31, 16  ;;  %v811_v29 = vrot.slane %v809_v28, 1  ;;  %v3694_v28 = vrot.slane %v10808_v7, 2 }
  0xbf   :  { %1154 = vmatmul.mubr.bf16.gmra.mrb[44].mxu1 %v756_v17  ;;  %v3680_v17 = vor.u32 %v3679_v58, %v3678_v52  ;;  %v785_v58 = vshll.u32 %v9085_v49, 16  ;;  %v3674_v38 = vrot.slane %v10772_v6, 2  ;;  %v525_v52 = vld [vmem:[#allocation2 + $0x1f0] sm:$0x1]  ;;  %v807_v6 = vor.u32 %v805_v37, %v795_v27 }
  0xc0   :  { %4019 = vmatmul.mubr.bf16.gmra.mrb[12].mxu0 %v3661_v11  ;;  %1163 = vmatprep.mubr.bf16.mxu1 %v780_v0  ;;  %v7710_v0 = vld [vmem:[%s10697_s1 + $0x670] ss:$8 sps:$4 sm:$0xff]   ;;  %v3675_v11 = vrot.slane %v10771_v47, 3  ;;  %v7724_v47 = vld [vmem:[%s10697_s1 + $0x694] ss:$8 sps:$4 sm:$0xff]   ;;  %v9125_v25 = vpack.c.bf16 %v525_v52, %v9104_v60  ;;  %v3688_v31 = vor.u32 %v3687_v43, %v3686_v57  ;;  %v816_v57 = vshrl.u32 %v9090_v61, 16 }
  0xc1   :  { %4028 = vmatprep.mubr.bf16.mxu0 %v3673_v13  ;;  %4638 = vmatpush1.bf16.msra.mxu0 %v7704_v46  ;;  %v7718_v13 = vld [vmem:[%s10697_s1 + $0x684] ss:$8 sps:$4 sm:$0xff]   ;;  %v796_v46 = vsel %vm564_vm1, %v791_v63, %v795_v27  ;;  %v783_v63 = vor.u32 %v781_v14, %v771_v41  ;;  %v7722_v27 = vld [vmem:[%s10697_s1 + $0x690] ss:$8 sps:$4 sm:$0xff]  }
  0xc2   :  { %4639 = vmatprep.subr.bf16.mxu0 %v7712_v10  ;;  %v3681_v10 = vsel %vm3617_vm2, %v3672_v39, %v3680_v17  ;;  %v787_v39 = vrot.slane %v785_v58, 1  ;;  %v7730_v41 = vld [vmem:[%s10697_s1 + $0x6a4] ss:$8 sps:$4 sm:$0xff]   ;;  %v797_v58 = vshrl.u32 %v9085_v49, 16  ;;  %v801_v43 = vshll.u32 %v9125_v25, 16 }
  0xc3   :  { %v7742_v61 = vld [vmem:[%s10697_s1 + $0x6c4] ss:$8 sps:$4 sm:$0xff]  }
  0xc4   :  { %v788_v14 = vsel %vm564_vm1, %v783_v63, %v787_v39 }
  0xc5   :  { %4640 = vmatpush1.bf16.msra.mxu0 %v7710_v0  ;;  %v3676_v0 = vor.u32 %v3675_v11, %v3674_v38  ;;  %v3682_v38 = vrot.slane %v10810_v42, 2  ;;  %v3689_v11 = vsel %vm3617_vm2, %v3680_v17, %v3688_v31  ;;  %v799_v17 = vor.u32 %v797_v58, %v787_v39  ;;  %v7734_v39 = vld [vmem:[%s10697_s1 + $0x6b0] ss:$8 sps:$4 sm:$0xff]  }
  0xc6   :  { %4641 = vmatprep.subr.bf16.mxu0 %v7718_v13  ;;  %v10809_v13 = vshll.u32 %v8695_v22, 16  ;;  %v818_v58 = vor.u32 %v816_v57, %v811_v29  ;;  %v9605_v22 = vld [vmem:[#allocation2 + $0x1e8] sm:$0xff] }
  0xc7   :  { %1164 = vmatmul.mubr.bf16.gmra.mrb[48].mxu1 %v772_v24  ;;  %v10807_v24 = vshll.u32 %v8710_v34, 16  ;;  %v3677_v37 = vsel %vm3617_vm2, %v3668_v50, %v3676_v0  ;;  %v7728_v50 = vld [vmem:[%s10697_s1 + $0x6a0] ss:$8 sps:$4 sm:$0xff]   ;;  %v4248_v34 = vld [vmem:[#allocation2 + $0x158] sm:$0xff] }
  0xc8   :  { %4029 = vmatmul.mubr.bf16.gmra.mrb[16].mxu0 %v3669_v45  ;;  %1173 = vmatprep.mubr.bf16.mxu1 %v796_v46  ;;  %v812_v45 = vsel %vm564_vm1, %v807_v6, %v811_v29  ;;  %v9153_v46 = vpack.c.bf16 %v8773_v59, %v8703_v26  ;;  %v7736_v6 = vld [vmem:[%s10697_s1 + $0x6b4] ss:$8 sps:$4 sm:$0xff]   ;;  %v10806_v59 = vshrl.u32 %v8741_v12, 16 }
  0xc9   :  { %4038 = vmatprep.mubr.bf16.mxu0 %v3681_v10  ;;  %4642 = vmatpush1.bf16.msra.mxu0 %v7716_v19  ;;  %v3695_v52 = vrot.slane %v10807_v24, 3  ;;  %v803_v10 = vrot.slane %v801_v43, 1  ;;  %v10805_v19 = vshll.u32 %v8741_v12, 16  ;;  %v10931_v24 = vld [vmem:[#allocation34_spill] sm:$0xff] }
  0xca   :  { %4643 = vmatprep.subr.bf16.mxu0 %v7724_v47  ;;  %v3683_v47 = vrot.slane %v10809_v13, 3  ;;  %10908 = vst [vmem:[#allocation45_spill] sm:$0xff] %v9153_v46  ;;  %v10942_v12 = vld [vmem:[#allocation42_spill] sm:$0xff] }
  0xcb   :  { %v3696_v63 = vor.u32 %v3695_v52, %v3694_v28  ;;  %v9192_v28 = vpack.c.bf16 %v8826_v3, %v8775_v54  ;;  %v398_v52 = vld [vmem:[#allocation2 + $0x8] sm:$0xff]  ;;  %v7746_v3 = vld [vmem:[%s10697_s1 + $0x6d0] ss:$8 sps:$4 sm:$0xff]  }
  0xcc   :  { %v3684_v26 = vor.u32 %v3683_v47, %v3682_v38  ;;  %v9180_v38 = vpack.c.bf16 %v8822_v32, %v8753_v8  ;;  %v813_v8 = vshrl.u32 %v9125_v25, 16  ;;  %v7754_v25 = vld [vmem:[%s10697_s1 + $0x6e4] ss:$8 sps:$4 sm:$0xff]  }
  0xcd   :  { %4644 = vmatpush1.bf16.msra.mxu0 %v7722_v27  ;;  %v10804_v27 = vshrl.u32 %v9153_v46, 16  ;;  %v3697_v47 = vsel %vm3617_vm2, %v3688_v31, %v3696_v63  ;;  %10910 = vst [vmem:[#allocation47_spill] sm:$0xff] %v9192_v28  ;;  %v7748_v31 = vld [vmem:[%s10697_s1 + $0x6d4] ss:$8 sps:$4 sm:$0xff]   ;;  %v10800_v54 = vshrl.u32 %v9192_v28, 16  ;;  %v10799_v57 = vshll.u32 %v9192_v28, 16 }
  0xce   :  { %4645 = vmatprep.subr.bf16.mxu0 %v7730_v41  ;;  %v10803_v41 = vshll.u32 %v9153_v46, 16  ;;  %v3685_v43 = vsel %vm3617_vm2, %v3676_v0, %v3684_v26  ;;  %10909 = vst [vmem:[#allocation46_spill] sm:$0xff] %v9180_v38  ;;  %v7740_v0 = vld [vmem:[%s10697_s1 + $0x6c0] ss:$8 sps:$4 sm:$0xff]  }
  0xcf   :  { %1174 = vmatmul.mubr.bf16.gmra.mrb[52].mxu1 %v788_v14  ;;  %v804_v14 = vsel %vm564_vm1, %v799_v17, %v803_v10 }
  0xd0   :  { %4039 = vmatmul.mubr.bf16.gmra.mrb[20].mxu0 %v3677_v37  ;;  %1183 = vmatprep.mubr.bf16.mxu1 %v812_v45  ;;  %v3690_v37 = vrot.slane %v10806_v59, 2  ;;  %v3691_v45 = vrot.slane %v10805_v19, 3  ;;  %v3703_v29 = vrot.slane %v10803_v41, 3  ;;  %v10929_v41 = vld [vmem:[#allocation31_spill] sm:$0xff] }
  0xd1   :  { %4048 = vmatprep.mubr.bf16.mxu0 %v3689_v11  ;;  %4646 = vmatpush1.bf16.msra.mxu0 %v7728_v50  ;;  %v3702_v11 = vrot.slane %v10804_v27, 2  ;;  %v10802_v50 = vshrl.u32 %v9180_v38, 16  ;;  %v7776_v59 = vld [vmem:[%s10697_s1 + $0x720] ss:$8 sps:$4 sm:$0xff]  }
  0xd2   :  { %4647 = vmatprep.subr.bf16.mxu0 %v7736_v6  ;;  %v3692_v32 = vor.u32 %v3691_v45, %v3690_v37  ;;  %v10801_v6 = vshll.u32 %v9180_v38, 16  ;;  %v9218_v45 = vpack.c.bf16 %v8877_v53, %v8824_v48  ;;  %v7757_v48 = vld [vmem:[%s10697_s1 + $0x6f4] ss:$8 sps:$4 sm:$0xff]  }
  0xd3   :  { %v3704_v17 = vor.u32 %v3703_v29, %v3702_v11  ;;  %v3710_v11 = vrot.slane %v10800_v54, 2  ;;  %v3711_v29 = vrot.slane %v10799_v57, 3  ;;  %v10927_v57 = vld [vmem:[#allocation27_spill] sm:$0xff]  ;;  %v4224_v54 = vld [vmem:[#allocation2 + $0x98] sm:$0xff] }
  0xd4   :  { %v3699_v37 = vrot.slane %v10801_v6, 3  ;;  %10911 = vst [vmem:[#allocation48_spill] sm:$0xff] %v9218_v45  ;;  %v10798_v53 = vshrl.u32 %v9218_v45, 16 }
  0xd5   :  { %4648 = vmatpush1.bf16.msra.mxu0 %v7734_v39  ;;  %v815_v39 = vor.u32 %v813_v8, %v803_v10  ;;  %v9223_v10 = vpack.c.bf16 %v8898_v33, %v8834_v20  ;;  %v397_v20 = vld [vmem:[#allocation2] sm:$0xff]  ;;  %v7755_v8 = vld [vmem:[%s10697_s1 + $0x6f0] ss:$8 sps:$4 sm:$0xff]  }
  0xd6   :  { %4649 = vmatprep.subr.bf16.mxu0 %v7742_v61  ;;  %v9208_v61 = vld [vmem:[#allocation2 + $0x18] sm:$0xff] }
  0xd7   :  { %1184 = vmatmul.mubr.bf16.gmra.mrb[56].mxu1 %v804_v14  ;;  %v460_v14 = vpack.c.bf16 %v9208_v61, %v398_v52  ;;  %10912 = vst [vmem:[#allocation49_spill] sm:$0xff] %v9223_v10  ;;  %v3712_v52 = vor.u32 %v3711_v29, %v3710_v11  ;;  %v9269_v29 = vpack.c.bf16 %v8949_v40, %v8900_v5  ;;  %v7721_v40 = vld [vmem:[%s10697_s1 + $0x224] ss:$8 sps:$4 sm:$0xff]  }
  0xd8   :  { %4049 = vmatmul.mubr.bf16.gmra.mrb[24].mxu0 %v3685_v43  ;;  %1193 = vmatprep.mubr.bf16.mxu1 %v818_v58  ;;  %v3693_v58 = vsel %vm3617_vm2, %v3684_v26, %v3692_v32  ;;  %v3698_v43 = vrot.slane %v10802_v50, 2  ;;  %v7752_v26 = vld [vmem:[%s10697_s1 + $0x6e0] ss:$8 sps:$4 sm:$0xff]  }
  0xd9   :  { %4058 = vmatprep.mubr.bf16.mxu0 %v3697_v47  ;;  %4650 = vmatpush1.bf16.msra.mxu0 %v7740_v0  ;;  %v3705_v47 = vsel %vm3617_vm2, %v3696_v63, %v3704_v17  ;;  %v10797_v63 = vshll.u32 %v9218_v45, 16  ;;  %v10796_v0 = vshrl.u32 %v9223_v10, 16  ;;  %10914 = vst [vmem:[#allocation51_spill] sm:$0xff] %v9269_v29  ;;  %v10938_v45 = vld [vmem:[#allocation40_spill] sm:$0xff] }
  0xda   :  { %4651 = vmatprep.subr.bf16.mxu0 %v7748_v31  ;;  %v3700_v33 = vor.u32 %v3699_v37, %v3698_v43  ;;  %v10781_v31 = vshll.u32 %v9223_v10, 16  ;;  %v3706_v43 = vrot.slane %v10798_v53, 2 }
  0xdb   :  { %v3707_v37 = vrot.slane %v10797_v63, 3  ;;  %v3718_v11 = vrot.slane %v10796_v0, 2 }
  0xdd   :  { %4652 = vmatpush1.bf16.msra.mxu0 %v7746_v3  ;;  %v7766_v3 = vld [vmem:[%s10697_s1 + $0x704] ss:$8 sps:$4 sm:$0xff]  }
  0xde   :  { %4653 = vmatprep.subr.bf16.mxu0 %v7754_v25  ;;  %v9245_v25 = vld [vmem:[#allocation2 + $0x10] sm:$0xff] }
  0xdf   :  { %1194 = vmatmul.mubr.bf16.gmra.mrb[60].mxu1 %v815_v39  ;;  %v459_v39 = vpack.c.bf16 %v9245_v25, %v397_v20 }
  0xe0   :  { %4059 = vmatmul.mubr.bf16.gmra.mrb[28].mxu0 %v3693_v58  ;;  %1394 = vmatprep.mubr.bf16.mxu1 %v460_v14  ;;  %v7707_v14 = vld [vmem:[%s10697_s1 + $0x200] ss:$8 sps:$4 sm:$0xff]   ;;  %v3701_v58 = vsel %vm3617_vm2, %v3692_v32, %v3700_v33  ;;  %v3719_v32 = vrot.slane %v10781_v31, 3 }
  0xe1   :  { %4068 = vmatprep.mubr.bf16.mxu0 %v3705_v47  ;;  %4654 = vmatpush1.bf16.msra.mxu0 %v7752_v26  ;;  %v9258_v47 = vpack.c.bf16 %v8937_v35, %v8879_v44  ;;  %v7715_v26 = vld [vmem:[%s10697_s1 + $0x214] ss:$8 sps:$4 sm:$0xff]   ;;  %v7713_v44 = vld [vmem:[%s10697_s1 + $0x210] ss:$8 sps:$4 sm:$0xff]   ;;  %v3708_v35 = vor.u32 %v3707_v37, %v3706_v43  ;;  %v9296_v37 = vpack.c.bf16 %v8998_v62, %v8939_v4 }
  0xe2   :  { %4655 = vmatprep.subr.bf16.mxu0 %v7757_v48  ;;  %v3713_v48 = vsel %vm3617_vm2, %v3704_v17, %v3712_v52  ;;  %v3720_v5 = vor.u32 %v3719_v32, %v3718_v11  ;;  %v10791_v17 = vshrl.u32 %v9269_v29, 16  ;;  %v7727_v43 = vld [vmem:[%s10697_s1 + $0x234] ss:$8 sps:$4 sm:$0xff]   ;;  %v9305_v32 = vpack.c.bf16 %v9011_v1, %v8957_v9  ;;  %v7725_v62 = vld [vmem:[%s10697_s1 + $0x230] ss:$8 sps:$4 sm:$0xff]  }
  0xe3   :  { %10913 = vst [vmem:[#allocation50_spill] sm:$0xff] %v9258_v47  ;;  %v10795_v20 = vshrl.u32 %v9258_v47, 16  ;;  %v10792_v31 = vshll.u32 %v9258_v47, 16  ;;  %10915 = vst [vmem:[#allocation52_spill] sm:$0xff] %v9296_v37 }
  0xe4   :  { %10916 = vst [vmem:[#allocation53_spill] sm:$0xff] %v9305_v32  ;;  %v10784_v9 = vshrl.u32 %v9305_v32, 16  ;;  %v10783_v1 = vshll.u32 %v9305_v32, 16 }
  0xe5   :  { %4656 = vmatpush1.bf16.msra.mxu0 %v7755_v8  ;;  %v10788_v8 = vshll.u32 %v9269_v29, 16 }
  0xe6   :  { %5398 = vmatprep.subr.bf16.mxu0 %v7766_v3  ;;  %v7719_v3 = vld [vmem:[%s10697_s1 + $0x220] ss:$8 sps:$4 sm:$0xff]  }
  0xe7   :  { %1395 = vmatmul.mubr.bf16.vlgmr.msra.gmra.mrb[0].mxu1 %v459_v39  ;;  %v3709_v39 = vsel %vm3617_vm2, %v3700_v33, %v3708_v35  ;;  %v3726_v33 = vrot.slane %v10791_v17, 2  ;;  %v3727_v11 = vrot.slane %v10788_v8, 3  ;;  %v3578_v8 = vld [vmem:[#allocation2 + $0x200] sm:$0x1f] }
  0xe8   :  { %4069 = vmatmul.mubr.bf16.gmra.mrb[32].mxu0 %v3701_v58  ;;  %1882 = vmatpush1.bf16.msra.mxu1 %v7707_v14  ;;  %v3714_v14 = vrot.slane %v10795_v20, 2  ;;  %v3715_v58 = vrot.slane %v10792_v31, 3  ;;  %v10921_v31 = vld [vmem:[#allocation15_spill] sm:$0xff] }
  0xe9   :  { %1404 = vmatprep.mubr.bf16.mxu1 %v8397_v56  ;;  %4078 = vmatprep.mubr.bf16.mxu0 %v3713_v48  ;;  %v10782_v48 = vshll.u32 %v9296_v37, 16 }
  0xea   :  { %1883 = vmatprep.subr.bf16.mxu1 %v7715_v26  ;;  %v3721_v26 = vsel %vm3617_vm2, %v3712_v52, %v3720_v5  ;;  %v3716_v4 = vor.u32 %v3715_v58, %v3714_v14  ;;  %v10785_v52 = vshrl.u32 %v9296_v37, 16  ;;  %v10935_v37 = vld [vmem:[#allocation38_spill] sm:$0xff] }
  0xec   :  { %1884 = vmatpush1.bf16.msra.mxu1 %v7713_v44  ;;  %v3728_v44 = vor.u32 %v3727_v11, %v3726_v33  ;;  %v3717_v14 = vsel %vm3617_vm2, %v3708_v35, %v3716_v4  ;;  %v3722_v58 = vrot.slane %v10785_v52, 2  ;;  %v3734_v35 = vrot.slane %v10784_v9, 2 }
  0xed   :  { %1885 = vmatprep.subr.bf16.mxu1 %v7721_v40  ;;  %v7733_v40 = vld [vmem:[%s10697_s1 + $0x244] ss:$8 sps:$4 sm:$0xff]   ;;  %v3735_v11 = vrot.slane %v10783_v1, 3 }
  0xee   :  { %v3729_v33 = vsel %vm3617_vm2, %v3720_v5, %v3728_v44  ;;  %v3579_v1 = vld [vmem:[#allocation2 + $0x208] sm:$0x1f] }
  0xef   :  { %1405 = vmatmul.mubr.bf16.gmra.mrb[4].mxu1 %v8437_v21  ;;  %v3736_v9 = vor.u32 %v3735_v11, %v3734_v35  ;;  %v9367_v35 = vpack.c.bf16 %v9104_v60, %v9052_v36  ;;  %v10920_v36 = vld [vmem:[#allocation12_spill] sm:$0xff] }
  0xf0   :  { %4079 = vmatmul.mubr.bf16.gmra.mrb[36].mxu0 %v3709_v39  ;;  %1414 = vmatprep.mubr.bf16.mxu1 %v8449_v30  ;;  %v7731_v39 = vld [vmem:[%s10697_s1 + $0x240] ss:$8 sps:$4 sm:$0xff]  }
  0xf1   :  { %4088 = vmatprep.mubr.bf16.mxu0 %v3721_v26  ;;  %1886 = vmatpush1.bf16.msra.mxu1 %v7719_v3  ;;  %v3723_v3 = vrot.slane %v10782_v48, 3  ;;  %v9329_v26 = vpack.c.bf16 %v9050_v15, %v9009_v18  ;;  %v9341_v48 = vpack.c.bf16 %v9063_v2, %v9019_v16  ;;  %10919 = vst [vmem:[#allocation56_spill] sm:$0xff] %v9367_v35 }
  0xf2   :  { %1887 = vmatprep.subr.bf16.mxu1 %v7727_v43  ;;  %v7739_v43 = vld [vmem:[%s10697_s1 + $0x254] ss:$8 sps:$4 sm:$0xff]   ;;  %v3737_v11 = vsel %vm3617_vm2, %v3728_v44, %v3736_v9  ;;  %v10794_v44 = vshll.u32 %v9367_v35, 16 }
  0xf3   :  { %10917 = vst [vmem:[#allocation54_spill] sm:$0xff] %v9329_v26  ;;  %10918 = vst [vmem:[#allocation55_spill] sm:$0xff] %v9341_v48  ;;  %v3724_v18 = vor.u32 %v3723_v3, %v3722_v58  ;;  %v10786_v15 = vshrl.u32 %v9329_v26, 16  ;;  %v10787_v5 = vshll.u32 %v9329_v26, 16  ;;  %v10790_v16 = vshrl.u32 %v9341_v48, 16 }
  0xf4   :  { %v10789_v2 = vshll.u32 %v9341_v48, 16  ;;  %v7743_v58 = vld [vmem:[%s10697_s1 + $0x260] ss:$8 sps:$4 sm:$0xff]  }
  0xf5   :  { %1888 = vmatpush1.bf16.msra.mxu1 %v7725_v62  ;;  %v7737_v62 = vld [vmem:[%s10697_s1 + $0x250] ss:$8 sps:$4 sm:$0xff]   ;;  %v3725_v3 = vsel %vm3617_vm2, %v3716_v4, %v3724_v18  ;;  %v3742_v52 = vrot.slane %v10790_v16, 2 }
  0xf6   :  { %1889 = vmatprep.subr.bf16.mxu1 %v7733_v40  ;;  %v9352_v40 = vld [vmem:[#allocation2 + $0x1f8] sm:$0xff]  ;;  %v3743_v4 = vrot.slane %v10789_v2, 3 }
  0xf7   :  { %1415 = vmatmul.mubr.bf16.gmra.mrb[8].mxu1 %v8475_v51  ;;  %v7749_v2 = vld [vmem:[%s10697_s1 + $0x270] ss:$8 sps:$4 sm:$0xff]  }
  0xf8   :  { %4089 = vmatmul.mubr.bf16.gmra.mrb[40].mxu0 %v3717_v14  ;;  %1424 = vmatprep.mubr.bf16.mxu1 %v8480_v55  ;;  %v7745_v14 = vld [vmem:[%s10697_s1 + $0x264] ss:$8 sps:$4 sm:$0xff]  }
  0xf9   :  { %4098 = vmatprep.mubr.bf16.mxu0 %v3729_v33  ;;  %1890 = vmatpush1.bf16.msra.mxu1 %v7731_v39  ;;  %v3730_v39 = vrot.slane %v10786_v15, 2  ;;  %v3731_v33 = vrot.slane %v10787_v5, 3  ;;  %v3583_v15 = vpack.c.bf16 %v3579_v1, %v9352_v40  ;;  %v10793_v5 = vshrl.u32 %v9367_v35, 16  ;;  %v10933_v35 = vld [vmem:[#allocation36_spill] sm:$0xff] }
  0xfa   :  { %1891 = vmatprep.subr.bf16.mxu1 %v7739_v43  ;;  %v7751_v43 = vld [vmem:[%s10697_s1 + $0x274] ss:$8 sps:$4 sm:$0xff]  }
  0xfb   :  { %v3732_v60 = vor.u32 %v3731_v33, %v3730_v39  ;;  %v3756_v16 = vshrl.u32 %v3583_v15, 16  ;;  %v3759_v1 = vshll.u32 %v3583_v15, 16  ;;  %v7758_v39 = vld [vmem:[%s10697_s1 + $0x280] ss:$8 sps:$4 sm:$0xff]  }
  0xfd   :  { %1892 = vmatpush1.bf16.msra.mxu1 %v7737_v62  ;;  %v3744_v62 = vor.u32 %v3743_v4, %v3742_v52  ;;  %v3733_v33 = vsel %vm3617_vm2, %v3724_v18, %v3732_v60  ;;  %v3739_v52 = vrot.slane %v10794_v44, 3  ;;  %v3758_v4 = vrot.slane %v3756_v16, 2  ;;  %v10922_v18 = vld [vmem:[#allocation16_spill] sm:$0xff] }
  0xfe   :  { %1893 = vmatprep.subr.bf16.mxu1 %v7745_v14  ;;  %v9385_v14 = vld [vmem:[#allocation2 + $0x1f0] sm:$0xff]  ;;  %v3761_v17 = vrot.slane %v3759_v1, 3  ;;  %v7767_v16 = vld [vmem:[%s10697_s1 + $0x2a0] ss:$8 sps:$4 sm:$0xff]  }
  0xff   :  { %1425 = vmatmul.mubr.bf16.gmra.mrb[12].mxu1 %v8519_v23  ;;  %v3582_v15 = vpack.c.bf16 %v3578_v8, %v9385_v14  ;;  %v7761_v8 = vld [vmem:[%s10697_s1 + $0x290] ss:$8 sps:$4 sm:$0xff]  }
 0x100   :  { %4099 = vmatmul.mubr.bf16.gmra.mrb[44].mxu0 %v3725_v3  ;;  %1434 = vmatprep.mubr.bf16.mxu1 %v10920_v36  ;;  %v7760_v3 = vld [vmem:[%s10697_s1 + $0x284] ss:$8 sps:$4 sm:$0xff]   ;;  %v3762_v0 = vor.u32 %v3761_v17, %v3758_v4  ;;  %v7775_v17 = vld [vmem:[%s10697_s1 + $0x2b4] ss:$8 sps:$4 sm:$0xff]  }
 0x101   :  { %4108 = vmatprep.mubr.bf16.mxu0 %v3737_v11  ;;  %1894 = vmatpush1.bf16.msra.mxu1 %v7743_v58  ;;  %v3738_v11 = vrot.slane %v10793_v5, 2  ;;  %v7763_v58 = vld [vmem:[%s10697_s1 + $0x294] ss:$8 sps:$4 sm:$0xff]   ;;  %v3747_v44 = vshrl.u32 %v3582_v15, 16  ;;  %v3750_v20 = vshll.u32 %v3582_v15, 16 }
 0x102   :  { %1895 = vmatprep.subr.bf16.mxu1 %v7751_v43  ;;  %v3745_v43 = vsel %vm3617_vm2, %v3736_v9, %v3744_v62  ;;  %v7769_v9 = vld [vmem:[%s10697_s1 + $0x2a4] ss:$8 sps:$4 sm:$0xff]  }
 0x103   :  { %v3740_v5 = vor.u32 %v3739_v52, %v3738_v11  ;;  %v3749_v1 = vrot.slane %v3747_v44, 2  ;;  %v10924_v11 = vld [vmem:[#allocation20_spill] sm:$0xff]  ;;  %v4216_v44 = vld [vmem:[#allocation2 + $0x58] sm:$0xff] }
 0x104   :  { %v4210_v15 = vld [vmem:[#allocation2 + $0x28] sm:$0xc0] }
 0x105   :  { %1896 = vmatpush1.bf16.msra.mxu1 %v7749_v2  ;;  %v3741_v2 = vsel %vm3617_vm2, %v3732_v60, %v3740_v5  ;;  %v4214_v60 = vld [vmem:[#allocation2 + $0x48] sm:$0xff] }
 0x106   :  { %1897 = vmatprep.subr.bf16.mxu1 %v7760_v3  ;;  %v3752_v3 = vrot.slane %v3750_v20, 3  ;;  %v7773_v20 = vld [vmem:[%s10697_s1 + $0x2b0] ss:$8 sps:$4 sm:$0xff]  }
 0x107   :  { %1435 = vmatmul.mubr.bf16.gmra.mrb[16].mxu1 %v10921_v31 }
 0x108   :  { %4109 = vmatmul.mubr.bf16.gmra.mrb[48].mxu0 %v3733_v33  ;;  %1444 = vmatprep.mubr.bf16.mxu1 %v10922_v18  ;;  %v3763_v33 = vsel %vm3617_vm2, %v3744_v62, %v3762_v0  ;;  %v3753_v52 = vor.u32 %v3752_v3, %v3749_v1  ;;  %v7781_v62 = vld [vmem:[%s10697_s1 + $0x2c4] ss:$8 sps:$4 sm:$0xff]   ;;  %v9441_v3 = vld [vmem:[#allocation2 + $0x30] sm:$0xff] }
 0x109   :  { %4118 = vmatprep.mubr.bf16.mxu0 %v3745_v43  ;;  %1898 = vmatpush1.bf16.msra.mxu1 %v7758_v39  ;;  %v10923_v39 = vld [vmem:[#allocation19_spill] sm:$0xff]  ;;  %v10926_v1 = vld [vmem:[#allocation24_spill] sm:$0xff] }
 0x10a   :  { %1899 = vmatprep.subr.bf16.mxu1 %v7763_v58  ;;  %v9421_v58 = vld [vmem:[#allocation2 + $0x38] sm:$0xff]  ;;  %v3754_v43 = vsel %vm3617_vm2, %v3740_v5, %v3753_v52  ;;  %v4209_v5 = vld [vmem:[#allocation2 + $0x20] sm:$0xc0]  ;;  %10944 = vst [vmem:[#allocation19_spill] sm:$0xff] %v9605_v22 }
 0x10b   :  { %v4274_v4 = vpack.c.bf16 %v9421_v58, %v4210_v15  ;;  %v4213_v15 = vld [vmem:[#allocation2 + $0x40] sm:$0xff] }
 0x10d   :  { %1900 = vmatpush1.bf16.msra.mxu1 %v7761_v8  ;;  %v9431_v8 = vpack.c.bf16 %v4216_v44, %v4214_v60  ;;  %v7785_v60 = vld [vmem:[%s10697_s1 + $0x2d0] ss:$8 sps:$4 sm:$0xff]   ;;  %v4218_v44 = vld [vmem:[#allocation2 + $0x68] sm:$0xff] }
 0x10e   :  { %1901 = vmatprep.subr.bf16.mxu1 %v7769_v9  ;;  %v7779_v9 = vld [vmem:[%s10697_s1 + $0x2c0] ss:$8 sps:$4 sm:$0xff]  }
 0x10f   :  { %1445 = vmatmul.mubr.bf16.gmra.mrb[20].mxu1 %v10923_v39 }
 0x110   :  { %4119 = vmatmul.mubr.bf16.gmra.mrb[52].mxu0 %v3741_v2  ;;  %1454 = vmatprep.mubr.bf16.mxu1 %v10924_v11  ;;  %v10925_v2 = vld [vmem:[#allocation23_spill] sm:$0xff] }
 0x111   :  { %4128 = vmatprep.mubr.bf16.mxu0 %v3763_v33  ;;  %1902 = vmatpush1.bf16.msra.mxu1 %v7767_v16  ;;  %v7787_v16 = vld [vmem:[%s10697_s1 + $0x2d4] ss:$8 sps:$4 sm:$0xff]   ;;  %v4374_v33 = vrot.slane %v4274_v4, 3 }
 0x112   :  { %1903 = vmatprep.subr.bf16.mxu1 %v7775_v17  ;;  %v4375_v17 = vrot.slane %v9431_v8, 3 }
 0x114   :  { %v4376_v63 = vsel %vm4370_vm3, %v4374_v33, %v4375_v17 }
 0x115   :  { %1904 = vmatpush1.bf16.msra.mxu1 %v7773_v20  ;;  %v4215_v20 = vld [vmem:[#allocation2 + $0x50] sm:$0xff] }
 0x116   :  { %1905 = vmatprep.subr.bf16.mxu1 %v7781_v62  ;;  %v4220_v62 = vld [vmem:[#allocation2 + $0x78] sm:$0xff]  ;;  %v9451_v4 = vpack.c.bf16 %v4215_v20, %v4213_v15 }
 0x117   :  { %1455 = vmatmul.mubr.bf16.gmra.mrb[24].mxu1 %v10925_v2  ;;  %v9454_v53 = vpack.c.bf16 %v4220_v62, %v4218_v44  ;;  %v4219_v44 = vld [vmem:[#allocation2 + $0x70] sm:$0xff] }
 0x118   :  { %4129 = vmatmul.mubr.bf16.gmra.mrb[56].mxu0 %v3754_v43  ;;  %1464 = vmatprep.mubr.bf16.mxu1 %v10926_v1  ;;  %v4273_v43 = vpack.c.bf16 %v9441_v3, %v4209_v5  ;;  %v10928_v5 = vld [vmem:[#allocation28_spill] sm:$0xff]  ;;  %v4372_v33 = vrot.slane %v9451_v4, 3  ;;  %v7797_v62 = vld [vmem:[%s10697_s1 + $0x2f0] ss:$8 sps:$4 sm:$0xff]  }
 0x119   :  { %4138 = vmatprep.mubr.bf16.mxu0 %v3762_v0  ;;  %1906 = vmatpush1.bf16.msra.mxu1 %v7779_v9  ;;  %v7793_v0 = vld [vmem:[%s10697_s1 + $0x2e4] ss:$8 sps:$4 sm:$0xff]   ;;  %v7791_v9 = vld [vmem:[%s10697_s1 + $0x2e0] ss:$8 sps:$4 sm:$0xff]   ;;  %v4379_v20 = vrot.slane %v9454_v53, 3 }
 0x11a   :  { %1907 = vmatprep.subr.bf16.mxu1 %v7787_v16  ;;  %v7799_v16 = vld [vmem:[%s10697_s1 + $0x2f4] ss:$8 sps:$4 sm:$0xff]   ;;  %v4371_v15 = vrot.slane %v4273_v43, 3 }
 0x11b   :  { %v4380_v6 = vsel %vm4370_vm3, %v4375_v17, %v4379_v20 }
 0x11d   :  { %1908 = vmatpush1.bf16.msra.mxu1 %v7785_v60  ;;  %v4217_v60 = vld [vmem:[#allocation2 + $0x60] sm:$0xff] }
 0x11e   :  { %1909 = vmatprep.subr.bf16.mxu1 %v7793_v0  ;;  %v4222_v0 = vld [vmem:[#allocation2 + $0x88] sm:$0xff]  ;;  %v9473_v43 = vpack.c.bf16 %v4219_v44, %v4217_v60  ;;  %v4221_v44 = vld [vmem:[#allocation2 + $0x80] sm:$0xff] }
 0x11f   :  { %1465 = vmatmul.mubr.bf16.gmra.mrb[28].mxu1 %v10927_v57  ;;  %v9479_v50 = vpack.c.bf16 %v4224_v54, %v4222_v0  ;;  %v4223_v54 = vld [vmem:[#allocation2 + $0x90] sm:$0xff]  ;;  %v4226_v0 = vld [vmem:[#allocation2 + $0xa8] sm:$0xff] }
 0x120   :  { %4139 = vmatmul.mubr.bf16.gmra.mrb[60].mxu0 %v3753_v52  ;;  %1474 = vmatprep.mubr.bf16.mxu1 %v10928_v5  ;;  %v7805_v52 = vld [vmem:[%s10697_s1 + $0x304] ss:$8 sps:$4 sm:$0xff]   ;;  %v4377_v17 = vrot.slane %v9473_v43, 3  ;;  %v9495_v27 = vpack.c.bf16 %v4223_v54, %v4221_v44 }
 0x121   :  { %4657 = vmatprep.mubr.bf16.mxu0 %v4376_v63  ;;  %1910 = vmatpush1.bf16.msra.mxu1 %v7791_v9  ;;  %v4373_v63 = vsel %vm4370_vm3, %v4371_v15, %v4372_v33  ;;  %v7764_v9 = vld [vmem:[%s10697_s1 + $0x700] ss:$8 sps:$4 sm:$0xff]   ;;  %v4383_v60 = vrot.slane %v9479_v50, 3 }
 0x122   :  { %1911 = vmatprep.subr.bf16.mxu1 %v7799_v16  ;;  %v7772_v16 = vld [vmem:[%s10697_s1 + $0x714] ss:$8 sps:$4 sm:$0xff]   ;;  %v10930_v15 = vld [vmem:[#allocation32_spill] sm:$0xff]  ;;  %v4225_v54 = vld [vmem:[#allocation2 + $0xa0] sm:$0xff] }
 0x125   :  { %1912 = vmatpush1.bf16.msra.mxu1 %v7797_v62  ;;  %v7770_v62 = vld [vmem:[%s10697_s1 + $0x710] ss:$8 sps:$4 sm:$0xff]  }
 0x126   :  { %2742 = vmatprep.subr.bf16.mxu1 %v7805_v52  ;;  %v4228_v52 = vld [vmem:[#allocation2 + $0xb8] sm:$0xff] }
 0x127   :  { %1475 = vmatmul.mubr.bf16.gmra.mrb[32].mxu1 %v10929_v41  ;;  %v9498_v19 = vpack.c.bf16 %v4228_v52, %v4226_v0  ;;  %v7782_v0 = vld [vmem:[%s10697_s1 + $0x730] ss:$8 sps:$4 sm:$0xff]   ;;  %v4230_v52 = vld [vmem:[#allocation2 + $0xc8] sm:$0xff] }
 0x128   :  { %4658 = vmatmul.mubr.bf16.vlgmr.msra.gmra.mrb[0].mxu0 %v4373_v63  ;;  %1484 = vmatprep.mubr.bf16.mxu1 %v10930_v15  ;;  %v7778_v63 = vld [vmem:[%s10697_s1 + $0x724] ss:$8 sps:$4 sm:$0xff]  }
 0x129   :  { %4667 = vmatprep.mubr.bf16.mxu0 %v4380_v6  ;;  %5399 = vmatpush1.bf16.msra.mxu0 %v7764_v9  ;;  %v4378_v6 = vsel %vm4370_vm3, %v4372_v33, %v4377_v17  ;;  %v4384_v9 = vsel %vm4370_vm3, %v4379_v20, %v4383_v60  ;;  %v10932_v33 = vld [vmem:[#allocation35_spill] sm:$0xff]  ;;  %v4381_v20 = vrot.slane %v9495_v27, 3  ;;  %v4387_v44 = vrot.slane %v9498_v19, 3 }
 0x12a   :  { %5400 = vmatprep.subr.bf16.mxu0 %v7772_v16  ;;  %v7784_v16 = vld [vmem:[%s10697_s1 + $0x734] ss:$8 sps:$4 sm:$0xff]  }
 0x12b   :  { %v4388_v13 = vsel %vm4370_vm3, %v4383_v60, %v4387_v44 }
 0x12d   :  { %5401 = vmatpush1.bf16.msra.mxu0 %v7770_v62  ;;  %v4227_v62 = vld [vmem:[#allocation2 + $0xb0] sm:$0xff] }
 0x12e   :  { %5402 = vmatprep.subr.bf16.mxu0 %v7778_v63  ;;  %v4232_v63 = vld [vmem:[#allocation2 + $0xd8] sm:$0xff]  ;;  %v9517_v7 = vpack.c.bf16 %v4227_v62, %v4225_v54  ;;  %v4229_v62 = vld [vmem:[#allocation2 + $0xc0] sm:$0xff] }
 0x12f   :  { %1485 = vmatmul.mubr.bf16.gmra.mrb[36].mxu1 %v10931_v24  ;;  %v9520_v42 = vpack.c.bf16 %v4232_v63, %v4230_v52  ;;  %v7794_v52 = vld [vmem:[%s10697_s1 + $0x750] ss:$8 sps:$4 sm:$0xff]   ;;  %v4234_v63 = vld [vmem:[#allocation2 + $0xe8] sm:$0xff] }
 0x130   :  { %4668 = vmatmul.mubr.bf16.gmra.mrb[4].mxu0 %v4378_v6  ;;  %1494 = vmatprep.mubr.bf16.mxu1 %v10932_v33  ;;  %v7790_v6 = vld [vmem:[%s10697_s1 + $0x744] ss:$8 sps:$4 sm:$0xff]   ;;  %v4385_v60 = vrot.slane %v9517_v7, 3 }
 0x131   :  { %4677 = vmatprep.mubr.bf16.mxu0 %v4384_v9  ;;  %5403 = vmatpush1.bf16.msra.mxu0 %v7776_v59  ;;  %v4382_v9 = vsel %vm4370_vm3, %v4377_v17, %v4381_v20  ;;  %v7788_v59 = vld [vmem:[%s10697_s1 + $0x740] ss:$8 sps:$4 sm:$0xff]   ;;  %v10934_v17 = vld [vmem:[#allocation37_spill] sm:$0xff]  ;;  %v4391_v54 = vrot.slane %v9520_v42, 3 }
 0x132   :  { %5404 = vmatprep.subr.bf16.mxu0 %v7784_v16  ;;  %v7796_v16 = vld [vmem:[%s10697_s1 + $0x754] ss:$8 sps:$4 sm:$0xff]  }
 0x133   :  { %v4392_v26 = vsel %vm4370_vm3, %v4387_v44, %v4391_v54 }
 0x135   :  { %5405 = vmatpush1.bf16.msra.mxu0 %v7782_v0  ;;  %v4231_v0 = vld [vmem:[#allocation2 + $0xd0] sm:$0xff] }
 0x136   :  { %5406 = vmatprep.subr.bf16.mxu0 %v7790_v6  ;;  %v4236_v6 = vld [vmem:[#allocation2 + $0xf8] sm:$0xff]  ;;  %v9539_v48 = vpack.c.bf16 %v4231_v0, %v4229_v62  ;;  %v4233_v0 = vld [vmem:[#allocation2 + $0xe0] sm:$0xff] }
 0x137   :  { %1495 = vmatmul.mubr.bf16.gmra.mrb[40].mxu1 %v10933_v35  ;;  %v9542_v32 = vpack.c.bf16 %v4236_v6, %v4234_v63  ;;  %v7806_v63 = vld [vmem:[%s10697_s1 + $0x770] ss:$8 sps:$4 sm:$0xff]   ;;  %v4238_v6 = vld [vmem:[#allocation2 + $0x108] sm:$0xff] }
 0x138   :  { %4678 = vmatmul.mubr.bf16.gmra.mrb[8].mxu0 %v4382_v9  ;;  %1504 = vmatprep.mubr.bf16.mxu1 %v10934_v17  ;;  %v7802_v9 = vld [vmem:[%s10697_s1 + $0x764] ss:$8 sps:$4 sm:$0xff]   ;;  %v4389_v44 = vrot.slane %v9539_v48, 3 }
 0x139   :  { %4687 = vmatprep.mubr.bf16.mxu0 %v4388_v13  ;;  %5407 = vmatpush1.bf16.msra.mxu0 %v7788_v59  ;;  %v4386_v13 = vsel %vm4370_vm3, %v4381_v20, %v4385_v60  ;;  %v7800_v59 = vld [vmem:[%s10697_s1 + $0x760] ss:$8 sps:$4 sm:$0xff]   ;;  %v4395_v62 = vrot.slane %v9542_v32, 3 }
 0x13a   :  { %5408 = vmatprep.subr.bf16.mxu0 %v7796_v16  ;;  %v7808_v16 = vld [vmem:[%s10697_s1 + $0x774] ss:$8 sps:$4 sm:$0xff]   ;;  %v10936_v20 = vld [vmem:[#allocation39_spill] sm:$0xff] }
 0x13b   :  { %v4396_v47 = vsel %vm4370_vm3, %v4391_v54, %v4395_v62 }
 0x13d   :  { %5409 = vmatpush1.bf16.msra.mxu0 %v7794_v52  ;;  %v4235_v52 = vld [vmem:[#allocation2 + $0xf0] sm:$0xff] }
 0x13e   :  { %5410 = vmatprep.subr.bf16.mxu0 %v7802_v9  ;;  %v4240_v9 = vld [vmem:[#allocation2 + $0x118] sm:$0xff]  ;;  %v9561_v29 = vpack.c.bf16 %v4235_v52, %v4233_v0  ;;  %v4237_v52 = vld [vmem:[#allocation2 + $0x100] sm:$0xff] }
 0x13f   :  { %1505 = vmatmul.mubr.bf16.gmra.mrb[44].mxu1 %v10935_v37  ;;  %v9564_v10 = vpack.c.bf16 %v4240_v9, %v4238_v6  ;;  %v7818_v6 = vld [vmem:[%s10697_s1 + $0x790] ss:$8 sps:$4 sm:$0xff]   ;;  %v4242_v9 = vld [vmem:[#allocation2 + $0x128] sm:$0xff] }
 0x140   :  { %4688 = vmatmul.mubr.bf16.gmra.mrb[12].mxu0 %v4386_v13  ;;  %1514 = vmatprep.mubr.bf16.mxu1 %v10936_v20  ;;  %v7814_v13 = vld [vmem:[%s10697_s1 + $0x784] ss:$8 sps:$4 sm:$0xff]   ;;  %v4393_v54 = vrot.slane %v9561_v29, 3 }
 0x141   :  { %4697 = vmatprep.mubr.bf16.mxu0 %v4392_v26  ;;  %5411 = vmatpush1.bf16.msra.mxu0 %v7800_v59  ;;  %v4390_v26 = vsel %vm4370_vm3, %v4385_v60, %v4389_v44  ;;  %10937 = vst [vmem:[#allocation12_spill] sm:$0xff] %v9564_v10  ;;  %v7812_v59 = vld [vmem:[%s10697_s1 + $0x780] ss:$8 sps:$4 sm:$0xff]   ;;  %v10939_v60 = vld [vmem:[#allocation41_spill] sm:$0xff]  ;;  %v4399_v0 = vrot.slane %v9564_v10, 3 }
 0x142   :  { %5412 = vmatprep.subr.bf16.mxu0 %v7808_v16  ;;  %v7820_v16 = vld [vmem:[%s10697_s1 + $0x794] ss:$8 sps:$4 sm:$0xff]  }
 0x143   :  { %v4400_v38 = vsel %vm4370_vm3, %v4395_v62, %v4399_v0 }
 0x145   :  { %5413 = vmatpush1.bf16.msra.mxu0 %v7806_v63  ;;  %v4239_v63 = vld [vmem:[#allocation2 + $0x110] sm:$0xff] }
 0x146   :  { %5414 = vmatprep.subr.bf16.mxu0 %v7814_v13  ;;  %v4244_v13 = vld [vmem:[#allocation2 + $0x138] sm:$0xff]  ;;  %v9583_v28 = vpack.c.bf16 %v4239_v63, %v4237_v52  ;;  %v4241_v52 = vld [vmem:[#allocation2 + $0x120] sm:$0xff] }
 0x147   :  { %1515 = vmatmul.mubr.bf16.gmra.mrb[48].mxu1 %v10938_v45  ;;  %v9586_v46 = vpack.c.bf16 %v4244_v13, %v4242_v9  ;;  %v1554_v9 = vld [vmem:[#allocation2 + $0x8] sm:$0xfc]  ;;  %v7830_v13 = vld [vmem:[%s10697_s1 + $0x7b0] ss:$8 sps:$4 sm:$0xff]  }
 0x148   :  { %4698 = vmatmul.mubr.bf16.gmra.mrb[16].mxu0 %v4390_v26  ;;  %1524 = vmatprep.mubr.bf16.mxu1 %v10939_v60  ;;  %v7826_v26 = vld [vmem:[%s10697_s1 + $0x7a4] ss:$8 sps:$4 sm:$0xff]   ;;  %10940 = vst [vmem:[#allocation15_spill] sm:$0xff] %v9583_v28  ;;  %v4397_v62 = vrot.slane %v9583_v28, 3  ;;  %v1558_v10 = vpack.c.bf16 %v9208_v61, %v1554_v9 }
 0x149   :  { %4707 = vmatprep.mubr.bf16.mxu0 %v4396_v47  ;;  %5415 = vmatpush1.bf16.msra.mxu0 %v7812_v59  ;;  %v4394_v47 = vsel %vm4370_vm3, %v4389_v44, %v4393_v54  ;;  %10941 = vst [vmem:[#allocation16_spill] sm:$0xff] %v9586_v46  ;;  %v7824_v59 = vld [vmem:[%s10697_s1 + $0x7a0] ss:$8 sps:$4 sm:$0xff]   ;;  %v4403_v63 = vrot.slane %v9586_v46, 3  ;;  %v490_v46 = vpack.c.bf16 %v9605_v22, %v9605_v22 }
 0x14a   :  { %5416 = vmatprep.subr.bf16.mxu0 %v7820_v16  ;;  %v7832_v16 = vld [vmem:[%s10697_s1 + $0x7b4] ss:$8 sps:$4 sm:$0xff]   ;;  %v10943_v44 = vld [vmem:[#allocation43_spill] sm:$0xff] }
 0x14b   :  { %v1553_v61 = vld [vmem:[#allocation2] sm:$0xfc] }
 0x14c   :  { %v4245_v9 = vld [vmem:[#allocation2 + $0x140] sm:$0xff] }
 0x14d   :  { %5417 = vmatpush1.bf16.msra.mxu0 %v7818_v6  ;;  %v4243_v6 = vld [vmem:[#allocation2 + $0x130] sm:$0xff] }
 0x14e   :  { %5418 = vmatprep.subr.bf16.mxu0 %v7826_v26  ;;  %v4246_v26 = vld [vmem:[#allocation2 + $0x148] sm:$0xff]  ;;  %v9609_v28 = vpack.c.bf16 %v4243_v6, %v4241_v52  ;;  %v1630_v52 = vrot.slane %v1558_v10, 1 }
 0x14f   :  { %1525 = vmatmul.mubr.bf16.gmra.mrb[52].mxu1 %v10942_v12  ;;  %v4250_v10 = vld [vmem:[#allocation2 + $0x168] sm:$0xff] }
 0x150   :  { %4708 = vmatmul.mubr.bf16.gmra.mrb[20].mxu0 %v4394_v47  ;;  %1534 = vmatprep.mubr.bf16.mxu1 %v10943_v44  ;;  %v7838_v47 = vld [vmem:[%s10697_s1 + $0x7c4] ss:$8 sps:$4 sm:$0xff]   ;;  %10945 = vst [vmem:[#allocation20_spill] sm:$0xff] %v9609_v28  ;;  %v9613_v44 = vpack.c.bf16 %v4248_v34, %v4246_v26  ;;  %v1631_v34 = vrot.slane %v8397_v56, 1  ;;  %v7842_v26 = vld [vmem:[%s10697_s1 + $0x7d0] ss:$8 sps:$4 sm:$0xff]  }
 0x151   :  { %4717 = vmatprep.mubr.bf16.mxu0 %v4400_v38  ;;  %5419 = vmatpush1.bf16.msra.mxu0 %v7824_v59  ;;  %v4398_v38 = vsel %vm4370_vm3, %v4393_v54, %v4397_v62  ;;  %v4404_v59 = vsel %vm4370_vm3, %v4399_v0, %v4403_v63  ;;  %v7844_v54 = vld [vmem:[%s10697_s1 + $0x7d4] ss:$8 sps:$4 sm:$0xff]   ;;  %v4401_v0 = vrot.slane %v9609_v28, 3 }
 0x152   :  { %5420 = vmatprep.subr.bf16.mxu0 %v7832_v16  ;;  %10946 = vst [vmem:[#allocation23_spill] sm:$0xff] %v9613_v44  ;;  %v7836_v16 = vld [vmem:[%s10697_s1 + $0x7c0] ss:$8 sps:$4 sm:$0xff]   ;;  %v4407_v6 = vrot.slane %v9613_v44, 3  ;;  %v1632_v28 = vsel %vm1626_vm4, %v1630_v52, %v1631_v34  ;;  %v1635_v52 = vrot.slane %v8449_v30, 1 }
 0x153   :  { %v7803_v30 = vld [vmem:[%s10697_s1 + $0x300] ss:$8 sps:$4 sm:$0xff]  }
 0x155   :  { %5421 = vmatpush1.bf16.msra.mxu0 %v7830_v13  ;;  %v4247_v13 = vld [vmem:[#allocation2 + $0x150] sm:$0xff] }
 0x156   :  { %5422 = vmatprep.subr.bf16.mxu0 %v7838_v47  ;;  %v9631_v47 = vld [vmem:[#allocation2 + $0x1e0] sm:$0xff]  ;;  %v9637_v44 = vpack.c.bf16 %v4247_v13, %v4245_v9  ;;  %v4251_v13 = vld [vmem:[#allocation2 + $0x170] sm:$0xff] }
 0x157   :  { %1535 = vmatmul.mubr.bf16.gmra.mrb[56].mxu1 %v9085_v49  ;;  %v489_v56 = vpack.c.bf16 %v9631_v47, %v9631_v47  ;;  %v7848_v49 = vld [vmem:[%s10697_s1 + $0x7e0] ss:$8 sps:$4 sm:$0xff]  }
 0x158   :  { %4718 = vmatmul.mubr.bf16.gmra.mrb[24].mxu0 %v4398_v38  ;;  %1544 = vmatprep.mubr.bf16.mxu1 %v490_v46  ;;  %v7850_v46 = vld [vmem:[%s10697_s1 + $0x7e4] ss:$8 sps:$4 sm:$0xff]   ;;  %v4252_v38 = vld [vmem:[#allocation2 + $0x178] sm:$0xff] }
 0x159   :  { %4727 = vmatprep.mubr.bf16.mxu0 %v4404_v59  ;;  %5423 = vmatpush1.bf16.msra.mxu0 %v7836_v16  ;;  %v4402_v59 = vsel %vm4370_vm3, %v4397_v62, %v4401_v0  ;;  %v1557_v16 = vpack.c.bf16 %v9245_v25, %v1553_v61  ;;  %v9644_v22 = vpack.c.bf16 %v4252_v38, %v4250_v10  ;;  %v7853_v62 = vld [vmem:[%s10697_s1 + $0x7f4] ss:$8 sps:$4 sm:$0xff]   ;;  %v1628_v61 = vrot.slane %v8437_v21, 1  ;;  %v4249_v9 = vld [vmem:[#allocation2 + $0x160] sm:$0xff] }
 0x15a   :  { %5424 = vmatprep.subr.bf16.mxu0 %v7844_v54  ;;  %v4408_v54 = vsel %vm4370_vm3, %v4403_v63, %v4407_v6  ;;  %v4405_v63 = vrot.slane %v9637_v44, 3  ;;  %v4256_v10 = vld [vmem:[#allocation2 + $0x198] sm:$0xff]  ;;  %v7862_v21 = vld [vmem:[%s10697_s1 + $0x804] ss:$8 sps:$4 sm:$0xff]   ;;  %v9664_v38 = vpack.c.bf16 %v4251_v13, %v4249_v9  ;;  %v1639_v9 = vrot.slane %v8480_v55, 1 }
 0x15b   :  { %v1627_v25 = vrot.slane %v1557_v16, 1  ;;  %v7811_v16 = vld [vmem:[%s10697_s1 + $0x314] ss:$8 sps:$4 sm:$0xff]  }
 0x15d   :  { %5425 = vmatpush1.bf16.msra.mxu0 %v7842_v26  ;;  %v7851_v26 = vld [vmem:[%s10697_s1 + $0x7f0] ss:$8 sps:$4 sm:$0xff]  }
 0x15e   :  { %5426 = vmatprep.subr.bf16.mxu0 %v7850_v46  ;;  %v4411_v46 = vrot.slane %v9644_v22, 3 }
 0x15f   :  { %1545 = vmatmul.mubr.bf16.gmra.mrb[64].mxu1 %v489_v56  ;;  %v4254_v56 = vld [vmem:[#allocation2 + $0x188] sm:$0xff] }
 0x160   :  { %4728 = vmatmul.mubr.bf16.gmra.mrb[28].mxu0 %v4402_v59  ;;  %1913 = vmatprep.mubr.bf16.mxu1 %v1632_v28  ;;  %v1629_v28 = vsel %vm1626_vm4, %v1627_v25, %v1628_v61  ;;  %v1636_v59 = vsel %vm1626_vm4, %v1631_v34, %v1635_v52  ;;  %v7809_v34 = vld [vmem:[%s10697_s1 + $0x310] ss:$8 sps:$4 sm:$0xff]   ;;  %v4409_v25 = vrot.slane %v9664_v38, 3 }
 0x161   :  { %4737 = vmatprep.mubr.bf16.mxu0 %v4408_v54  ;;  %5427 = vmatpush1.bf16.msra.mxu0 %v7848_v49  ;;  %v4406_v49 = vsel %vm4370_vm3, %v4401_v0, %v4405_v63  ;;  %v9670_v54 = vpack.c.bf16 %v4256_v10, %v4254_v56  ;;  %v1633_v0 = vrot.slane %v8475_v51, 1  ;;  %v4255_v56 = vld [vmem:[#allocation2 + $0x190] sm:$0xff]  ;;  %v4258_v10 = vld [vmem:[#allocation2 + $0x1a8] sm:$0xff]  ;;  %v4260_v51 = vld [vmem:[#allocation2 + $0x1b8] sm:$0xff] }
 0x162   :  { %5428 = vmatprep.subr.bf16.mxu0 %v7853_v62  ;;  %v4412_v62 = vsel %vm4370_vm3, %v4407_v6, %v4411_v46  ;;  %v7817_v6 = vld [vmem:[%s10697_s1 + $0x324] ss:$8 sps:$4 sm:$0xff]  }
 0x163   :  { %v4415_v13 = vrot.slane %v9670_v54, 3 }
 0x165   :  { %5429 = vmatpush1.bf16.msra.mxu0 %v7851_v26  ;;  %v4253_v26 = vld [vmem:[#allocation2 + $0x180] sm:$0xff]  ;;  %v4416_v55 = vsel %vm4370_vm3, %v4411_v46, %v4415_v13  ;;  %v1643_v46 = vrot.slane %v10920_v36, 1 }
 0x166   :  { %5878 = vmatprep.subr.bf16.mxu0 %v7862_v21  ;;  %v1634_v21 = vsel %vm1626_vm4, %v1628_v61, %v1633_v0  ;;  %v7823_v61 = vld [vmem:[%s10697_s1 + $0x334] ss:$8 sps:$4 sm:$0xff]  }
 0x167   :  { %1914 = vmatmul.mubr.bf16.vlgmr.msra.gmra.mrb[0].mxu1 %v1629_v28  ;;  %v4410_v28 = vsel %vm4370_vm3, %v4405_v63, %v4409_v25  ;;  %v1637_v63 = vrot.slane %v8519_v23, 1  ;;  %v7829_v23 = vld [vmem:[%s10697_s1 + $0x344] ss:$8 sps:$4 sm:$0xff]  }
 0x168   :  { %4738 = vmatmul.mubr.bf16.gmra.mrb[32].mxu0 %v4406_v49  ;;  %2743 = vmatpush1.bf16.msra.mxu1 %v7803_v30  ;;  %v9685_v30 = vpack.c.bf16 %v4255_v56, %v4253_v26  ;;  %v1640_v49 = vsel %vm1626_vm4, %v1635_v52, %v1639_v9  ;;  %v4259_v26 = vld [vmem:[#allocation2 + $0x1b0] sm:$0xff]  ;;  %v4262_v56 = vld [vmem:[#allocation2 + $0x1c8] sm:$0xff] }
 0x169   :  { %1923 = vmatprep.mubr.bf16.mxu1 %v1636_v59  ;;  %4747 = vmatprep.mubr.bf16.mxu0 %v4412_v62  ;;  %v7815_v59 = vld [vmem:[%s10697_s1 + $0x320] ss:$8 sps:$4 sm:$0xff]  }
 0x16a   :  { %2744 = vmatprep.subr.bf16.mxu1 %v7811_v16  ;;  %v9692_v16 = vpack.c.bf16 %v4260_v51, %v4258_v10  ;;  %v4413_v52 = vrot.slane %v9685_v30, 3  ;;  %v4264_v10 = vld [vmem:[#allocation2 + $0x1d8] sm:$0xff]  ;;  %v1638_v51 = vsel %vm1626_vm4, %v1633_v0, %v1637_v63 }
 0x16b   :  { %v7835_v0 = vld [vmem:[%s10697_s1 + $0x354] ss:$8 sps:$4 sm:$0xff]  }
 0x16c   :  { %2745 = vmatpush1.bf16.msra.mxu1 %v7809_v34  ;;  %v4419_v62 = vrot.slane %v9692_v16, 3  ;;  %v7821_v34 = vld [vmem:[%s10697_s1 + $0x330] ss:$8 sps:$4 sm:$0xff]  }
 0x16d   :  { %2746 = vmatprep.subr.bf16.mxu1 %v7817_v6  ;;  %v4257_v6 = vld [vmem:[#allocation2 + $0x1a0] sm:$0xff] }
 0x16e   :  { %v9709_v36 = vpack.c.bf16 %v4259_v26, %v4257_v6  ;;  %v4263_v6 = vld [vmem:[#allocation2 + $0x1d0] sm:$0xff] }
 0x16f   :  { %1924 = vmatmul.mubr.bf16.gmra.mrb[4].mxu1 %v1634_v21  ;;  %v4414_v21 = vsel %vm4370_vm3, %v4409_v25, %v4413_v52  ;;  %v1641_v25 = vrot.slane %v10921_v31, 1  ;;  %v7833_v26 = vld [vmem:[%s10697_s1 + $0x350] ss:$8 sps:$4 sm:$0xff]  }
 0x170   :  { %4748 = vmatmul.mubr.bf16.gmra.mrb[36].mxu0 %v4410_v28  ;;  %1933 = vmatprep.mubr.bf16.mxu1 %v1640_v49  ;;  %v1644_v28 = vsel %vm1626_vm4, %v1639_v9, %v1643_v46  ;;  %v4420_v49 = vsel %vm4370_vm3, %v4415_v13, %v4419_v62  ;;  %v4417_v9 = vrot.slane %v9709_v36, 3  ;;  %v1647_v13 = vrot.slane %v10922_v18, 1 }
 0x171   :  { %4757 = vmatprep.mubr.bf16.mxu0 %v4416_v55  ;;  %2747 = vmatpush1.bf16.msra.mxu1 %v7815_v59  ;;  %v9713_v55 = vpack.c.bf16 %v4264_v10, %v4262_v56  ;;  %v7827_v59 = vld [vmem:[%s10697_s1 + $0x340] ss:$8 sps:$4 sm:$0xff]   ;;  %v7841_v10 = vld [vmem:[%s10697_s1 + $0x364] ss:$8 sps:$4 sm:$0xff]   ;;  %v1642_v31 = vsel %vm1626_vm4, %v1637_v63, %v1641_v25  ;;  %v7847_v63 = vld [vmem:[%s10697_s1 + $0x374] ss:$8 sps:$4 sm:$0xff]  }
 0x172   :  { %2748 = vmatprep.subr.bf16.mxu1 %v7823_v61  ;;  %v4266_v56 = vld [vmem:[#allocation2 + $0x1e8] sm:$0xff] }
 0x173   :  { %v4423_v61 = vrot.slane %v9713_v55, 3 }
 0x175   :  { %2749 = vmatpush1.bf16.msra.mxu1 %v7821_v34  ;;  %v4261_v34 = vld [vmem:[#allocation2 + $0x1c0] sm:$0xff] }
 0x176   :  { %2750 = vmatprep.subr.bf16.mxu1 %v7829_v23  ;;  %v4418_v23 = vsel %vm4370_vm3, %v4413_v52, %v4417_v9  ;;  %v9733_v18 = vpack.c.bf16 %v4263_v6, %v4261_v34  ;;  %v1645_v52 = vrot.slane %v10923_v39, 1  ;;  %v9753_v34 = vld [vmem:[#allocation2 + $0x208] sm:$0xff]  ;;  %v4272_v6 = vld [vmem:[#allocation2 + $0x218] sm:$0x3f] }
 0x177   :  { %1934 = vmatmul.mubr.bf16.gmra.mrb[8].mxu1 %v1638_v51  ;;  %v1648_v51 = vsel %vm1626_vm4, %v1643_v46, %v1647_v13  ;;  %v7856_v39 = vld [vmem:[%s10697_s1 + $0x384] ss:$8 sps:$4 sm:$0xff]  }
 0x178   :  { %4758 = vmatmul.mubr.bf16.gmra.mrb[40].mxu0 %v4414_v21  ;;  %1943 = vmatprep.mubr.bf16.mxu1 %v1644_v28  ;;  %v4424_v21 = vsel %vm4370_vm3, %v4419_v62, %v4423_v61  ;;  %v9738_v28 = vpack.c.bf16 %v9352_v40, %v4266_v56  ;;  %v4421_v46 = vrot.slane %v9733_v18, 3  ;;  %v1651_v40 = vrot.slane %v10924_v11, 1 }
 0x179   :  { %4767 = vmatprep.mubr.bf16.mxu0 %v4420_v49  ;;  %2751 = vmatpush1.bf16.msra.mxu1 %v7827_v59  ;;  %v7839_v49 = vld [vmem:[%s10697_s1 + $0x360] ss:$8 sps:$4 sm:$0xff]  }
 0x17a   :  { %2752 = vmatprep.subr.bf16.mxu1 %v7835_v0  ;;  %v4427_v62 = vrot.slane %v9738_v28, 3  ;;  %v4265_v59 = vld [vmem:[#allocation2 + $0x1e0] sm:$0xff]  ;;  %v7845_v0 = vld [vmem:[%s10697_s1 + $0x370] ss:$8 sps:$4 sm:$0xff]   ;;  %v4422_v11 = vsel %vm4370_vm3, %v4417_v9, %v4421_v46 }
 0x17b   :  { %v9761_v56 = vpack.c.bf16 %v9385_v14, %v4265_v59  ;;  %v1649_v14 = vrot.slane %v10925_v2, 1  ;;  %v4879_v59 = vld [vmem:[#allocation2 + $0x28] sm:$0x80] }
 0x17d   :  { %2753 = vmatpush1.bf16.msra.mxu1 %v7833_v26  ;;  %v1646_v26 = vsel %vm1626_vm4, %v1641_v25, %v1645_v52  ;;  %v7859_v25 = vld [vmem:[%s10697_s1 + $0x394] ss:$8 sps:$4 sm:$0xff]   ;;  %v4425_v9 = vrot.slane %v9761_v56, 3  ;;  %v1650_v2 = vsel %vm1626_vm4, %v1645_v52, %v1649_v14 }
 0x17e   :  { %2754 = vmatprep.subr.bf16.mxu1 %v7841_v10  ;;  %v1652_v10 = vsel %vm1626_vm4, %v1647_v13, %v1651_v40  ;;  %v1655_v13 = vrot.slane %v10926_v1, 1  ;;  %v7871_v52 = vld [vmem:[%s10697_s1 + $0x3b4] ss:$8 sps:$4 sm:$0xff]  }
 0x17f   :  { %1944 = vmatmul.mubr.bf16.gmra.mrb[12].mxu1 %v1642_v31  ;;  %v4428_v31 = vsel %vm4370_vm3, %v4423_v61, %v4427_v62 }
 0x180   :  { %4768 = vmatmul.mubr.bf16.gmra.mrb[44].mxu0 %v4418_v23  ;;  %1953 = vmatprep.mubr.bf16.mxu1 %v1648_v51  ;;  %v4304_v23 = vpack.c.bf16 %v4272_v6, %v9753_v34  ;;  %v7854_v51 = vld [vmem:[%s10697_s1 + $0x380] ss:$8 sps:$4 sm:$0xff]   ;;  %v4426_v6 = vsel %vm4370_vm3, %v4421_v46, %v4425_v9  ;;  %v1653_v46 = vrot.slane %v10927_v57, 1  ;;  %v7877_v57 = vld [vmem:[%s10697_s1 + $0x3c4] ss:$8 sps:$4 sm:$0xff]  }
 0x181   :  { %4777 = vmatprep.mubr.bf16.mxu0 %v4424_v21  ;;  %2755 = vmatpush1.bf16.msra.mxu1 %v7839_v49  ;;  %v9775_v21 = vld [vmem:[#allocation2 + $0x200] sm:$0xff]  ;;  %v4271_v49 = vld [vmem:[#allocation2 + $0x210] sm:$0x3f] }
 0x182   :  { %2756 = vmatprep.subr.bf16.mxu1 %v7847_v63  ;;  %v4431_v61 = vrot.slane %v4304_v23, 3  ;;  %v7857_v63 = vld [vmem:[%s10697_s1 + $0x390] ss:$8 sps:$4 sm:$0xff]   ;;  %v4303_v1 = vpack.c.bf16 %v4271_v49, %v9775_v21 }
 0x183   :  { %v7869_v49 = vld [vmem:[%s10697_s1 + $0x3b0] ss:$8 sps:$4 sm:$0xff]  }
 0x185   :  { %2757 = vmatpush1.bf16.msra.mxu1 %v7845_v0  ;;  %v7865_v0 = vld [vmem:[%s10697_s1 + $0x3a4] ss:$8 sps:$4 sm:$0xff]  }
 0x186   :  { %2758 = vmatprep.subr.bf16.mxu1 %v7856_v39  ;;  %v1656_v39 = vsel %vm1626_vm4, %v1651_v40, %v1655_v13  ;;  %v4429_v40 = vrot.slane %v4303_v1, 3 }
 0x187   :  { %1954 = vmatmul.mubr.bf16.gmra.mrb[16].mxu1 %v1646_v26  ;;  %v4432_v26 = vsel %vm4370_vm3, %v4427_v62, %v4431_v61  ;;  %v1659_v62 = vrot.slane %v10928_v5, 1 }
 0x188   :  { %4778 = vmatmul.mubr.bf16.gmra.mrb[48].mxu0 %v4422_v11  ;;  %1963 = vmatprep.mubr.bf16.mxu1 %v1652_v10  ;;  %v4883_v11 = vpack.c.bf16 %v9421_v58, %v4879_v59  ;;  %v7863_v10 = vld [vmem:[%s10697_s1 + $0x3a0] ss:$8 sps:$4 sm:$0xff]   ;;  %v4878_v58 = vld [vmem:[#allocation2 + $0x20] sm:$0x80]  ;;  %v4430_v5 = vsel %vm4370_vm3, %v4425_v9, %v4429_v40  ;;  %v1657_v9 = vrot.slane %v10929_v41, 1 }
 0x189   :  { %4787 = vmatprep.mubr.bf16.mxu0 %v4428_v31  ;;  %2759 = vmatpush1.bf16.msra.mxu1 %v7854_v51  ;;  %v4946_v51 = vshrl.u32 %v9431_v8, 16  ;;  %v1660_v59 = vsel %vm1626_vm4, %v1655_v13, %v1659_v62  ;;  %v7881_v41 = vld [vmem:[%s10697_s1 + $0x3d0] ss:$8 sps:$4 sm:$0xff]  }
 0x18a   :  { %2760 = vmatprep.subr.bf16.mxu1 %v7859_v25  ;;  %v4938_v31 = vshrl.u32 %v4883_v11, 16  ;;  %v4941_v23 = vshll.u32 %v4883_v11, 16  ;;  %v4949_v25 = vshll.u32 %v9431_v8, 16  ;;  %v4929_v11 = vshrl.u32 %v9451_v4, 16 }
 0x18c   :  { %v4943_v8 = vrot.slane %v4941_v23, 4  ;;  %v4951_v1 = vrot.slane %v4949_v25, 4  ;;  %v4967_v23 = vshll.u32 %v9454_v53, 16  ;;  %v4931_v25 = vrot.slane %v4929_v11, 3 }
 0x18d   :  { %2761 = vmatpush1.bf16.msra.mxu1 %v7857_v63  ;;  %v1654_v63 = vsel %vm1626_vm4, %v1649_v14, %v1653_v46  ;;  %v7883_v14 = vld [vmem:[%s10697_s1 + $0x3d4] ss:$8 sps:$4 sm:$0xff]  }
 0x18e   :  { %2762 = vmatprep.subr.bf16.mxu1 %v7865_v0  ;;  %v4882_v0 = vpack.c.bf16 %v9441_v3, %v4878_v58  ;;  %v1663_v3 = vrot.slane %v10930_v15, 1  ;;  %v7889_v15 = vld [vmem:[%s10697_s1 + $0x3e4] ss:$8 sps:$4 sm:$0xff]  }
 0x18f   :  { %1964 = vmatmul.mubr.bf16.gmra.mrb[20].mxu1 %v1650_v2  ;;  %v4940_v2 = vrot.slane %v4938_v31, 3  ;;  %v4964_v31 = vshrl.u32 %v9454_v53, 16 }
 0x190   :  { %4788 = vmatmul.mubr.bf16.gmra.mrb[52].mxu0 %v4426_v6  ;;  %1973 = vmatprep.mubr.bf16.mxu1 %v1656_v39  ;;  %v4948_v6 = vrot.slane %v4946_v51, 3  ;;  %v7875_v39 = vld [vmem:[%s10697_s1 + $0x3c0] ss:$8 sps:$4 sm:$0xff]   ;;  %v4921_v13 = vshrl.u32 %v4882_v0, 16 }
 0x191   :  { %4797 = vmatprep.mubr.bf16.mxu0 %v4432_v26  ;;  %2763 = vmatpush1.bf16.msra.mxu1 %v7863_v10  ;;  %v4924_v26 = vshll.u32 %v4882_v0, 16  ;;  %v4932_v10 = vshll.u32 %v9451_v4, 16  ;;  %v1661_v0 = vrot.slane %v10931_v24, 1  ;;  %v7893_v24 = vld [vmem:[%s10697_s1 + $0x3f0] ss:$8 sps:$4 sm:$0xff]  }
 0x192   :  { %2764 = vmatprep.subr.bf16.mxu1 %v7871_v52  ;;  %v4944_v52 = vor.u32 %v4943_v8, %v4940_v2  ;;  %v4952_v58 = vor.u32 %v4951_v1, %v4948_v6  ;;  %v4923_v4 = vrot.slane %v4921_v13, 3  ;;  %v4955_v8 = vshrl.u32 %v9473_v43, 16 }
 0x193   :  { %v4926_v51 = vrot.slane %v4924_v26, 4  ;;  %v4958_v6 = vshll.u32 %v9473_v43, 16  ;;  %v1667_v1 = vrot.slane %v10932_v33, 1  ;;  %v4985_v13 = vshll.u32 %v9479_v50, 16 }
 0x194   :  { %v4953_v53 = vsel %vm4919_vm5, %v4944_v52, %v4952_v58  ;;  %v4957_v11 = vrot.slane %v4955_v8, 3  ;;  %v4991_v8 = vshrl.u32 %v9517_v7, 16 }
 0x195   :  { %2765 = vmatpush1.bf16.msra.mxu1 %v7869_v49  ;;  %v4934_v49 = vrot.slane %v4932_v10, 4  ;;  %v4960_v10 = vrot.slane %v4958_v6, 4  ;;  %v1668_v43 = vsel %vm1626_vm4, %v1663_v3, %v1667_v1  ;;  %v4994_v6 = vshll.u32 %v9517_v7, 16 }
 0x196   :  { %2766 = vmatprep.subr.bf16.mxu1 %v7877_v57  ;;  %v1664_v57 = vsel %vm1626_vm4, %v1659_v62, %v1663_v3  ;;  %v4927_v62 = vor.u32 %v4926_v51, %v4923_v4  ;;  %v1665_v3 = vrot.slane %v10933_v35, 1  ;;  %v7866_v51 = vld [vmem:[%s10697_s1 + $0x810] ss:$8 sps:$4 sm:$0xff]   ;;  %v7874_v35 = vld [vmem:[%s10697_s1 + $0x824] ss:$8 sps:$4 sm:$0xff]  }
 0x197   :  { %1974 = vmatmul.mubr.bf16.gmra.mrb[24].mxu1 %v1654_v63  ;;  %v4966_v63 = vrot.slane %v4964_v31, 3  ;;  %v4935_v2 = vor.u32 %v4934_v49, %v4931_v25  ;;  %v4987_v31 = vrot.slane %v4985_v13, 4  ;;  %v5000_v25 = vshrl.u32 %v9498_v19, 16 }
 0x198   :  { %4798 = vmatmul.mubr.bf16.gmra.mrb[56].mxu0 %v4430_v5  ;;  %1983 = vmatprep.mubr.bf16.mxu1 %v1660_v59  ;;  %v4969_v5 = vrot.slane %v4967_v23, 4  ;;  %v7887_v59 = vld [vmem:[%s10697_s1 + $0x3e0] ss:$8 sps:$4 sm:$0xff]   ;;  %v7868_v23 = vld [vmem:[%s10697_s1 + $0x814] ss:$8 sps:$4 sm:$0xff]   ;;  %v5003_v49 = vshll.u32 %v9498_v19, 16 }
 0x199   :  { %4807 = vmatprep.mubr.bf16.mxu0 %v4431_v61  ;;  %2767 = vmatpush1.bf16.msra.mxu1 %v7875_v39  ;;  %v1658_v61 = vsel %vm1626_vm4, %v1653_v46, %v1657_v9  ;;  %v7895_v46 = vld [vmem:[%s10697_s1 + $0x3f4] ss:$8 sps:$4 sm:$0xff]   ;;  %v4936_v26 = vsel %vm4919_vm5, %v4927_v62, %v4935_v2  ;;  %v7872_v19 = vld [vmem:[%s10697_s1 + $0x820] ss:$8 sps:$4 sm:$0xff]   ;;  %v1669_v62 = vrot.slane %v10935_v37, 1  ;;  %v5021_v13 = vshll.u32 %v9520_v42, 16 }
 0x19a   :  { %2768 = vmatprep.subr.bf16.mxu1 %v7883_v14  ;;  %v4970_v39 = vor.u32 %v4969_v5, %v4966_v63  ;;  %v4982_v14 = vshrl.u32 %v9479_v50, 16  ;;  %v7860_v50 = vld [vmem:[%s10697_s1 + $0x800] ss:$8 sps:$4 sm:$0xff]   ;;  %v7886_v37 = vld [vmem:[%s10697_s1 + $0x844] ss:$8 sps:$4 sm:$0xff]  }
 0x19c   :  { %v4971_v33 = vsel %vm4919_vm5, %v4952_v58, %v4970_v39  ;;  %v4984_v52 = vrot.slane %v4982_v14, 3  ;;  %v4961_v58 = vor.u32 %v4960_v10, %v4957_v11  ;;  %v5018_v14 = vshrl.u32 %v9520_v42, 16 }
 0x19d   :  { %2769 = vmatpush1.bf16.msra.mxu1 %v7881_v41  ;;  %v4973_v41 = vshrl.u32 %v9495_v27, 16  ;;  %v4993_v10 = vrot.slane %v4991_v8, 3  ;;  %v4996_v42 = vrot.slane %v4994_v6, 4  ;;  %v10948_v6 = vld [vmem:[#allocation12_spill] sm:$0xff] }
 0x19e   :  { %2770 = vmatprep.subr.bf16.mxu1 %v7889_v15  ;;  %v4976_v15 = vshll.u32 %v9495_v27, 16  ;;  %v4988_v4 = vor.u32 %v4987_v31, %v4984_v52  ;;  %v4962_v27 = vsel %vm4919_vm5, %v4935_v2, %v4961_v58  ;;  %v5020_v52 = vrot.slane %v5018_v14, 3  ;;  %v7899_v14 = vld [vmem:[%s10697_s1 + $0x870] ss:$8 sps:$4 sm:$0xff]  }
 0x19f   :  { %1984 = vmatmul.mubr.bf16.gmra.mrb[28].mxu1 %v1658_v61  ;;  %v1671_v61 = vrot.slane %v10934_v17, 1  ;;  %v5023_v31 = vrot.slane %v5021_v13, 4  ;;  %v1556_v13 = vld [vmem:[#allocation2 + $0x1f8] sm:$0x3] }
 0x1a0   :  { %4808 = vmatmul.mubr.bf16.gmra.mrb[64].mxu0 %v4429_v40  ;;  %1993 = vmatprep.mubr.bf16.mxu1 %v1664_v57  ;;  %v1662_v40 = vsel %vm1626_vm4, %v1657_v9, %v1661_v0  ;;  %v7930_v9 = vld [vmem:[%s10697_s1 + $0x404] ss:$8 sps:$4 sm:$0xff]   ;;  %v1666_v57 = vsel %vm1626_vm4, %v1661_v0, %v1665_v3  ;;  %v4978_v17 = vrot.slane %v4976_v15, 4  ;;  %v4989_v5 = vsel %vm4919_vm5, %v4970_v39, %v4988_v4  ;;  %v7880_v0 = vld [vmem:[%s10697_s1 + $0x834] ss:$8 sps:$4 sm:$0xff]  }
 0x1a1   :  { %5430 = vmatprep.mubr.bf16.mxu0 %v4953_v53  ;;  %2771 = vmatpush1.bf16.msra.mxu1 %v7887_v59  ;;  %v4975_v53 = vrot.slane %v4973_v41, 3  ;;  %v1672_v63 = vsel %vm1626_vm4, %v1667_v1, %v1671_v61  ;;  %v5002_v59 = vrot.slane %v5000_v25, 3  ;;  %v1675_v1 = vrot.slane %v10936_v20, 1 }
 0x1a2   :  { %2772 = vmatprep.subr.bf16.mxu1 %v7895_v46  ;;  %v5005_v46 = vrot.slane %v5003_v49, 4  ;;  %v5009_v41 = vshrl.u32 %v9539_v48, 16  ;;  %v5012_v15 = vshll.u32 %v9539_v48, 16  ;;  %v5039_v25 = vshll.u32 %v9542_v32, 16  ;;  %v7890_v49 = vld [vmem:[%s10697_s1 + $0x850] ss:$8 sps:$4 sm:$0xff]  }
 0x1a3   :  { %v4979_v2 = vor.u32 %v4978_v17, %v4975_v53 }
 0x1a4   :  { %v5006_v39 = vor.u32 %v5005_v46, %v5002_v59  ;;  %v5041_v17 = vrot.slane %v5039_v25, 4  ;;  %v5027_v59 = vshrl.u32 %v9561_v29, 16  ;;  %v5030_v46 = vshll.u32 %v9561_v29, 16  ;;  %v7904_v29 = vld [vmem:[%s10697_s1 + $0x884] ss:$8 sps:$4 sm:$0xff]  }
 0x1a5   :  { %2773 = vmatpush1.bf16.msra.mxu1 %v7893_v24  ;;  %v7878_v24 = vld [vmem:[%s10697_s1 + $0x830] ss:$8 sps:$4 sm:$0xff]   ;;  %v4980_v11 = vsel %vm4919_vm5, %v4961_v58, %v4979_v2  ;;  %v4997_v58 = vor.u32 %v4996_v42, %v4993_v10  ;;  %v10949_v10 = vld [vmem:[#allocation19_spill] sm:$0xff] }
 0x1a6   :  { %6982 = vmatprep.subr.bf16.mxu1 %v7930_v9  ;;  %v7892_v9 = vld [vmem:[%s10697_s1 + $0x854] ss:$8 sps:$4 sm:$0xff]   ;;  %v1560_v42 = vpack.c.bf16 %v1556_v13, %v10949_v10  ;;  %v7916_v10 = vld [vmem:[%s10697_s1 + $0x8c4] ss:$8 sps:$4 sm:$0xff]  }
 0x1a7   :  { %1994 = vmatmul.mubr.bf16.gmra.mrb[32].mxu1 %v1662_v40  ;;  %v4998_v48 = vsel %vm4919_vm5, %v4979_v2, %v4997_v58 }
 0x1a8   :  { %5431 = vmatmul.mubr.bf16.vlgmr.msra.gmra.mrb[0].mxu0 %v4936_v26  ;;  %2003 = vmatprep.mubr.bf16.mxu1 %v1668_v43  ;;  %v1670_v26 = vsel %vm1626_vm4, %v1665_v3, %v1669_v62  ;;  %v1673_v3 = vrot.slane %v10938_v45, 1  ;;  %v7898_v45 = vld [vmem:[%s10697_s1 + $0x864] ss:$8 sps:$4 sm:$0xff]   ;;  %v1687_v25 = vrot.slane %v1560_v42, 1 }
 0x1a9   :  { %5440 = vmatprep.mubr.bf16.mxu0 %v4971_v33  ;;  %5879 = vmatpush1.bf16.msra.mxu0 %v7860_v50  ;;  %v1676_v33 = vsel %vm1626_vm4, %v1671_v61, %v1675_v1  ;;  %v5007_v50 = vsel %vm4919_vm5, %v4988_v4, %v5006_v39  ;;  %v1679_v61 = vrot.slane %v10939_v60, 1  ;;  %v5024_v4 = vor.u32 %v5023_v31, %v5020_v52  ;;  %v7907_v52 = vld [vmem:[%s10697_s1 + $0x894] ss:$8 sps:$4 sm:$0xff]   ;;  %v10950_v31 = vld [vmem:[#allocation44_spill] sm:$0xff]  ;;  %v7932_v42 = vld [vmem:[#allocation2 + $0x20] sm:$0xff] }
 0x1aa   :  { %5880 = vmatprep.subr.bf16.mxu0 %v7868_v23  ;;  %v7884_v23 = vld [vmem:[%s10697_s1 + $0x840] ss:$8 sps:$4 sm:$0xff]   ;;  %v5011_v60 = vrot.slane %v5009_v41, 3 }
 0x1ad   :  { %5881 = vmatpush1.bf16.msra.mxu0 %v7866_v51  ;;  %v5036_v51 = vshrl.u32 %v9542_v32, 16  ;;  %v5025_v32 = vsel %vm4919_vm5, %v5006_v39, %v5024_v4  ;;  %v5057_v39 = vshll.u32 %v10948_v6, 16 }
 0x1ae   :  { %5882 = vmatprep.subr.bf16.mxu0 %v7874_v35  ;;  %v1674_v35 = vsel %vm1626_vm4, %v1669_v62, %v1673_v3  ;;  %v10947_v62 = vld [vmem:[#allocation43_spill] sm:$0xff] }
 0x1af   :  { %2004 = vmatmul.mubr.bf16.gmra.mrb[36].mxu1 %v1666_v57  ;;  %v5014_v57 = vrot.slane %v5012_v15, 4  ;;  %v5038_v53 = vrot.slane %v5036_v51, 3  ;;  %v1683_v2 = vrot.slane %v10947_v62, 1 }
 0x1b0   :  { %5441 = vmatmul.mubr.bf16.gmra.mrb[4].mxu0 %v4962_v27  ;;  %2013 = vmatprep.mubr.bf16.mxu1 %v1672_v63  ;;  %v1680_v27 = vsel %vm1626_vm4, %v1675_v1, %v1679_v61  ;;  %v7896_v63 = vld [vmem:[%s10697_s1 + $0x860] ss:$8 sps:$4 sm:$0xff]   ;;  %v5054_v1 = vshrl.u32 %v10948_v6, 16 }
 0x1b1   :  { %5450 = vmatprep.mubr.bf16.mxu0 %v4989_v5  ;;  %5883 = vmatpush1.bf16.msra.mxu0 %v7872_v19  ;;  %v7901_v5 = vld [vmem:[%s10697_s1 + $0x874] ss:$8 sps:$4 sm:$0xff]   ;;  %v1677_v19 = vrot.slane %v10942_v12, 1  ;;  %v5042_v8 = vor.u32 %v5041_v17, %v5038_v53  ;;  %v5029_v12 = vrot.slane %v5027_v59, 3  ;;  %v7908_v6 = vld [vmem:[%s10697_s1 + $0x8a0] ss:$8 sps:$4 sm:$0xff]  }
 0x1b2   :  { %v9889_v40 = vpop.f32.mrb[60].mxu1  ;;  %5884 = vmatprep.subr.bf16.mxu0 %v7880_v0  ;;  %v5015_v0 = vor.u32 %v5014_v57, %v5011_v60 }
 0x1b3   :  { %v9894_v7 = vpop.f32.mrb[61].mxu1 }
 0x1b4   :  { %v1199_v20 = vpop.f32.mrb[62].mxu1 }
 0x1b5   :  { %v1200_v43 = vpop.f32.mrb[63].mxu1  ;;  %5885 = vmatpush1.bf16.msra.mxu0 %v7878_v24  ;;  %v5032_v24 = vrot.slane %v5030_v46, 4  ;;  %v5016_v20 = vsel %vm4919_vm5, %v4997_v58, %v5015_v0  ;;  %v10951_v58 = vld [vmem:[#allocation15_spill] sm:$0xff]  ;;  %v1688_v46 = vsel %vm1626_vm4, %v1683_v2, %v1687_v25 }
 0x1b6   :  { %5886 = vmatprep.subr.bf16.mxu0 %v7886_v37  ;;  %v1678_v37 = vsel %vm1626_vm4, %v1673_v3, %v1677_v19  ;;  %v5056_v43 = vrot.slane %v5054_v1, 3  ;;  %v1555_v3 = vld [vmem:[#allocation2 + $0x1f0] sm:$0x3]  ;;  %v5045_v41 = vshrl.u32 %v10951_v58, 16  ;;  %v5048_v15 = vshll.u32 %v10951_v58, 16 }
 0x1b7   :  { %2014 = vmatmul.mubr.bf16.gmra.mrb[40].mxu1 %v1670_v26  ;;  %v1684_v26 = vsel %vm1626_vm4, %v1679_v61, %v1683_v2  ;;  %v10952_v61 = vld [vmem:[#allocation16_spill] sm:$0xff]  ;;  %v2134_v2 = vld [vmem:[#allocation2 + $0x10] sm:$0xf8] }
 0x1b8   :  { %5451 = vmatmul.mubr.bf16.gmra.mrb[8].mxu0 %v4980_v11  ;;  %2023 = vmatprep.mubr.bf16.mxu1 %v1676_v33  ;;  %v5043_v11 = vsel %vm4919_vm5, %v5024_v4, %v5042_v8  ;;  %v5059_v33 = vrot.slane %v5057_v39, 4  ;;  %v5072_v4 = vshrl.u32 %v10952_v61, 16  ;;  %v5075_v51 = vshll.u32 %v10952_v61, 16 }
 0x1b9   :  { %5460 = vmatprep.mubr.bf16.mxu0 %v5007_v50  ;;  %5887 = vmatpush1.bf16.msra.mxu0 %v7884_v23  ;;  %v7902_v50 = vld [vmem:[%s10697_s1 + $0x880] ss:$8 sps:$4 sm:$0xff]   ;;  %v1681_v23 = vrot.slane %v10950_v31, 1  ;;  %v5050_v53 = vrot.slane %v5048_v15, 4 }
 0x1ba   :  { %5888 = vmatprep.subr.bf16.mxu0 %v7892_v9  ;;  %v5033_v9 = vor.u32 %v5032_v24, %v5029_v12  ;;  %v5074_v17 = vrot.slane %v5072_v4, 3  ;;  %v10954_v12 = vld [vmem:[#allocation23_spill] sm:$0xff] }
 0x1bb   :  { %v1682_v60 = vsel %vm1626_vm4, %v1677_v19, %v1681_v23  ;;  %v10953_v19 = vld [vmem:[#allocation20_spill] sm:$0xff]  ;;  %v5090_v24 = vshrl.u32 %v10954_v12, 16  ;;  %v10955_v31 = vld [vmem:[#allocation7_spill] sm:$0xff] }
 0x1bc   :  { %v5034_v57 = vsel %vm4919_vm5, %v5015_v0, %v5033_v9  ;;  %v5063_v1 = vshrl.u32 %v10953_v19, 16  ;;  %v5066_v0 = vshll.u32 %v10953_v19, 16 }
 0x1bd   :  { %5889 = vmatpush1.bf16.msra.mxu0 %v7890_v49  ;;  %v5060_v49 = vor.u32 %v5059_v33, %v5056_v43  ;;  %v2198_v43 = vpack.c.bf16 %v7932_v42, %v2134_v2  ;;  %v5102_v42 = vshll.u32 %v9664_v38, 16 }
 0x1be   :  { %5890 = vmatprep.subr.bf16.mxu0 %v7898_v45  ;;  %v7905_v45 = vld [vmem:[%s10697_s1 + $0x890] ss:$8 sps:$4 sm:$0xff]  }
 0x1bf   :  { %2024 = vmatmul.mubr.bf16.gmra.mrb[44].mxu1 %v1674_v35  ;;  %v2135_v35 = vld [vmem:[#allocation2 + $0x18] sm:$0xf8]  ;;  %v5061_v62 = vsel %vm4919_vm5, %v5042_v8, %v5060_v49 }
 0x1c0   :  { %5461 = vmatmul.mubr.bf16.gmra.mrb[12].mxu0 %v4998_v48  ;;  %2033 = vmatprep.mubr.bf16.mxu1 %v1680_v27  ;;  %v7910_v48 = vld [vmem:[%s10697_s1 + $0x8a4] ss:$8 sps:$4 sm:$0xff]   ;;  %v1559_v27 = vpack.c.bf16 %v1555_v3, %v9631_v47  ;;  %v7913_v47 = vld [vmem:[%s10697_s1 + $0x8b4] ss:$8 sps:$4 sm:$0xff]   ;;  %v10956_v3 = vshrl.u32 %v10955_v31, 16 }
 0x1c1   :  { %5470 = vmatprep.mubr.bf16.mxu0 %v5025_v32  ;;  %5891 = vmatpush1.bf16.msra.mxu0 %v7896_v63  ;;  %v5047_v32 = vrot.slane %v5045_v41, 3  ;;  %v5077_v63 = vrot.slane %v5075_v51, 4  ;;  %v10957_v41 = vshll.u32 %v10955_v31, 16  ;;  %v5092_v51 = vrot.slane %v5090_v24, 3  ;;  %v10964_v31 = vld [vmem:[#allocation10_spill] sm:$0xff] }
 0x1c2   :  { %5892 = vmatprep.subr.bf16.mxu0 %v7901_v5  ;;  %v7931_v5 = vld [vmem:[#allocation2 + $0x28] sm:$0xff]  ;;  %v9975_v39 = vrot.slane %v1559_v27, 1  ;;  %v2292_v58 = vrot.slane %v10956_v3, 1  ;;  %v10965_v3 = vshrl.u32 %v10964_v31, 16 }
 0x1c3   :  { %v2199_v59 = vpack.c.bf16 %v7931_v5, %v2135_v35  ;;  %v5051_v8 = vor.u32 %v5050_v53, %v5047_v32  ;;  %v2295_v15 = vrot.slane %v10957_v41, 2  ;;  %v7914_v35 = vld [vmem:[%s10697_s1 + $0x8c0] ss:$8 sps:$4 sm:$0xff]   ;;  %v5108_v5 = vshrl.u32 %v9644_v22, 16 }
 0x1c4   :  { %v1686_v33 = vsel %vm1626_vm4, %v1681_v23, %v9975_v39  ;;  %v5126_v41 = vshrl.u32 %v9670_v54, 16 }
 0x1c5   :  { %5893 = vmatpush1.bf16.msra.mxu0 %v7899_v14  ;;  %v5078_v14 = vor.u32 %v5077_v63, %v5074_v17  ;;  %v2282_v13 = vshrl.u32 %v2199_v59, 16  ;;  %v2296_v32 = vor.u32 %v2295_v15, %v2292_v58  ;;  %v7917_v17 = vld [vmem:[%s10697_s1 + $0x8d0] ss:$8 sps:$4 sm:$0xff]   ;;  %v2301_v58 = vrot.slane %v10965_v3, 1 }
 0x1c6   :  { %5894 = vmatprep.subr.bf16.mxu0 %v7904_v29  ;;  %v2285_v29 = vshll.u32 %v2199_v59, 16  ;;  %v7923_v15 = vld [vmem:[%s10697_s1 + $0x8f0] ss:$8 sps:$4 sm:$0xff]  }
 0x1c7   :  { %2034 = vmatmul.mubr.bf16.gmra.mrb[48].mxu1 %v1678_v37  ;;  %v5093_v37 = vshll.u32 %v10954_v12, 16  ;;  %v2284_v61 = vrot.slane %v2282_v13, 1 }
 0x1c8   :  { %5471 = vmatmul.mubr.bf16.gmra.mrb[16].mxu0 %v5016_v20  ;;  %2043 = vmatprep.mubr.bf16.mxu1 %v1684_v26  ;;  %v7911_v20 = vld [vmem:[%s10697_s1 + $0x8b0] ss:$8 sps:$4 sm:$0xff]   ;;  %v5065_v26 = vrot.slane %v5063_v1, 3  ;;  %v2287_v4 = vrot.slane %v2285_v29, 2 }
 0x1c9   :  { %5480 = vmatprep.mubr.bf16.mxu0 %v5043_v11  ;;  %5895 = vmatpush1.bf16.msra.mxu0 %v7902_v50  ;;  %v5068_v11 = vrot.slane %v5066_v0, 4  ;;  %v5052_v50 = vsel %vm4919_vm5, %v5033_v9, %v5051_v8  ;;  %v7919_v9 = vld [vmem:[%s10697_s1 + $0x8d4] ss:$8 sps:$4 sm:$0xff]  }
 0x1ca   :  { %5896 = vmatprep.subr.bf16.mxu0 %v7907_v52  ;;  %v5079_v52 = vsel %vm4919_vm5, %v5060_v49, %v5078_v14  ;;  %v2265_v49 = vshrl.u32 %v2198_v43, 16  ;;  %v2288_v27 = vor.u32 %v2287_v4, %v2284_v61  ;;  %v10966_v61 = vshll.u32 %v10964_v31, 16 }
 0x1cb   :  { %v5069_v23 = vor.u32 %v5068_v11, %v5065_v26  ;;  %v5110_v26 = vrot.slane %v5108_v5, 3  ;;  %v5138_v31 = vshll.u32 %v9709_v36, 16 }
 0x1cc   :  { %v2267_v59 = vrot.slane %v2265_v49, 1  ;;  %v2297_v24 = vsel %vm2263_vm6, %v2288_v27, %v2296_v32  ;;  %v2304_v4 = vrot.slane %v10966_v61, 2 }
 0x1cd   :  { %5897 = vmatpush1.bf16.msra.mxu0 %v7905_v45  ;;  %v5095_v45 = vrot.slane %v5093_v37, 4  ;;  %v5070_v63 = vsel %vm4919_vm5, %v5051_v8, %v5069_v23  ;;  %v10961_v8 = vld [vmem:[#allocation9_spill] sm:$0xff] }
 0x1ce   :  { %5898 = vmatprep.subr.bf16.mxu0 %v7910_v48  ;;  %v2268_v48 = vshll.u32 %v2198_v43, 16  ;;  %v10962_v13 = vshrl.u32 %v10961_v8, 16  ;;  %v7925_v43 = vld [vmem:[%s10697_s1 + $0x8f4] ss:$8 sps:$4 sm:$0xff]  }
 0x1cf   :  { %2044 = vmatmul.mubr.bf16.gmra.mrb[52].mxu1 %v1682_v60  ;;  %v5081_v60 = vshrl.u32 %v9637_v44, 16  ;;  %v5096_v53 = vor.u32 %v5095_v45, %v5092_v51  ;;  %v5104_v45 = vrot.slane %v5102_v42, 4 }
 0x1d0   :  { %5481 = vmatmul.mubr.bf16.gmra.mrb[20].mxu0 %v5034_v57  ;;  %2053 = vmatprep.mubr.bf16.mxu1 %v1688_v46  ;;  %v5084_v57 = vshll.u32 %v9637_v44, 16  ;;  %v7922_v44 = vld [vmem:[%s10697_s1 + $0x8e4] ss:$8 sps:$4 sm:$0xff]   ;;  %v2270_v46 = vrot.slane %v2268_v48, 2  ;;  %v2310_v29 = vrot.slane %v10962_v13, 1 }
 0x1d1   :  { %5490 = vmatprep.mubr.bf16.mxu0 %v5061_v62  ;;  %5899 = vmatpush1.bf16.msra.mxu0 %v7908_v6  ;;  %v10958_v62 = vld [vmem:[#allocation8_spill] sm:$0xff]  ;;  %v5097_v37 = vsel %vm4919_vm5, %v5078_v14, %v5096_v53  ;;  %v10967_v48 = vld [vmem:[#allocation11_spill] sm:$0xff] }
 0x1d2   :  { %5900 = vmatprep.subr.bf16.mxu0 %v7913_v47  ;;  %v10959_v6 = vshrl.u32 %v10958_v62, 16  ;;  %v10960_v1 = vshll.u32 %v10958_v62, 16  ;;  %v5083_v47 = vrot.slane %v5081_v60, 3  ;;  %v5086_v2 = vrot.slane %v5084_v57, 4 }
 0x1d3   :  { %v2271_v14 = vor.u32 %v2270_v46, %v2267_v59  ;;  %v10969_v57 = vshll.u32 %v10967_v48, 16  ;;  %v5117_v59 = vshrl.u32 %v9685_v30, 16  ;;  %v5144_v46 = vshrl.u32 %v9692_v16, 16 }
 0x1d4   :  { %v2275_v19 = vrot.slane %v10959_v6, 1  ;;  %v2278_v0 = vrot.slane %v10960_v1, 2  ;;  %v5147_v62 = vshll.u32 %v9692_v16, 16 }
 0x1d5   :  { %5901 = vmatpush1.bf16.msra.mxu0 %v7911_v20  ;;  %v7920_v20 = vld [vmem:[%s10697_s1 + $0x8e0] ss:$8 sps:$4 sm:$0xff]   ;;  %v2331_v27 = vrot.slane %v10969_v57, 2 }
 0x1d6   :  { %5902 = vmatprep.subr.bf16.mxu0 %v7916_v10  ;;  %v5099_v10 = vshrl.u32 %v9664_v38, 16  ;;  %v5129_v38 = vshll.u32 %v9670_v54, 16  ;;  %v10968_v54 = vshrl.u32 %v10967_v48, 16  ;;  %v5140_v48 = vrot.slane %v5138_v31, 4 }
 0x1d7   :  { %2054 = vmatmul.mubr.bf16.gmra.mrb[56].mxu1 %v1686_v33  ;;  %v2279_v33 = vor.u32 %v2278_v0, %v2275_v19  ;;  %v10970_v0 = vld [vmem:[#allocation13_spill] sm:$0xff] }
 0x1d8   :  { %5491 = vmatmul.mubr.bf16.gmra.mrb[24].mxu0 %v5052_v50  ;;  %2063 = vmatprep.mubr.bf16.mxu1 %v1687_v25  ;;  %v5111_v25 = vshll.u32 %v9644_v22, 16  ;;  %v10963_v22 = vshll.u32 %v10961_v8, 16  ;;  %v5087_v50 = vor.u32 %v5086_v2, %v5083_v47  ;;  %v5101_v51 = vrot.slane %v5099_v10, 3 }
 0x1d9   :  { %5500 = vmatprep.mubr.bf16.mxu0 %v5079_v52  ;;  %5903 = vmatpush1.bf16.msra.mxu0 %v7914_v35  ;;  %v2280_v35 = vsel %vm2263_vm6, %v2271_v14, %v2279_v33  ;;  %v2328_v60 = vrot.slane %v10968_v54, 1  ;;  %v10971_v47 = vshrl.u32 %v10970_v0, 16  ;;  %v10972_v8 = vshll.u32 %v10970_v0, 16  ;;  %v7936_v14 = vld [vmem:[%s10697_s1 + $0x424] ss:$8 sps:$4 sm:$0xff]  }
 0x1da   :  { %5904 = vmatprep.subr.bf16.mxu0 %v7919_v9  ;;  %v2313_v12 = vrot.slane %v10963_v22, 2  ;;  %v5113_v11 = vrot.slane %v5111_v25, 4  ;;  %v5088_v9 = vsel %vm4919_vm5, %v5069_v23, %v5087_v50  ;;  %v2305_v25 = vor.u32 %v2304_v4, %v2301_v58  ;;  %v7935_v22 = vld [vmem:[%s10697_s1 + $0x410] ss:$8 sps:$4 sm:$0xff]  }
 0x1db   :  { %v5120_v23 = vshll.u32 %v9685_v30, 16  ;;  %v2332_v6 = vor.u32 %v2331_v27, %v2328_v60  ;;  %v2319_v2 = vrot.slane %v10971_v47, 1  ;;  %v2322_v13 = vrot.slane %v10972_v8, 2  ;;  %v10976_v4 = vld [vmem:[#allocation17_spill] sm:$0xff]  ;;  %v7941_v8 = vld [vmem:[%s10697_s1 + $0x440] ss:$8 sps:$4 sm:$0xff]  }
 0x1dc   :  { %v2314_v52 = vor.u32 %v2313_v12, %v2310_v29  ;;  %v2306_v30 = vsel %vm2263_vm6, %v2279_v33, %v2305_v25  ;;  %v5119_v29 = vrot.slane %v5117_v59, 3  ;;  %v10973_v12 = vld [vmem:[#allocation14_spill] sm:$0xff]  ;;  %v5149_v10 = vrot.slane %v5147_v62, 4 }
 0x1dd   :  { %5905 = vmatpush1.bf16.msra.mxu0 %v7917_v17  ;;  %v5128_v17 = vrot.slane %v5126_v41, 3  ;;  %v5122_v16 = vrot.slane %v5120_v23, 4  ;;  %v2323_v33 = vor.u32 %v2322_v13, %v2319_v2  ;;  %v5183_v0 = vshll.u32 %v9738_v28, 16  ;;  %v10982_v13 = vld [vmem:[#allocation21_spill] sm:$0xff] }
 0x1de   :  { %5906 = vmatprep.subr.bf16.mxu0 %v7922_v44  ;;  %v2315_v49 = vsel %vm2263_vm6, %v2296_v32, %v2314_v52  ;;  %v5105_v44 = vor.u32 %v5104_v45, %v5101_v51  ;;  %v7933_v32 = vld [vmem:[%s10697_s1 + $0x400] ss:$8 sps:$4 sm:$0xff]   ;;  %v2333_v42 = vsel %vm2263_vm6, %v2314_v52, %v2332_v6  ;;  %v10977_v51 = vshrl.u32 %v10976_v4, 16 }
 0x1df   :  { %2064 = vmatmul.mubr.bf16.gmra.mrb[68].mxu1 %v9975_v39  ;;  %v5114_v39 = vor.u32 %v5113_v11, %v5110_v26  ;;  %v5146_v11 = vrot.slane %v5144_v46, 3  ;;  %v5123_v3 = vor.u32 %v5122_v16, %v5119_v29  ;;  %v7937_v52 = vld [vmem:[%s10697_s1 + $0x420] ss:$8 sps:$4 sm:$0xff]   ;;  %v2324_v54 = vsel %vm2263_vm6, %v2305_v25, %v2323_v33 }
 0x1e0   :  { %5501 = vmatmul.mubr.bf16.gmra.mrb[28].mxu0 %v5070_v63  ;;  %2774 = vmatprep.mubr.bf16.mxu1 %v2297_v24  ;;  %v5131_v63 = vrot.slane %v5129_v38, 4  ;;  %v5106_v1 = vsel %vm4919_vm5, %v5087_v50, %v5105_v44  ;;  %v10974_v24 = vshrl.u32 %v10973_v12, 16  ;;  %v5135_v50 = vshrl.u32 %v9709_v36, 16  ;;  %v7938_v36 = vld [vmem:[%s10697_s1 + $0x434] ss:$8 sps:$4 sm:$0xff]  }
 0x1e1   :  { %5510 = vmatprep.mubr.bf16.mxu0 %v5097_v37  ;;  %5907 = vmatpush1.bf16.msra.mxu0 %v7920_v20  ;;  %v5115_v5 = vsel %vm4919_vm5, %v5096_v53, %v5114_v39  ;;  %v7934_v53 = vld [vmem:[%s10697_s1 + $0x414] ss:$8 sps:$4 sm:$0xff]   ;;  %v10975_v20 = vshll.u32 %v10973_v12, 16  ;;  %v5150_v41 = vor.u32 %v5149_v10, %v5146_v11  ;;  %v5162_v38 = vshrl.u32 %v9713_v55, 16 }
 0x1e2   :  { %5908 = vmatprep.subr.bf16.mxu0 %v7925_v43  ;;  %v5132_v19 = vor.u32 %v5131_v63, %v5128_v17  ;;  %v2346_v37 = vrot.slane %v10974_v24, 1  ;;  %v2337_v45 = vrot.slane %v10977_v51, 1  ;;  %v7939_v63 = vld [vmem:[%s10697_s1 + $0x430] ss:$8 sps:$4 sm:$0xff]   ;;  %v10983_v29 = vshrl.u32 %v10982_v13, 16 }
 0x1e3   :  { %v2349_v26 = vrot.slane %v10975_v20, 2  ;;  %v5164_v25 = vrot.slane %v5162_v38, 3  ;;  %v4881_v24 = vld [vmem:[#allocation2 + $0x218] sm:$0x7f]  ;;  %v5185_v31 = vrot.slane %v5183_v0, 4 }
 0x1e4   :  { %v5133_v43 = vsel %vm4919_vm5, %v5114_v39, %v5132_v19  ;;  %v5151_v27 = vsel %vm4919_vm5, %v5132_v19, %v5150_v41  ;;  %v5153_v19 = vshrl.u32 %v9733_v18, 16  ;;  %v2355_v16 = vrot.slane %v10983_v29, 1  ;;  %v10985_v11 = vld [vmem:[#allocation22_spill] sm:$0xff]  ;;  %v7949_v29 = vld [vmem:[%s10697_s1 + $0x480] ss:$8 sps:$4 sm:$0xff]  }
 0x1e5   :  { %5909 = vmatpush1.bf16.msra.mxu0 %v7923_v15  ;;  %v2350_v58 = vor.u32 %v2349_v26, %v2346_v37  ;;  %v5165_v15 = vshll.u32 %v9713_v55, 16  ;;  %v5124_v55 = vsel %vm4919_vm5, %v5105_v44, %v5123_v3  ;;  %v7940_v44 = vld [vmem:[%s10697_s1 + $0x444] ss:$8 sps:$4 sm:$0xff]   ;;  %v10986_v10 = vshrl.u32 %v10985_v11, 16 }
 0x1e6   :  { %v5155_v20 = vrot.slane %v5153_v19, 3 }
 0x1e7   :  { %2775 = vmatmul.mubr.bf16.vlgmr.msra.gmra.mrb[0].mxu1 %v2280_v35  ;;  %v10978_v35 = vshll.u32 %v10976_v4, 16  ;;  %v2351_v57 = vsel %vm2263_vm6, %v2332_v6, %v2350_v58  ;;  %v5167_v62 = vrot.slane %v5165_v15, 4  ;;  %v5171_v4 = vshrl.u32 %v9761_v56, 16 }
 0x1e8   :  { %5511 = vmatmul.mubr.bf16.gmra.mrb[32].mxu0 %v5088_v9  ;;  %6998 = vmatpush1.bf16.msra.mxu1 %v7933_v32 }
 0x1e9   :  { %2784 = vmatprep.mubr.bf16.mxu1 %v2315_v49  ;;  %5520 = vmatprep.mubr.bf16.mxu0 %v5115_v5  ;;  %v2340_v9 = vrot.slane %v10978_v35, 2  ;;  %v5137_v49 = vrot.slane %v5135_v50, 3  ;;  %v10979_v5 = vld [vmem:[#allocation18_spill] sm:$0xff]  ;;  %v5168_v2 = vor.u32 %v5167_v62, %v5164_v25 }
 0x1ea   :  { %6983 = vmatprep.subr.bf16.mxu1 %v7934_v53  ;;  %v10980_v59 = vshrl.u32 %v10979_v5, 16  ;;  %v10981_v32 = vshll.u32 %v10979_v5, 16 }
 0x1eb   :  { %v2341_v53 = vor.u32 %v2340_v9, %v2337_v45  ;;  %v5141_v6 = vor.u32 %v5140_v48, %v5137_v49  ;;  %v5169_v38 = vsel %vm4919_vm5, %v5150_v41, %v5168_v2  ;;  %v7945_v49 = vld [vmem:[%s10697_s1 + $0x460] ss:$8 sps:$4 sm:$0xff]  }
 0x1ec   :  { %6999 = vmatpush1.bf16.msra.mxu1 %v7935_v22  ;;  %v2364_v23 = vrot.slane %v10980_v59, 1  ;;  %v2367_v46 = vrot.slane %v10981_v32, 2  ;;  %v10984_v22 = vshll.u32 %v10982_v13, 16 }
 0x1ed   :  { %6984 = vmatprep.subr.bf16.mxu1 %v7936_v14  ;;  %v5142_v37 = vsel %vm4919_vm5, %v5123_v3, %v5141_v6  ;;  %v4885_v3 = vpack.c.bf16 %v4881_v24, %v9753_v34  ;;  %v4880_v34 = vld [vmem:[#allocation2 + $0x210] sm:$0x7f] }
 0x1ee   :  { %v2368_v47 = vor.u32 %v2367_v46, %v2364_v23  ;;  %v2358_v12 = vrot.slane %v10984_v22, 2  ;;  %v4884_v32 = vpack.c.bf16 %v4880_v34, %v9775_v21  ;;  %v10991_v46 = vld [vmem:[#allocation26_spill] sm:$0xff] }
 0x1ef   :  { %2785 = vmatmul.mubr.bf16.gmra.mrb[4].mxu1 %v2306_v30  ;;  %v5156_v30 = vshll.u32 %v9733_v18, 16  ;;  %v7942_v18 = vld [vmem:[%s10697_s1 + $0x454] ss:$8 sps:$4 sm:$0xff]   ;;  %v5198_v35 = vshrl.u32 %v4885_v3, 16  ;;  %v5201_v9 = vshll.u32 %v4885_v3, 16  ;;  %v10992_v25 = vshrl.u32 %v10991_v46, 16 }
 0x1f0   :  { %5521 = vmatmul.mubr.bf16.gmra.mrb[36].mxu0 %v5106_v1  ;;  %2794 = vmatprep.mubr.bf16.mxu1 %v2333_v42  ;;  %v5180_v1 = vshrl.u32 %v9738_v28, 16  ;;  %v2342_v28 = vsel %vm2263_vm6, %v2323_v33, %v2341_v53  ;;  %v2382_v42 = vrot.slane %v10986_v10, 1  ;;  %v7943_v33 = vld [vmem:[%s10697_s1 + $0x450] ss:$8 sps:$4 sm:$0xff]   ;;  %v2359_v15 = vor.u32 %v2358_v12, %v2355_v16  ;;  %v7950_v16 = vld [vmem:[%s10697_s1 + $0x494] ss:$8 sps:$4 sm:$0xff]  }
 0x1f1   :  { %5530 = vmatprep.mubr.bf16.mxu0 %v5133_v43  ;;  %7000 = vmatpush1.bf16.msra.mxu1 %v7937_v52  ;;  %v5158_v26 = vrot.slane %v5156_v30, 4  ;;  %v10987_v43 = vshll.u32 %v10985_v11, 16  ;;  %v2369_v52 = vsel %vm2263_vm6, %v2350_v58, %v2368_v47  ;;  %v5174_v58 = vshll.u32 %v9761_v56, 16  ;;  %v10988_v56 = vld [vmem:[#allocation25_spill] sm:$0xff] }
 0x1f2   :  { %6985 = vmatprep.subr.bf16.mxu1 %v7938_v36  ;;  %v5182_v50 = vrot.slane %v5180_v1, 3  ;;  %v7944_v36 = vld [vmem:[%s10697_s1 + $0x464] ss:$8 sps:$4 sm:$0xff]   ;;  %v2360_v48 = vsel %vm2263_vm6, %v2341_v53, %v2359_v15  ;;  %v2400_v62 = vrot.slane %v10992_v25, 1  ;;  %v5200_v19 = vrot.slane %v5198_v35, 3 }
 0x1f3   :  { %v10081_v39 = vpop.f32.mrb[60].mxu0  ;;  %v2385_v14 = vrot.slane %v10987_v43, 2  ;;  %v5159_v41 = vor.u32 %v5158_v26, %v5155_v20  ;;  %v5203_v30 = vrot.slane %v5201_v9, 4  ;;  %v7947_v1 = vld [vmem:[%s10697_s1 + $0x470] ss:$8 sps:$4 sm:$0xff]   ;;  %v7960_v25 = vld [vmem:[#allocation2 + $0x48] sm:$0xff] }
 0x1f4   :  { %v10086_v61 = vpop.f32.mrb[61].mxu0  ;;  %v5186_v45 = vor.u32 %v5185_v31, %v5182_v50  ;;  %v10997_v43 = vld [vmem:[#allocation30_spill] sm:$0xff] }
 0x1f5   :  { %v4144_v60 = vpop.f32.mrb[62].mxu0  ;;  %7001 = vmatpush1.bf16.msra.mxu1 %v7939_v63  ;;  %v2386_v51 = vor.u32 %v2385_v14, %v2382_v42  ;;  %v5176_v63 = vrot.slane %v5174_v58, 4  ;;  %v5160_v5 = vsel %vm4919_vm5, %v5141_v6, %v5159_v41  ;;  %v7948_v6 = vld [vmem:[%s10697_s1 + $0x484] ss:$8 sps:$4 sm:$0xff]   ;;  %v5204_v13 = vor.u32 %v5203_v30, %v5200_v19  ;;  %v7954_v58 = vld [vmem:[%s10697_s1 + $0x4b4] ss:$8 sps:$4 sm:$0xff]  }
 0x1f6   :  { %v4145_v17 = vpop.f32.mrb[63].mxu0  ;;  %6986 = vmatprep.subr.bf16.mxu1 %v7940_v44  ;;  %v5187_v23 = vsel %vm4919_vm5, %v5168_v2, %v5186_v45  ;;  %v10993_v44 = vshll.u32 %v10991_v46, 16  ;;  %v5192_v2 = vshll.u32 %v4884_v32, 16  ;;  %v10998_v14 = vshrl.u32 %v10997_v43, 16  ;;  %v7959_v46 = vld [vmem:[#allocation2 + $0x38] sm:$0xff] }
 0x1f7   :  { %2795 = vmatmul.mubr.bf16.gmra.mrb[8].mxu1 %v2324_v54  ;;  %v7946_v54 = vld [vmem:[%s10697_s1 + $0x474] ss:$8 sps:$4 sm:$0xff]   ;;  %v5173_v17 = vrot.slane %v5171_v4, 3  ;;  %v2387_v59 = vsel %vm2263_vm6, %v2368_v47, %v2386_v51  ;;  %v5189_v47 = vshrl.u32 %v4884_v32, 16  ;;  %v5205_v42 = vsel %vm4919_vm5, %v5186_v45, %v5204_v13  ;;  %v7953_v4 = vld [vmem:[%s10697_s1 + $0x4a0] ss:$8 sps:$4 sm:$0xff]  }
 0x1f8   :  { %5531 = vmatmul.mubr.bf16.gmra.mrb[40].mxu0 %v5124_v55  ;;  %2804 = vmatprep.mubr.bf16.mxu1 %v2351_v57  ;;  %v10989_v55 = vshrl.u32 %v10988_v56, 16  ;;  %v10990_v57 = vshll.u32 %v10988_v56, 16  ;;  %v2403_v53 = vrot.slane %v10993_v44, 2  ;;  %v5194_v11 = vrot.slane %v5192_v2, 4  ;;  %v11000_v45 = vld [vmem:[#allocation33_spill] sm:$0xff]  ;;  %v11006_v44 = vld [vmem:[#allocation46_spill] sm:$0xff] }
 0x1f9   :  { %5540 = vmatprep.mubr.bf16.mxu0 %v5151_v27  ;;  %7002 = vmatpush1.bf16.msra.mxu1 %v7941_v8  ;;  %v5177_v0 = vor.u32 %v5176_v63, %v5173_v17  ;;  %v5191_v26 = vrot.slane %v5189_v47, 3  ;;  %v2418_v50 = vrot.slane %v10998_v14, 1  ;;  %v10999_v31 = vshll.u32 %v10997_v43, 16  ;;  %v7956_v17 = vld [vmem:[%s10697_s1 + $0x4c4] ss:$8 sps:$4 sm:$0xff]  }
 0x1fa   :  { %6987 = vmatprep.subr.bf16.mxu1 %v7942_v18  ;;  %v2373_v60 = vrot.slane %v10989_v55, 1  ;;  %v2376_v27 = vrot.slane %v10990_v57, 2  ;;  %v2404_v8 = vor.u32 %v2403_v53, %v2400_v62  ;;  %v10994_v18 = vld [vmem:[#allocation29_spill] sm:$0xff]  ;;  %v11001_v35 = vshrl.u32 %v11000_v45, 16 }
 0x1fb   :  { %v5178_v12 = vsel %vm4919_vm5, %v5159_v41, %v5177_v0  ;;  %v10995_v24 = vshrl.u32 %v10994_v18, 16  ;;  %v11002_v34 = vshll.u32 %v11000_v45, 16  ;;  %v5654_v62 = vpack.c.bf16 %v7960_v25, %v7959_v46 }
 0x1fc   :  { %v2377_v21 = vor.u32 %v2376_v27, %v2373_v60  ;;  %v2405_v10 = vsel %vm2263_vm6, %v2386_v51, %v2404_v8  ;;  %v2409_v9 = vrot.slane %v11001_v35, 1  ;;  %v7955_v27 = vld [vmem:[%s10697_s1 + $0x4b0] ss:$8 sps:$4 sm:$0xff]   ;;  %v11007_v53 = vshrl.u32 %v11006_v44, 16 }
 0x1fd   :  { %7003 = vmatpush1.bf16.msra.mxu1 %v7943_v33  ;;  %v7952_v33 = vld [vmem:[%s10697_s1 + $0x4a4] ss:$8 sps:$4 sm:$0xff]   ;;  %v11008_v30 = vshll.u32 %v11006_v44, 16  ;;  %v7970_v35 = vld [vmem:[#allocation2 + $0x50] sm:$0xff] }
 0x1fe   :  { %6988 = vmatprep.subr.bf16.mxu1 %v7944_v36  ;;  %v2378_v22 = vsel %vm2263_vm6, %v2359_v15, %v2377_v21  ;;  %v5195_v15 = vor.u32 %v5194_v11, %v5191_v26  ;;  %v2427_v19 = vrot.slane %v11007_v53, 1  ;;  %v7967_v26 = vld [vmem:[#allocation2 + $0x58] sm:$0xff]  ;;  %v7968_v11 = vld [vmem:[#allocation2 + $0x68] sm:$0xff] }
 0x1ff   :  { %2805 = vmatmul.mubr.bf16.gmra.mrb[12].mxu1 %v2342_v28  ;;  %v2391_v28 = vrot.slane %v10995_v24, 1  ;;  %v7965_v24 = vld [vmem:[#allocation2 + $0x30] sm:$0xff] }
 0x200   :  { %5541 = vmatmul.mubr.bf16.gmra.mrb[44].mxu0 %v5142_v37  ;;  %2814 = vmatprep.mubr.bf16.mxu1 %v2369_v52  ;;  %v10996_v37 = vshll.u32 %v10994_v18, 16  ;;  %v2421_v52 = vrot.slane %v10999_v31, 2  ;;  %v5196_v51 = vsel %vm4919_vm5, %v5177_v0, %v5195_v15  ;;  %v7964_v18 = vld [vmem:[%s10697_s1 + $0x4f4] ss:$8 sps:$4 sm:$0xff]  }
 0x201   :  { %5550 = vmatprep.mubr.bf16.mxu0 %v5169_v38  ;;  %7004 = vmatpush1.bf16.msra.mxu1 %v7945_v49  ;;  %v7951_v38 = vld [vmem:[%s10697_s1 + $0x490] ss:$8 sps:$4 sm:$0xff]   ;;  %v2412_v49 = vrot.slane %v11002_v34, 2 }
 0x202   :  { %6989 = vmatprep.subr.bf16.mxu1 %v7946_v54  ;;  %v2394_v20 = vrot.slane %v10996_v37, 2  ;;  %v2422_v36 = vor.u32 %v2421_v52, %v2418_v50  ;;  %v11003_v54 = vld [vmem:[#allocation45_spill] sm:$0xff] }
 0x203   :  { %v11004_v56 = vshrl.u32 %v11003_v54, 16  ;;  %v11005_v60 = vshll.u32 %v11003_v54, 16  ;;  %v2413_v63 = vor.u32 %v2412_v49, %v2409_v9  ;;  %v7971_v9 = vld [vmem:[#allocation2 + $0x60] sm:$0xff]  ;;  %v11018_v49 = vld [vmem:[#allocation50_spill] sm:$0xff] }
 0x204   :  { %v2395_v3 = vor.u32 %v2394_v20, %v2391_v28  ;;  %v7966_v28 = vld [vmem:[#allocation2 + $0x40] sm:$0xff]  ;;  %v5655_v34 = vpack.c.bf16 %v7971_v9, %v7970_v35  ;;  %v7980_v9 = vld [vmem:[#allocation2 + $0xb8] sm:$0xff] }
 0x205   :  { %7005 = vmatpush1.bf16.msra.mxu1 %v7947_v1  ;;  %v2436_v55 = vrot.slane %v11004_v56, 1  ;;  %v2439_v57 = vrot.slane %v11005_v60, 2  ;;  %v2430_v1 = vrot.slane %v11008_v30, 2  ;;  %v5653_v37 = vpack.c.bf16 %v7966_v28, %v7965_v24 }
 0x206   :  { %6990 = vmatprep.subr.bf16.mxu1 %v7948_v6  ;;  %v2396_v41 = vsel %vm2263_vm6, %v2377_v21, %v2395_v3  ;;  %v2414_v32 = vsel %vm2263_vm6, %v2395_v3, %v2413_v63  ;;  %v11009_v21 = vld [vmem:[#allocation47_spill] sm:$0xff] }
 0x207   :  { %2815 = vmatmul.mubr.bf16.gmra.mrb[16].mxu1 %v2360_v48  ;;  %v2423_v48 = vsel %vm2263_vm6, %v2404_v8, %v2422_v36  ;;  %v11010_v0 = vshrl.u32 %v11009_v21, 16  ;;  %v11011_v2 = vshll.u32 %v11009_v21, 16 }
 0x208   :  { %5551 = vmatmul.mubr.bf16.gmra.mrb[48].mxu0 %v5160_v5  ;;  %2824 = vmatprep.mubr.bf16.mxu1 %v2387_v59  ;;  %v2440_v5 = vor.u32 %v2439_v57, %v2436_v55  ;;  %v7957_v59 = vld [vmem:[%s10697_s1 + $0x4c0] ss:$8 sps:$4 sm:$0xff]   ;;  %v11020_v55 = vshll.u32 %v11018_v49, 16 }
 0x209   :  { %5560 = vmatprep.mubr.bf16.mxu0 %v5187_v23  ;;  %7006 = vmatpush1.bf16.msra.mxu1 %v7949_v29  ;;  %v7958_v23 = vld [vmem:[%s10697_s1 + $0x4d4] ss:$8 sps:$4 sm:$0xff]   ;;  %v2454_v47 = vrot.slane %v11010_v0, 1  ;;  %v2457_v8 = vrot.slane %v11011_v2, 2  ;;  %v7962_v29 = vld [vmem:[%s10697_s1 + $0x4e4] ss:$8 sps:$4 sm:$0xff]  }
 0x20a   :  { %6991 = vmatprep.subr.bf16.mxu1 %v7950_v16  ;;  %v2441_v6 = vsel %vm2263_vm6, %v2422_v36, %v2440_v5  ;;  %v2431_v16 = vor.u32 %v2430_v1, %v2427_v19  ;;  %v2466_v60 = vrot.slane %v11020_v55, 2  ;;  %v7974_v0 = vld [vmem:[#allocation2 + $0x70] sm:$0xff]  ;;  %v11033_v55 = vld [vmem:[#allocation55_spill] sm:$0xff] }
 0x20c   :  { %v2432_v20 = vsel %vm2263_vm6, %v2413_v63, %v2431_v16 }
 0x20d   :  { %7007 = vmatpush1.bf16.msra.mxu1 %v7951_v38 }
 0x20e   :  { %6992 = vmatprep.subr.bf16.mxu1 %v7952_v33  ;;  %v11015_v33 = vld [vmem:[#allocation49_spill] sm:$0xff] }
 0x20f   :  { %2825 = vmatmul.mubr.bf16.gmra.mrb[20].mxu1 %v2378_v22  ;;  %v2458_v22 = vor.u32 %v2457_v8, %v2454_v47  ;;  %v11016_v3 = vshrl.u32 %v11015_v33, 16  ;;  %v11017_v36 = vshll.u32 %v11015_v33, 16  ;;  %v7975_v47 = vld [vmem:[#allocation2 + $0x80] sm:$0xff] }
 0x210   :  { %5561 = vmatmul.mubr.bf16.gmra.mrb[52].mxu0 %v5178_v12  ;;  %2834 = vmatprep.mubr.bf16.mxu1 %v2405_v10  ;;  %v7963_v12 = vld [vmem:[%s10697_s1 + $0x4e0] ss:$8 sps:$4 sm:$0xff]   ;;  %v5656_v10 = vpack.c.bf16 %v7968_v11, %v7967_v26  ;;  %v5657_v2 = vpack.c.bf16 %v7975_v47, %v7974_v0  ;;  %v11027_v26 = vld [vmem:[#allocation53_spill] sm:$0xff]  ;;  %v7985_v0 = vld [vmem:[#allocation2 + $0xd8] sm:$0xff] }
 0x211   :  { %5570 = vmatprep.mubr.bf16.mxu0 %v5205_v42  ;;  %7008 = vmatpush1.bf16.msra.mxu1 %v7953_v4  ;;  %v11012_v42 = vld [vmem:[#allocation48_spill] sm:$0xff]  ;;  %v2459_v38 = vsel %vm2263_vm6, %v2440_v5, %v2458_v22  ;;  %v2475_v4 = vrot.slane %v11017_v36, 2  ;;  %v11028_v11 = vshrl.u32 %v11027_v26, 16  ;;  %v11030_v36 = vld [vmem:[#allocation54_spill] sm:$0xff] }
 0x212   :  { %6993 = vmatprep.subr.bf16.mxu1 %v7954_v58  ;;  %v11013_v14 = vshrl.u32 %v11012_v42, 16  ;;  %v11014_v31 = vshll.u32 %v11012_v42, 16  ;;  %v7969_v58 = vld [vmem:[%s10697_s1 + $0x4f0] ss:$8 sps:$4 sm:$0xff]   ;;  %v7986_v47 = vld [vmem:[#allocation2 + $0xe8] sm:$0xff] }
 0x214   :  { %v2445_v50 = vrot.slane %v11013_v14, 1  ;;  %v2448_v52 = vrot.slane %v11014_v31, 2  ;;  %v11029_v14 = vshll.u32 %v11027_v26, 16 }
 0x215   :  { %7009 = vmatpush1.bf16.msra.mxu1 %v7955_v27  ;;  %v7972_v27 = vld [vmem:[#allocation2 + $0x78] sm:$0xff] }
 0x216   :  { %6994 = vmatprep.subr.bf16.mxu1 %v7956_v17  ;;  %v7973_v17 = vld [vmem:[#allocation2 + $0x88] sm:$0xff] }
 0x217   :  { %2835 = vmatmul.mubr.bf16.gmra.mrb[24].mxu1 %v2396_v41  ;;  %v2449_v41 = vor.u32 %v2448_v52, %v2445_v50  ;;  %v5658_v63 = vpack.c.bf16 %v7973_v17, %v7972_v27  ;;  %v2197_v52 = vld [vmem:[#allocation2 + $0x208] sm:$0x7]  ;;  %v11035_v27 = vshll.u32 %v11033_v55, 16 }
 0x218   :  { %5571 = vmatmul.mubr.bf16.gmra.mrb[56].mxu0 %v5196_v51  ;;  %2844 = vmatprep.mubr.bf16.mxu1 %v2423_v48  ;;  %v11019_v48 = vshrl.u32 %v11018_v49, 16 }
 0x219   :  { %5580 = vmatprep.mubr.bf16.mxu0 %v5204_v13  ;;  %7010 = vmatpush1.bf16.msra.mxu1 %v7957_v59  ;;  %v7961_v13 = vld [vmem:[%s10697_s1 + $0x4d0] ss:$8 sps:$4 sm:$0xff]   ;;  %v2450_v57 = vsel %vm2263_vm6, %v2431_v16, %v2449_v41  ;;  %v11021_v59 = vld [vmem:[#allocation51_spill] sm:$0xff]  ;;  %v7977_v16 = vld [vmem:[#allocation2 + $0xa8] sm:$0xff]  ;;  %v2529_v17 = vrot.slane %v11035_v27, 2 }
 0x21a   :  { %6995 = vmatprep.subr.bf16.mxu1 %v7958_v23  ;;  %v2463_v56 = vrot.slane %v11019_v48, 1  ;;  %v11022_v23 = vshrl.u32 %v11021_v59, 16  ;;  %v11023_v46 = vshll.u32 %v11021_v59, 16 }
 0x21c   :  { %v2493_v25 = vrot.slane %v11023_v46, 2 }
 0x21d   :  { %7011 = vmatpush1.bf16.msra.mxu1 %v7961_v13 }
 0x21e   :  { %6996 = vmatprep.subr.bf16.mxu1 %v7962_v29  ;;  %v7976_v29 = vld [vmem:[#allocation2 + $0x98] sm:$0xff] }
 0x21f   :  { %2845 = vmatmul.mubr.bf16.gmra.mrb[28].mxu1 %v2414_v32  ;;  %v2490_v32 = vrot.slane %v11022_v23, 1 }
 0x220   :  { %5581 = vmatmul.mubr.bf16.gmra.mrb[68].mxu0 %v5195_v15  ;;  %2854 = vmatprep.mubr.bf16.mxu1 %v2441_v6  ;;  %v2472_v15 = vrot.slane %v11016_v3, 1  ;;  %v7979_v3 = vld [vmem:[#allocation2 + $0xa0] sm:$0xff] }
 0x221   :  { %5910 = vmatprep.mubr.bf16.mxu0 %v5654_v62  ;;  %7012 = vmatpush1.bf16.msra.mxu1 %v7963_v12  ;;  %v2467_v62 = vor.u32 %v2466_v60, %v2463_v56  ;;  %v2494_v53 = vor.u32 %v2493_v25, %v2490_v32  ;;  %v11024_v12 = vld [vmem:[#allocation52_spill] sm:$0xff]  ;;  %v11034_v60 = vshrl.u32 %v11033_v55, 16 }
 0x222   :  { %6997 = vmatprep.subr.bf16.mxu1 %v7964_v18  ;;  %v2476_v51 = vor.u32 %v2475_v4, %v2472_v15  ;;  %v11025_v18 = vshrl.u32 %v11024_v12, 16  ;;  %v11026_v28 = vshll.u32 %v11024_v12, 16  ;;  %v11031_v4 = vshrl.u32 %v11030_v36, 16 }
 0x223   :  { %v2468_v6 = vsel %vm2263_vm6, %v2449_v41, %v2467_v62  ;;  %v11032_v41 = vshll.u32 %v11030_v36, 16 }
 0x224   :  { %v2477_v5 = vsel %vm2263_vm6, %v2458_v22, %v2476_v51  ;;  %v5660_v22 = vpack.c.bf16 %v7977_v16, %v7976_v29  ;;  %v2481_v24 = vrot.slane %v11025_v18, 1 }
 0x225   :  { %7013 = vmatpush1.bf16.msra.mxu1 %v7969_v58  ;;  %v2499_v58 = vrot.slane %v11031_v4, 1  ;;  %v7991_v4 = vld [vmem:[#allocation2 + $0x108] sm:$0xff] }
 0x227   :  { %2855 = vmatmul.mubr.bf16.gmra.mrb[32].mxu1 %v2432_v20  ;;  %v2495_v20 = vsel %vm2263_vm6, %v2476_v51, %v2494_v53  ;;  %v2502_v51 = vrot.slane %v11032_v41, 2 }
 0x228   :  { %5911 = vmatmul.mubr.bf16.vlgmr.msra.gmra.mrb[0].mxu0 %v5653_v37  ;;  %2864 = vmatprep.mubr.bf16.mxu1 %v2459_v38  ;;  %v7978_v38 = vld [vmem:[#allocation2 + $0x90] sm:$0xff] }
 0x229   :  { %5920 = vmatprep.mubr.bf16.mxu0 %v5656_v10  ;;  %v2508_v10 = vrot.slane %v11028_v11, 1  ;;  %v5659_v15 = vpack.c.bf16 %v7979_v3, %v7978_v38  ;;  %v2503_v23 = vor.u32 %v2502_v51, %v2499_v58 }
 0x22f   :  { %2865 = vmatmul.mubr.bf16.gmra.mrb[36].mxu1 %v2450_v57  ;;  %v2526_v57 = vrot.slane %v11034_v60, 1  ;;  %v7994_v60 = vld [vmem:[#allocation2 + $0x118] sm:$0xff] }
 0x230   :  { %5921 = vmatmul.mubr.bf16.gmra.mrb[4].mxu0 %v5655_v34  ;;  %2874 = vmatprep.mubr.bf16.mxu1 %v2477_v5  ;;  %v7981_v34 = vld [vmem:[#allocation2 + $0xc8] sm:$0xff] }
 0x231   :  { %5930 = vmatprep.mubr.bf16.mxu0 %v5658_v63  ;;  %v5662_v48 = vpack.c.bf16 %v7981_v34, %v7980_v9  ;;  %v10286_v63 = vld [vmem:[#allocation2 + $0x1f8] sm:$0xff]  ;;  %v2530_v32 = vor.u32 %v2529_v17, %v2526_v57  ;;  %v7992_v9 = vld [vmem:[#allocation2 + $0xf0] sm:$0xff]  ;;  %v7993_v34 = vld [vmem:[#allocation2 + $0x100] sm:$0xff]  ;;  %v3105_v17 = vrot.slane %v11003_v54, 2 }
 0x232   :  { %v1546_v19 = vpop.f32.mrb[64].mxu1  ;;  %v2229_v5 = vpack.c.bf16 %v2197_v52, %v10286_v63  ;;  %v7989_v52 = vld [vmem:[#allocation2 + $0xe0] sm:$0xff]  ;;  %v7995_v57 = vld [vmem:[#allocation2 + $0x128] sm:$0xff] }
 0x233   :  { %v10261_v30 = vadd.f32 %v1546_v19, %v9889_v40  ;;  %v1548_v1 = vpop.f32.mrb[65].mxu1  ;;  %v2484_v40 = vrot.slane %v11026_v28, 2  ;;  %v7983_v19 = vld [vmem:[#allocation2 + $0xb0] sm:$0xff]  ;;  %v5668_v27 = vpack.c.bf16 %v7995_v57, %v7994_v60  ;;  %v8001_v54 = vld [vmem:[#allocation2 + $0x140] sm:$0xff]  ;;  %v8014_v60 = vld [vmem:[#allocation2 + $0x1b8] sm:$0xff] }
 0x234   :  { %v10265_v8 = vadd.f32 %v1548_v1, %v9894_v7  ;;  %v1550_v13 = vpop.f32.mrb[66].mxu1  ;;  %v2511_v7 = vrot.slane %v11029_v14, 2  ;;  %v2542_v46 = vshrl.u32 %v2229_v5, 16  ;;  %v2545_v25 = vshll.u32 %v2229_v5, 16  ;;  %v7984_v1 = vld [vmem:[#allocation2 + $0xc0] sm:$0xff]  ;;  %v7996_v5 = vld [vmem:[#allocation2 + $0x110] sm:$0xff] }
 0x235   :  { %v1551_v37 = vpop.f32.mrb[67].mxu1  ;;  %v2485_v50 = vor.u32 %v2484_v40, %v2481_v24  ;;  %v11036_v13 = vld [vmem:[#allocation56_spill] sm:$0xff]  ;;  %v10294_v24 = vld [vmem:[#allocation2 + $0x1f0] sm:$0xff] }
 0x236   :  { %v2512_v31 = vor.u32 %v2511_v7, %v2508_v10  ;;  %v11037_v29 = vshrl.u32 %v11036_v13, 16  ;;  %v2544_v37 = vrot.slane %v2542_v46, 1  ;;  %v7998_v46 = vld [vmem:[#allocation2 + $0x138] sm:$0xff]  ;;  %v8015_v57 = vld [vmem:[#allocation2 + $0x1c8] sm:$0xff] }
 0x237   :  { %2875 = vmatmul.mubr.bf16.gmra.mrb[40].mxu1 %v2468_v6  ;;  %v2486_v35 = vsel %vm2263_vm6, %v2467_v62, %v2485_v50  ;;  %v2196_v62 = vld [vmem:[#allocation2 + $0x200] sm:$0x7]  ;;  %v5661_v6 = vpack.c.bf16 %v7984_v1, %v7983_v19  ;;  %v3103_v1 = vrot.slane %v11006_v44, 2  ;;  %v3107_v44 = vrot.slane %v11012_v42, 2 }
 0x238   :  { %5931 = vmatmul.mubr.bf16.gmra.mrb[8].mxu0 %v5657_v2  ;;  %2884 = vmatprep.mubr.bf16.mxu1 %v2495_v20  ;;  %v2513_v56 = vsel %vm2263_vm6, %v2494_v53, %v2512_v31  ;;  %v2504_v53 = vsel %vm2263_vm6, %v2485_v50, %v2503_v23  ;;  %v5664_v2 = vpack.c.bf16 %v7986_v47, %v7985_v0  ;;  %v2517_v16 = vrot.slane %v11037_v29, 1  ;;  %v7988_v50 = vld [vmem:[#allocation2 + $0xd0] sm:$0xff] }
 0x239   :  { %5940 = vmatprep.mubr.bf16.mxu0 %v5660_v22  ;;  %v11038_v22 = vshll.u32 %v11036_v13, 16  ;;  %v2228_v28 = vpack.c.bf16 %v2196_v62, %v10294_v24  ;;  %v2531_v40 = vsel %vm2263_vm6, %v2512_v31, %v2530_v32  ;;  %v2547_v20 = vrot.slane %v2545_v25, 2  ;;  %v7999_v25 = vld [vmem:[#allocation2 + $0x148] sm:$0xff]  ;;  %v8000_v0 = vld [vmem:[#allocation2 + $0x130] sm:$0xff] }
 0x23a   :  { %v5663_v38 = vpack.c.bf16 %v7989_v52, %v7988_v50  ;;  %v5670_v62 = vpack.c.bf16 %v7999_v25, %v7998_v46  ;;  %v5669_v47 = vpack.c.bf16 %v8001_v54, %v8000_v0  ;;  %v3117_v42 = vrot.slane %v11021_v59, 2  ;;  %v8009_v52 = vld [vmem:[#allocation2 + $0x180] sm:$0xff]  ;;  %v8020_v54 = vld [vmem:[#allocation2 + $0x1d0] sm:$0xff] }
 0x23b   :  { %v2520_v18 = vrot.slane %v11038_v22, 2  ;;  %v2533_v10 = vshrl.u32 %v2228_v28, 16  ;;  %v2536_v14 = vshll.u32 %v2228_v28, 16  ;;  %v2548_v7 = vor.u32 %v2547_v20, %v2544_v37  ;;  %v8003_v22 = vld [vmem:[#allocation2 + $0x168] sm:$0xff]  ;;  %v8004_v28 = vld [vmem:[#allocation2 + $0x150] sm:$0xff]  ;;  %v8006_v20 = vld [vmem:[#allocation2 + $0x178] sm:$0xff] }
 0x23c   :  { %v3121_v59 = vrot.slane %v11027_v26, 2  ;;  %v8016_v26 = vld [vmem:[#allocation2 + $0x1b0] sm:$0xff]  ;;  %v2997_v0 = vld [vmem:[#allocation2 + $0x200] sm:$0xf] }
 0x23d   :  { %v2521_v11 = vor.u32 %v2520_v18, %v2517_v16  ;;  %v2535_v41 = vrot.slane %v2533_v10, 1  ;;  %v2538_v31 = vrot.slane %v2536_v14, 2  ;;  %v2549_v51 = vsel %vm2263_vm6, %v2530_v32, %v2548_v7  ;;  %v8002_v16 = vld [vmem:[#allocation2 + $0x158] sm:$0xff] }
 0x23f   :  { %2885 = vmatmul.mubr.bf16.gmra.mrb[44].mxu1 %v2486_v35  ;;  %v2522_v3 = vsel %vm2263_vm6, %v2503_v23, %v2521_v11  ;;  %v2539_v35 = vor.u32 %v2538_v31, %v2535_v41  ;;  %v7997_v23 = vld [vmem:[#allocation2 + $0x120] sm:$0xff]  ;;  %v8011_v41 = vld [vmem:[#allocation2 + $0x1a8] sm:$0xff] }
 0x240   :  { %5941 = vmatmul.mubr.bf16.gmra.mrb[12].mxu0 %v5659_v15  ;;  %2894 = vmatprep.mubr.bf16.mxu1 %v2513_v56  ;;  %v7990_v15 = vld [vmem:[#allocation2 + $0xf8] sm:$0xff]  ;;  %v5667_v32 = vpack.c.bf16 %v7997_v23, %v7996_v5  ;;  %v3119_v5 = vrot.slane %v11030_v36, 2  ;;  %v2998_v23 = vld [vmem:[#allocation2 + $0x208] sm:$0xf]  ;;  %v3123_v36 = vrot.slane %v11036_v13, 2 }
 0x241   :  { %5950 = vmatprep.mubr.bf16.mxu0 %v5662_v48  ;;  %v5666_v58 = vpack.c.bf16 %v7991_v4, %v7990_v15  ;;  %v5665_v48 = vpack.c.bf16 %v7993_v34, %v7992_v9  ;;  %v2540_v56 = vsel %vm2263_vm6, %v2521_v11, %v2539_v35  ;;  %v8007_v11 = vld [vmem:[#allocation2 + $0x188] sm:$0xff]  ;;  %v8012_v9 = vld [vmem:[#allocation2 + $0x190] sm:$0xff]  ;;  %v8013_v34 = vld [vmem:[#allocation2 + $0x1a0] sm:$0xff] }
 0x242   :  { %v5674_v10 = vpack.c.bf16 %v8007_v11, %v8006_v20  ;;  %v5652_v13 = vld [vmem:[#allocation2 + $0x218] sm:$0xff] }
 0x247   :  { %2895 = vmatmul.mubr.bf16.gmra.mrb[48].mxu1 %v2504_v53  ;;  %v11039_v53 = vrot.slane %v10997_v43, 2  ;;  %v5672_v43 = vpack.c.bf16 %v8003_v22, %v8002_v16  ;;  %v8022_v16 = vld [vmem:[#allocation2 + $0x208] sm:$0xff] }
 0x248   :  { %5951 = vmatmul.mubr.bf16.gmra.mrb[16].mxu0 %v5661_v6  ;;  %2904 = vmatprep.mubr.bf16.mxu1 %v2531_v40  ;;  %v3109_v6 = vrot.slane %v11009_v21, 2  ;;  %v3113_v21 = vrot.slane %v11015_v33, 2  ;;  %v8005_v40 = vld [vmem:[#allocation2 + $0x160] sm:$0xff]  ;;  %v8008_v33 = vld [vmem:[#allocation2 + $0x170] sm:$0xff]  ;;  %v5682_v22 = vpack.c.bf16 %v8022_v16, %v10286_v63 }
 0x249   :  { %5960 = vmatprep.mubr.bf16.mxu0 %v5664_v2  ;;  %v3106_v19 = vsel %vm3068_vm0, %v11039_v53, %v3105_v17  ;;  %v11040_v2 = vrot.slane %v11000_v45, 2  ;;  %v5671_v37 = vpack.c.bf16 %v8005_v40, %v8004_v28  ;;  %v3108_v45 = vsel %vm3068_vm0, %v3103_v1, %v3107_v44  ;;  %v8019_v53 = vld [vmem:[#allocation2 + $0x1e8] sm:$0xff] }
 0x24a   :  { %v3110_v18 = vsel %vm3068_vm0, %v3105_v17, %v3109_v6  ;;  %v3114_v14 = vsel %vm3068_vm0, %v3109_v6, %v3113_v21  ;;  %v3122_v17 = vsel %vm3068_vm0, %v3117_v42, %v3121_v59  ;;  %v3002_v6 = vpack.c.bf16 %v2998_v23, %v10286_v63  ;;  %v5651_v63 = vld [vmem:[#allocation2 + $0x210] sm:$0xff] }
 0x24b   :  { %v3104_v29 = vsel %vm3068_vm0, %v11040_v2, %v3103_v1 }
 0x24f   :  { %2905 = vmatmul.mubr.bf16.gmra.mrb[52].mxu1 %v2522_v3 }
 0x250   :  { %5961 = vmatmul.mubr.bf16.gmra.mrb[20].mxu0 %v5663_v38  ;;  %2914 = vmatprep.mubr.bf16.mxu1 %v2549_v51  ;;  %v5673_v38 = vpack.c.bf16 %v8009_v52, %v8008_v33 }
 0x251   :  { %5970 = vmatprep.mubr.bf16.mxu0 %v5666_v58  ;;  %v8010_v58 = vld [vmem:[#allocation2 + $0x198] sm:$0xff] }
 0x252   :  { %v5676_v31 = vpack.c.bf16 %v8011_v41, %v8010_v58 }
 0x257   :  { %2915 = vmatmul.mubr.bf16.gmra.mrb[56].mxu1 %v2540_v56 }
 0x258   :  { %5971 = vmatmul.mubr.bf16.gmra.mrb[24].mxu0 %v5665_v48  ;;  %2924 = vmatprep.mubr.bf16.mxu1 %v2548_v7  ;;  %v3111_v7 = vrot.slane %v11018_v49, 2  ;;  %v3115_v49 = vrot.slane %v11024_v12, 2  ;;  %v5675_v48 = vpack.c.bf16 %v8013_v34, %v8012_v9  ;;  %v3125_v12 = vrot.slane %v11033_v55, 2 }
 0x259   :  { %5980 = vmatprep.mubr.bf16.mxu0 %v5668_v27  ;;  %v5678_v27 = vpack.c.bf16 %v8015_v57, %v8014_v60  ;;  %v3129_v55 = vrot.slane %v3002_v6, 2 }
 0x25a   :  { %v3112_v15 = vsel %vm3068_vm0, %v3107_v44, %v3111_v7  ;;  %v3116_v56 = vsel %vm3068_vm0, %v3111_v7, %v3115_v49  ;;  %v3120_v25 = vsel %vm3068_vm0, %v3115_v49, %v3119_v5  ;;  %v3126_v1 = vsel %vm3068_vm0, %v3121_v59, %v3125_v12 }
 0x25f   :  { %2925 = vmatmul.mubr.bf16.gmra.mrb[72].mxu1 %v2539_v35  ;;  %v3118_v35 = vsel %vm3068_vm0, %v3113_v21, %v3117_v42  ;;  %v8023_v21 = vld [vmem:[#allocation2 + $0x200] sm:$0xff] }
 0x260   :  { %5981 = vmatmul.mubr.bf16.gmra.mrb[28].mxu0 %v5667_v32  ;;  %3435 = vmatprep.mubr.bf16.mxu1 %v3106_v19  ;;  %v8017_v32 = vld [vmem:[#allocation2 + $0x1c0] sm:$0xff]  ;;  %v5681_v28 = vpack.c.bf16 %v8023_v21, %v10294_v24 }
 0x261   :  { %5990 = vmatprep.mubr.bf16.mxu0 %v5670_v62  ;;  %v5677_v46 = vpack.c.bf16 %v8017_v32, %v8016_v26  ;;  %v8018_v62 = vld [vmem:[#allocation2 + $0x1d8] sm:$0xff] }
 0x262   :  { %v5680_v19 = vpack.c.bf16 %v8019_v53, %v8018_v62 }
 0x267   :  { %3436 = vmatmul.mubr.bf16.vlgmr.msra.gmra.mrb[32].mxu1 %v3104_v29  ;;  %v3124_v29 = vsel %vm3068_vm0, %v3119_v5, %v3123_v36 }
 0x268   :  { %5991 = vmatmul.mubr.bf16.gmra.mrb[32].mxu0 %v5669_v47  ;;  %3445 = vmatprep.mubr.bf16.mxu1 %v3110_v18  ;;  %v8021_v47 = vld [vmem:[#allocation2 + $0x1e0] sm:$0xff]  ;;  %v3130_v18 = vsel %vm3068_vm0, %v3125_v12, %v3129_v55 }
 0x269   :  { %6000 = vmatprep.mubr.bf16.mxu0 %v5672_v43  ;;  %v5679_v2 = vpack.c.bf16 %v8021_v47, %v8020_v54  ;;  %v3001_v43 = vpack.c.bf16 %v2997_v0, %v10294_v24  ;;  %v6131_v47 = vld [vmem:[%s10698_s2] sm:$0x3] }
 0x26b   :  { %v3127_v44 = vrot.slane %v3001_v43, 2 }
 0x26d   :  { %v3128_v40 = vsel %vm3068_vm0, %v3123_v36, %v3127_v44 }
 0x26f   :  { %3446 = vmatmul.mubr.bf16.gmra.mrb[36].mxu1 %v3108_v45  ;;  %v5683_v45 = vpack.c.bf16 %v5651_v63, %v5651_v63 }
 0x270   :  { %6001 = vmatmul.mubr.bf16.gmra.mrb[36].mxu0 %v5671_v37  ;;  %3455 = vmatprep.mubr.bf16.mxu1 %v3114_v14  ;;  %v5684_v37 = vpack.c.bf16 %v5652_v13, %v5652_v13 }
 0x271   :  { %6010 = vmatprep.mubr.bf16.mxu0 %v5674_v10 }
 0x273   :  { %v10317_v50 = vpop.f32.mrb[64].mxu0 }
 0x274   :  { %v10319_v3 = vpop.f32.mrb[65].mxu0 }
 0x275   :  { %v4813_v4 = vpop.f32.mrb[66].mxu0 }
 0x276   :  { %v4814_v51 = vpop.f32.mrb[67].mxu0 }
 0x277   :  { %3456 = vmatmul.mubr.bf16.gmra.mrb[40].mxu1 %v3112_v15 }
 0x278   :  { %6011 = vmatmul.mubr.bf16.gmra.mrb[40].mxu0 %v5673_v38  ;;  %3465 = vmatprep.mubr.bf16.mxu1 %v3118_v35 }
 0x279   :  { %6020 = vmatprep.mubr.bf16.mxu0 %v5676_v31 }
 0x27f   :  { %3466 = vmatmul.mubr.bf16.gmra.mrb[44].mxu1 %v3116_v56 }
 0x280   :  { %6021 = vmatmul.mubr.bf16.gmra.mrb[44].mxu0 %v5675_v48  ;;  %3475 = vmatprep.mubr.bf16.mxu1 %v3122_v17 }
 0x281   :  { %6030 = vmatprep.mubr.bf16.mxu0 %v5678_v27 }
 0x287   :  { %3476 = vmatmul.mubr.bf16.gmra.mrb[48].mxu1 %v3120_v25 }
 0x288   :  { %6031 = vmatmul.mubr.bf16.gmra.mrb[48].mxu0 %v5677_v46  ;;  %3485 = vmatprep.mubr.bf16.mxu1 %v3126_v1  ;;  %v6133_v46 = vlaneseq }
 0x289   :  { %6040 = vmatprep.mubr.bf16.mxu0 %v5680_v19 }
 0x28a   :  { %v6134_v25 = vshrl.u32 %v6133_v46, 7 }
 0x28c   :  { %v6135_v54 = vsub.s32 0, %v6134_v25 }
 0x28f   :  { %3486 = vmatmul.mubr.bf16.gmra.mrb[52].mxu1 %v3124_v29  ;;  %v10404_v29 = vrot.slane %v6131_v47, %v6135_v54 }
 0x290   :  { %6041 = vmatmul.mubr.bf16.gmra.mrb[52].mxu0 %v5679_v2  ;;  %3495 = vmatprep.mubr.bf16.mxu1 %v3130_v18  ;;  %v6139_v2 = vsub.s32 1, %v6134_v25 }
 0x291   :  { %6050 = vmatprep.mubr.bf16.mxu0 %v5682_v22 }
 0x292   :  { %v10406_v22 = vrot.slane %v6131_v47, %v6139_v2 }
 0x297   :  { %3496 = vmatmul.mubr.bf16.gmra.mrb[56].mxu1 %v3128_v40 }
 0x298   :  { %6051 = vmatmul.mubr.bf16.gmra.mrb[56].mxu0 %v5681_v28  ;;  %3505 = vmatprep.mubr.bf16.mxu1 %v3129_v55 }
 0x299   :  { %6060 = vmatprep.mubr.bf16.mxu0 %v5684_v37 }
 0x29f   :  { %3506 = vmatmul.mubr.bf16.gmra.mrb[76].mxu1 %v3127_v44 }
 0x2a0   :  { %6061 = vmatmul.mubr.bf16.gmra.mrb[72].mxu0 %v5683_v45 }
 0x2b2   :  { %v2065_v20 = vpop.f32.mrb[68].mxu1 }
 0x2b3   :  { %v10340_v11 = vadd.f32 %v2065_v20, %v10261_v30  ;;  %v2067_v10 = vpop.f32.mrb[69].mxu1 }
 0x2b4   :  { %v10343_v14 = vadd.f32 %v2067_v10, %v10265_v8  ;;  %v2069_v24 = vpop.f32.mrb[70].mxu1 }
 0x2b5   :  { %v2070_v7 = vpop.f32.mrb[71].mxu1 }
 0x2ba   :  { %v2776_v42 = vpop.f32.mrb[0].mxu1 }
 0x2bb   :  { %v2778_v33 = vpop.f32.mrb[1].mxu1 }
 0x2bc   :  { %v2780_v52 = vpop.f32.mrb[2].mxu1 }
 0x2bd   :  { %v2782_v38 = vpop.f32.mrb[3].mxu1 }
 0x2c2   :  { %v2786_v15 = vpop.f32.mrb[4].mxu1 }
 0x2c3   :  { %v2788_v4 = vpop.f32.mrb[5].mxu1 }
 0x2c4   :  { %v10345_v58 = vpop.f32.mrb[6].mxu1 }
 0x2c5   :  { %v10347_v41 = vpop.f32.mrb[7].mxu1 }
 0x2ca   :  { %v10349_v31 = vpop.f32.mrb[8].mxu1 }
 0x2cb   :  { %v10351_v30 = vpop.f32.mrb[9].mxu1 }
 0x2cc   :  { %v10353_v51 = vpop.f32.mrb[10].mxu1 }
 0x2cd   :  { %v10355_v8 = vpop.f32.mrb[11].mxu1 }
 0x2d2   :  { %v10357_v35 = vpop.f32.mrb[12].mxu1 }
 0x2d3   :  { %v10359_v49 = vpop.f32.mrb[13].mxu1 }
 0x2d4   :  { %v10361_v59 = vpop.f32.mrb[14].mxu1 }
 0x2d5   :  { %v10363_v9 = vpop.f32.mrb[15].mxu1 }
 0x2da   :  { %v10365_v34 = vpop.f32.mrb[16].mxu1 }
 0x2db   :  { %v10367_v48 = vpop.f32.mrb[17].mxu1 }
 0x2dc   :  { %v10369_v56 = vpop.f32.mrb[18].mxu1 }
 0x2dd   :  { %v10371_v60 = vpop.f32.mrb[19].mxu1 }
 0x2e2   :  { %v10373_v57 = vpop.f32.mrb[20].mxu1 }
 0x2e3   :  { %v10375_v27 = vpop.f32.mrb[21].mxu1 }
 0x2e4   :  { %v10377_v17 = vpop.f32.mrb[22].mxu1 }
 0x2e5   :  { %v10379_v5 = vpop.f32.mrb[23].mxu1 }
 0x2ea   :  { %v10381_v12 = vpop.f32.mrb[24].mxu1 }
 0x2eb   :  { %v10383_v23 = vpop.f32.mrb[25].mxu1 }
 0x2ec   :  { %v10385_v26 = vpop.f32.mrb[26].mxu1 }
 0x2ed   :  { %v10387_v32 = vpop.f32.mrb[27].mxu1 }
 0x2f2   :  { %v10389_v62 = vpop.f32.mrb[28].mxu1 }
 0x2f3   :  { %v10391_v53 = vpop.f32.mrb[68].mxu0  ;;  %v10393_v19 = vpop.f32.mrb[29].mxu1 }
 0x2f4   :  { %v10395_v1 = vpop.f32.mrb[69].mxu0  ;;  %v10397_v6 = vpop.f32.mrb[30].mxu1 }
 0x2f5   :  { %v5586_v36 = vpop.f32.mrb[70].mxu0  ;;  %v10399_v55 = vpop.f32.mrb[31].mxu1 }
 0x2f6   :  { %v5587_v0 = vpop.f32.mrb[71].mxu0 }
 0x2fb   :  { %v5912_v16 = vpop.f32.mrb[0].mxu0 }
 0x2fc   :  { %v7014_v43 = vadd.f32 %v5912_v16, %v2776_v42  ;;  %v5914_v18 = vpop.f32.mrb[1].mxu0 }
 0x2fd   :  { %v7015_v44 = vadd.f32 %v5914_v18, %v2778_v33  ;;  %v5916_v13 = vpop.f32.mrb[2].mxu0 }
 0x2fe   :  { %v6143_v21 = vadd.f32 %v7014_v43, %v10404_v29  ;;  %v7016_v28 = vadd.f32 %v5916_v13, %v2780_v52  ;;  %v5918_v40 = vpop.f32.mrb[3].mxu0 }
 0x2ff   :  { %v6144_v37 = vadd.f32 %v7015_v44, %v10406_v22  ;;  %v7017_v63 = vadd.f32 %v5918_v40, %v2782_v38 }
 0x300   :  { %v6205_v45 = vmax.f32 %v6143_v21, 0.0  ;;  %v6145_v20 = vadd.f32 %v7016_v28, %v10404_v29 }
 0x301   :  { %v6206_v10 = vmax.f32 %v6144_v37, 0.0  ;;  %v6146_v24 = vadd.f32 %v7017_v63, %v10406_v22 }
 0x302   :  { %6267 = vst [vmem:[%s10699_s3] sm:$0xff] %v6205_v45  ;;  %v6207_v7 = vmax.f32 %v6145_v20, 0.0 }
 0x303   :  { %6268 = vst [vmem:[%s10699_s3 + $0x8] sm:$0xff] %v6206_v10  ;;  %v6208_v42 = vmax.f32 %v6146_v24, 0.0  ;;  %v5922_v33 = vpop.f32.mrb[4].mxu0 }
 0x304   :  { %6269 = vst [vmem:[%s10699_s3 + $0x10] sm:$0xff] %v6207_v7  ;;  %v7018_v52 = vadd.f32 %v5922_v33, %v2786_v15  ;;  %v5924_v38 = vpop.f32.mrb[5].mxu0 }
 0x305   :  { %6270 = vst [vmem:[%s10699_s3 + $0x18] sm:$0xff] %v6208_v42  ;;  %v7019_v46 = vadd.f32 %v5924_v38, %v2788_v4  ;;  %v5926_v25 = vpop.f32.mrb[6].mxu0 }
 0x306   :  { %v6147_v36 = vadd.f32 %v7018_v52, %v10404_v29  ;;  %v7020_v0 = vadd.f32 %v5926_v25, %v10345_v58  ;;  %v5928_v54 = vpop.f32.mrb[7].mxu0 }
 0x307   :  { %v6148_v47 = vadd.f32 %v7019_v46, %v10406_v22  ;;  %v7021_v2 = vadd.f32 %v5928_v54, %v10347_v41 }
 0x308   :  { %v6209_v16 = vmax.f32 %v6147_v36, 0.0  ;;  %v6149_v43 = vadd.f32 %v7020_v0, %v10404_v29 }
 0x309   :  { %v6210_v15 = vmax.f32 %v6148_v47, 0.0  ;;  %v6150_v18 = vadd.f32 %v7021_v2, %v10406_v22 }
 0x30a   :  { %6271 = vst [vmem:[%s10699_s3 + $0x20] sm:$0xff] %v6209_v16  ;;  %v6211_v4 = vmax.f32 %v6149_v43, 0.0 }
 0x30b   :  { %6272 = vst [vmem:[%s10699_s3 + $0x28] sm:$0xff] %v6210_v15  ;;  %v6212_v58 = vmax.f32 %v6150_v18, 0.0  ;;  %v5932_v44 = vpop.f32.mrb[8].mxu0 }
 0x30c   :  { %6273 = vst [vmem:[%s10699_s3 + $0x30] sm:$0xff] %v6211_v4  ;;  %v7022_v41 = vadd.f32 %v5932_v44, %v10349_v31  ;;  %v5934_v13 = vpop.f32.mrb[9].mxu0 }
 0x30d   :  { %6274 = vst [vmem:[%s10699_s3 + $0x38] sm:$0xff] %v6212_v58  ;;  %v7023_v21 = vadd.f32 %v5934_v13, %v10351_v30  ;;  %v5936_v28 = vpop.f32.mrb[10].mxu0 }
 0x30e   :  { %v6151_v40 = vadd.f32 %v7022_v41, %v10404_v29  ;;  %v7024_v37 = vadd.f32 %v5936_v28, %v10353_v51  ;;  %v5938_v63 = vpop.f32.mrb[11].mxu0 }
 0x30f   :  { %v6152_v45 = vadd.f32 %v7023_v21, %v10406_v22  ;;  %v7025_v20 = vadd.f32 %v5938_v63, %v10355_v8 }
 0x310   :  { %v6213_v10 = vmax.f32 %v6151_v40, 0.0  ;;  %v6153_v31 = vadd.f32 %v7024_v37, %v10404_v29 }
 0x311   :  { %v6214_v24 = vmax.f32 %v6152_v45, 0.0  ;;  %v6154_v7 = vadd.f32 %v7025_v20, %v10406_v22 }
 0x312   :  { %6275 = vst [vmem:[%s10699_s3 + $0x40] sm:$0xff] %v6213_v10  ;;  %v6215_v30 = vmax.f32 %v6153_v31, 0.0 }
 0x313   :  { %6276 = vst [vmem:[%s10699_s3 + $0x48] sm:$0xff] %v6214_v24  ;;  %v6216_v51 = vmax.f32 %v6154_v7, 0.0  ;;  %v5942_v42 = vpop.f32.mrb[12].mxu0 }
 0x314   :  { %6277 = vst [vmem:[%s10699_s3 + $0x50] sm:$0xff] %v6215_v30  ;;  %v7026_v8 = vadd.f32 %v5942_v42, %v10357_v35  ;;  %v5944_v33 = vpop.f32.mrb[13].mxu0 }
 0x315   :  { %6278 = vst [vmem:[%s10699_s3 + $0x58] sm:$0xff] %v6216_v51  ;;  %v7027_v52 = vadd.f32 %v5944_v33, %v10359_v49  ;;  %v5946_v38 = vpop.f32.mrb[14].mxu0 }
 0x316   :  { %v6155_v46 = vadd.f32 %v7026_v8, %v10404_v29  ;;  %v7028_v25 = vadd.f32 %v5946_v38, %v10361_v59  ;;  %v5948_v36 = vpop.f32.mrb[15].mxu0 }
 0x317   :  { %v6156_v0 = vadd.f32 %v7027_v52, %v10406_v22  ;;  %v7029_v54 = vadd.f32 %v5948_v36, %v10363_v9 }
 0x318   :  { %v6217_v47 = vmax.f32 %v6155_v46, 0.0  ;;  %v6157_v35 = vadd.f32 %v7028_v25, %v10404_v29 }
 0x319   :  { %v6218_v2 = vmax.f32 %v6156_v0, 0.0  ;;  %v6158_v16 = vadd.f32 %v7029_v54, %v10406_v22 }
 0x31a   :  { %6279 = vst [vmem:[%s10699_s3 + $0x60] sm:$0xff] %v6217_v47  ;;  %v6219_v49 = vmax.f32 %v6157_v35, 0.0 }
 0x31b   :  { %6280 = vst [vmem:[%s10699_s3 + $0x68] sm:$0xff] %v6218_v2  ;;  %v6220_v59 = vmax.f32 %v6158_v16, 0.0  ;;  %v5952_v43 = vpop.f32.mrb[16].mxu0 }
 0x31c   :  { %6281 = vst [vmem:[%s10699_s3 + $0x70] sm:$0xff] %v6219_v49  ;;  %v7030_v9 = vadd.f32 %v5952_v43, %v10365_v34  ;;  %v5954_v15 = vpop.f32.mrb[17].mxu0 }
 0x31d   :  { %6282 = vst [vmem:[%s10699_s3 + $0x78] sm:$0xff] %v6220_v59  ;;  %v7031_v18 = vadd.f32 %v5954_v15, %v10367_v48  ;;  %v5956_v4 = vpop.f32.mrb[18].mxu0 }
 0x31e   :  { %v6159_v58 = vadd.f32 %v7030_v9, %v10404_v29  ;;  %v7032_v44 = vadd.f32 %v5956_v4, %v10369_v56  ;;  %v5958_v41 = vpop.f32.mrb[19].mxu0 }
 0x31f   :  { %v6160_v13 = vadd.f32 %v7031_v18, %v10406_v22  ;;  %v7033_v21 = vadd.f32 %v5958_v41, %v10371_v60 }
 0x320   :  { %v6221_v28 = vmax.f32 %v6159_v58, 0.0  ;;  %v6161_v34 = vadd.f32 %v7032_v44, %v10404_v29 }
 0x321   :  { %v6222_v40 = vmax.f32 %v6160_v13, 0.0  ;;  %v6162_v37 = vadd.f32 %v7033_v21, %v10406_v22 }
 0x322   :  { %6283 = vst [vmem:[%s10699_s3 + $0x80] sm:$0xff] %v6221_v28  ;;  %v6223_v48 = vmax.f32 %v6161_v34, 0.0 }
 0x323   :  { %6284 = vst [vmem:[%s10699_s3 + $0x88] sm:$0xff] %v6222_v40  ;;  %v6224_v56 = vmax.f32 %v6162_v37, 0.0  ;;  %v5962_v63 = vpop.f32.mrb[20].mxu0 }
 0x324   :  { %6285 = vst [vmem:[%s10699_s3 + $0x90] sm:$0xff] %v6223_v48  ;;  %v7034_v60 = vadd.f32 %v5962_v63, %v10373_v57  ;;  %v5964_v45 = vpop.f32.mrb[21].mxu0 }
 0x325   :  { %6286 = vst [vmem:[%s10699_s3 + $0x98] sm:$0xff] %v6224_v56  ;;  %v7035_v20 = vadd.f32 %v5964_v45, %v10375_v27  ;;  %v5966_v10 = vpop.f32.mrb[22].mxu0 }
 0x326   :  { %v6163_v31 = vadd.f32 %v7034_v60, %v10404_v29  ;;  %v7036_v24 = vadd.f32 %v5966_v10, %v10377_v17  ;;  %v5968_v7 = vpop.f32.mrb[23].mxu0 }
 0x327   :  { %v6164_v30 = vadd.f32 %v7035_v20, %v10406_v22  ;;  %v7037_v51 = vadd.f32 %v5968_v7, %v10379_v5 }
 0x328   :  { %v6225_v42 = vmax.f32 %v6163_v31, 0.0  ;;  %v6165_v57 = vadd.f32 %v7036_v24, %v10404_v29 }
 0x329   :  { %v6226_v8 = vmax.f32 %v6164_v30, 0.0  ;;  %v6166_v33 = vadd.f32 %v7037_v51, %v10406_v22 }
 0x32a   :  { %6287 = vst [vmem:[%s10699_s3 + $0xa0] sm:$0xff] %v6225_v42  ;;  %v6227_v27 = vmax.f32 %v6165_v57, 0.0 }
 0x32b   :  { %6288 = vst [vmem:[%s10699_s3 + $0xa8] sm:$0xff] %v6226_v8  ;;  %v6228_v17 = vmax.f32 %v6166_v33, 0.0  ;;  %v5972_v52 = vpop.f32.mrb[24].mxu0 }
 0x32c   :  { %6289 = vst [vmem:[%s10699_s3 + $0xb0] sm:$0xff] %v6227_v27  ;;  %v7038_v5 = vadd.f32 %v5972_v52, %v10381_v12  ;;  %v5974_v38 = vpop.f32.mrb[25].mxu0 }
 0x32d   :  { %6290 = vst [vmem:[%s10699_s3 + $0xb8] sm:$0xff] %v6228_v17  ;;  %v7039_v46 = vadd.f32 %v5974_v38, %v10383_v23  ;;  %v5976_v25 = vpop.f32.mrb[26].mxu0 }
 0x32e   :  { %v6167_v36 = vadd.f32 %v7038_v5, %v10404_v29  ;;  %v7040_v0 = vadd.f32 %v5976_v25, %v10385_v26  ;;  %v5978_v54 = vpop.f32.mrb[27].mxu0 }
 0x32f   :  { %v6168_v47 = vadd.f32 %v7039_v46, %v10406_v22  ;;  %v7041_v35 = vadd.f32 %v5978_v54, %v10387_v32 }
 0x330   :  { %v6229_v2 = vmax.f32 %v6167_v36, 0.0  ;;  %v6169_v12 = vadd.f32 %v7040_v0, %v10404_v29 }
 0x331   :  { %v6230_v16 = vmax.f32 %v6168_v47, 0.0  ;;  %v6170_v49 = vadd.f32 %v7041_v35, %v10406_v22 }
 0x332   :  { %6291 = vst [vmem:[%s10699_s3 + $0xc0] sm:$0xff] %v6229_v2  ;;  %v6231_v23 = vmax.f32 %v6169_v12, 0.0  ;;  %v2926_v59 = vpop.f32.mrb[72].mxu1 }
 0x333   :  { %6292 = vst [vmem:[%s10699_s3 + $0xc8] sm:$0xff] %v6230_v16  ;;  %v6232_v26 = vmax.f32 %v6170_v49, 0.0  ;;  %v5982_v43 = vpop.f32.mrb[28].mxu0  ;;  %v10540_v32 = vadd.f32 %v2926_v59, %v10340_v11  ;;  %v2928_v15 = vpop.f32.mrb[73].mxu1 }
 0x334   :  { %6293 = vst [vmem:[%s10699_s3 + $0xd0] sm:$0xff] %v6231_v23  ;;  %v7042_v9 = vadd.f32 %v5982_v43, %v10389_v62  ;;  %v5984_v18 = vpop.f32.mrb[29].mxu0  ;;  %v10547_v4 = vadd.f32 %v2928_v15, %v10343_v14  ;;  %v2930_v44 = vpop.f32.mrb[74].mxu1 }
 0x335   :  { %6294 = vst [vmem:[%s10699_s3 + $0xd8] sm:$0xff] %v6232_v26  ;;  %v7043_v58 = vadd.f32 %v5984_v18, %v10393_v19  ;;  %v5986_v41 = vpop.f32.mrb[30].mxu0  ;;  %v2931_v21 = vpop.f32.mrb[75].mxu1 }
 0x336   :  { %v6171_v13 = vadd.f32 %v7042_v9, %v10404_v29  ;;  %v7044_v11 = vadd.f32 %v5986_v41, %v10397_v6  ;;  %v5988_v28 = vpop.f32.mrb[31].mxu0 }
 0x337   :  { %v6172_v62 = vadd.f32 %v7043_v58, %v10406_v22  ;;  %v7045_v34 = vadd.f32 %v5988_v28, %v10399_v55 }
 0x338   :  { %v6233_v40 = vmax.f32 %v6171_v13, 0.0  ;;  %v6173_v37 = vadd.f32 %v7044_v11, %v10404_v29 }
 0x339   :  { %v6234_v48 = vmax.f32 %v6172_v62, 0.0  ;;  %v6174_v14 = vadd.f32 %v7045_v34, %v10406_v22 }
 0x33a   :  { %6295 = vst [vmem:[%s10699_s3 + $0xe0] sm:$0xff] %v6233_v40  ;;  %v6235_v19 = vmax.f32 %v6173_v37, 0.0  ;;  %v3437_v56 = vpop.f32.mrb[32].mxu1 }
 0x33b   :  { %6296 = vst [vmem:[%s10699_s3 + $0xe8] sm:$0xff] %v6234_v48  ;;  %v6236_v6 = vmax.f32 %v6174_v14, 0.0  ;;  %v5992_v63 = vpop.f32.mrb[32].mxu0  ;;  %v3439_v60 = vpop.f32.mrb[33].mxu1 }
 0x33c   :  { %6297 = vst [vmem:[%s10699_s3 + $0xf0] sm:$0xff] %v6235_v19  ;;  %v7046_v55 = vadd.f32 %v5992_v63, %v3437_v56  ;;  %v5994_v45 = vpop.f32.mrb[33].mxu0  ;;  %v3441_v10 = vpop.f32.mrb[34].mxu1 }
 0x33d   :  { %6298 = vst [vmem:[%s10699_s3 + $0xf8] sm:$0xff] %v6236_v6  ;;  %v7047_v20 = vadd.f32 %v5994_v45, %v3439_v60  ;;  %v5996_v31 = vpop.f32.mrb[34].mxu0  ;;  %v3443_v30 = vpop.f32.mrb[35].mxu1 }
 0x33e   :  { %v6175_v24 = vadd.f32 %v7046_v55, %v10404_v29  ;;  %v7048_v7 = vadd.f32 %v5996_v31, %v3441_v10  ;;  %v5998_v51 = vpop.f32.mrb[35].mxu0 }
 0x33f   :  { %v6176_v42 = vadd.f32 %v7047_v20, %v10406_v22  ;;  %v7049_v57 = vadd.f32 %v5998_v51, %v3443_v30 }
 0x340   :  { %v6237_v8 = vmax.f32 %v6175_v24, 0.0  ;;  %v6177_v33 = vadd.f32 %v7048_v7, %v10404_v29 }
 0x341   :  { %v6238_v27 = vmax.f32 %v6176_v42, 0.0  ;;  %v6178_v17 = vadd.f32 %v7049_v57, %v10406_v22 }
 0x342   :  { %6299 = vst [vmem:[%s10699_s3 + $0x100] sm:$0xff] %v6237_v8  ;;  %v6239_v52 = vmax.f32 %v6177_v33, 0.0  ;;  %v3447_v38 = vpop.f32.mrb[36].mxu1 }
 0x343   :  { %6300 = vst [vmem:[%s10699_s3 + $0x108] sm:$0xff] %v6238_v27  ;;  %v6240_v5 = vmax.f32 %v6178_v17, 0.0  ;;  %v6002_v46 = vpop.f32.mrb[36].mxu0  ;;  %v3449_v36 = vpop.f32.mrb[37].mxu1 }
 0x344   :  { %6301 = vst [vmem:[%s10699_s3 + $0x110] sm:$0xff] %v6239_v52  ;;  %v7050_v25 = vadd.f32 %v6002_v46, %v3447_v38  ;;  %v6004_v0 = vpop.f32.mrb[37].mxu0  ;;  %v3451_v47 = vpop.f32.mrb[38].mxu1 }
 0x345   :  { %6302 = vst [vmem:[%s10699_s3 + $0x118] sm:$0xff] %v6240_v5  ;;  %v7051_v54 = vadd.f32 %v6004_v0, %v3449_v36  ;;  %v6006_v35 = vpop.f32.mrb[38].mxu0  ;;  %v3453_v16 = vpop.f32.mrb[39].mxu1 }
 0x346   :  { %v6179_v2 = vadd.f32 %v7050_v25, %v10404_v29  ;;  %v7052_v12 = vadd.f32 %v6006_v35, %v3451_v47  ;;  %v6008_v49 = vpop.f32.mrb[39].mxu0 }
 0x347   :  { %v6180_v23 = vadd.f32 %v7051_v54, %v10406_v22  ;;  %v7053_v26 = vadd.f32 %v6008_v49, %v3453_v16 }
 0x348   :  { %v6241_v59 = vmax.f32 %v6179_v2, 0.0  ;;  %v6181_v43 = vadd.f32 %v7052_v12, %v10404_v29 }
 0x349   :  { %v6242_v9 = vmax.f32 %v6180_v23, 0.0  ;;  %v6182_v15 = vadd.f32 %v7053_v26, %v10406_v22 }
 0x34a   :  { %6303 = vst [vmem:[%s10699_s3 + $0x120] sm:$0xff] %v6241_v59  ;;  %v6243_v18 = vmax.f32 %v6181_v43, 0.0  ;;  %v3457_v44 = vpop.f32.mrb[40].mxu1 }
 0x34b   :  { %6304 = vst [vmem:[%s10699_s3 + $0x128] sm:$0xff] %v6242_v9  ;;  %v6244_v58 = vmax.f32 %v6182_v15, 0.0  ;;  %v6012_v41 = vpop.f32.mrb[40].mxu0  ;;  %v3459_v11 = vpop.f32.mrb[41].mxu1 }
 0x34c   :  { %6305 = vst [vmem:[%s10699_s3 + $0x130] sm:$0xff] %v6243_v18  ;;  %v7054_v13 = vadd.f32 %v6012_v41, %v3457_v44  ;;  %v6014_v21 = vpop.f32.mrb[41].mxu0  ;;  %v3461_v62 = vpop.f32.mrb[42].mxu1 }
 0x34d   :  { %6306 = vst [vmem:[%s10699_s3 + $0x138] sm:$0xff] %v6244_v58  ;;  %v7055_v28 = vadd.f32 %v6014_v21, %v3459_v11  ;;  %v6016_v34 = vpop.f32.mrb[42].mxu0  ;;  %v3463_v48 = vpop.f32.mrb[43].mxu1 }
 0x34e   :  { %v6183_v40 = vadd.f32 %v7054_v13, %v10404_v29  ;;  %v7056_v37 = vadd.f32 %v6016_v34, %v3461_v62  ;;  %v6018_v14 = vpop.f32.mrb[43].mxu0 }
 0x34f   :  { %v6184_v19 = vadd.f32 %v7055_v28, %v10406_v22  ;;  %v7057_v6 = vadd.f32 %v6018_v14, %v3463_v48 }
 0x350   :  { %v6245_v56 = vmax.f32 %v6183_v40, 0.0  ;;  %v6185_v63 = vadd.f32 %v7056_v37, %v10404_v29 }
 0x351   :  { %v6246_v55 = vmax.f32 %v6184_v19, 0.0  ;;  %v6186_v60 = vadd.f32 %v7057_v6, %v10406_v22 }
 0x352   :  { %6307 = vst [vmem:[%s10699_s3 + $0x140] sm:$0xff] %v6245_v56  ;;  %v6247_v45 = vmax.f32 %v6185_v63, 0.0  ;;  %v3467_v10 = vpop.f32.mrb[44].mxu1 }
 0x353   :  { %6308 = vst [vmem:[%s10699_s3 + $0x148] sm:$0xff] %v6246_v55  ;;  %v6248_v20 = vmax.f32 %v6186_v60, 0.0  ;;  %v6022_v31 = vpop.f32.mrb[44].mxu0  ;;  %v3469_v7 = vpop.f32.mrb[45].mxu1 }
 0x354   :  { %6309 = vst [vmem:[%s10699_s3 + $0x150] sm:$0xff] %v6247_v45  ;;  %v7058_v24 = vadd.f32 %v6022_v31, %v3467_v10  ;;  %v6024_v30 = vpop.f32.mrb[45].mxu0  ;;  %v3471_v42 = vpop.f32.mrb[46].mxu1 }
 0x355   :  { %6310 = vst [vmem:[%s10699_s3 + $0x158] sm:$0xff] %v6248_v20  ;;  %v7059_v51 = vadd.f32 %v6024_v30, %v3469_v7  ;;  %v6026_v57 = vpop.f32.mrb[46].mxu0  ;;  %v3473_v27 = vpop.f32.mrb[47].mxu1 }
 0x356   :  { %v6187_v8 = vadd.f32 %v7058_v24, %v10404_v29  ;;  %v7060_v33 = vadd.f32 %v6026_v57, %v3471_v42  ;;  %v6028_v17 = vpop.f32.mrb[47].mxu0 }
 0x357   :  { %v6188_v52 = vadd.f32 %v7059_v51, %v10406_v22  ;;  %v7061_v5 = vadd.f32 %v6028_v17, %v3473_v27 }
 0x358   :  { %v6249_v38 = vmax.f32 %v6187_v8, 0.0  ;;  %v6189_v46 = vadd.f32 %v7060_v33, %v10404_v29 }
 0x359   :  { %v6250_v25 = vmax.f32 %v6188_v52, 0.0  ;;  %v6190_v36 = vadd.f32 %v7061_v5, %v10406_v22 }
 0x35a   :  { %6311 = vst [vmem:[%s10699_s3 + $0x160] sm:$0xff] %v6249_v38  ;;  %v6251_v0 = vmax.f32 %v6189_v46, 0.0  ;;  %v3477_v47 = vpop.f32.mrb[48].mxu1 }
 0x35b   :  { %6312 = vst [vmem:[%s10699_s3 + $0x168] sm:$0xff] %v6250_v25  ;;  %v6252_v54 = vmax.f32 %v6190_v36, 0.0  ;;  %v6032_v35 = vpop.f32.mrb[48].mxu0  ;;  %v3479_v12 = vpop.f32.mrb[49].mxu1 }
 0x35c   :  { %6313 = vst [vmem:[%s10699_s3 + $0x170] sm:$0xff] %v6251_v0  ;;  %v7062_v2 = vadd.f32 %v6032_v35, %v3477_v47  ;;  %v6034_v16 = vpop.f32.mrb[49].mxu0  ;;  %v3481_v23 = vpop.f32.mrb[50].mxu1 }
 0x35d   :  { %6314 = vst [vmem:[%s10699_s3 + $0x178] sm:$0xff] %v6252_v54  ;;  %v7063_v49 = vadd.f32 %v6034_v16, %v3479_v12  ;;  %v6036_v26 = vpop.f32.mrb[50].mxu0  ;;  %v3483_v9 = vpop.f32.mrb[51].mxu1 }
 0x35e   :  { %v6191_v59 = vadd.f32 %v7062_v2, %v10404_v29  ;;  %v7064_v43 = vadd.f32 %v6036_v26, %v3481_v23  ;;  %v6038_v15 = vpop.f32.mrb[51].mxu0 }
 0x35f   :  { %v6192_v18 = vadd.f32 %v7063_v49, %v10406_v22  ;;  %v7065_v58 = vadd.f32 %v6038_v15, %v3483_v9 }
 0x360   :  { %v6253_v44 = vmax.f32 %v6191_v59, 0.0  ;;  %v6193_v41 = vadd.f32 %v7064_v43, %v10404_v29 }
 0x361   :  { %v6254_v13 = vmax.f32 %v6192_v18, 0.0  ;;  %v6194_v11 = vadd.f32 %v7065_v58, %v10406_v22 }
 0x362   :  { %6315 = vst [vmem:[%s10699_s3 + $0x180] sm:$0xff] %v6253_v44  ;;  %v6255_v21 = vmax.f32 %v6193_v41, 0.0  ;;  %v3487_v62 = vpop.f32.mrb[52].mxu1 }
 0x363   :  { %6316 = vst [vmem:[%s10699_s3 + $0x188] sm:$0xff] %v6254_v13  ;;  %v6256_v28 = vmax.f32 %v6194_v11, 0.0  ;;  %v6042_v34 = vpop.f32.mrb[52].mxu0  ;;  %v3489_v37 = vpop.f32.mrb[53].mxu1 }
 0x364   :  { %6317 = vst [vmem:[%s10699_s3 + $0x190] sm:$0xff] %v6255_v21  ;;  %v7066_v40 = vadd.f32 %v6042_v34, %v3487_v62  ;;  %v6044_v48 = vpop.f32.mrb[53].mxu0  ;;  %v3491_v19 = vpop.f32.mrb[54].mxu1 }
 0x365   :  { %6318 = vst [vmem:[%s10699_s3 + $0x198] sm:$0xff] %v6256_v28  ;;  %v7067_v14 = vadd.f32 %v6044_v48, %v3489_v37  ;;  %v6046_v6 = vpop.f32.mrb[54].mxu0  ;;  %v3493_v55 = vpop.f32.mrb[55].mxu1 }
 0x366   :  { %v6195_v56 = vadd.f32 %v7066_v40, %v10404_v29  ;;  %v7068_v63 = vadd.f32 %v6046_v6, %v3491_v19  ;;  %v6048_v60 = vpop.f32.mrb[55].mxu0 }
 0x367   :  { %v6196_v45 = vadd.f32 %v7067_v14, %v10406_v22  ;;  %v7069_v20 = vadd.f32 %v6048_v60, %v3493_v55 }
 0x368   :  { %v6257_v10 = vmax.f32 %v6195_v56, 0.0  ;;  %v6197_v31 = vadd.f32 %v7068_v63, %v10404_v29 }
 0x369   :  { %v6258_v24 = vmax.f32 %v6196_v45, 0.0  ;;  %v6198_v7 = vadd.f32 %v7069_v20, %v10406_v22 }
 0x36a   :  { %6319 = vst [vmem:[%s10699_s3 + $0x1a0] sm:$0xff] %v6257_v10  ;;  %v6259_v30 = vmax.f32 %v6197_v31, 0.0  ;;  %v3497_v42 = vpop.f32.mrb[56].mxu1 }
 0x36b   :  { %6320 = vst [vmem:[%s10699_s3 + $0x1a8] sm:$0xff] %v6258_v24  ;;  %v6260_v51 = vmax.f32 %v6198_v7, 0.0  ;;  %v6052_v57 = vpop.f32.mrb[56].mxu0  ;;  %v3499_v33 = vpop.f32.mrb[57].mxu1 }
 0x36c   :  { %6321 = vst [vmem:[%s10699_s3 + $0x1b0] sm:$0xff] %v6259_v30  ;;  %v7070_v8 = vadd.f32 %v6052_v57, %v3497_v42  ;;  %v6054_v27 = vpop.f32.mrb[57].mxu0  ;;  %v3501_v52 = vpop.f32.mrb[58].mxu1 }
 0x36d   :  { %6322 = vst [vmem:[%s10699_s3 + $0x1b8] sm:$0xff] %v6260_v51  ;;  %v7071_v17 = vadd.f32 %v6054_v27, %v3499_v33  ;;  %v6056_v5 = vpop.f32.mrb[58].mxu0  ;;  %v3503_v25 = vpop.f32.mrb[59].mxu1 }
 0x36e   :  { %v6199_v38 = vadd.f32 %v7070_v8, %v10404_v29  ;;  %v7072_v46 = vadd.f32 %v6056_v5, %v3501_v52  ;;  %v6058_v36 = vpop.f32.mrb[59].mxu0 }
 0x36f   :  { %v6200_v0 = vadd.f32 %v7071_v17, %v10406_v22  ;;  %v7073_v54 = vadd.f32 %v6058_v36, %v3503_v25 }
 0x370   :  { %v6261_v47 = vmax.f32 %v6199_v38, 0.0  ;;  %v6201_v35 = vadd.f32 %v7072_v46, %v10404_v29 }
 0x371   :  { %v6262_v2 = vmax.f32 %v6200_v0, 0.0  ;;  %v6202_v12 = vadd.f32 %v7073_v54, %v10406_v22 }
 0x372   :  { %6323 = vst [vmem:[%s10699_s3 + $0x1c0] sm:$0xff] %v6261_v47  ;;  %v6263_v16 = vmax.f32 %v6201_v35, 0.0  ;;  %v3507_v23 = vpop.f32.mrb[76].mxu1 }
 0x373   :  { %6324 = vst [vmem:[%s10699_s3 + $0x1c8] sm:$0xff] %v6262_v2  ;;  %v6264_v49 = vmax.f32 %v6202_v12, 0.0  ;;  %v6062_v26 = vpop.f32.mrb[72].mxu0  ;;  %v3574_v59 = vadd.f32 %v3507_v23, %v10540_v32  ;;  %v3509_v43 = vpop.f32.mrb[77].mxu1 }
 0x374   :  { %6325 = vst [vmem:[%s10699_s3 + $0x1d0] sm:$0xff] %v6263_v16  ;;  %v6064_v9 = vpop.f32.mrb[73].mxu0  ;;  %v3575_v15 = vadd.f32 %v3509_v43, %v10547_v4  ;;  %v3511_v18 = vpop.f32.mrb[78].mxu1 }
 0x375   :  { %6326 = vst [vmem:[%s10699_s3 + $0x1d8] sm:$0xff] %v6264_v49  ;;  %v6066_v58 = vpop.f32.mrb[74].mxu0  ;;  %v4207_v44 = vadd.f32 %v10081_v39, %v3574_v59  ;;  %v3512_v41 = vpop.f32.mrb[79].mxu1 }
 0x376   :  { %v6067_v13 = vpop.f32.mrb[75].mxu0  ;;  %v4208_v11 = vadd.f32 %v10086_v61, %v3575_v15 }
 0x377   :  { %v4876_v21 = vadd.f32 %v10317_v50, %v4207_v44 }
 0x378   :  { %v4877_v32 = vadd.f32 %v10319_v3, %v4208_v11 }
 0x379   :  { %v5649_v28 = vadd.f32 %v10391_v53, %v4876_v21 }
 0x37a   :  { %v5650_v62 = vadd.f32 %v10395_v1, %v4877_v32 }
 0x37b   :  { %v6129_v34 = vadd.f32 %v6062_v26, %v5649_v28 }
 0x37c   :  { %v6130_v40 = vadd.f32 %v6064_v9, %v5650_v62 }
 0x37d   :  { %v6203_v4 = vadd.f32 %v10404_v29, %v6129_v34 }
 0x37e   :  { %v6204_v37 = vadd.f32 %v10406_v22, %v6130_v40 }
 0x37f   :  { %v6265_v48 = vmax.f32 %v6203_v4, 0.0 }
 0x380   :  { %v6266_v39 = vmax.f32 %v6204_v37, 0.0 }
 0x381   :  { %6327 = vst [vmem:[%s10699_s3 + $0x1e0] sm:$0xff] %v6265_v48 }
 0x382   :  { %6328 = vst [vmem:[%s10699_s3 + $0x1e8] sm:$0xff] %v6266_v39 }
 0x383   :  { %6333 = vsyncmov [#allocation3] }
 0x386   :  { %s6334_s13 = vpop.sfrf %6333 }
 0x387   :  { %p6980_p0 = scmp.ne.s32.totalorder %s6334_s13, 0 }
 0x389   :  { %6338 = shalt.err (%p6980_p0)  }
 0x38a   :  { %6340 = vsyncmov [#allocation3 + $0x1] }
 0x38d   :  { %s6341_s14 = vpop.sfrf %6340 }
 0x38e   :  { %p6981_p1 = scmp.ne.s32.totalorder %s6341_s14, 0 }
 0x390   :  { %6345 = shalt.err (%p6981_p1)  }

// kernel: mixed_6a_forward.7
= control target key start
LH: loop header
LB: loop body
LE: loop exit
PB: predicated region body
PF: predicated region fallthrough
CT: control target
= control target key end

     0   :  { %s7121_s1 = inlined_call_operand.vmem [shape: bf16[2304,384], index: 1, kind: input, shape index: {}]   ;;  %s7122_s0 = inlined_call_operand.vmem [shape: bf16[32,2304], index: 0, kind: input, shape index: {}]   ;;  %s7123_s2 = inlined_call_operand.vmem [shape: f32[1,384], index: 2, kind: input, shape index: {}]   ;;  %s7124_s3 = inlined_call_operand.vmem [shape: f32[32,384], index: 3, kind: output, shape index: {}]  }
   0x1   :  { %v4866_v0 = vld [vmem:[%s7121_s1 + $0x4] ss:$12 sps:$4 sm:$0xff]   ;;  %v4870_v2 = vld [vmem:[%s7121_s1] ss:$12 sps:$4 sm:$0xff]   ;;  %v4872_v4 = vld [vmem:[%s7121_s1 + $0x1c] ss:$12 sps:$4 sm:$0xff]  }
   0x2   :  { %v4868_v1 = vld [vmem:[%s7121_s1 + $0x304] ss:$12 sps:$4 sm:$0xff]   ;;  %3128 = vmatprep.subr.bf16.mxu1 %v4866_v0  ;;  %v4871_v3 = vld [vmem:[%s7121_s1 + $0x300] ss:$12 sps:$4 sm:$0xff]   ;;  %v4874_v5 = vld [vmem:[%s7121_s1 + $0x31c] ss:$12 sps:$4 sm:$0xff]  }
   0x3   :  { %3234 = vmatprep.subr.bf16.mxu0 %v4868_v1  ;;  %3129 = vmatpush1.bf16.msra.mxu1 %v4870_v2  ;;  %v4876_v6 = vld [vmem:[%s7121_s1 + $0x18] ss:$12 sps:$4 sm:$0xff]   ;;  %v4878_v8 = vld [vmem:[%s7121_s1 + $0x34] ss:$12 sps:$4 sm:$0xff]   ;;  %v4882_v10 = vld [vmem:[%s7121_s1 + $0x30] ss:$12 sps:$4 sm:$0xff]  }
   0x4   :  { %3235 = vmatpush1.bf16.msra.mxu0 %v4871_v3  ;;  %3130 = vmatprep.subr.bf16.mxu1 %v4872_v4  ;;  %v4877_v7 = vld [vmem:[%s7121_s1 + $0x318] ss:$12 sps:$4 sm:$0xff]   ;;  %v4880_v9 = vld [vmem:[%s7121_s1 + $0x334] ss:$12 sps:$4 sm:$0xff]   ;;  %v4883_v11 = vld [vmem:[%s7121_s1 + $0x330] ss:$12 sps:$4 sm:$0xff]  }
   0x5   :  { %3236 = vmatprep.subr.bf16.mxu0 %v4874_v5  ;;  %v4884_v12 = vld [vmem:[%s7121_s1 + $0x4c] ss:$12 sps:$4 sm:$0xff]   ;;  %v4888_v14 = vld [vmem:[%s7121_s1 + $0x48] ss:$12 sps:$4 sm:$0xff]   ;;  %v4890_v16 = vld [vmem:[%s7121_s1 + $0x64] ss:$12 sps:$4 sm:$0xff]  }
   0x6   :  { %v4886_v13 = vld [vmem:[%s7121_s1 + $0x34c] ss:$12 sps:$4 sm:$0xff]   ;;  %v4889_v15 = vld [vmem:[%s7121_s1 + $0x348] ss:$12 sps:$4 sm:$0xff]   ;;  %v4892_v17 = vld [vmem:[%s7121_s1 + $0x364] ss:$12 sps:$4 sm:$0xff]  }
   0x7   :  { %3131 = vmatpush1.bf16.msra.mxu1 %v4876_v6  ;;  %v4894_v18 = vld [vmem:[%s7121_s1 + $0x60] ss:$12 sps:$4 sm:$0xff]   ;;  %v4896_v20 = vld [vmem:[%s7121_s1 + $0x7c] ss:$12 sps:$4 sm:$0xff]   ;;  %v4900_v22 = vld [vmem:[%s7121_s1 + $0x78] ss:$12 sps:$4 sm:$0xff]  }
   0x8   :  { %3237 = vmatpush1.bf16.msra.mxu0 %v4877_v7  ;;  %3132 = vmatprep.subr.bf16.mxu1 %v4878_v8  ;;  %v4895_v19 = vld [vmem:[%s7121_s1 + $0x360] ss:$12 sps:$4 sm:$0xff]   ;;  %v4898_v21 = vld [vmem:[%s7121_s1 + $0x37c] ss:$12 sps:$4 sm:$0xff]   ;;  %v4901_v23 = vld [vmem:[%s7121_s1 + $0x378] ss:$12 sps:$4 sm:$0xff]  }
   0x9   :  { %3238 = vmatprep.subr.bf16.mxu0 %v4880_v9  ;;  %v4902_v24 = vld [vmem:[%s7121_s1 + $0x94] ss:$12 sps:$4 sm:$0xff]   ;;  %v4906_v26 = vld [vmem:[%s7121_s1 + $0x90] ss:$12 sps:$4 sm:$0xff]   ;;  %v4908_v28 = vld [vmem:[%s7121_s1 + $0xac] ss:$12 sps:$4 sm:$0xff]  }
   0xa   :  { %v4904_v25 = vld [vmem:[%s7121_s1 + $0x394] ss:$12 sps:$4 sm:$0xff]   ;;  %v4907_v27 = vld [vmem:[%s7121_s1 + $0x390] ss:$12 sps:$4 sm:$0xff]   ;;  %v4910_v29 = vld [vmem:[%s7121_s1 + $0x3ac] ss:$12 sps:$4 sm:$0xff]  }
   0xb   :  { %3133 = vmatpush1.bf16.msra.mxu1 %v4882_v10  ;;  %v4912_v30 = vld [vmem:[%s7121_s1 + $0xa8] ss:$12 sps:$4 sm:$0xff]   ;;  %v4914_v32 = vld [vmem:[%s7121_s1 + $0xc4] ss:$12 sps:$4 sm:$0xff]   ;;  %v4918_v34 = vld [vmem:[%s7121_s1 + $0xc0] ss:$12 sps:$4 sm:$0xff]  }
   0xc   :  { %3239 = vmatpush1.bf16.msra.mxu0 %v4883_v11  ;;  %3134 = vmatprep.subr.bf16.mxu1 %v4884_v12  ;;  %v4913_v31 = vld [vmem:[%s7121_s1 + $0x3a8] ss:$12 sps:$4 sm:$0xff]   ;;  %v4916_v33 = vld [vmem:[%s7121_s1 + $0x3c4] ss:$12 sps:$4 sm:$0xff]   ;;  %v4919_v35 = vld [vmem:[%s7121_s1 + $0x3c0] ss:$12 sps:$4 sm:$0xff]  }
   0xd   :  { %3240 = vmatprep.subr.bf16.mxu0 %v4886_v13  ;;  %v4920_v36 = vld [vmem:[%s7121_s1 + $0xdc] ss:$12 sps:$4 sm:$0xff]   ;;  %v4924_v38 = vld [vmem:[%s7121_s1 + $0xd8] ss:$12 sps:$4 sm:$0xff]   ;;  %v4926_v40 = vld [vmem:[%s7121_s1 + $0xf4] ss:$12 sps:$4 sm:$0xff]  }
   0xe   :  { %v4922_v37 = vld [vmem:[%s7121_s1 + $0x3dc] ss:$12 sps:$4 sm:$0xff]   ;;  %v4925_v39 = vld [vmem:[%s7121_s1 + $0x3d8] ss:$12 sps:$4 sm:$0xff]   ;;  %v4928_v41 = vld [vmem:[%s7121_s1 + $0x3f4] ss:$12 sps:$4 sm:$0xff]  }
   0xf   :  { %3135 = vmatpush1.bf16.msra.mxu1 %v4888_v14  ;;  %v4930_v42 = vld [vmem:[%s7121_s1 + $0xf0] ss:$12 sps:$4 sm:$0xff]   ;;  %v4932_v44 = vld [vmem:[%s7121_s1 + $0x10c] ss:$12 sps:$4 sm:$0xff]   ;;  %v4936_v46 = vld [vmem:[%s7121_s1 + $0x108] ss:$12 sps:$4 sm:$0xff]  }
  0x10   :  { %3241 = vmatpush1.bf16.msra.mxu0 %v4889_v15  ;;  %3136 = vmatprep.subr.bf16.mxu1 %v4890_v16  ;;  %v4931_v43 = vld [vmem:[%s7121_s1 + $0x3f0] ss:$12 sps:$4 sm:$0xff]   ;;  %v4934_v45 = vld [vmem:[%s7121_s1 + $0x40c] ss:$12 sps:$4 sm:$0xff]   ;;  %v4937_v47 = vld [vmem:[%s7121_s1 + $0x408] ss:$12 sps:$4 sm:$0xff]  }
  0x11   :  { %3242 = vmatprep.subr.bf16.mxu0 %v4892_v17  ;;  %v5669_v48 = vld [vmem:[%s7122_s0 + $0x4] ss:$72 sps:$4 sm:$0xff]   ;;  %v4970_v51 = vld [vmem:[%s7122_s0 + $0x14] ss:$72 sps:$4 sm:$0xff]   ;;  %v5732_v4 = vld [vmem:[%s7122_s0] ss:$72 sps:$4 sm:$0xff]  }
  0x12   :  { %v4938_v49 = vld [vmem:[%s7121_s1 + $0x124] ss:$12 sps:$4 sm:$0xff]   ;;  %3160 = vmatprep.mubr.bf16.mxu1 %v5669_v48  ;;  %v4942_v52 = vld [vmem:[%s7121_s1 + $0x120] ss:$12 sps:$4 sm:$0xff]   ;;  %v4944_v54 = vld [vmem:[%s7121_s1 + $0x13c] ss:$12 sps:$4 sm:$0xff]   ;;  %3266 = vmatprep.mubr.bf16.mxu0 %v4970_v51 }
  0x13   :  { %3137 = vmatpush1.bf16.msra.mxu1 %v4894_v18  ;;  %v4940_v50 = vld [vmem:[%s7121_s1 + $0x424] ss:$12 sps:$4 sm:$0xff]   ;;  %v4943_v53 = vld [vmem:[%s7121_s1 + $0x420] ss:$12 sps:$4 sm:$0xff]   ;;  %v4946_v55 = vld [vmem:[%s7121_s1 + $0x43c] ss:$12 sps:$4 sm:$0xff]  }
  0x14   :  { %3243 = vmatpush1.bf16.msra.mxu0 %v4895_v19  ;;  %3138 = vmatprep.subr.bf16.mxu1 %v4896_v20  ;;  %v4948_v56 = vld [vmem:[%s7121_s1 + $0x138] ss:$12 sps:$4 sm:$0xff]   ;;  %v4950_v58 = vld [vmem:[%s7121_s1 + $0x154] ss:$12 sps:$4 sm:$0xff]   ;;  %v4954_v60 = vld [vmem:[%s7121_s1 + $0x150] ss:$12 sps:$4 sm:$0xff]  }
  0x15   :  { %3244 = vmatprep.subr.bf16.mxu0 %v4898_v21  ;;  %v4949_v57 = vld [vmem:[%s7121_s1 + $0x438] ss:$12 sps:$4 sm:$0xff]   ;;  %v4952_v59 = vld [vmem:[%s7121_s1 + $0x454] ss:$12 sps:$4 sm:$0xff]   ;;  %v4955_v61 = vld [vmem:[%s7121_s1 + $0x450] ss:$12 sps:$4 sm:$0xff]  }
  0x16   :  { %v4956_v62 = vld [vmem:[%s7121_s1 + $0x16c] ss:$12 sps:$4 sm:$0xff]   ;;  %v4960_v0 = vld [vmem:[%s7121_s1 + $0x168] ss:$12 sps:$4 sm:$0xff]   ;;  %v4967_v2 = vld [vmem:[%s7121_s1 + $0x184] ss:$12 sps:$4 sm:$0xff]  }
  0x17   :  { %3139 = vmatpush1.bf16.msra.mxu1 %v4900_v22  ;;  %v4958_v63 = vld [vmem:[%s7121_s1 + $0x46c] ss:$12 sps:$4 sm:$0xff]   ;;  %v4961_v1 = vld [vmem:[%s7121_s1 + $0x468] ss:$12 sps:$4 sm:$0xff]   ;;  %v4973_v3 = vld [vmem:[%s7121_s1 + $0x484] ss:$12 sps:$4 sm:$0xff]  }
  0x18   :  { %3245 = vmatpush1.bf16.msra.mxu0 %v4901_v23  ;;  %3140 = vmatprep.subr.bf16.mxu1 %v4902_v24  ;;  %v4965_v5 = vld [vmem:[%s7121_s1 + $0x180] ss:$12 sps:$4 sm:$0xff]   ;;  %v4968_v6 = vld [vmem:[%s7122_s0 + $0x10] ss:$72 sps:$4 sm:$0xff]   ;;  %v4976_v8 = vld [vmem:[%s7121_s1 + $0x19c] ss:$12 sps:$4 sm:$0xff]  }
  0x19   :  { %3246 = vmatprep.subr.bf16.mxu0 %v4904_v25  ;;  %v4971_v7 = vld [vmem:[%s7121_s1 + $0x480] ss:$12 sps:$4 sm:$0xff]   ;;  %v4979_v9 = vld [vmem:[%s7121_s1 + $0x49c] ss:$12 sps:$4 sm:$0xff]   ;;  %v4974_v10 = vld [vmem:[%s7121_s1 + $0x198] ss:$12 sps:$4 sm:$0xff]  }
  0x1a   :  { %v4977_v11 = vld [vmem:[%s7121_s1 + $0x498] ss:$12 sps:$4 sm:$0xff]   ;;  %v4982_v12 = vld [vmem:[%s7121_s1 + $0x1b4] ss:$12 sps:$4 sm:$0xff]   ;;  %v4980_v14 = vld [vmem:[%s7121_s1 + $0x1b0] ss:$12 sps:$4 sm:$0xff]  }
  0x1b   :  { %3141 = vmatpush1.bf16.msra.mxu1 %v4906_v26  ;;  %v4985_v13 = vld [vmem:[%s7121_s1 + $0x4b4] ss:$12 sps:$4 sm:$0xff]   ;;  %v4983_v15 = vld [vmem:[%s7121_s1 + $0x4b0] ss:$12 sps:$4 sm:$0xff]   ;;  %v4988_v16 = vld [vmem:[%s7121_s1 + $0x1cc] ss:$12 sps:$4 sm:$0xff]  }
  0x1c   :  { %3247 = vmatpush1.bf16.msra.mxu0 %v4907_v27  ;;  %3142 = vmatprep.subr.bf16.mxu1 %v4908_v28  ;;  %v4991_v17 = vld [vmem:[%s7121_s1 + $0x4cc] ss:$12 sps:$4 sm:$0xff]   ;;  %v4986_v18 = vld [vmem:[%s7121_s1 + $0x1c8] ss:$12 sps:$4 sm:$0xff]   ;;  %v4994_v20 = vld [vmem:[%s7121_s1 + $0x1e4] ss:$12 sps:$4 sm:$0xff]  }
  0x1d   :  { %3248 = vmatprep.subr.bf16.mxu0 %v4910_v29  ;;  %v4989_v19 = vld [vmem:[%s7121_s1 + $0x4c8] ss:$12 sps:$4 sm:$0xff]   ;;  %v4997_v21 = vld [vmem:[%s7121_s1 + $0x4e4] ss:$12 sps:$4 sm:$0xff]   ;;  %v4992_v22 = vld [vmem:[%s7121_s1 + $0x1e0] ss:$12 sps:$4 sm:$0xff]  }
  0x1e   :  { %v4995_v23 = vld [vmem:[%s7121_s1 + $0x4e0] ss:$12 sps:$4 sm:$0xff]   ;;  %v5000_v24 = vld [vmem:[%s7121_s1 + $0x1fc] ss:$12 sps:$4 sm:$0xff]   ;;  %v4998_v26 = vld [vmem:[%s7121_s1 + $0x1f8] ss:$12 sps:$4 sm:$0xff]  }
  0x1f   :  { %3143 = vmatpush1.bf16.msra.mxu1 %v4912_v30  ;;  %v5003_v25 = vld [vmem:[%s7121_s1 + $0x4fc] ss:$12 sps:$4 sm:$0xff]   ;;  %v5001_v27 = vld [vmem:[%s7121_s1 + $0x4f8] ss:$12 sps:$4 sm:$0xff]   ;;  %v5006_v30 = vld [vmem:[%s7121_s1 + $0x214] ss:$12 sps:$4 sm:$0xff]  }
  0x20   :  { %3249 = vmatpush1.bf16.msra.mxu0 %v4913_v31  ;;  %3144 = vmatprep.subr.bf16.mxu1 %v4914_v32  ;;  %v5807_v28 = vld [vmem:[%s7122_s0 + $0x94] ss:$72 sps:$4 sm:$0xff]   ;;  %v5812_v29 = vld [vmem:[%s7122_s0 + $0x90] ss:$72 sps:$4 sm:$0xff]   ;;  %v5058_v32 = vld [vmem:[%s7122_s0 + $0xa4] ss:$72 sps:$4 sm:$0xff]  }
  0x21   :  { %3250 = vmatprep.subr.bf16.mxu0 %v4916_v33  ;;  %v5009_v31 = vld [vmem:[%s7121_s1 + $0x514] ss:$12 sps:$4 sm:$0xff]   ;;  %v5004_v33 = vld [vmem:[%s7121_s1 + $0x210] ss:$12 sps:$4 sm:$0xff]  }
  0x22   :  { %v5030_v51 = vld [vmem:[%s7121_s1 + $0x274] ss:$12 sps:$4 sm:$0xff]  }
  0x23   :  { %3145 = vmatpush1.bf16.msra.mxu1 %v4918_v34  ;;  %v5007_v34 = vld [vmem:[%s7121_s1 + $0x510] ss:$12 sps:$4 sm:$0xff]  }
  0x24   :  { %3251 = vmatpush1.bf16.msra.mxu0 %v4919_v35  ;;  %3146 = vmatprep.subr.bf16.mxu1 %v4920_v36  ;;  %v5063_v35 = vld [vmem:[%s7122_s0 + $0xa0] ss:$72 sps:$4 sm:$0xff]   ;;  %v5012_v36 = vld [vmem:[%s7121_s1 + $0x22c] ss:$12 sps:$4 sm:$0xff]  }
  0x25   :  { %3252 = vmatprep.subr.bf16.mxu0 %v4922_v37  ;;  %v5015_v37 = vld [vmem:[%s7121_s1 + $0x52c] ss:$12 sps:$4 sm:$0xff]  }
  0x27   :  { %3147 = vmatpush1.bf16.msra.mxu1 %v4924_v38  ;;  %v5010_v38 = vld [vmem:[%s7121_s1 + $0x228] ss:$12 sps:$4 sm:$0xff]  }
  0x28   :  { %3253 = vmatpush1.bf16.msra.mxu0 %v4925_v39  ;;  %3148 = vmatprep.subr.bf16.mxu1 %v4926_v40  ;;  %v5013_v39 = vld [vmem:[%s7121_s1 + $0x528] ss:$12 sps:$4 sm:$0xff]   ;;  %v5018_v40 = vld [vmem:[%s7121_s1 + $0x244] ss:$12 sps:$4 sm:$0xff]  }
  0x29   :  { %3254 = vmatprep.subr.bf16.mxu0 %v4928_v41  ;;  %v5852_v41 = vld [vmem:[%s7122_s0 + $0xc] ss:$72 sps:$4 sm:$0xff]  }
  0x2b   :  { %3149 = vmatpush1.bf16.msra.mxu1 %v4930_v42  ;;  %v5021_v42 = vld [vmem:[%s7121_s1 + $0x544] ss:$12 sps:$4 sm:$0xff]  }
  0x2c   :  { %3255 = vmatpush1.bf16.msra.mxu0 %v4931_v43  ;;  %3150 = vmatprep.subr.bf16.mxu1 %v4932_v44  ;;  %v5075_v43 = vld [vmem:[%s7122_s0 + $0x1c] ss:$72 sps:$4 sm:$0xff]   ;;  %v5016_v44 = vld [vmem:[%s7121_s1 + $0x240] ss:$12 sps:$4 sm:$0xff]  }
  0x2d   :  { %3256 = vmatprep.subr.bf16.mxu0 %v4934_v45  ;;  %v5019_v45 = vld [vmem:[%s7121_s1 + $0x540] ss:$12 sps:$4 sm:$0xff]  }
  0x2f   :  { %3151 = vmatpush1.bf16.msra.mxu1 %v4936_v46  ;;  %v5024_v46 = vld [vmem:[%s7121_s1 + $0x25c] ss:$12 sps:$4 sm:$0xff]  }
  0x30   :  { %3257 = vmatpush1.bf16.msra.mxu0 %v4937_v47  ;;  %3152 = vmatprep.subr.bf16.mxu1 %v4938_v49  ;;  %v5027_v47 = vld [vmem:[%s7121_s1 + $0x55c] ss:$12 sps:$4 sm:$0xff]   ;;  %v5022_v49 = vld [vmem:[%s7121_s1 + $0x258] ss:$12 sps:$4 sm:$0xff]  }
  0x31   :  { %3258 = vmatprep.subr.bf16.mxu0 %v4940_v50  ;;  %v5025_v50 = vld [vmem:[%s7121_s1 + $0x558] ss:$12 sps:$4 sm:$0xff]  }
  0x33   :  { %3153 = vmatpush1.bf16.msra.mxu1 %v4942_v52  ;;  %v5033_v52 = vld [vmem:[%s7121_s1 + $0x574] ss:$12 sps:$4 sm:$0xff]  }
  0x34   :  { %3259 = vmatpush1.bf16.msra.mxu0 %v4943_v53  ;;  %3154 = vmatprep.subr.bf16.mxu1 %v4944_v54  ;;  %v5028_v53 = vld [vmem:[%s7121_s1 + $0x270] ss:$12 sps:$4 sm:$0xff]  }
  0x35   :  { %3260 = vmatprep.subr.bf16.mxu0 %v4946_v55  ;;  %v5031_v54 = vld [vmem:[%s7121_s1 + $0x570] ss:$12 sps:$4 sm:$0xff]   ;;  %v5036_v55 = vld [vmem:[%s7121_s1 + $0x28c] ss:$12 sps:$4 sm:$0xff]  }
  0x37   :  { %3155 = vmatpush1.bf16.msra.mxu1 %v4948_v56  ;;  %v5039_v56 = vld [vmem:[%s7121_s1 + $0x58c] ss:$12 sps:$4 sm:$0xff]  }
  0x38   :  { %3261 = vmatpush1.bf16.msra.mxu0 %v4949_v57  ;;  %3156 = vmatprep.subr.bf16.mxu1 %v4950_v58  ;;  %v5034_v57 = vld [vmem:[%s7121_s1 + $0x288] ss:$12 sps:$4 sm:$0xff]  }
  0x39   :  { %3262 = vmatprep.subr.bf16.mxu0 %v4952_v59  ;;  %v5037_v58 = vld [vmem:[%s7121_s1 + $0x588] ss:$12 sps:$4 sm:$0xff]   ;;  %v5042_v59 = vld [vmem:[%s7121_s1 + $0x2a4] ss:$12 sps:$4 sm:$0xff]  }
  0x3b   :  { %3157 = vmatpush1.bf16.msra.mxu1 %v4954_v60  ;;  %v5045_v60 = vld [vmem:[%s7121_s1 + $0x5a4] ss:$12 sps:$4 sm:$0xff]  }
  0x3c   :  { %3263 = vmatpush1.bf16.msra.mxu0 %v4955_v61  ;;  %3158 = vmatprep.subr.bf16.mxu1 %v4956_v62  ;;  %v5040_v61 = vld [vmem:[%s7121_s1 + $0x2a0] ss:$12 sps:$4 sm:$0xff]  }
  0x3d   :  { %3264 = vmatprep.subr.bf16.mxu0 %v4958_v63  ;;  %v5043_v62 = vld [vmem:[%s7121_s1 + $0x5a0] ss:$12 sps:$4 sm:$0xff]   ;;  %v5048_v63 = vld [vmem:[%s7121_s1 + $0x2bc] ss:$12 sps:$4 sm:$0xff]  }
  0x3f   :  { %3159 = vmatpush1.bf16.msra.mxu1 %v4960_v0  ;;  %v5051_v0 = vld [vmem:[%s7121_s1 + $0x5bc] ss:$12 sps:$4 sm:$0xff]  }
  0x40   :  { %3265 = vmatpush1.bf16.msra.mxu0 %v4961_v1  ;;  %3181 = vmatprep.subr.bf16.mxu1 %v4967_v2  ;;  %v5046_v1 = vld [vmem:[%s7121_s1 + $0x2b8] ss:$12 sps:$4 sm:$0xff]  }
  0x41   :  { %3287 = vmatprep.subr.bf16.mxu0 %v4973_v3  ;;  %v5049_v2 = vld [vmem:[%s7121_s1 + $0x5b8] ss:$12 sps:$4 sm:$0xff]   ;;  %v5057_v3 = vld [vmem:[%s7121_s1 + $0x2d4] ss:$12 sps:$4 sm:$0xff]  }
  0x42   :  { %3161 = vmatmul.mubr.bf16.vlgmr.msra.gmra.mrb[0].mxu1 %v5732_v4 }
  0x43   :  { %3267 = vmatmul.mubr.bf16.vlgmr.msra.gmra.mrb[0].mxu0 %v4968_v6  ;;  %3182 = vmatpush1.bf16.msra.mxu1 %v4965_v5  ;;  %v5062_v5 = vld [vmem:[%s7121_s1 + $0x5d4] ss:$12 sps:$4 sm:$0xff]   ;;  %v5055_v6 = vld [vmem:[%s7121_s1 + $0x2d0] ss:$12 sps:$4 sm:$0xff]  }
  0x44   :  { %3288 = vmatpush1.bf16.msra.mxu0 %v4971_v7  ;;  %3183 = vmatprep.subr.bf16.mxu1 %v4976_v8  ;;  %v5060_v7 = vld [vmem:[%s7121_s1 + $0x5d0] ss:$12 sps:$4 sm:$0xff]   ;;  %v5066_v8 = vld [vmem:[%s7121_s1 + $0x2ec] ss:$12 sps:$4 sm:$0xff]  }
  0x45   :  { %3289 = vmatprep.subr.bf16.mxu0 %v4979_v9  ;;  %3170 = vmatprep.mubr.bf16.mxu1 %v5807_v28  ;;  %v5069_v9 = vld [vmem:[%s7121_s1 + $0x5ec] ss:$12 sps:$4 sm:$0xff]  }
  0x46   :  { %3276 = vmatprep.mubr.bf16.mxu0 %v5058_v32  ;;  %v5091_v32 = vld [vmem:[%s7121_s1 + $0x648] ss:$12 sps:$4 sm:$0xff]  }
  0x47   :  { %3184 = vmatpush1.bf16.msra.mxu1 %v4974_v10  ;;  %v5064_v10 = vld [vmem:[%s7121_s1 + $0x2e8] ss:$12 sps:$4 sm:$0xff]  }
  0x48   :  { %3290 = vmatpush1.bf16.msra.mxu0 %v4977_v11  ;;  %3185 = vmatprep.subr.bf16.mxu1 %v4982_v12  ;;  %v5067_v11 = vld [vmem:[%s7121_s1 + $0x5e8] ss:$12 sps:$4 sm:$0xff]  }
  0x49   :  { %3291 = vmatprep.subr.bf16.mxu0 %v4985_v13  ;;  %v5954_v12 = vld [vmem:[%s7122_s0 + $0x8] ss:$72 sps:$4 sm:$0xff]   ;;  %v5073_v13 = vld [vmem:[%s7122_s0 + $0x18] ss:$72 sps:$4 sm:$0xff]  }
  0x4a   :  { %3171 = vmatmul.mubr.bf16.gmra.mrb[4].mxu1 %v5812_v29 }
  0x4b   :  { %3186 = vmatpush1.bf16.msra.mxu1 %v4980_v14  ;;  %3277 = vmatmul.mubr.bf16.gmra.mrb[4].mxu0 %v5063_v35  ;;  %v5078_v14 = vld [vmem:[%s7121_s1 + $0x604] ss:$12 sps:$4 sm:$0xff]   ;;  %v5099_v35 = vld [vmem:[%s7121_s1 + $0x128] ss:$12 sps:$4 sm:$0xff]  }
  0x4c   :  { %3292 = vmatpush1.bf16.msra.mxu0 %v4983_v15  ;;  %3187 = vmatprep.subr.bf16.mxu1 %v4988_v16  ;;  %v5079_v15 = vld [vmem:[%s7121_s1 + $0xc8] ss:$12 sps:$4 sm:$0xff]   ;;  %v5076_v16 = vld [vmem:[%s7121_s1 + $0x600] ss:$12 sps:$4 sm:$0xff]  }
  0x4d   :  { %3293 = vmatprep.subr.bf16.mxu0 %v4991_v17  ;;  %3213 = vmatprep.mubr.bf16.mxu1 %v5852_v41  ;;  %v5080_v17 = vld [vmem:[%s7121_s1 + $0x8] ss:$12 sps:$4 sm:$0xff]  }
  0x4e   :  { %3319 = vmatprep.mubr.bf16.mxu0 %v5075_v43  ;;  %v5108_v43 = vld [vmem:[%s7121_s1 + $0x80] ss:$12 sps:$4 sm:$0xff]  }
  0x4f   :  { %3188 = vmatpush1.bf16.msra.mxu1 %v4986_v18  ;;  %v5083_v18 = vld [vmem:[%s7121_s1 + $0x61c] ss:$12 sps:$4 sm:$0xff]  }
  0x50   :  { %3294 = vmatpush1.bf16.msra.mxu0 %v4989_v19  ;;  %3189 = vmatprep.subr.bf16.mxu1 %v4994_v20  ;;  %v5084_v19 = vld [vmem:[%s7121_s1 + $0xe0] ss:$12 sps:$4 sm:$0xff]   ;;  %v5980_v20 = vld [vmem:[%s7122_s0 + $0x9c] ss:$72 sps:$4 sm:$0xff]  }
  0x51   :  { %3295 = vmatprep.subr.bf16.mxu0 %v4997_v21  ;;  %v5081_v21 = vld [vmem:[%s7121_s1 + $0x618] ss:$12 sps:$4 sm:$0xff]  }
  0x53   :  { %3190 = vmatpush1.bf16.msra.mxu1 %v4992_v22  ;;  %v5085_v22 = vld [vmem:[%s7121_s1 + $0x20] ss:$12 sps:$4 sm:$0xff]  }
  0x54   :  { %3296 = vmatpush1.bf16.msra.mxu0 %v4995_v23  ;;  %3191 = vmatprep.subr.bf16.mxu1 %v5000_v24  ;;  %v5088_v23 = vld [vmem:[%s7121_s1 + $0x634] ss:$12 sps:$4 sm:$0xff]   ;;  %v5089_v24 = vld [vmem:[%s7121_s1 + $0xf8] ss:$12 sps:$4 sm:$0xff]  }
  0x55   :  { %3297 = vmatprep.subr.bf16.mxu0 %v5003_v25  ;;  %v5086_v25 = vld [vmem:[%s7121_s1 + $0x630] ss:$12 sps:$4 sm:$0xff]  }
  0x57   :  { %3192 = vmatpush1.bf16.msra.mxu1 %v4998_v26  ;;  %v5090_v26 = vld [vmem:[%s7121_s1 + $0x38] ss:$12 sps:$4 sm:$0xff]  }
  0x58   :  { %3298 = vmatpush1.bf16.msra.mxu0 %v5001_v27  ;;  %3193 = vmatprep.subr.bf16.mxu1 %v5006_v30  ;;  %v6005_v27 = vld [vmem:[%s7122_s0 + $0x98] ss:$72 sps:$4 sm:$0xff]  }
  0x59   :  { %3299 = vmatprep.subr.bf16.mxu0 %v5009_v31  ;;  %v5093_v30 = vld [vmem:[%s7121_s1 + $0x64c] ss:$12 sps:$4 sm:$0xff]   ;;  %v5094_v31 = vld [vmem:[%s7121_s1 + $0x110] ss:$12 sps:$4 sm:$0xff]  }
  0x5b   :  { %3194 = vmatpush1.bf16.msra.mxu1 %v5004_v33  ;;  %v5095_v33 = vld [vmem:[%s7121_s1 + $0x50] ss:$12 sps:$4 sm:$0xff]  }
  0x5c   :  { %3300 = vmatpush1.bf16.msra.mxu0 %v5007_v34  ;;  %3195 = vmatprep.subr.bf16.mxu1 %v5012_v36  ;;  %v5098_v34 = vld [vmem:[%s7121_s1 + $0x664] ss:$12 sps:$4 sm:$0xff]   ;;  %v6030_v36 = vld [vmem:[%s7122_s0 + $0xac] ss:$72 sps:$4 sm:$0xff]  }
  0x5d   :  { %3301 = vmatprep.subr.bf16.mxu0 %v5015_v37  ;;  %v5096_v37 = vld [vmem:[%s7121_s1 + $0x660] ss:$12 sps:$4 sm:$0xff]  }
  0x5f   :  { %3196 = vmatpush1.bf16.msra.mxu1 %v5010_v38  ;;  %v5100_v38 = vld [vmem:[%s7121_s1 + $0x68] ss:$12 sps:$4 sm:$0xff]  }
  0x60   :  { %3302 = vmatpush1.bf16.msra.mxu0 %v5013_v39  ;;  %3197 = vmatprep.subr.bf16.mxu1 %v5018_v40  ;;  %v5106_v39 = vld [vmem:[%s7121_s1 + $0x67c] ss:$12 sps:$4 sm:$0xff]   ;;  %v5107_v40 = vld [vmem:[%s7121_s1 + $0x140] ss:$12 sps:$4 sm:$0xff]  }
  0x61   :  { %3303 = vmatprep.subr.bf16.mxu0 %v5021_v42  ;;  %v5104_v42 = vld [vmem:[%s7121_s1 + $0x678] ss:$12 sps:$4 sm:$0xff]  }
  0x63   :  { %3198 = vmatpush1.bf16.msra.mxu1 %v5016_v44  ;;  %v5111_v44 = vld [vmem:[%s7121_s1 + $0x694] ss:$12 sps:$4 sm:$0xff]  }
  0x64   :  { %3304 = vmatpush1.bf16.msra.mxu0 %v5019_v45  ;;  %3199 = vmatprep.subr.bf16.mxu1 %v5024_v46  ;;  %v5112_v45 = vld [vmem:[%s7121_s1 + $0x158] ss:$12 sps:$4 sm:$0xff]  }
  0x65   :  { %3305 = vmatprep.subr.bf16.mxu0 %v5027_v47  ;;  %v6066_v46 = vld [vmem:[%s7122_s0 + $0x24] ss:$72 sps:$4 sm:$0xff]   ;;  %v5109_v47 = vld [vmem:[%s7121_s1 + $0x690] ss:$12 sps:$4 sm:$0xff]  }
  0x67   :  { %3200 = vmatpush1.bf16.msra.mxu1 %v5022_v49  ;;  %v5113_v49 = vld [vmem:[%s7121_s1 + $0x98] ss:$12 sps:$4 sm:$0xff]  }
  0x68   :  { %3306 = vmatpush1.bf16.msra.mxu0 %v5025_v50  ;;  %3201 = vmatprep.subr.bf16.mxu1 %v5030_v51  ;;  %v5116_v50 = vld [vmem:[%s7121_s1 + $0x6ac] ss:$12 sps:$4 sm:$0xff]   ;;  %v5117_v51 = vld [vmem:[%s7121_s1 + $0x170] ss:$12 sps:$4 sm:$0xff]  }
  0x69   :  { %3307 = vmatprep.subr.bf16.mxu0 %v5033_v52  ;;  %v5114_v52 = vld [vmem:[%s7121_s1 + $0x6a8] ss:$12 sps:$4 sm:$0xff]  }
  0x6b   :  { %3202 = vmatpush1.bf16.msra.mxu1 %v5028_v53  ;;  %v5118_v53 = vld [vmem:[%s7121_s1 + $0xb0] ss:$12 sps:$4 sm:$0xff]  }
  0x6c   :  { %3308 = vmatpush1.bf16.msra.mxu0 %v5031_v54  ;;  %3203 = vmatprep.subr.bf16.mxu1 %v5036_v55  ;;  %v5121_v54 = vld [vmem:[%s7121_s1 + $0x6c4] ss:$12 sps:$4 sm:$0xff]   ;;  %v5122_v55 = vld [vmem:[%s7121_s1 + $0x248] ss:$12 sps:$4 sm:$0xff]  }
  0x6d   :  { %3309 = vmatprep.subr.bf16.mxu0 %v5039_v56  ;;  %v5119_v56 = vld [vmem:[%s7121_s1 + $0x6c0] ss:$12 sps:$4 sm:$0xff]  }
  0x6f   :  { %3204 = vmatpush1.bf16.msra.mxu1 %v5034_v57  ;;  %v5123_v57 = vld [vmem:[%s7121_s1 + $0x188] ss:$12 sps:$4 sm:$0xff]  }
  0x70   :  { %3310 = vmatpush1.bf16.msra.mxu0 %v5037_v58  ;;  %3205 = vmatprep.subr.bf16.mxu1 %v5042_v59  ;;  %v5126_v58 = vld [vmem:[%s7121_s1 + $0x6dc] ss:$12 sps:$4 sm:$0xff]   ;;  %v5127_v59 = vld [vmem:[%s7121_s1 + $0x260] ss:$12 sps:$4 sm:$0xff]  }
  0x71   :  { %3311 = vmatprep.subr.bf16.mxu0 %v5045_v60  ;;  %v5124_v60 = vld [vmem:[%s7121_s1 + $0x6d8] ss:$12 sps:$4 sm:$0xff]  }
  0x73   :  { %3206 = vmatpush1.bf16.msra.mxu1 %v5040_v61  ;;  %v5128_v61 = vld [vmem:[%s7121_s1 + $0x1a0] ss:$12 sps:$4 sm:$0xff]  }
  0x74   :  { %3312 = vmatpush1.bf16.msra.mxu0 %v5043_v62  ;;  %3207 = vmatprep.subr.bf16.mxu1 %v5048_v63  ;;  %v5131_v62 = vld [vmem:[%s7121_s1 + $0x6f4] ss:$12 sps:$4 sm:$0xff]   ;;  %v5132_v63 = vld [vmem:[%s7121_s1 + $0x278] ss:$12 sps:$4 sm:$0xff]  }
  0x75   :  { %3313 = vmatprep.subr.bf16.mxu0 %v5051_v0  ;;  %v5133_v0 = vld [vmem:[%s7121_s1 + $0x1b8] ss:$12 sps:$4 sm:$0xff]  }
  0x77   :  { %3208 = vmatpush1.bf16.msra.mxu1 %v5046_v1  ;;  %v5136_v1 = vld [vmem:[%s7121_s1 + $0x70c] ss:$12 sps:$4 sm:$0xff]  }
  0x78   :  { %3314 = vmatpush1.bf16.msra.mxu0 %v5049_v2  ;;  %3209 = vmatprep.subr.bf16.mxu1 %v5057_v3  ;;  %v5134_v2 = vld [vmem:[%s7121_s1 + $0x708] ss:$12 sps:$4 sm:$0xff]   ;;  %v5138_v3 = vld [vmem:[%s7121_s1 + $0x1d0] ss:$12 sps:$4 sm:$0xff]  }
  0x79   :  { %3315 = vmatprep.subr.bf16.mxu0 %v5062_v5  ;;  %v5141_v5 = vld [vmem:[%s7121_s1 + $0x724] ss:$12 sps:$4 sm:$0xff]  }
  0x7b   :  { %3210 = vmatpush1.bf16.msra.mxu1 %v5055_v6  ;;  %v5142_v6 = vld [vmem:[%s7121_s1 + $0x2a8] ss:$12 sps:$4 sm:$0xff]  }
  0x7c   :  { %3316 = vmatpush1.bf16.msra.mxu0 %v5060_v7  ;;  %3211 = vmatprep.subr.bf16.mxu1 %v5066_v8  ;;  %v5139_v7 = vld [vmem:[%s7121_s1 + $0x720] ss:$12 sps:$4 sm:$0xff]   ;;  %v5146_v8 = vld [vmem:[%s7121_s1 + $0x73c] ss:$12 sps:$4 sm:$0xff]  }
  0x7d   :  { %3317 = vmatprep.subr.bf16.mxu0 %v5069_v9  ;;  %v5147_v9 = vld [vmem:[%s7121_s1 + $0x2c0] ss:$12 sps:$4 sm:$0xff]  }
  0x7f   :  { %3212 = vmatpush1.bf16.msra.mxu1 %v5064_v10  ;;  %v5148_v10 = vld [vmem:[%s7121_s1 + $0x200] ss:$12 sps:$4 sm:$0xff]  }
  0x80   :  { %3318 = vmatpush1.bf16.msra.mxu0 %v5067_v11  ;;  %4542 = vmatprep.subr.bf16.mxu1 %v5079_v15  ;;  %v5153_v11 = vld [vmem:[%s7121_s1 + $0x754] ss:$12 sps:$4 sm:$0xff]   ;;  %v5156_v15 = vld [vmem:[%s7121_s1 + $0x218] ss:$12 sps:$4 sm:$0xff]  }
  0x81   :  { %3340 = vmatprep.subr.bf16.mxu0 %v5078_v14  ;;  %v5151_v14 = vld [vmem:[%s7121_s1 + $0x750] ss:$12 sps:$4 sm:$0xff]  }
  0x82   :  { %3214 = vmatmul.mubr.bf16.vlgmr.msra.gmra.mrb[0].mxu1 %v5954_v12 }
  0x83   :  { %3320 = vmatmul.mubr.bf16.vlgmr.msra.gmra.mrb[0].mxu0 %v5073_v13  ;;  %4543 = vmatpush3.bf16.msra.mxu1 %v5080_v17  ;;  %v5154_v13 = vld [vmem:[%s7121_s1 + $0x2d8] ss:$12 sps:$4 sm:$0xff]   ;;  %v5160_v17 = vld [vmem:[%s7121_s1 + $0x2f0] ss:$12 sps:$4 sm:$0xff]  }
  0x84   :  { %3341 = vmatpush1.bf16.msra.mxu0 %v5076_v16  ;;  %4544 = vmatprep.subr.bf16.mxu1 %v5084_v19  ;;  %v5159_v16 = vld [vmem:[%s7121_s1 + $0x76c] ss:$12 sps:$4 sm:$0xff]   ;;  %v5161_v19 = vld [vmem:[%s7121_s1 + $0x230] ss:$12 sps:$4 sm:$0xff]  }
  0x85   :  { %3342 = vmatprep.subr.bf16.mxu0 %v5083_v18  ;;  %3223 = vmatprep.mubr.bf16.mxu1 %v5980_v20  ;;  %v5157_v18 = vld [vmem:[%s7121_s1 + $0x768] ss:$12 sps:$4 sm:$0xff]  }
  0x86   :  { %3329 = vmatprep.mubr.bf16.mxu0 %v6030_v36 }
  0x87   :  { %4545 = vmatpush3.bf16.msra.mxu1 %v5085_v22  ;;  %v5168_v22 = vld [vmem:[%s7121_s1 + $0x3c8] ss:$12 sps:$4 sm:$0xff]  }
  0x88   :  { %3343 = vmatpush1.bf16.msra.mxu0 %v5081_v21  ;;  %4546 = vmatprep.subr.bf16.mxu1 %v5089_v24  ;;  %v5167_v21 = vld [vmem:[%s7121_s1 + $0x784] ss:$12 sps:$4 sm:$0xff]   ;;  %v5165_v24 = vld [vmem:[%s7121_s1 + $0x780] ss:$12 sps:$4 sm:$0xff]  }
  0x89   :  { %3344 = vmatprep.subr.bf16.mxu0 %v5088_v23  ;;  %v6196_v23 = vld [vmem:[%s7122_s0 + $0x20] ss:$72 sps:$4 sm:$0xff]  }
  0x8a   :  { %3224 = vmatmul.mubr.bf16.gmra.mrb[4].mxu1 %v6005_v27 }
  0x8b   :  { %4547 = vmatpush3.bf16.msra.mxu1 %v5090_v26  ;;  %3637 = vmatprep.mubr.bf16.mxu1 %v5669_v48  ;;  %v6044_v48 = vld [vmem:[%s7122_s0 + $0xa8] ss:$72 sps:$4 sm:$0xff]  }
  0x8c   :  { %3345 = vmatpush1.bf16.msra.mxu0 %v5086_v25  ;;  %4548 = vmatprep.subr.bf16.mxu1 %v5094_v31  ;;  %v5169_v25 = vld [vmem:[%s7121_s1 + $0x308] ss:$12 sps:$4 sm:$0xff]   ;;  %v5170_v31 = vld [vmem:[%s7121_s1 + $0x798] ss:$12 sps:$4 sm:$0xff]  }
  0x8d   :  { %3346 = vmatprep.subr.bf16.mxu0 %v5093_v30  ;;  %3330 = vmatmul.mubr.bf16.gmra.mrb[4].mxu0 %v6044_v48  ;;  %v5172_v26 = vld [vmem:[%s7121_s1 + $0x79c] ss:$12 sps:$4 sm:$0xff]   ;;  %v5173_v30 = vld [vmem:[%s7121_s1 + $0x3e0] ss:$12 sps:$4 sm:$0xff]  }
  0x8e   :  { %3372 = vmatprep.mubr.bf16.mxu0 %v6066_v46 }
  0x8f   :  { %4549 = vmatpush3.bf16.msra.mxu1 %v5095_v33  ;;  %v5177_v33 = vld [vmem:[%s7121_s1 + $0x7b4] ss:$12 sps:$4 sm:$0xff]  }
  0x90   :  { %3347 = vmatpush1.bf16.msra.mxu0 %v5091_v32  ;;  %4550 = vmatprep.subr.bf16.mxu1 %v5099_v35  ;;  %v5174_v32 = vld [vmem:[%s7121_s1 + $0x320] ss:$12 sps:$4 sm:$0xff]   ;;  %v5175_v35 = vld [vmem:[%s7121_s1 + $0x7b0] ss:$12 sps:$4 sm:$0xff]  }
  0x91   :  { %3348 = vmatprep.subr.bf16.mxu0 %v5098_v34  ;;  %v5178_v34 = vld [vmem:[%s7121_s1 + $0x3f8] ss:$12 sps:$4 sm:$0xff]  }
  0x93   :  { %4551 = vmatpush3.bf16.msra.mxu1 %v5100_v38  ;;  %v5182_v38 = vld [vmem:[%s7121_s1 + $0x7cc] ss:$12 sps:$4 sm:$0xff]  }
  0x94   :  { %3349 = vmatpush1.bf16.msra.mxu0 %v5096_v37  ;;  %4552 = vmatprep.subr.bf16.mxu1 %v5107_v40  ;;  %v5179_v37 = vld [vmem:[%s7121_s1 + $0x338] ss:$12 sps:$4 sm:$0xff]   ;;  %v5180_v40 = vld [vmem:[%s7121_s1 + $0x7c8] ss:$12 sps:$4 sm:$0xff]  }
  0x95   :  { %3350 = vmatprep.subr.bf16.mxu0 %v5106_v39  ;;  %v5183_v39 = vld [vmem:[%s7121_s1 + $0x410] ss:$12 sps:$4 sm:$0xff]  }
  0x97   :  { %4553 = vmatpush3.bf16.msra.mxu1 %v5108_v43  ;;  %v5187_v43 = vld [vmem:[%s7121_s1 + $0x7e4] ss:$12 sps:$4 sm:$0xff]  }
  0x98   :  { %3351 = vmatpush1.bf16.msra.mxu0 %v5104_v42  ;;  %4554 = vmatprep.subr.bf16.mxu1 %v5112_v45  ;;  %v5184_v42 = vld [vmem:[%s7121_s1 + $0x350] ss:$12 sps:$4 sm:$0xff]  }
  0x99   :  { %3352 = vmatprep.subr.bf16.mxu0 %v5111_v44  ;;  %v5188_v44 = vld [vmem:[%s7121_s1 + $0x428] ss:$12 sps:$4 sm:$0xff]  }
  0x9a   :  { %v5496_v45 = vld [vmem:[%s7122_s0 + $0x14] ss:$72 sps:$4 sm:$0xff]  }
  0x9b   :  { %4555 = vmatpush3.bf16.msra.mxu1 %v5113_v49  ;;  %v5189_v49 = vld [vmem:[%s7121_s1 + $0x368] ss:$12 sps:$4 sm:$0xff]  }
  0x9c   :  { %3353 = vmatpush1.bf16.msra.mxu0 %v5109_v47  ;;  %4556 = vmatprep.subr.bf16.mxu1 %v5117_v51  ;;  %v5185_v47 = vld [vmem:[%s7121_s1 + $0x7e0] ss:$12 sps:$4 sm:$0xff]  }
  0x9d   :  { %3354 = vmatprep.subr.bf16.mxu0 %v5116_v50  ;;  %v5192_v50 = vld [vmem:[%s7121_s1 + $0x7fc] ss:$12 sps:$4 sm:$0xff]   ;;  %v5193_v51 = vld [vmem:[%s7121_s1 + $0x440] ss:$12 sps:$4 sm:$0xff]  }
  0x9f   :  { %4557 = vmatpush3.bf16.msra.mxu1 %v5118_v53  ;;  %v5194_v53 = vld [vmem:[%s7121_s1 + $0x380] ss:$12 sps:$4 sm:$0xff]  }
  0xa0   :  { %3355 = vmatpush1.bf16.msra.mxu0 %v5114_v52  ;;  %4570 = vmatprep.subr.bf16.mxu1 %v5122_v55  ;;  %v5190_v52 = vld [vmem:[%s7121_s1 + $0x7f8] ss:$12 sps:$4 sm:$0xff]  }
  0xa1   :  { %3356 = vmatprep.subr.bf16.mxu0 %v5121_v54  ;;  %v5197_v54 = vld [vmem:[%s7121_s1 + $0x814] ss:$12 sps:$4 sm:$0xff]   ;;  %v5198_v55 = vld [vmem:[%s7121_s1 + $0x458] ss:$12 sps:$4 sm:$0xff]  }
  0xa2   :  { %3638 = vmatmul.mubr.bf16.vlgmr.msra.gmra.mrb[8].mxu1 %v5732_v4  ;;  %v5129_v4 = vld [vmem:[%s7121_s1 + $0x6f0] ss:$12 sps:$4 sm:$0xff]  }
  0xa3   :  { %4571 = vmatpush3.bf16.msra.mxu1 %v5123_v57  ;;  %3645 = vmatprep.mubr.bf16.mxu1 %v5807_v28  ;;  %v5137_v28 = vld [vmem:[%s7121_s1 + $0x290] ss:$12 sps:$4 sm:$0xff]   ;;  %v5199_v57 = vld [vmem:[%s7121_s1 + $0x398] ss:$12 sps:$4 sm:$0xff]  }
  0xa4   :  { %3357 = vmatpush1.bf16.msra.mxu0 %v5119_v56  ;;  %4572 = vmatprep.subr.bf16.mxu1 %v5127_v59  ;;  %v5195_v56 = vld [vmem:[%s7121_s1 + $0x810] ss:$12 sps:$4 sm:$0xff]  }
  0xa5   :  { %3358 = vmatprep.subr.bf16.mxu0 %v5126_v58  ;;  %v5202_v58 = vld [vmem:[%s7121_s1 + $0x82c] ss:$12 sps:$4 sm:$0xff]   ;;  %v5203_v59 = vld [vmem:[%s7121_s1 + $0x470] ss:$12 sps:$4 sm:$0xff]  }
  0xa7   :  { %4573 = vmatpush3.bf16.msra.mxu1 %v5128_v61  ;;  %v5204_v61 = vld [vmem:[%s7121_s1 + $0x3b0] ss:$12 sps:$4 sm:$0xff]  }
  0xa8   :  { %3359 = vmatpush1.bf16.msra.mxu0 %v5124_v60  ;;  %4574 = vmatprep.subr.bf16.mxu1 %v5132_v63  ;;  %v5200_v60 = vld [vmem:[%s7121_s1 + $0x828] ss:$12 sps:$4 sm:$0xff]  }
  0xa9   :  { %3360 = vmatprep.subr.bf16.mxu0 %v5131_v62  ;;  %v5207_v62 = vld [vmem:[%s7121_s1 + $0x844] ss:$12 sps:$4 sm:$0xff]   ;;  %v5208_v63 = vld [vmem:[%s7121_s1 + $0x548] ss:$12 sps:$4 sm:$0xff]  }
  0xaa   :  { %3646 = vmatmul.mubr.bf16.gmra.mrb[12].mxu1 %v5812_v29  ;;  %v5143_v29 = vld [vmem:[%s7121_s1 + $0x1e8] ss:$12 sps:$4 sm:$0xff]  }
  0xab   :  { %4575 = vmatpush3.bf16.msra.mxu1 %v5133_v0  ;;  %3686 = vmatprep.mubr.bf16.mxu1 %v5852_v41  ;;  %v5144_v41 = vld [vmem:[%s7121_s1 + $0x738] ss:$12 sps:$4 sm:$0xff]   ;;  %v5209_v0 = vld [vmem:[%s7121_s1 + $0x488] ss:$12 sps:$4 sm:$0xff]  }
  0xac   :  { %3361 = vmatpush1.bf16.msra.mxu0 %v5129_v4  ;;  %4576 = vmatprep.subr.bf16.mxu1 %v5137_v28  ;;  %v5205_v4 = vld [vmem:[%s7121_s1 + $0x840] ss:$12 sps:$4 sm:$0xff]  }
  0xad   :  { %3362 = vmatprep.subr.bf16.mxu0 %v5136_v1  ;;  %v5212_v1 = vld [vmem:[%s7121_s1 + $0x85c] ss:$12 sps:$4 sm:$0xff]   ;;  %v5213_v28 = vld [vmem:[%s7121_s1 + $0x560] ss:$12 sps:$4 sm:$0xff]  }
  0xaf   :  { %4577 = vmatpush3.bf16.msra.mxu1 %v5138_v3  ;;  %v5210_v3 = vld [vmem:[%s7121_s1 + $0x858] ss:$12 sps:$4 sm:$0xff]  }
  0xb0   :  { %3363 = vmatpush1.bf16.msra.mxu0 %v5134_v2  ;;  %4578 = vmatprep.subr.bf16.mxu1 %v5142_v6  ;;  %v5497_v2 = vld [vmem:[%s7122_s0 + $0x10] ss:$72 sps:$4 sm:$0xff]   ;;  %v5217_v6 = vld [vmem:[%s7121_s1 + $0x874] ss:$12 sps:$4 sm:$0xff]  }
  0xb1   :  { %3364 = vmatprep.subr.bf16.mxu0 %v5141_v5  ;;  %v5214_v5 = vld [vmem:[%s7121_s1 + $0x4a0] ss:$12 sps:$4 sm:$0xff]  }
  0xb3   :  { %4579 = vmatpush3.bf16.msra.mxu1 %v5143_v29  ;;  %v5498_v29 = vld [vmem:[%s7122_s0 + $0xa4] ss:$72 sps:$4 sm:$0xff]  }
  0xb4   :  { %3365 = vmatpush1.bf16.msra.mxu0 %v5139_v7  ;;  %4580 = vmatprep.subr.bf16.mxu1 %v5147_v9  ;;  %v5218_v7 = vld [vmem:[%s7121_s1 + $0x578] ss:$12 sps:$4 sm:$0xff]  }
  0xb5   :  { %3366 = vmatprep.subr.bf16.mxu0 %v5146_v8  ;;  %v5215_v8 = vld [vmem:[%s7121_s1 + $0x870] ss:$12 sps:$4 sm:$0xff]   ;;  %v5219_v9 = vld [vmem:[%s7121_s1 + $0x4b8] ss:$12 sps:$4 sm:$0xff]  }
  0xb7   :  { %4581 = vmatpush3.bf16.msra.mxu1 %v5148_v10  ;;  %v5223_v10 = vld [vmem:[%s7121_s1 + $0x590] ss:$12 sps:$4 sm:$0xff]  }
  0xb8   :  { %3367 = vmatpush1.bf16.msra.mxu0 %v5144_v41  ;;  %4582 = vmatprep.subr.bf16.mxu1 %v5154_v13  ;;  %v5222_v41 = vld [vmem:[%s7121_s1 + $0x88c] ss:$12 sps:$4 sm:$0xff]   ;;  %v5220_v13 = vld [vmem:[%s7121_s1 + $0x888] ss:$12 sps:$4 sm:$0xff]  }
  0xb9   :  { %3368 = vmatprep.subr.bf16.mxu0 %v5153_v11  ;;  %v5499_v11 = vld [vmem:[%s7122_s0 + $0xa0] ss:$72 sps:$4 sm:$0xff]  }
  0xbb   :  { %4583 = vmatpush3.bf16.msra.mxu1 %v5156_v15  ;;  %v5227_v15 = vld [vmem:[%s7121_s1 + $0x8a4] ss:$12 sps:$4 sm:$0xff]  }
  0xbc   :  { %3369 = vmatpush1.bf16.msra.mxu0 %v5151_v14  ;;  %4584 = vmatprep.subr.bf16.mxu1 %v5160_v17  ;;  %v5224_v14 = vld [vmem:[%s7121_s1 + $0x4d0] ss:$12 sps:$4 sm:$0xff]   ;;  %v5225_v17 = vld [vmem:[%s7121_s1 + $0x8a0] ss:$12 sps:$4 sm:$0xff]  }
  0xbd   :  { %3370 = vmatprep.subr.bf16.mxu0 %v5159_v16  ;;  %v5228_v16 = vld [vmem:[%s7121_s1 + $0x5a8] ss:$12 sps:$4 sm:$0xff]  }
  0xbf   :  { %4585 = vmatpush3.bf16.msra.mxu1 %v5161_v19  ;;  %v5229_v19 = vld [vmem:[%s7121_s1 + $0x4e8] ss:$12 sps:$4 sm:$0xff]  }
  0xc0   :  { %3371 = vmatpush1.bf16.msra.mxu0 %v5157_v18  ;;  %4598 = vmatprep.subr.bf16.mxu1 %v5168_v22  ;;  %v5500_v18 = vld [vmem:[%s7122_s0 + $0x1c] ss:$72 sps:$4 sm:$0xff]   ;;  %v5233_v22 = vld [vmem:[%s7121_s1 + $0x5c0] ss:$12 sps:$4 sm:$0xff]  }
  0xc1   :  { %3393 = vmatprep.subr.bf16.mxu0 %v5167_v21  ;;  %v5232_v21 = vld [vmem:[%s7121_s1 + $0x8bc] ss:$12 sps:$4 sm:$0xff]  }
  0xc2   :  { %3687 = vmatmul.mubr.bf16.vlgmr.msra.gmra.mrb[16].mxu1 %v5954_v12  ;;  %v6228_v12 = vld [vmem:[%s7122_s0 + $0xb4] ss:$72 sps:$4 sm:$0xff]  }
  0xc3   :  { %3373 = vmatmul.mubr.bf16.vlgmr.msra.gmra.mrb[0].mxu0 %v6196_v23  ;;  %4599 = vmatpush3.bf16.msra.mxu1 %v5169_v25  ;;  %v5234_v25 = vld [vmem:[%s7121_s1 + $0x500] ss:$12 sps:$4 sm:$0xff]  }
  0xc4   :  { %3394 = vmatpush1.bf16.msra.mxu0 %v5165_v24  ;;  %4600 = vmatprep.subr.bf16.mxu1 %v5173_v30  ;;  %v5230_v24 = vld [vmem:[%s7121_s1 + $0x8b8] ss:$12 sps:$4 sm:$0xff]  }
  0xc5   :  { %3395 = vmatprep.subr.bf16.mxu0 %v5172_v26  ;;  %3694 = vmatprep.mubr.bf16.mxu1 %v5980_v20  ;;  %v6242_v20 = vld [vmem:[%s7122_s0 + $0xb0] ss:$72 sps:$4 sm:$0xff]   ;;  %v5239_v26 = vld [vmem:[%s7121_s1 + $0x8d4] ss:$12 sps:$4 sm:$0xff]  }
  0xc6   :  { %3382 = vmatprep.mubr.bf16.mxu0 %v6228_v12  ;;  %v5240_v30 = vld [vmem:[%s7121_s1 + $0x5d8] ss:$12 sps:$4 sm:$0xff]  }
  0xc7   :  { %4601 = vmatpush3.bf16.msra.mxu1 %v5174_v32  ;;  %v5242_v32 = vld [vmem:[%s7121_s1 + $0x518] ss:$12 sps:$4 sm:$0xff]  }
  0xc8   :  { %3396 = vmatpush1.bf16.msra.mxu0 %v5170_v31  ;;  %4602 = vmatprep.subr.bf16.mxu1 %v5178_v34  ;;  %v5237_v31 = vld [vmem:[%s7121_s1 + $0x8d0] ss:$12 sps:$4 sm:$0xff]  }
  0xc9   :  { %3397 = vmatprep.subr.bf16.mxu0 %v5177_v33  ;;  %v5245_v33 = vld [vmem:[%s7121_s1 + $0x8ec] ss:$12 sps:$4 sm:$0xff]   ;;  %v5246_v34 = vld [vmem:[%s7121_s1 + $0x5f0] ss:$12 sps:$4 sm:$0xff]  }
  0xca   :  { %3695 = vmatmul.mubr.bf16.gmra.mrb[20].mxu1 %v6005_v27  ;;  %v6268_v27 = vld [vmem:[%s7122_s0 + $0x2c] ss:$72 sps:$4 sm:$0xff]  }
  0xcb   :  { %3383 = vmatmul.mubr.bf16.gmra.mrb[4].mxu0 %v6242_v20  ;;  %4603 = vmatpush3.bf16.msra.mxu1 %v5179_v37  ;;  %v5247_v37 = vld [vmem:[%s7121_s1 + $0x530] ss:$12 sps:$4 sm:$0xff]  }
  0xcc   :  { %3398 = vmatpush1.bf16.msra.mxu0 %v5175_v35  ;;  %4604 = vmatprep.subr.bf16.mxu1 %v5183_v39  ;;  %v5243_v35 = vld [vmem:[%s7121_s1 + $0x8e8] ss:$12 sps:$4 sm:$0xff]  }
  0xcd   :  { %3399 = vmatprep.subr.bf16.mxu0 %v5182_v38  ;;  %3735 = vmatprep.mubr.bf16.mxu1 %v5496_v45  ;;  %v5253_v38 = vld [vmem:[%s7121_s1 + $0x904] ss:$12 sps:$4 sm:$0xff]   ;;  %v5254_v39 = vld [vmem:[%s7121_s1 + $0x6c8] ss:$12 sps:$4 sm:$0xff]   ;;  %v5259_v45 = vld [vmem:[%s7121_s1 + $0x6e0] ss:$12 sps:$4 sm:$0xff]  }
  0xce   :  { %3425 = vmatprep.mubr.bf16.mxu0 %v6268_v27 }
  0xcf   :  { %4605 = vmatpush3.bf16.msra.mxu1 %v5184_v42  ;;  %v5251_v42 = vld [vmem:[%s7121_s1 + $0x900] ss:$12 sps:$4 sm:$0xff]  }
  0xd0   :  { %3400 = vmatpush1.bf16.msra.mxu0 %v5180_v40  ;;  %4606 = vmatprep.subr.bf16.mxu1 %v5188_v44  ;;  %v6430_v40 = vld [vmem:[%s7122_s0 + $0x28] ss:$72 sps:$4 sm:$0xff]  }
  0xd1   :  { %3401 = vmatprep.subr.bf16.mxu0 %v5187_v43  ;;  %v5255_v43 = vld [vmem:[%s7121_s1 + $0x608] ss:$12 sps:$4 sm:$0xff]  }
  0xd2   :  { %v5258_v44 = vld [vmem:[%s7121_s1 + $0x91c] ss:$12 sps:$4 sm:$0xff]  }
  0xd3   :  { %4607 = vmatpush3.bf16.msra.mxu1 %v5189_v49  ;;  %v6450_v49 = vld [vmem:[%s7122_s0 + $0xbc] ss:$72 sps:$4 sm:$0xff]  }
  0xd4   :  { %3402 = vmatpush1.bf16.msra.mxu0 %v5185_v47  ;;  %4608 = vmatprep.subr.bf16.mxu1 %v5193_v51  ;;  %v5256_v47 = vld [vmem:[%s7121_s1 + $0x918] ss:$12 sps:$4 sm:$0xff]   ;;  %v5260_v51 = vld [vmem:[%s7121_s1 + $0x620] ss:$12 sps:$4 sm:$0xff]  }
  0xd5   :  { %3403 = vmatprep.subr.bf16.mxu0 %v5192_v50  ;;  %v5501_v50 = vld [vmem:[%s7122_s0 + $0x18] ss:$72 sps:$4 sm:$0xff]  }
  0xd7   :  { %4609 = vmatpush3.bf16.msra.mxu1 %v5194_v53  ;;  %v5264_v53 = vld [vmem:[%s7121_s1 + $0x6f8] ss:$12 sps:$4 sm:$0xff]  }
  0xd8   :  { %3404 = vmatpush1.bf16.msra.mxu0 %v5190_v52  ;;  %4610 = vmatprep.subr.bf16.mxu1 %v5198_v55  ;;  %v5263_v52 = vld [vmem:[%s7121_s1 + $0x934] ss:$12 sps:$4 sm:$0xff]   ;;  %v5265_v55 = vld [vmem:[%s7121_s1 + $0x638] ss:$12 sps:$4 sm:$0xff]  }
  0xd9   :  { %3405 = vmatprep.subr.bf16.mxu0 %v5197_v54  ;;  %v5261_v54 = vld [vmem:[%s7121_s1 + $0x930] ss:$12 sps:$4 sm:$0xff]  }
  0xdb   :  { %4611 = vmatpush3.bf16.msra.mxu1 %v5199_v57  ;;  %v5269_v57 = vld [vmem:[%s7121_s1 + $0x710] ss:$12 sps:$4 sm:$0xff]  }
  0xdc   :  { %3406 = vmatpush1.bf16.msra.mxu0 %v5195_v56  ;;  %4612 = vmatprep.subr.bf16.mxu1 %v5203_v59  ;;  %v6476_v56 = vld [vmem:[%s7122_s0 + $0xb8] ss:$72 sps:$4 sm:$0xff]   ;;  %v6490_v59 = vld [vmem:[%s7122_s0 + $0x34] ss:$72 sps:$4 sm:$0xff]  }
  0xdd   :  { %3407 = vmatprep.subr.bf16.mxu0 %v5202_v58  ;;  %v5266_v58 = vld [vmem:[%s7121_s1 + $0x948] ss:$12 sps:$4 sm:$0xff]  }
  0xdf   :  { %4613 = vmatpush3.bf16.msra.mxu1 %v5204_v61  ;;  %v5273_v61 = vld [vmem:[%s7121_s1 + $0x964] ss:$12 sps:$4 sm:$0xff]  }
  0xe0   :  { %3408 = vmatpush1.bf16.msra.mxu0 %v5200_v60  ;;  %4626 = vmatprep.subr.bf16.mxu1 %v5208_v63  ;;  %v5270_v60 = vld [vmem:[%s7121_s1 + $0x650] ss:$12 sps:$4 sm:$0xff]   ;;  %v5275_v63 = vld [vmem:[%s7121_s1 + $0x668] ss:$12 sps:$4 sm:$0xff]  }
  0xe1   :  { %3409 = vmatprep.subr.bf16.mxu0 %v5207_v62  ;;  %v5274_v62 = vld [vmem:[%s7121_s1 + $0x728] ss:$12 sps:$4 sm:$0xff]  }
  0xe2   :  { %3736 = vmatmul.mubr.bf16.vlgmr.msra.gmra.mrb[24].mxu1 %v5497_v2  ;;  %v5284_v2 = vld [vmem:[%s7121_s1 + $0x758] ss:$12 sps:$4 sm:$0xff]  }
  0xe3   :  { %4627 = vmatpush3.bf16.msra.mxu1 %v5209_v0  ;;  %3743 = vmatprep.mubr.bf16.mxu1 %v5498_v29  ;;  %v5276_v0 = vld [vmem:[%s7121_s1 + $0x978] ss:$12 sps:$4 sm:$0xff]   ;;  %v5286_v29 = vld [vmem:[%s7121_s1 + $0x9a8] ss:$12 sps:$4 sm:$0xff]  }
  0xe4   :  { %3410 = vmatpush1.bf16.msra.mxu0 %v5205_v4  ;;  %4628 = vmatprep.subr.bf16.mxu1 %v5213_v28  ;;  %v5278_v4 = vld [vmem:[%s7121_s1 + $0x97c] ss:$12 sps:$4 sm:$0xff]   ;;  %v5283_v28 = vld [vmem:[%s7121_s1 + $0x994] ss:$12 sps:$4 sm:$0xff]  }
  0xe5   :  { %3411 = vmatprep.subr.bf16.mxu0 %v5212_v1  ;;  %v5280_v1 = vld [vmem:[%s7121_s1 + $0x680] ss:$12 sps:$4 sm:$0xff]  }
  0xe7   :  { %4629 = vmatpush3.bf16.msra.mxu1 %v5214_v5  ;;  %v5285_v5 = vld [vmem:[%s7121_s1 + $0x698] ss:$12 sps:$4 sm:$0xff]  }
  0xe8   :  { %3412 = vmatpush1.bf16.msra.mxu0 %v5210_v3  ;;  %4630 = vmatprep.subr.bf16.mxu1 %v5218_v7  ;;  %v5281_v3 = vld [vmem:[%s7121_s1 + $0x990] ss:$12 sps:$4 sm:$0xff]  }
  0xe9   :  { %3413 = vmatprep.subr.bf16.mxu0 %v5217_v6  ;;  %v5288_v6 = vld [vmem:[%s7121_s1 + $0x9ac] ss:$12 sps:$4 sm:$0xff]   ;;  %v5289_v7 = vld [vmem:[%s7121_s1 + $0x770] ss:$12 sps:$4 sm:$0xff]  }
  0xea   :  { %3744 = vmatmul.mubr.bf16.gmra.mrb[28].mxu1 %v5499_v11  ;;  %v5295_v11 = vld [vmem:[%s7121_s1 + $0x788] ss:$12 sps:$4 sm:$0xff]  }
  0xeb   :  { %4631 = vmatpush3.bf16.msra.mxu1 %v5219_v9  ;;  %3784 = vmatprep.mubr.bf16.mxu1 %v5500_v18  ;;  %v5293_v9 = vld [vmem:[%s7121_s1 + $0x9c4] ss:$12 sps:$4 sm:$0xff]  }
  0xec   :  { %3414 = vmatpush1.bf16.msra.mxu0 %v5215_v8  ;;  %4632 = vmatprep.subr.bf16.mxu1 %v5223_v10  ;;  %v5290_v8 = vld [vmem:[%s7121_s1 + $0x6b0] ss:$12 sps:$4 sm:$0xff]   ;;  %v5291_v10 = vld [vmem:[%s7121_s1 + $0x9c0] ss:$12 sps:$4 sm:$0xff]   ;;  %v5304_v18 = vld [vmem:[%s7121_s1 + $0x878] ss:$12 sps:$4 sm:$0xff]  }
  0xed   :  { %3415 = vmatprep.subr.bf16.mxu0 %v5222_v41  ;;  %v5294_v41 = vld [vmem:[%s7121_s1 + $0x848] ss:$12 sps:$4 sm:$0xff]  }
  0xef   :  { %4633 = vmatpush3.bf16.msra.mxu1 %v5224_v14  ;;  %v5299_v14 = vld [vmem:[%s7121_s1 + $0x860] ss:$12 sps:$4 sm:$0xff]  }
  0xf0   :  { %3416 = vmatpush1.bf16.msra.mxu0 %v5220_v13  ;;  %4634 = vmatprep.subr.bf16.mxu1 %v5228_v16  ;;  %v5298_v13 = vld [vmem:[%s7121_s1 + $0x9dc] ss:$12 sps:$4 sm:$0xff]   ;;  %v5300_v16 = vld [vmem:[%s7121_s1 + $0x7a0] ss:$12 sps:$4 sm:$0xff]  }
  0xf1   :  { %3417 = vmatprep.subr.bf16.mxu0 %v5227_v15  ;;  %v5296_v15 = vld [vmem:[%s7121_s1 + $0x9d8] ss:$12 sps:$4 sm:$0xff]  }
  0xf3   :  { %4635 = vmatpush3.bf16.msra.mxu1 %v5229_v19  ;;  %v5305_v19 = vld [vmem:[%s7121_s1 + $0x7b8] ss:$12 sps:$4 sm:$0xff]  }
  0xf4   :  { %3418 = vmatpush1.bf16.msra.mxu0 %v5225_v17  ;;  %4636 = vmatprep.subr.bf16.mxu1 %v5233_v22  ;;  %v5303_v17 = vld [vmem:[%s7121_s1 + $0x9f4] ss:$12 sps:$4 sm:$0xff]  }
  0xf5   :  { %3419 = vmatprep.subr.bf16.mxu0 %v5232_v21  ;;  %v5308_v21 = vld [vmem:[%s7121_s1 + $0xa0c] ss:$12 sps:$4 sm:$0xff]   ;;  %v5306_v22 = vld [vmem:[%s7121_s1 + $0xa08] ss:$12 sps:$4 sm:$0xff]  }
  0xf7   :  { %4637 = vmatpush3.bf16.msra.mxu1 %v5234_v25  ;;  %v5313_v25 = vld [vmem:[%s7121_s1 + $0xa24] ss:$12 sps:$4 sm:$0xff]  }
  0xf8   :  { %3420 = vmatpush1.bf16.msra.mxu0 %v5230_v24  ;;  %4638 = vmatprep.subr.bf16.mxu1 %v5240_v30  ;;  %v5310_v24 = vld [vmem:[%s7121_s1 + $0x7d0] ss:$12 sps:$4 sm:$0xff]   ;;  %v5315_v30 = vld [vmem:[%s7121_s1 + $0x7e8] ss:$12 sps:$4 sm:$0xff]  }
  0xf9   :  { %3421 = vmatprep.subr.bf16.mxu0 %v5239_v26  ;;  %v5314_v26 = vld [vmem:[%s7121_s1 + $0x8a8] ss:$12 sps:$4 sm:$0xff]  }
  0xfb   :  { %4639 = vmatpush3.bf16.msra.mxu1 %v5242_v32  ;;  %v5316_v32 = vld [vmem:[%s7121_s1 + $0xa38] ss:$12 sps:$4 sm:$0xff]  }
  0xfc   :  { %3422 = vmatpush1.bf16.msra.mxu0 %v5237_v31  ;;  %4640 = vmatprep.subr.bf16.mxu1 %v5246_v34  ;;  %v5318_v31 = vld [vmem:[%s7121_s1 + $0xa3c] ss:$12 sps:$4 sm:$0xff]   ;;  %v5325_v34 = vld [vmem:[%s7121_s1 + $0xa54] ss:$12 sps:$4 sm:$0xff]  }
  0xfd   :  { %3423 = vmatprep.subr.bf16.mxu0 %v5245_v33  ;;  %v5320_v33 = vld [vmem:[%s7121_s1 + $0x800] ss:$12 sps:$4 sm:$0xff]  }
  0xff   :  { %4641 = vmatpush3.bf16.msra.mxu1 %v5247_v37  ;;  %v5323_v37 = vld [vmem:[%s7121_s1 + $0xa50] ss:$12 sps:$4 sm:$0xff]  }
 0x100   :  { %3424 = vmatpush1.bf16.msra.mxu0 %v5243_v35  ;;  %4654 = vmatprep.subr.bf16.mxu1 %v5254_v39  ;;  %v5326_v35 = vld [vmem:[%s7121_s1 + $0x8d8] ss:$12 sps:$4 sm:$0xff]  }
 0x101   :  { %3446 = vmatprep.subr.bf16.mxu0 %v5253_v38  ;;  %v5328_v38 = vld [vmem:[%s7121_s1 + $0x818] ss:$12 sps:$4 sm:$0xff]  }
 0x102   :  { %3785 = vmatmul.mubr.bf16.vlgmr.msra.gmra.mrb[32].mxu1 %v5501_v50  ;;  %v5331_v39 = vld [vmem:[%s7121_s1 + $0xa6c] ss:$12 sps:$4 sm:$0xff]  }
 0x103   :  { %3426 = vmatmul.mubr.bf16.vlgmr.msra.gmra.mrb[0].mxu0 %v6430_v40  ;;  %4655 = vmatpush3.bf16.msra.mxu1 %v5255_v43  ;;  %v5329_v43 = vld [vmem:[%s7121_s1 + $0xa68] ss:$12 sps:$4 sm:$0xff]   ;;  %v6656_v50 = vld [vmem:[%s7122_s0 + $0x30] ss:$72 sps:$4 sm:$0xff]  }
 0x104   :  { %3447 = vmatpush1.bf16.msra.mxu0 %v5251_v42  ;;  %4656 = vmatprep.subr.bf16.mxu1 %v5259_v45  ;;  %v5332_v42 = vld [vmem:[%s7121_s1 + $0x8f0] ss:$12 sps:$4 sm:$0xff]  }
 0x105   :  { %3448 = vmatprep.subr.bf16.mxu0 %v5258_v44  ;;  %3792 = vmatprep.mubr.bf16.mxu1 %v6030_v36  ;;  %v5268_v36 = vld [vmem:[%s7121_s1 + $0x94c] ss:$12 sps:$4 sm:$0xff]   ;;  %v5333_v44 = vld [vmem:[%s7121_s1 + $0x830] ss:$12 sps:$4 sm:$0xff]  }
 0x106   :  { %3435 = vmatprep.mubr.bf16.mxu0 %v6450_v49  ;;  %v5339_v45 = vld [vmem:[%s7121_s1 + $0xa84] ss:$12 sps:$4 sm:$0xff]  }
 0x107   :  { %4657 = vmatpush3.bf16.msra.mxu1 %v5260_v51  ;;  %v5337_v51 = vld [vmem:[%s7121_s1 + $0xa80] ss:$12 sps:$4 sm:$0xff]  }
 0x108   :  { %3449 = vmatpush1.bf16.msra.mxu0 %v5256_v47  ;;  %4658 = vmatprep.subr.bf16.mxu1 %v5264_v53  ;;  %v5340_v47 = vld [vmem:[%s7121_s1 + $0x9c8] ss:$12 sps:$4 sm:$0xff]  }
 0x109   :  { %3450 = vmatprep.subr.bf16.mxu0 %v5263_v52  ;;  %v5341_v52 = vld [vmem:[%s7121_s1 + $0x908] ss:$12 sps:$4 sm:$0xff]  }
 0x10a   :  { %3793 = vmatmul.mubr.bf16.gmra.mrb[36].mxu1 %v6044_v48  ;;  %v5271_v48 = vld [vmem:[%s7121_s1 + $0x960] ss:$12 sps:$4 sm:$0xff]   ;;  %v5344_v53 = vld [vmem:[%s7121_s1 + $0xa9c] ss:$12 sps:$4 sm:$0xff]  }
 0x10b   :  { %3436 = vmatmul.mubr.bf16.gmra.mrb[4].mxu0 %v6476_v56  ;;  %4659 = vmatpush3.bf16.msra.mxu1 %v5265_v55  ;;  %v5342_v55 = vld [vmem:[%s7121_s1 + $0xa98] ss:$12 sps:$4 sm:$0xff]  }
 0x10c   :  { %3451 = vmatpush1.bf16.msra.mxu0 %v5261_v54  ;;  %4660 = vmatprep.subr.bf16.mxu1 %v5269_v57  ;;  %v5345_v54 = vld [vmem:[%s7121_s1 + $0x9e0] ss:$12 sps:$4 sm:$0xff]  }
 0x10d   :  { %3452 = vmatprep.subr.bf16.mxu0 %v5268_v36  ;;  %3833 = vmatprep.mubr.bf16.mxu1 %v6066_v46  ;;  %v5279_v46 = vld [vmem:[%s7121_s1 + $0x740] ss:$12 sps:$4 sm:$0xff]  }
 0x10e   :  { %3478 = vmatprep.mubr.bf16.mxu0 %v6490_v59  ;;  %v5346_v36 = vld [vmem:[%s7121_s1 + $0x920] ss:$12 sps:$4 sm:$0xff]  }
 0x10f   :  { %4661 = vmatpush3.bf16.msra.mxu1 %v5270_v60  ;;  %v5349_v57 = vld [vmem:[%s7121_s1 + $0xab4] ss:$12 sps:$4 sm:$0xff]   ;;  %v5347_v60 = vld [vmem:[%s7121_s1 + $0xab0] ss:$12 sps:$4 sm:$0xff]  }
 0x110   :  { %3453 = vmatpush1.bf16.msra.mxu0 %v5266_v58  ;;  %4662 = vmatprep.subr.bf16.mxu1 %v5274_v62  ;;  %v6684_v58 = vld [vmem:[%s7122_s0 + $0xc4] ss:$72 sps:$4 sm:$0xff]  }
 0x111   :  { %3454 = vmatprep.subr.bf16.mxu0 %v5273_v61  ;;  %v5351_v61 = vld [vmem:[%s7121_s1 + $0x938] ss:$12 sps:$4 sm:$0xff]  }
 0x112   :  { %v5354_v62 = vld [vmem:[%s7121_s1 + $0xacc] ss:$12 sps:$4 sm:$0xff]  }
 0x113   :  { %4663 = vmatpush3.bf16.msra.mxu1 %v5275_v63  ;;  %v6711_v63 = vld [vmem:[%s7122_s0 + $0x3c] ss:$72 sps:$4 sm:$0xff]  }
 0x114   :  { %3455 = vmatpush1.bf16.msra.mxu0 %v5271_v48  ;;  %4664 = vmatprep.subr.bf16.mxu1 %v5279_v46  ;;  %v6706_v48 = vld [vmem:[%s7122_s0 + $0xc0] ss:$72 sps:$4 sm:$0xff]   ;;  %v5356_v46 = vld [vmem:[%s7121_s1 + $0x950] ss:$12 sps:$4 sm:$0xff]  }
 0x115   :  { %3456 = vmatprep.subr.bf16.mxu0 %v5278_v4  ;;  %v5352_v4 = vld [vmem:[%s7121_s1 + $0xac8] ss:$12 sps:$4 sm:$0xff]  }
 0x117   :  { %4665 = vmatpush3.bf16.msra.mxu1 %v5280_v1  ;;  %v5357_v1 = vld [vmem:[%s7121_s1 + $0xae0] ss:$12 sps:$4 sm:$0xff]  }
 0x118   :  { %3457 = vmatpush1.bf16.msra.mxu0 %v5276_v0  ;;  %4666 = vmatprep.subr.bf16.mxu1 %v5284_v2  ;;  %v5359_v0 = vld [vmem:[%s7121_s1 + $0xae4] ss:$12 sps:$4 sm:$0xff]   ;;  %v5364_v2 = vld [vmem:[%s7121_s1 + $0xafc] ss:$12 sps:$4 sm:$0xff]  }
 0x119   :  { %3458 = vmatprep.subr.bf16.mxu0 %v5283_v28  ;;  %v5361_v28 = vld [vmem:[%s7121_s1 + $0x968] ss:$12 sps:$4 sm:$0xff]  }
 0x11b   :  { %4667 = vmatpush3.bf16.msra.mxu1 %v5285_v5  ;;  %v5366_v5 = vld [vmem:[%s7121_s1 + $0x980] ss:$12 sps:$4 sm:$0xff]  }
 0x11c   :  { %3459 = vmatpush1.bf16.msra.mxu0 %v5281_v3  ;;  %4668 = vmatprep.subr.bf16.mxu1 %v5289_v7  ;;  %v5365_v3 = vld [vmem:[%s7121_s1 + $0xa40] ss:$12 sps:$4 sm:$0xff]   ;;  %v5370_v7 = vld [vmem:[%s7121_s1 + $0xa58] ss:$12 sps:$4 sm:$0xff]  }
 0x11d   :  { %3460 = vmatprep.subr.bf16.mxu0 %v5288_v6  ;;  %v5369_v6 = vld [vmem:[%s7121_s1 + $0xb14] ss:$12 sps:$4 sm:$0xff]  }
 0x11f   :  { %4669 = vmatpush3.bf16.msra.mxu1 %v5290_v8  ;;  %v5367_v8 = vld [vmem:[%s7121_s1 + $0xb10] ss:$12 sps:$4 sm:$0xff]  }
 0x120   :  { %3461 = vmatpush1.bf16.msra.mxu0 %v5286_v29  ;;  %4682 = vmatprep.subr.bf16.mxu1 %v5294_v41 }
 0x121   :  { %3462 = vmatprep.subr.bf16.mxu0 %v5293_v9 }
 0x122   :  { %3834 = vmatmul.mubr.bf16.vlgmr.msra.gmra.mrb[40].mxu1 %v6196_v23  ;;  %v5301_v23 = vld [vmem:[%s7121_s1 + $0x9f0] ss:$12 sps:$4 sm:$0xff]  }
 0x123   :  { %4683 = vmatpush3.bf16.msra.mxu1 %v5295_v11  ;;  %3841 = vmatprep.mubr.bf16.mxu1 %v6228_v12  ;;  %v5309_v12 = vld [vmem:[%s7121_s1 + $0x890] ss:$12 sps:$4 sm:$0xff]   ;;  %v5374_v11 = vld [vmem:[%s7121_s1 + $0xb2c] ss:$12 sps:$4 sm:$0xff]  }
 0x124   :  { %3463 = vmatpush1.bf16.msra.mxu0 %v5291_v10  ;;  %4684 = vmatprep.subr.bf16.mxu1 %v5299_v14  ;;  %v5371_v10 = vld [vmem:[%s7121_s1 + $0x998] ss:$12 sps:$4 sm:$0xff]   ;;  %v5375_v14 = vld [vmem:[%s7121_s1 + $0xa70] ss:$12 sps:$4 sm:$0xff]  }
 0x125   :  { %3464 = vmatprep.subr.bf16.mxu0 %v5298_v13 }
 0x127   :  { %4685 = vmatpush3.bf16.msra.mxu1 %v5300_v16  ;;  %v5376_v16 = vld [vmem:[%s7121_s1 + $0x9b0] ss:$12 sps:$4 sm:$0xff]  }
 0x128   :  { %3465 = vmatpush1.bf16.msra.mxu0 %v5296_v15  ;;  %4686 = vmatprep.subr.bf16.mxu1 %v5304_v18  ;;  %v5372_v15 = vld [vmem:[%s7121_s1 + $0xb28] ss:$12 sps:$4 sm:$0xff]  }
 0x129   :  { %3466 = vmatprep.subr.bf16.mxu0 %v5303_v17  ;;  %v5379_v17 = vld [vmem:[%s7121_s1 + $0xb44] ss:$12 sps:$4 sm:$0xff]   ;;  %v5380_v18 = vld [vmem:[%s7121_s1 + $0xb48] ss:$12 sps:$4 sm:$0xff]  }
 0x12a   :  { %3842 = vmatmul.mubr.bf16.gmra.mrb[44].mxu1 %v6242_v20  ;;  %v5311_v20 = vld [vmem:[%s7121_s1 + $0xa20] ss:$12 sps:$4 sm:$0xff]  }
 0x12b   :  { %4687 = vmatpush3.bf16.msra.mxu1 %v5305_v19  ;;  %3882 = vmatprep.mubr.bf16.mxu1 %v6268_v27  ;;  %v5319_v27 = vld [vmem:[%s7121_s1 + $0x8c0] ss:$12 sps:$4 sm:$0xff]  }
 0x12c   :  { %3467 = vmatpush1.bf16.msra.mxu0 %v5301_v23  ;;  %4688 = vmatprep.subr.bf16.mxu1 %v5309_v12  ;;  %v5377_v19 = vld [vmem:[%s7121_s1 + $0xb40] ss:$12 sps:$4 sm:$0xff]   ;;  %v5381_v12 = vld [vmem:[%s7121_s1 + $0xa88] ss:$12 sps:$4 sm:$0xff]  }
 0x12d   :  { %3468 = vmatprep.subr.bf16.mxu0 %v5308_v21 }
 0x12f   :  { %4689 = vmatpush3.bf16.msra.mxu1 %v5310_v24  ;;  %v5384_v24 = vld [vmem:[%s7121_s1 + $0xb5c] ss:$12 sps:$4 sm:$0xff]  }
 0x130   :  { %3469 = vmatpush1.bf16.msra.mxu0 %v5306_v22  ;;  %4690 = vmatprep.subr.bf16.mxu1 %v5314_v26 }
 0x131   :  { %3470 = vmatprep.subr.bf16.mxu0 %v5313_v25  ;;  %v5385_v25 = vld [vmem:[%s7121_s1 + $0xb60] ss:$12 sps:$4 sm:$0xff]  }
 0x133   :  { %4691 = vmatpush3.bf16.msra.mxu1 %v5315_v30  ;;  %v5386_v30 = vld [vmem:[%s7121_s1 + $0xaa0] ss:$12 sps:$4 sm:$0xff]  }
 0x134   :  { %3471 = vmatpush1.bf16.msra.mxu0 %v5311_v20  ;;  %4692 = vmatprep.subr.bf16.mxu1 %v5319_v27  ;;  %v5382_v20 = vld [vmem:[%s7121_s1 + $0xb58] ss:$12 sps:$4 sm:$0xff]  }
 0x135   :  { %3472 = vmatprep.subr.bf16.mxu0 %v5318_v31  ;;  %v5391_v31 = vld [vmem:[%s7121_s1 + $0xb74] ss:$12 sps:$4 sm:$0xff]   ;;  %v5393_v27 = vld [vmem:[%s7121_s1 + $0xb78] ss:$12 sps:$4 sm:$0xff]  }
 0x137   :  { %4693 = vmatpush3.bf16.msra.mxu1 %v5320_v33  ;;  %v5394_v33 = vld [vmem:[%s7121_s1 + $0xab8] ss:$12 sps:$4 sm:$0xff]  }
 0x138   :  { %3473 = vmatpush1.bf16.msra.mxu0 %v5316_v32  ;;  %4694 = vmatprep.subr.bf16.mxu1 %v5326_v35  ;;  %v5389_v32 = vld [vmem:[%s7121_s1 + $0xb70] ss:$12 sps:$4 sm:$0xff]  }
 0x139   :  { %3474 = vmatprep.subr.bf16.mxu0 %v5325_v34  ;;  %v5397_v34 = vld [vmem:[%s7121_s1 + $0xb8c] ss:$12 sps:$4 sm:$0xff]   ;;  %v5398_v35 = vld [vmem:[%s7121_s1 + $0xb90] ss:$12 sps:$4 sm:$0xff]  }
 0x13b   :  { %4695 = vmatpush3.bf16.msra.mxu1 %v5328_v38  ;;  %v5399_v38 = vld [vmem:[%s7121_s1 + $0xad0] ss:$12 sps:$4 sm:$0xff]  }
 0x13c   :  { %3475 = vmatpush1.bf16.msra.mxu0 %v5323_v37  ;;  %4696 = vmatprep.subr.bf16.mxu1 %v5332_v42  ;;  %v5395_v37 = vld [vmem:[%s7121_s1 + $0xb88] ss:$12 sps:$4 sm:$0xff]  }
 0x13d   :  { %3476 = vmatprep.subr.bf16.mxu0 %v5331_v39  ;;  %v5402_v39 = vld [vmem:[%s7121_s1 + $0xba4] ss:$12 sps:$4 sm:$0xff]   ;;  %v5403_v42 = vld [vmem:[%s7121_s1 + $0xba8] ss:$12 sps:$4 sm:$0xff]  }
 0x13f   :  { %4697 = vmatpush3.bf16.msra.mxu1 %v5333_v44  ;;  %v5404_v44 = vld [vmem:[%s7121_s1 + $0xae8] ss:$12 sps:$4 sm:$0xff]  }
 0x140   :  { %3477 = vmatpush1.bf16.msra.mxu0 %v5329_v43  ;;  %4710 = vmatprep.subr.bf16.mxu1 %v5340_v47  ;;  %v5400_v43 = vld [vmem:[%s7121_s1 + $0xba0] ss:$12 sps:$4 sm:$0xff]  }
 0x141   :  { %3499 = vmatprep.subr.bf16.mxu0 %v5339_v45  ;;  %v5407_v45 = vld [vmem:[%s7121_s1 + $0xbbc] ss:$12 sps:$4 sm:$0xff]   ;;  %v5408_v47 = vld [vmem:[%s7121_s1 + $0xbc0] ss:$12 sps:$4 sm:$0xff]  }
 0x142   :  { %3883 = vmatmul.mubr.bf16.vlgmr.msra.gmra.mrb[48].mxu1 %v6430_v40  ;;  %v5350_v40 = vld [vmem:[%s7121_s1 + $0x9f8] ss:$12 sps:$4 sm:$0xff]  }
 0x143   :  { %3479 = vmatmul.mubr.bf16.vlgmr.msra.gmra.mrb[0].mxu0 %v6656_v50  ;;  %4711 = vmatpush3.bf16.msra.mxu1 %v5341_v52  ;;  %v5412_v52 = vld [vmem:[%s7121_s1 + $0xbd4] ss:$12 sps:$4 sm:$0xff]  }
 0x144   :  { %3500 = vmatpush1.bf16.msra.mxu0 %v5337_v51  ;;  %4712 = vmatprep.subr.bf16.mxu1 %v5345_v54  ;;  %v5409_v51 = vld [vmem:[%s7121_s1 + $0xb00] ss:$12 sps:$4 sm:$0xff]  }
 0x145   :  { %3501 = vmatprep.subr.bf16.mxu0 %v5344_v53  ;;  %3890 = vmatprep.mubr.bf16.mxu1 %v6450_v49  ;;  %v5355_v49 = vld [vmem:[%s7121_s1 + $0xa10] ss:$12 sps:$4 sm:$0xff]   ;;  %v5413_v53 = vld [vmem:[%s7121_s1 + $0xbd8] ss:$12 sps:$4 sm:$0xff]  }
 0x146   :  { %3488 = vmatprep.mubr.bf16.mxu0 %v6684_v58 }
 0x147   :  { %4713 = vmatpush3.bf16.msra.mxu1 %v5346_v36  ;;  %v5410_v36 = vld [vmem:[%s7121_s1 + $0xbd0] ss:$12 sps:$4 sm:$0xff]  }
 0x148   :  { %3502 = vmatpush1.bf16.msra.mxu0 %v5342_v55  ;;  %4714 = vmatprep.subr.bf16.mxu1 %v5350_v40 }
 0x149   :  { %3503 = vmatprep.subr.bf16.mxu0 %v5349_v57  ;;  %v5414_v57 = vld [vmem:[%s7121_s1 + $0xb18] ss:$12 sps:$4 sm:$0xff]  }
 0x14a   :  { %3891 = vmatmul.mubr.bf16.gmra.mrb[52].mxu1 %v6476_v56  ;;  %v5360_v56 = vld [vmem:[%s7121_s1 + $0xa28] ss:$12 sps:$4 sm:$0xff]  }
 0x14b   :  { %3489 = vmatmul.mubr.bf16.gmra.mrb[4].mxu0 %v6706_v48  ;;  %4715 = vmatpush3.bf16.msra.mxu1 %v5351_v61  ;;  %v5418_v61 = vld [vmem:[%s7121_s1 + $0xbf0] ss:$12 sps:$4 sm:$0xff]  }
 0x14c   :  { %3504 = vmatpush1.bf16.msra.mxu0 %v5347_v60  ;;  %4716 = vmatprep.subr.bf16.mxu1 %v5355_v49  ;;  %v5417_v60 = vld [vmem:[%s7121_s1 + $0xbec] ss:$12 sps:$4 sm:$0xff]  }
 0x14d   :  { %3505 = vmatprep.subr.bf16.mxu0 %v5354_v62  ;;  %3931 = vmatprep.mubr.bf16.mxu1 %v6490_v59  ;;  %v5362_v59 = vld [vmem:[%s7121_s1 + $0xaf8] ss:$12 sps:$4 sm:$0xff]  }
 0x14e   :  { %3531 = vmatprep.mubr.bf16.mxu0 %v6711_v63 }
 0x14f   :  { %4717 = vmatpush3.bf16.msra.mxu1 %v5356_v46  ;;  %v5426_v46 = vld [vmem:[%s7121_s1 + $0xcc8] ss:$12 sps:$4 sm:$0xff]  }
 0x150   :  { %3506 = vmatpush1.bf16.msra.mxu0 %v5352_v4  ;;  %4718 = vmatprep.subr.bf16.mxu1 %v5360_v56  ;;  %v5425_v4 = vld [vmem:[%s7121_s1 + $0xc04] ss:$12 sps:$4 sm:$0xff]   ;;  %v5420_v56 = vld [vmem:[%s7122_s0 + $0x38] ss:$72 sps:$4 sm:$0xff]  }
 0x151   :  { %3507 = vmatprep.subr.bf16.mxu0 %v5359_v0 }
 0x153   :  { %4719 = vmatpush3.bf16.msra.mxu1 %v5361_v28  ;;  %v5423_v28 = vld [vmem:[%s7121_s1 + $0xc00] ss:$12 sps:$4 sm:$0xff]  }
 0x154   :  { %3508 = vmatpush1.bf16.msra.mxu0 %v5357_v1  ;;  %4720 = vmatprep.subr.bf16.mxu1 %v5365_v3 }
 0x155   :  { %3509 = vmatprep.subr.bf16.mxu0 %v5364_v2  ;;  %v6753_v29 = vpop.f32.mrb[0].mxu1  ;;  %v5427_v2 = vld [vmem:[%s7121_s1 + $0xc08] ss:$12 sps:$4 sm:$0xff]  }
 0x156   :  { %v6758_v9 = vpop.f32.mrb[1].mxu1 }
 0x157   :  { %v6760_v41 = vpop.f32.mrb[2].mxu1  ;;  %4721 = vmatpush3.bf16.msra.mxu1 %v5366_v5  ;;  %v5430_v5 = vld [vmem:[%s7121_s1 + $0xc1c] ss:$12 sps:$4 sm:$0xff]  }
 0x158   :  { %3510 = vmatpush1.bf16.msra.mxu0 %v5362_v59  ;;  %v6768_v13 = vpop.f32.mrb[3].mxu1  ;;  %4722 = vmatprep.subr.bf16.mxu1 %v5370_v7 }
 0x159   :  { %3511 = vmatprep.subr.bf16.mxu0 %v5369_v6  ;;  %v5431_v6 = vld [vmem:[%s7121_s1 + $0xce0] ss:$12 sps:$4 sm:$0xff]  }
 0x15b   :  { %4723 = vmatpush3.bf16.msra.mxu1 %v5371_v10 }
 0x15c   :  { %3512 = vmatpush1.bf16.msra.mxu0 %v5367_v8  ;;  %4724 = vmatprep.subr.bf16.mxu1 %v5375_v14  ;;  %v5433_v8 = vld [vmem:[%s7122_s0 + $0xcc] ss:$72 sps:$4 sm:$0xff]  }
 0x15d   :  { %3513 = vmatprep.subr.bf16.mxu0 %v5374_v11  ;;  %v6785_v23 = vpop.f32.mrb[4].mxu1  ;;  %v5428_v11 = vld [vmem:[%s7121_s1 + $0xc18] ss:$12 sps:$4 sm:$0xff]   ;;  %v5432_v14 = vld [vmem:[%s7121_s1 + $0xc20] ss:$12 sps:$4 sm:$0xff]  }
 0x15e   :  { %v6790_v21 = vpop.f32.mrb[5].mxu1 }
 0x15f   :  { %4725 = vmatpush3.bf16.msra.mxu1 %v5376_v16  ;;  %v6795_v22 = vpop.f32.mrb[6].mxu1  ;;  %v5439_v16 = vld [vmem:[%s7121_s1 + $0xcf8] ss:$12 sps:$4 sm:$0xff]  }
 0x160   :  { %3514 = vmatpush1.bf16.msra.mxu0 %v5372_v15  ;;  %4738 = vmatprep.subr.bf16.mxu1 %v5380_v18  ;;  %v6803_v26 = vpop.f32.mrb[7].mxu1  ;;  %v5437_v15 = vld [vmem:[%s7121_s1 + $0xc34] ss:$12 sps:$4 sm:$0xff]   ;;  %v629_v18 = vlaneseq }
 0x161   :  { %3515 = vmatprep.subr.bf16.mxu0 %v5379_v17  ;;  %v5438_v17 = vld [vmem:[%s7122_s0 + $0xc8] ss:$72 sps:$4 sm:$0xff]  }
 0x162   :  { %3932 = vmatmul.mubr.bf16.vlgmr.msra.gmra.mrb[56].mxu1 %v6656_v50  ;;  %v5405_v50 = vld [vmem:[%s7121_s1 + $0xbb8] ss:$12 sps:$4 sm:$0xff]  }
 0x163   :  { %4739 = vmatpush3.bf16.msra.mxu1 %v5381_v12  ;;  %3939 = vmatprep.mubr.bf16.mxu1 %v6684_v58  ;;  %v5440_v12 = vld [vmem:[%s7121_s1 + $0xc38] ss:$12 sps:$4 sm:$0xff]  }
 0x164   :  { %3516 = vmatpush1.bf16.msra.mxu0 %v5377_v19  ;;  %4740 = vmatprep.subr.bf16.mxu1 %v5385_v25  ;;  %v5435_v19 = vld [vmem:[%s7121_s1 + $0xc30] ss:$12 sps:$4 sm:$0xff]  }
 0x165   :  { %3517 = vmatprep.subr.bf16.mxu0 %v5384_v24  ;;  %v5443_v24 = vld [vmem:[%s7121_s1 + $0xc4c] ss:$12 sps:$4 sm:$0xff]   ;;  %v5444_v25 = vld [vmem:[%s7121_s1 + $0xd10] ss:$12 sps:$4 sm:$0xff]  }
 0x167   :  { %4741 = vmatpush3.bf16.msra.mxu1 %v5386_v30  ;;  %v6949_v30 = vshrl.u32 %v629_v18, 7  ;;  %v5477_v18 = vld [vmem:[%s7121_s1 + $0xcf0] ss:$12 sps:$4 sm:$0xff]  }
 0x168   :  { %3518 = vmatpush1.bf16.msra.mxu0 %v5382_v20  ;;  %4742 = vmatprep.subr.bf16.mxu1 %v5393_v27  ;;  %v5468_v20 = vld [vmem:[%s7122_s0 + $0x44] ss:$72 sps:$4 sm:$0xff]   ;;  %v5445_v27 = vld [vmem:[%s7121_s1 + $0xc50] ss:$12 sps:$4 sm:$0xff]  }
 0x169   :  { %3519 = vmatprep.subr.bf16.mxu0 %v5391_v31  ;;  %v5441_v31 = vld [vmem:[%s7121_s1 + $0xc48] ss:$12 sps:$4 sm:$0xff]  }
 0x16a   :  { %3940 = vmatmul.mubr.bf16.gmra.mrb[60].mxu1 %v6706_v48  ;;  %v5415_v48 = vld [vmem:[%s7121_s1 + $0xbe8] ss:$12 sps:$4 sm:$0xff]  }
 0x16b   :  { %4743 = vmatpush3.bf16.msra.mxu1 %v5394_v33  ;;  %3980 = vmatprep.mubr.bf16.mxu1 %v6711_v63  ;;  %v5419_v63 = vld [vmem:[%s7121_s1 + $0xb30] ss:$12 sps:$4 sm:$0xff]   ;;  %v5449_v33 = vld [vmem:[%s7121_s1 + $0xd28] ss:$12 sps:$4 sm:$0xff]  }
 0x16c   :  { %3520 = vmatpush1.bf16.msra.mxu0 %v5389_v32  ;;  %4744 = vmatprep.subr.bf16.mxu1 %v5398_v35  ;;  %v5448_v32 = vld [vmem:[%s7121_s1 + $0xc64] ss:$12 sps:$4 sm:$0xff]   ;;  %v5446_v35 = vld [vmem:[%s7121_s1 + $0xc60] ss:$12 sps:$4 sm:$0xff]  }
 0x16d   :  { %3521 = vmatprep.subr.bf16.mxu0 %v5397_v34  ;;  %v639_v34 = vsub.s32 2, %v6949_v30 }
 0x16f   :  { %4745 = vmatpush3.bf16.msra.mxu1 %v5399_v38  ;;  %v6973_v38 = vld [vmem:[%s7123_s2] sm:$0x7] }
 0x170   :  { %3522 = vmatpush1.bf16.msra.mxu0 %v5395_v37  ;;  %4746 = vmatprep.subr.bf16.mxu1 %v5403_v42  ;;  %v5450_v37 = vld [vmem:[%s7121_s1 + $0xc68] ss:$12 sps:$4 sm:$0xff]   ;;  %v5454_v42 = vld [vmem:[%s7121_s1 + $0xd40] ss:$12 sps:$4 sm:$0xff]  }
 0x171   :  { %3523 = vmatprep.subr.bf16.mxu0 %v5402_v39  ;;  %v5453_v39 = vld [vmem:[%s7121_s1 + $0xc7c] ss:$12 sps:$4 sm:$0xff]  }
 0x173   :  { %4747 = vmatpush3.bf16.msra.mxu1 %v5404_v44  ;;  %v5451_v44 = vld [vmem:[%s7121_s1 + $0xc78] ss:$12 sps:$4 sm:$0xff]  }
 0x174   :  { %3524 = vmatpush1.bf16.msra.mxu0 %v5400_v43  ;;  %4748 = vmatprep.subr.bf16.mxu1 %v5408_v47  ;;  %v640_v43 = vrot.slane %v6973_v38, %v639_v34  ;;  %v5458_v47 = vld [vmem:[%s7121_s1 + $0xc94] ss:$12 sps:$4 sm:$0xff]  }
 0x175   :  { %3525 = vmatprep.subr.bf16.mxu0 %v5407_v45  ;;  %v4558_v54 = vpop.f32.mrb[8].mxu1  ;;  %v5455_v45 = vld [vmem:[%s7121_s1 + $0xc80] ss:$12 sps:$4 sm:$0xff]  }
 0x176   :  { %v4559_v55 = vpop.f32.mrb[9].mxu1 }
 0x177   :  { %4749 = vmatpush3.bf16.msra.mxu1 %v5409_v51  ;;  %v6875_v58 = vadd.f32 %v4559_v55, %v4558_v54  ;;  %v4561_v40 = vpop.f32.mrb[10].mxu1 }
 0x178   :  { %3526 = vmatpush1.bf16.msra.mxu0 %v5405_v50  ;;  %4750 = vmatprep.subr.bf16.mxu1 %v5413_v53  ;;  %v4562_v62 = vpop.f32.mrb[11].mxu1  ;;  %v5459_v50 = vld [vmem:[%s7121_s1 + $0xd58] ss:$12 sps:$4 sm:$0xff]  }
 0x179   :  { %3527 = vmatprep.subr.bf16.mxu0 %v5412_v52  ;;  %v6883_v49 = vadd.f32 %v4562_v62, %v4561_v40  ;;  %v3640_v51 = vadd.f32 %v6875_v58, %v640_v43  ;;  %v5463_v58 = vld [vmem:[%s7121_s1 + $0xcac] ss:$12 sps:$4 sm:$0xff]  }
 0x17b   :  { %4751 = vmatpush3.bf16.msra.mxu1 %v5414_v57  ;;  %v5460_v57 = vld [vmem:[%s7121_s1 + $0xc98] ss:$12 sps:$4 sm:$0xff]  }
 0x17c   :  { %3528 = vmatpush1.bf16.msra.mxu0 %v5410_v36  ;;  %4752 = vmatprep.subr.bf16.mxu1 %v5418_v61  ;;  %v5456_v36 = vld [vmem:[%s7121_s1 + $0xc90] ss:$12 sps:$4 sm:$0xff]   ;;  %v3643_v61 = vadd.f32 %v6883_v49, %v640_v43 }
 0x17d   :  { %3529 = vmatprep.subr.bf16.mxu0 %v5417_v60  ;;  %v4564_v0 = vpop.f32.mrb[12].mxu1  ;;  %v5464_v60 = vld [vmem:[%s7121_s1 + $0xd70] ss:$12 sps:$4 sm:$0xff]  }
 0x17e   :  { %v4565_v1 = vpop.f32.mrb[13].mxu1 }
 0x17f   :  { %4753 = vmatpush3.bf16.msra.mxu1 %v5419_v63  ;;  %v6906_v3 = vadd.f32 %v4565_v1, %v4564_v0  ;;  %v4567_v59 = vpop.f32.mrb[14].mxu1  ;;  %v5471_v0 = vld [vmem:[%s7121_s1 + $0xcc4] ss:$12 sps:$4 sm:$0xff]   ;;  %v5466_v1 = vld [vmem:[%s7122_s0 + $0x40] ss:$72 sps:$4 sm:$0xff]  }
 0x180   :  { %3530 = vmatpush1.bf16.msra.mxu0 %v5415_v48  ;;  %4766 = vmatprep.subr.bf16.mxu1 %v5426_v46  ;;  %v4568_v7 = vpop.f32.mrb[15].mxu1  ;;  %v5465_v46 = vld [vmem:[%s7121_s1 + $0xcb0] ss:$12 sps:$4 sm:$0xff]  }
 0x181   :  { %3552 = vmatprep.subr.bf16.mxu0 %v5425_v4  ;;  %v6917_v10 = vadd.f32 %v4568_v7, %v4567_v59  ;;  %v5461_v4 = vld [vmem:[%s7121_s1 + $0xca8] ss:$12 sps:$4 sm:$0xff]   ;;  %v3648_v49 = vadd.f32 %v6906_v3, %v640_v43  ;;  %v5469_v59 = vld [vmem:[%s7121_s1 + $0xcc0] ss:$12 sps:$4 sm:$0xff]  }
 0x182   :  { %3981 = vmatmul.mubr.bf16.vlgmr.msra.gmra.mrb[64].mxu1 %v5420_v56  ;;  %v5474_v7 = vld [vmem:[%s7121_s1 + $0xcdc] ss:$12 sps:$4 sm:$0xff]  }
 0x183   :  { %3532 = vmatmul.mubr.bf16.vlgmr.msra.gmra.mrb[0].mxu0 %v5420_v56  ;;  %4767 = vmatpush3.bf16.msra.mxu1 %v5427_v2  ;;  %v3651_v2 = vadd.f32 %v6917_v10, %v640_v43 }
 0x184   :  { %3553 = vmatpush1.bf16.msra.mxu0 %v5423_v28  ;;  %4768 = vmatprep.subr.bf16.mxu1 %v5431_v6 }
 0x185   :  { %3554 = vmatprep.subr.bf16.mxu0 %v5430_v5  ;;  %3988 = vmatprep.mubr.bf16.mxu1 %v5433_v8  ;;  %v5475_v5 = vld [vmem:[%s7122_s0 + $0xd4] ss:$72 sps:$4 sm:$0xff]  }
 0x186   :  { %3541 = vmatprep.mubr.bf16.mxu0 %v5433_v8 }
 0x187   :  { %4769 = vmatpush3.bf16.msra.mxu1 %v5432_v14  ;;  %v5472_v14 = vld [vmem:[%s7121_s1 + $0xcd8] ss:$12 sps:$4 sm:$0xff]  }
 0x188   :  { %3555 = vmatpush1.bf16.msra.mxu0 %v5428_v11  ;;  %4770 = vmatprep.subr.bf16.mxu1 %v5439_v16  ;;  %v5479_v16 = vld [vmem:[%s7121_s1 + $0xcf4] ss:$12 sps:$4 sm:$0xff]  }
 0x189   :  { %3556 = vmatprep.subr.bf16.mxu0 %v5437_v15 }
 0x18a   :  { %3989 = vmatmul.mubr.bf16.gmra.mrb[68].mxu1 %v5438_v17 }
 0x18b   :  { %3542 = vmatmul.mubr.bf16.gmra.mrb[4].mxu0 %v5438_v17  ;;  %4771 = vmatpush3.bf16.msra.mxu1 %v5440_v12  ;;  %v5480_v17 = vld [vmem:[%s7122_s0 + $0xd0] ss:$72 sps:$4 sm:$0xff]   ;;  %v5481_v12 = vld [vmem:[%s7121_s1 + $0xd08] ss:$12 sps:$4 sm:$0xff]  }
 0x18c   :  { %3557 = vmatpush1.bf16.msra.mxu0 %v5435_v19  ;;  %4772 = vmatprep.subr.bf16.mxu1 %v5444_v25  ;;  %v5483_v19 = vld [vmem:[%s7121_s1 + $0xd0c] ss:$12 sps:$4 sm:$0xff]  }
 0x18d   :  { %3558 = vmatprep.subr.bf16.mxu0 %v5443_v24  ;;  %4029 = vmatprep.mubr.bf16.mxu1 %v5468_v20  ;;  %v5486_v24 = vld [vmem:[%s7121_s1 + $0xd24] ss:$12 sps:$4 sm:$0xff]   ;;  %v5484_v25 = vld [vmem:[%s7121_s1 + $0xd20] ss:$12 sps:$4 sm:$0xff]  }
 0x18e   :  { %3584 = vmatprep.mubr.bf16.mxu0 %v5468_v20  ;;  %v5489_v20 = vld [vmem:[%s7121_s1 + $0xd3c] ss:$12 sps:$4 sm:$0xff]  }
 0x18f   :  { %4773 = vmatpush3.bf16.msra.mxu1 %v5445_v27  ;;  %v5492_v27 = vld [vmem:[%s7121_s1 + $0xd54] ss:$12 sps:$4 sm:$0xff]  }
 0x190   :  { %3559 = vmatpush1.bf16.msra.mxu0 %v5441_v31  ;;  %4774 = vmatprep.subr.bf16.mxu1 %v5449_v33  ;;  %v5487_v31 = vld [vmem:[%s7121_s1 + $0xd38] ss:$12 sps:$4 sm:$0xff]  }
 0x191   :  { %3560 = vmatprep.subr.bf16.mxu0 %v5448_v32 }
 0x193   :  { %4775 = vmatpush3.bf16.msra.mxu1 %v5450_v37  ;;  %v5490_v37 = vld [vmem:[%s7121_s1 + $0xd50] ss:$12 sps:$4 sm:$0xff]  }
 0x194   :  { %3561 = vmatpush1.bf16.msra.mxu0 %v5446_v35  ;;  %4776 = vmatprep.subr.bf16.mxu1 %v5454_v42  ;;  %v5495_v42 = vld [vmem:[%s7121_s1 + $0xd6c] ss:$12 sps:$4 sm:$0xff]  }
 0x195   :  { %3562 = vmatprep.subr.bf16.mxu0 %v5453_v39  ;;  %v4586_v52 = vpop.f32.mrb[16].mxu1 }
 0x196   :  { %v4587_v53 = vpop.f32.mrb[17].mxu1 }
 0x197   :  { %v4588_v54 = vadd.f32 %v4587_v53, %v4586_v52  ;;  %v4589_v55 = vpop.f32.mrb[18].mxu1  ;;  %4777 = vmatpush3.bf16.msra.mxu1 %v5455_v45 }
 0x198   :  { %3563 = vmatpush1.bf16.msra.mxu0 %v5451_v44  ;;  %v4590_v40 = vpop.f32.mrb[19].mxu1  ;;  %4778 = vmatprep.subr.bf16.mxu1 %v5459_v50 }
 0x199   :  { %3564 = vmatprep.subr.bf16.mxu0 %v5458_v47  ;;  %v3689_v62 = vadd.f32 %v4588_v54, %v3640_v51  ;;  %v4591_v48 = vadd.f32 %v4590_v40, %v4589_v55  ;;  %v5493_v47 = vld [vmem:[%s7121_s1 + $0xd68] ss:$12 sps:$4 sm:$0xff]  }
 0x19b   :  { %v3692_v63 = vadd.f32 %v4591_v48, %v3643_v61  ;;  %4779 = vmatpush3.bf16.msra.mxu1 %v5460_v57 }
 0x19c   :  { %3565 = vmatpush1.bf16.msra.mxu0 %v5456_v36  ;;  %4780 = vmatprep.subr.bf16.mxu1 %v5464_v60 }
 0x19d   :  { %3566 = vmatprep.subr.bf16.mxu0 %v5463_v58  ;;  %v4592_v56 = vpop.f32.mrb[20].mxu1 }
 0x19e   :  { %v4593_v28 = vpop.f32.mrb[21].mxu1 }
 0x19f   :  { %4781 = vmatpush3.bf16.msra.mxu1 %v5465_v46  ;;  %v4594_v6 = vadd.f32 %v4593_v28, %v4592_v56  ;;  %v4595_v3 = vpop.f32.mrb[22].mxu1 }
 0x1a0   :  { %3567 = vmatpush1.bf16.msra.mxu0 %v5461_v4  ;;  %v4596_v8 = vpop.f32.mrb[23].mxu1 }
 0x1a1   :  { %3568 = vmatprep.subr.bf16.mxu0 %v5471_v0  ;;  %v3697_v11 = vadd.f32 %v4594_v6, %v3648_v49  ;;  %v4597_v10 = vadd.f32 %v4596_v8, %v4595_v3 }
 0x1a2   :  { %4030 = vmatmul.mubr.bf16.vlgmr.msra.gmra.mrb[72].mxu1 %v5466_v1 }
 0x1a3   :  { %4037 = vmatprep.mubr.bf16.mxu1 %v5475_v5  ;;  %v3700_v15 = vadd.f32 %v4597_v10, %v3651_v2 }
 0x1a4   :  { %3569 = vmatpush1.bf16.msra.mxu0 %v5469_v59 }
 0x1a5   :  { %3570 = vmatprep.subr.bf16.mxu0 %v5474_v7 }
 0x1a8   :  { %3571 = vmatpush1.bf16.msra.mxu0 %v5472_v14 }
 0x1a9   :  { %3572 = vmatprep.subr.bf16.mxu0 %v5479_v16 }
 0x1aa   :  { %4038 = vmatmul.mubr.bf16.gmra.mrb[76].mxu1 %v5480_v17 }
 0x1ac   :  { %3573 = vmatpush1.bf16.msra.mxu0 %v5477_v18 }
 0x1ad   :  { %3574 = vmatprep.subr.bf16.mxu0 %v5483_v19 }
 0x1b0   :  { %3575 = vmatpush1.bf16.msra.mxu0 %v5481_v12 }
 0x1b1   :  { %3576 = vmatprep.subr.bf16.mxu0 %v5486_v24 }
 0x1b4   :  { %3577 = vmatpush1.bf16.msra.mxu0 %v5484_v25 }
 0x1b5   :  { %3578 = vmatprep.subr.bf16.mxu0 %v5489_v20  ;;  %v4614_v32 = vpop.f32.mrb[24].mxu1 }
 0x1b6   :  { %v4615_v33 = vpop.f32.mrb[25].mxu1 }
 0x1b7   :  { %v4616_v34 = vadd.f32 %v4615_v33, %v4614_v32  ;;  %v4617_v35 = vpop.f32.mrb[26].mxu1 }
 0x1b8   :  { %3579 = vmatpush1.bf16.msra.mxu0 %v5487_v31  ;;  %v4618_v39 = vpop.f32.mrb[27].mxu1 }
 0x1b9   :  { %3580 = vmatprep.subr.bf16.mxu0 %v5492_v27  ;;  %v3738_v43 = vadd.f32 %v4616_v34, %v3689_v62  ;;  %v4619_v44 = vadd.f32 %v4618_v39, %v4617_v35 }
 0x1bb   :  { %v3741_v45 = vadd.f32 %v4619_v44, %v3692_v63 }
 0x1bc   :  { %3581 = vmatpush1.bf16.msra.mxu0 %v5490_v37 }
 0x1bd   :  { %3582 = vmatprep.subr.bf16.mxu0 %v5495_v42  ;;  %v4620_v50 = vpop.f32.mrb[28].mxu1 }
 0x1be   :  { %v4621_v51 = vpop.f32.mrb[29].mxu1 }
 0x1bf   :  { %v4622_v52 = vadd.f32 %v4621_v51, %v4620_v50  ;;  %v4623_v53 = vpop.f32.mrb[30].mxu1 }
 0x1c0   :  { %3583 = vmatpush1.bf16.msra.mxu0 %v5493_v47  ;;  %v4624_v54 = vpop.f32.mrb[31].mxu1 }
 0x1c1   :  { %v3746_v55 = vadd.f32 %v4622_v52, %v3697_v11  ;;  %v4625_v36 = vadd.f32 %v4624_v54, %v4623_v53 }
 0x1c3   :  { %3585 = vmatmul.mubr.bf16.vlgmr.msra.gmra.mrb[0].mxu0 %v5466_v1  ;;  %v3749_v57 = vadd.f32 %v4625_v36, %v3700_v15 }
 0x1c4   :  { %3594 = vmatprep.mubr.bf16.mxu0 %v5475_v5 }
 0x1cb   :  { %3595 = vmatmul.mubr.bf16.gmra.mrb[4].mxu0 %v5480_v17 }
 0x1d5   :  { %v4642_v40 = vpop.f32.mrb[32].mxu1 }
 0x1d6   :  { %v4643_v58 = vpop.f32.mrb[33].mxu1 }
 0x1d7   :  { %v4644_v60 = vadd.f32 %v4643_v58, %v4642_v40  ;;  %v4645_v61 = vpop.f32.mrb[34].mxu1 }
 0x1d8   :  { %v4646_v62 = vpop.f32.mrb[35].mxu1 }
 0x1d9   :  { %v3787_v48 = vadd.f32 %v4644_v60, %v3738_v43  ;;  %v4647_v63 = vadd.f32 %v4646_v62, %v4645_v61 }
 0x1db   :  { %v3790_v4 = vadd.f32 %v4647_v63, %v3741_v45 }
 0x1dd   :  { %v4648_v46 = vpop.f32.mrb[36].mxu1 }
 0x1de   :  { %v4649_v0 = vpop.f32.mrb[37].mxu1 }
 0x1df   :  { %v4650_v49 = vadd.f32 %v4649_v0, %v4648_v46  ;;  %v4651_v56 = vpop.f32.mrb[38].mxu1 }
 0x1e0   :  { %v4652_v28 = vpop.f32.mrb[39].mxu1 }
 0x1e1   :  { %v3795_v2 = vadd.f32 %v4650_v49, %v3746_v55  ;;  %v4653_v59 = vadd.f32 %v4652_v28, %v4651_v56 }
 0x1e3   :  { %v3798_v6 = vadd.f32 %v4653_v59, %v3749_v57 }
 0x1f5   :  { %v4670_v1 = vpop.f32.mrb[40].mxu1 }
 0x1f6   :  { %v4671_v3 = vpop.f32.mrb[41].mxu1 }
 0x1f7   :  { %v4672_v5 = vadd.f32 %v4671_v3, %v4670_v1  ;;  %v4673_v7 = vpop.f32.mrb[42].mxu1 }
 0x1f8   :  { %v4674_v8 = vpop.f32.mrb[43].mxu1 }
 0x1f9   :  { %v3836_v11 = vadd.f32 %v4672_v5, %v3787_v48  ;;  %v4675_v10 = vadd.f32 %v4674_v8, %v4673_v7 }
 0x1fb   :  { %v3839_v14 = vadd.f32 %v4675_v10, %v3790_v4 }
 0x1fd   :  { %v4676_v15 = vpop.f32.mrb[44].mxu1 }
 0x1fe   :  { %v4677_v16 = vpop.f32.mrb[45].mxu1 }
 0x1ff   :  { %v4678_v17 = vadd.f32 %v4677_v16, %v4676_v15  ;;  %v4679_v18 = vpop.f32.mrb[46].mxu1 }
 0x200   :  { %v4680_v19 = vpop.f32.mrb[47].mxu1 }
 0x201   :  { %v3844_v12 = vadd.f32 %v4678_v17, %v3795_v2  ;;  %v4681_v24 = vadd.f32 %v4680_v19, %v4679_v18 }
 0x203   :  { %v3847_v25 = vadd.f32 %v4681_v24, %v3798_v6 }
 0x215   :  { %v4698_v20 = vpop.f32.mrb[48].mxu1 }
 0x216   :  { %v4699_v31 = vpop.f32.mrb[49].mxu1 }
 0x217   :  { %v4700_v27 = vadd.f32 %v4699_v31, %v4698_v20  ;;  %v4701_v32 = vpop.f32.mrb[50].mxu1 }
 0x218   :  { %v4702_v33 = vpop.f32.mrb[51].mxu1 }
 0x219   :  { %v3885_v34 = vadd.f32 %v4700_v27, %v3836_v11  ;;  %v4703_v35 = vadd.f32 %v4702_v33, %v4701_v32 }
 0x21b   :  { %v3888_v37 = vadd.f32 %v4703_v35, %v3839_v14 }
 0x21d   :  { %v4704_v39 = vpop.f32.mrb[52].mxu1 }
 0x21e   :  { %v4705_v42 = vpop.f32.mrb[53].mxu1 }
 0x21f   :  { %v4706_v43 = vadd.f32 %v4705_v42, %v4704_v39  ;;  %v4707_v44 = vpop.f32.mrb[54].mxu1 }
 0x220   :  { %v4708_v45 = vpop.f32.mrb[55].mxu1 }
 0x221   :  { %v3893_v47 = vadd.f32 %v4706_v43, %v3844_v12  ;;  %v4709_v50 = vadd.f32 %v4708_v45, %v4707_v44 }
 0x223   :  { %v3896_v51 = vadd.f32 %v4709_v50, %v3847_v25  ;;  %v631_v50 = vsub.s32 0, %v6949_v30 }
 0x235   :  { %v4726_v52 = vpop.f32.mrb[56].mxu1 }
 0x236   :  { %v4727_v53 = vpop.f32.mrb[57].mxu1 }
 0x237   :  { %v4728_v54 = vadd.f32 %v4727_v53, %v4726_v52  ;;  %v4729_v55 = vpop.f32.mrb[58].mxu1  ;;  %v632_v52 = vrot.slane %v6973_v38, %v631_v50 }
 0x238   :  { %v4730_v36 = vpop.f32.mrb[59].mxu1 }
 0x239   :  { %v3934_v57 = vadd.f32 %v4728_v54, %v3885_v34  ;;  %v4731_v40 = vadd.f32 %v4730_v36, %v4729_v55  ;;  %v4794_v54 = vadd.f32 %v6753_v29, %v632_v52 }
 0x23b   :  { %v3937_v58 = vadd.f32 %v4731_v40, %v3888_v37 }
 0x23d   :  { %v4732_v60 = vpop.f32.mrb[60].mxu1 }
 0x23e   :  { %v4733_v61 = vpop.f32.mrb[61].mxu1 }
 0x23f   :  { %v4734_v62 = vadd.f32 %v4733_v61, %v4732_v60  ;;  %v4735_v48 = vpop.f32.mrb[62].mxu1 }
 0x240   :  { %v4736_v63 = vpop.f32.mrb[63].mxu1 }
 0x241   :  { %v3942_v4 = vadd.f32 %v4734_v62, %v3893_v47  ;;  %v4737_v46 = vadd.f32 %v4736_v63, %v4735_v48 }
 0x243   :  { %v3945_v0 = vadd.f32 %v4737_v46, %v3896_v51  ;;  %v635_v51 = vsub.s32 1, %v6949_v30 }
 0x245   :  { %v636_v53 = vrot.slane %v6973_v38, %v635_v51 }
 0x247   :  { %v4796_v55 = vadd.f32 %v6758_v9, %v636_v53  ;;  %v4800_v60 = vadd.f32 %v6768_v13, %v636_v53  ;;  %v4804_v13 = vadd.f32 %v6790_v21, %v636_v53 }
 0x255   :  { %v4754_v49 = vpop.f32.mrb[64].mxu1 }
 0x256   :  { %v4755_v56 = vpop.f32.mrb[65].mxu1 }
 0x257   :  { %v4756_v28 = vadd.f32 %v4755_v56, %v4754_v49  ;;  %v4757_v2 = vpop.f32.mrb[66].mxu1 }
 0x258   :  { %v4758_v59 = vpop.f32.mrb[67].mxu1 }
 0x259   :  { %v3983_v6 = vadd.f32 %v4756_v28, %v3934_v57  ;;  %v4759_v1 = vadd.f32 %v4758_v59, %v4757_v2  ;;  %v4798_v57 = vadd.f32 %v6760_v41, %v632_v52  ;;  %v4802_v41 = vadd.f32 %v6785_v23, %v632_v52 }
 0x25a   :  { %v4808_v28 = vadd.f32 %v6803_v26, %v636_v53 }
 0x25b   :  { %v3986_v3 = vadd.f32 %v4759_v1, %v3937_v58 }
 0x25d   :  { %v4760_v5 = vpop.f32.mrb[68].mxu1 }
 0x25e   :  { %v4761_v7 = vpop.f32.mrb[69].mxu1 }
 0x25f   :  { %v4762_v8 = vadd.f32 %v4761_v7, %v4760_v5  ;;  %v4763_v11 = vpop.f32.mrb[70].mxu1 }
 0x260   :  { %v4764_v10 = vpop.f32.mrb[71].mxu1 }
 0x261   :  { %v3991_v14 = vadd.f32 %v4762_v8, %v3942_v4  ;;  %v4765_v15 = vadd.f32 %v4764_v10, %v4763_v11 }
 0x263   :  { %v3994_v16 = vadd.f32 %v4765_v15, %v3945_v0  ;;  %v4806_v0 = vadd.f32 %v6795_v22, %v632_v52 }
 0x275   :  { %v4782_v17 = vpop.f32.mrb[72].mxu1 }
 0x276   :  { %v4783_v18 = vpop.f32.mrb[73].mxu1 }
 0x277   :  { %v4784_v19 = vadd.f32 %v4783_v18, %v4782_v17  ;;  %v4785_v12 = vpop.f32.mrb[74].mxu1 }
 0x278   :  { %v4786_v24 = vpop.f32.mrb[75].mxu1 }
 0x279   :  { %v4032_v25 = vadd.f32 %v4784_v19, %v3983_v6  ;;  %v4787_v20 = vadd.f32 %v4786_v24, %v4785_v12 }
 0x27b   :  { %v4048_v31 = vmax.f32 %v4032_v25, 0.0  ;;  %v4035_v27 = vadd.f32 %v4787_v20, %v3986_v3 }
 0x27d   :  { %4060 = vst [vmem:[%s7124_s3 + $0x10] sm:$0xff] %v4048_v31  ;;  %v4051_v32 = vmax.f32 %v4035_v27, 0.0  ;;  %v4788_v33 = vpop.f32.mrb[76].mxu1 }
 0x27e   :  { %v4789_v34 = vpop.f32.mrb[77].mxu1 }
 0x27f   :  { %4063 = vst [vmem:[%s7124_s3 + $0x28] sm:$0xff] %v4051_v32  ;;  %v4790_v35 = vadd.f32 %v4789_v34, %v4788_v33  ;;  %v4791_v37 = vpop.f32.mrb[78].mxu1 }
 0x280   :  { %v4792_v39 = vpop.f32.mrb[79].mxu1 }
 0x281   :  { %v4040_v42 = vadd.f32 %v4790_v35, %v3991_v14  ;;  %v4793_v43 = vadd.f32 %v4792_v39, %v4791_v37 }
 0x283   :  { %v4054_v44 = vmax.f32 %v4040_v42, 0.0  ;;  %v4043_v45 = vadd.f32 %v4793_v43, %v3994_v16 }
 0x285   :  { %4066 = vst [vmem:[%s7124_s3 + $0x40] sm:$0xff] %v4054_v44  ;;  %v4057_v47 = vmax.f32 %v4043_v45, 0.0 }
 0x287   :  { %4069 = vst [vmem:[%s7124_s3 + $0x58] sm:$0xff] %v4057_v47 }
 0x296   :  { %v3586_v36 = vpop.f32.mrb[0].mxu0 }
 0x297   :  { %v4795_v40 = vadd.f32 %v4794_v54, %v3586_v36  ;;  %v3588_v58 = vpop.f32.mrb[1].mxu0 }
 0x298   :  { %v4797_v61 = vadd.f32 %v4796_v55, %v3588_v58  ;;  %v3590_v62 = vpop.f32.mrb[2].mxu0 }
 0x299   :  { %v4046_v48 = vmax.f32 %v4795_v40, 0.0  ;;  %v4799_v63 = vadd.f32 %v4798_v57, %v3590_v62  ;;  %v3592_v30 = vpop.f32.mrb[3].mxu0 }
 0x29a   :  { %v4047_v4 = vmax.f32 %v4797_v61, 0.0  ;;  %v4801_v46 = vadd.f32 %v4800_v60, %v3592_v30 }
 0x29b   :  { %4058 = vst [vmem:[%s7124_s3] sm:$0xff] %v4046_v48  ;;  %v4049_v29 = vmax.f32 %v4799_v63, 0.0 }
 0x29c   :  { %4059 = vst [vmem:[%s7124_s3 + $0x8] sm:$0xff] %v4047_v4  ;;  %v4050_v9 = vmax.f32 %v4801_v46, 0.0 }
 0x29d   :  { %4061 = vst [vmem:[%s7124_s3 + $0x18] sm:$0xff] %v4049_v29 }
 0x29e   :  { %4062 = vst [vmem:[%s7124_s3 + $0x20] sm:$0xff] %v4050_v9  ;;  %v3596_v38 = vpop.f32.mrb[4].mxu0 }
 0x29f   :  { %v4803_v49 = vadd.f32 %v4802_v41, %v3596_v38  ;;  %v3598_v56 = vpop.f32.mrb[5].mxu0 }
 0x2a0   :  { %v4805_v2 = vadd.f32 %v4804_v13, %v3598_v56  ;;  %v3600_v59 = vpop.f32.mrb[6].mxu0 }
 0x2a1   :  { %v4052_v23 = vmax.f32 %v4803_v49, 0.0  ;;  %v4807_v6 = vadd.f32 %v4806_v0, %v3600_v59  ;;  %v3602_v1 = vpop.f32.mrb[7].mxu0 }
 0x2a2   :  { %v4053_v3 = vmax.f32 %v4805_v2, 0.0  ;;  %v4809_v5 = vadd.f32 %v4808_v28, %v3602_v1 }
 0x2a3   :  { %4064 = vst [vmem:[%s7124_s3 + $0x30] sm:$0xff] %v4052_v23  ;;  %v4055_v21 = vmax.f32 %v4807_v6, 0.0 }
 0x2a4   :  { %4065 = vst [vmem:[%s7124_s3 + $0x38] sm:$0xff] %v4053_v3  ;;  %v4056_v22 = vmax.f32 %v4809_v5, 0.0 }
 0x2a5   :  { %4067 = vst [vmem:[%s7124_s3 + $0x48] sm:$0xff] %v4055_v21 }
 0x2a6   :  { %4068 = vst [vmem:[%s7124_s3 + $0x50] sm:$0xff] %v4056_v22 }

// kernel: mixed_6a_forward.4
= control target key start
LH: loop header
LB: loop body
LE: loop exit
PB: predicated region body
PF: predicated region fallthrough
CT: control target
= control target key end

     0   :  { %vm3910_vm0 = vcmask 523264   ;;  %s9050_s1 = inlined_call_operand.vmem [shape: bf16[2880,384], index: 1, kind: input, shape index: {}]   ;;  %s9051_s0 = inlined_call_operand.vmem [shape: bf16[32,2880], index: 0, kind: input, shape index: {}]   ;;  %s9052_s2 = inlined_call_operand.vmem [shape: f32[1,384], index: 2, kind: input, shape index: {}]   ;;  %s9053_s3 = inlined_call_operand.vmem [shape: f32[32,384], index: 3, kind: output, shape index: {}]  }
   0x1   :  { %v6182_v0 = vld [vmem:[%s9050_s1 + $0x4] ss:$12 sps:$4 sm:$0xff]   ;;  %v6186_v2 = vld [vmem:[%s9050_s1] ss:$12 sps:$4 sm:$0xff]   ;;  %v6188_v4 = vld [vmem:[%s9050_s1 + $0x1c] ss:$12 sps:$4 sm:$0xff]  }
   0x2   :  { %v6184_v1 = vld [vmem:[%s9050_s1 + $0x484] ss:$12 sps:$4 sm:$0xff]   ;;  %3917 = vmatprep.subr.bf16.mxu1 %v6182_v0  ;;  %v6187_v3 = vld [vmem:[%s9050_s1 + $0x480] ss:$12 sps:$4 sm:$0xff]   ;;  %v6190_v5 = vld [vmem:[%s9050_s1 + $0x49c] ss:$12 sps:$4 sm:$0xff]  }
   0x3   :  { %4076 = vmatprep.subr.bf16.mxu0 %v6184_v1  ;;  %3918 = vmatpush1.bf16.msra.mxu1 %v6186_v2  ;;  %v6192_v6 = vld [vmem:[%s9050_s1 + $0x18] ss:$12 sps:$4 sm:$0xff]   ;;  %v6194_v8 = vld [vmem:[%s9050_s1 + $0x34] ss:$12 sps:$4 sm:$0xff]   ;;  %v6198_v10 = vld [vmem:[%s9050_s1 + $0x30] ss:$12 sps:$4 sm:$0xff]  }
   0x4   :  { %4077 = vmatpush1.bf16.msra.mxu0 %v6187_v3  ;;  %3919 = vmatprep.subr.bf16.mxu1 %v6188_v4  ;;  %v6193_v7 = vld [vmem:[%s9050_s1 + $0x498] ss:$12 sps:$4 sm:$0xff]   ;;  %v6196_v9 = vld [vmem:[%s9050_s1 + $0x4b4] ss:$12 sps:$4 sm:$0xff]   ;;  %v6199_v11 = vld [vmem:[%s9050_s1 + $0x4b0] ss:$12 sps:$4 sm:$0xff]  }
   0x5   :  { %4078 = vmatprep.subr.bf16.mxu0 %v6190_v5  ;;  %v6200_v12 = vld [vmem:[%s9050_s1 + $0x4c] ss:$12 sps:$4 sm:$0xff]   ;;  %v6204_v14 = vld [vmem:[%s9050_s1 + $0x48] ss:$12 sps:$4 sm:$0xff]   ;;  %v6206_v16 = vld [vmem:[%s9050_s1 + $0x64] ss:$12 sps:$4 sm:$0xff]  }
   0x6   :  { %v6202_v13 = vld [vmem:[%s9050_s1 + $0x4cc] ss:$12 sps:$4 sm:$0xff]   ;;  %v6205_v15 = vld [vmem:[%s9050_s1 + $0x4c8] ss:$12 sps:$4 sm:$0xff]   ;;  %v6208_v17 = vld [vmem:[%s9050_s1 + $0x4e4] ss:$12 sps:$4 sm:$0xff]  }
   0x7   :  { %3920 = vmatpush1.bf16.msra.mxu1 %v6192_v6  ;;  %v6210_v18 = vld [vmem:[%s9050_s1 + $0x60] ss:$12 sps:$4 sm:$0xff]   ;;  %v6212_v20 = vld [vmem:[%s9050_s1 + $0x7c] ss:$12 sps:$4 sm:$0xff]   ;;  %v6216_v22 = vld [vmem:[%s9050_s1 + $0x78] ss:$12 sps:$4 sm:$0xff]  }
   0x8   :  { %4079 = vmatpush1.bf16.msra.mxu0 %v6193_v7  ;;  %3921 = vmatprep.subr.bf16.mxu1 %v6194_v8  ;;  %v6211_v19 = vld [vmem:[%s9050_s1 + $0x4e0] ss:$12 sps:$4 sm:$0xff]   ;;  %v6214_v21 = vld [vmem:[%s9050_s1 + $0x4fc] ss:$12 sps:$4 sm:$0xff]   ;;  %v6217_v23 = vld [vmem:[%s9050_s1 + $0x4f8] ss:$12 sps:$4 sm:$0xff]  }
   0x9   :  { %4080 = vmatprep.subr.bf16.mxu0 %v6196_v9  ;;  %v6218_v24 = vld [vmem:[%s9050_s1 + $0x94] ss:$12 sps:$4 sm:$0xff]   ;;  %v6222_v26 = vld [vmem:[%s9050_s1 + $0x90] ss:$12 sps:$4 sm:$0xff]   ;;  %v6224_v28 = vld [vmem:[%s9050_s1 + $0xac] ss:$12 sps:$4 sm:$0xff]  }
   0xa   :  { %v6220_v25 = vld [vmem:[%s9050_s1 + $0x514] ss:$12 sps:$4 sm:$0xff]   ;;  %v6223_v27 = vld [vmem:[%s9050_s1 + $0x510] ss:$12 sps:$4 sm:$0xff]   ;;  %v6226_v29 = vld [vmem:[%s9050_s1 + $0x52c] ss:$12 sps:$4 sm:$0xff]  }
   0xb   :  { %3922 = vmatpush1.bf16.msra.mxu1 %v6198_v10  ;;  %v6228_v30 = vld [vmem:[%s9050_s1 + $0xa8] ss:$12 sps:$4 sm:$0xff]   ;;  %v6230_v32 = vld [vmem:[%s9050_s1 + $0xc4] ss:$12 sps:$4 sm:$0xff]   ;;  %v6234_v34 = vld [vmem:[%s9050_s1 + $0xc0] ss:$12 sps:$4 sm:$0xff]  }
   0xc   :  { %4081 = vmatpush1.bf16.msra.mxu0 %v6199_v11  ;;  %3923 = vmatprep.subr.bf16.mxu1 %v6200_v12  ;;  %v6229_v31 = vld [vmem:[%s9050_s1 + $0x528] ss:$12 sps:$4 sm:$0xff]   ;;  %v6232_v33 = vld [vmem:[%s9050_s1 + $0x544] ss:$12 sps:$4 sm:$0xff]   ;;  %v6235_v35 = vld [vmem:[%s9050_s1 + $0x540] ss:$12 sps:$4 sm:$0xff]  }
   0xd   :  { %4082 = vmatprep.subr.bf16.mxu0 %v6202_v13  ;;  %v6236_v36 = vld [vmem:[%s9050_s1 + $0xdc] ss:$12 sps:$4 sm:$0xff]   ;;  %v6240_v38 = vld [vmem:[%s9050_s1 + $0xd8] ss:$12 sps:$4 sm:$0xff]   ;;  %v6242_v40 = vld [vmem:[%s9050_s1 + $0xf4] ss:$12 sps:$4 sm:$0xff]  }
   0xe   :  { %v6238_v37 = vld [vmem:[%s9050_s1 + $0x55c] ss:$12 sps:$4 sm:$0xff]   ;;  %v6241_v39 = vld [vmem:[%s9050_s1 + $0x558] ss:$12 sps:$4 sm:$0xff]   ;;  %v6244_v41 = vld [vmem:[%s9050_s1 + $0x574] ss:$12 sps:$4 sm:$0xff]  }
   0xf   :  { %3924 = vmatpush1.bf16.msra.mxu1 %v6204_v14  ;;  %v6246_v42 = vld [vmem:[%s9050_s1 + $0xf0] ss:$12 sps:$4 sm:$0xff]   ;;  %v6248_v44 = vld [vmem:[%s9050_s1 + $0x10c] ss:$12 sps:$4 sm:$0xff]   ;;  %v6252_v46 = vld [vmem:[%s9050_s1 + $0x108] ss:$12 sps:$4 sm:$0xff]  }
  0x10   :  { %4083 = vmatpush1.bf16.msra.mxu0 %v6205_v15  ;;  %3925 = vmatprep.subr.bf16.mxu1 %v6206_v16  ;;  %v6247_v43 = vld [vmem:[%s9050_s1 + $0x570] ss:$12 sps:$4 sm:$0xff]   ;;  %v6250_v45 = vld [vmem:[%s9050_s1 + $0x58c] ss:$12 sps:$4 sm:$0xff]   ;;  %v6253_v47 = vld [vmem:[%s9050_s1 + $0x588] ss:$12 sps:$4 sm:$0xff]  }
  0x11   :  { %4084 = vmatprep.subr.bf16.mxu0 %v6208_v17  ;;  %v6280_v48 = vld [vmem:[%s9051_s0 + $0x4] ss:$92 sps:$4 sm:$0xff]   ;;  %v6286_v51 = vld [vmem:[%s9051_s0 + $0x1c] ss:$92 sps:$4 sm:$0xff]   ;;  %v6276_v0 = vld [vmem:[%s9050_s1 + $0x168] ss:$12 sps:$4 sm:$0xff]  }
  0x12   :  { %v6254_v49 = vld [vmem:[%s9050_s1 + $0x124] ss:$12 sps:$4 sm:$0xff]   ;;  %3949 = vmatprep.mubr.bf16.mxu1 %v6280_v48  ;;  %v6258_v52 = vld [vmem:[%s9050_s1 + $0x120] ss:$12 sps:$4 sm:$0xff]   ;;  %v6260_v54 = vld [vmem:[%s9050_s1 + $0x13c] ss:$12 sps:$4 sm:$0xff]   ;;  %4108 = vmatprep.mubr.bf16.mxu0 %v6286_v51 }
  0x13   :  { %3926 = vmatpush1.bf16.msra.mxu1 %v6210_v18  ;;  %v6256_v50 = vld [vmem:[%s9050_s1 + $0x5a4] ss:$12 sps:$4 sm:$0xff]   ;;  %v6259_v53 = vld [vmem:[%s9050_s1 + $0x5a0] ss:$12 sps:$4 sm:$0xff]   ;;  %v6262_v55 = vld [vmem:[%s9050_s1 + $0x5bc] ss:$12 sps:$4 sm:$0xff]  }
  0x14   :  { %4085 = vmatpush1.bf16.msra.mxu0 %v6211_v19  ;;  %3927 = vmatprep.subr.bf16.mxu1 %v6212_v20  ;;  %v6264_v56 = vld [vmem:[%s9050_s1 + $0x138] ss:$12 sps:$4 sm:$0xff]   ;;  %v6266_v58 = vld [vmem:[%s9050_s1 + $0x154] ss:$12 sps:$4 sm:$0xff]   ;;  %v6270_v60 = vld [vmem:[%s9050_s1 + $0x150] ss:$12 sps:$4 sm:$0xff]  }
  0x15   :  { %4086 = vmatprep.subr.bf16.mxu0 %v6214_v21  ;;  %v6265_v57 = vld [vmem:[%s9050_s1 + $0x5b8] ss:$12 sps:$4 sm:$0xff]   ;;  %v6268_v59 = vld [vmem:[%s9050_s1 + $0x5d4] ss:$12 sps:$4 sm:$0xff]   ;;  %v6271_v61 = vld [vmem:[%s9050_s1 + $0x5d0] ss:$12 sps:$4 sm:$0xff]  }
  0x16   :  { %v6272_v62 = vld [vmem:[%s9050_s1 + $0x16c] ss:$12 sps:$4 sm:$0xff]   ;;  %v6277_v1 = vld [vmem:[%s9050_s1 + $0x5e8] ss:$12 sps:$4 sm:$0xff]   ;;  %v6283_v2 = vld [vmem:[%s9050_s1 + $0x184] ss:$12 sps:$4 sm:$0xff]  }
  0x17   :  { %3928 = vmatpush1.bf16.msra.mxu1 %v6216_v22  ;;  %v6274_v63 = vld [vmem:[%s9050_s1 + $0x5ec] ss:$12 sps:$4 sm:$0xff]   ;;  %v6289_v3 = vld [vmem:[%s9050_s1 + $0x604] ss:$12 sps:$4 sm:$0xff]   ;;  %v6278_v4 = vld [vmem:[%s9051_s0] ss:$92 sps:$4 sm:$0xff]  }
  0x18   :  { %4087 = vmatpush1.bf16.msra.mxu0 %v6217_v23  ;;  %3929 = vmatprep.subr.bf16.mxu1 %v6218_v24  ;;  %v6281_v5 = vld [vmem:[%s9050_s1 + $0x180] ss:$12 sps:$4 sm:$0xff]   ;;  %v6284_v6 = vld [vmem:[%s9051_s0 + $0x18] ss:$92 sps:$4 sm:$0xff]   ;;  %v6292_v8 = vld [vmem:[%s9050_s1 + $0x19c] ss:$12 sps:$4 sm:$0xff]  }
  0x19   :  { %4088 = vmatprep.subr.bf16.mxu0 %v6220_v25  ;;  %v6287_v7 = vld [vmem:[%s9050_s1 + $0x600] ss:$12 sps:$4 sm:$0xff]   ;;  %v6295_v9 = vld [vmem:[%s9050_s1 + $0x61c] ss:$12 sps:$4 sm:$0xff]   ;;  %v6290_v10 = vld [vmem:[%s9050_s1 + $0x198] ss:$12 sps:$4 sm:$0xff]  }
  0x1a   :  { %v6293_v11 = vld [vmem:[%s9050_s1 + $0x618] ss:$12 sps:$4 sm:$0xff]   ;;  %v6298_v12 = vld [vmem:[%s9050_s1 + $0x1b4] ss:$12 sps:$4 sm:$0xff]   ;;  %v6296_v14 = vld [vmem:[%s9050_s1 + $0x1b0] ss:$12 sps:$4 sm:$0xff]  }
  0x1b   :  { %3930 = vmatpush1.bf16.msra.mxu1 %v6222_v26  ;;  %v6301_v13 = vld [vmem:[%s9050_s1 + $0x634] ss:$12 sps:$4 sm:$0xff]   ;;  %v6299_v15 = vld [vmem:[%s9050_s1 + $0x630] ss:$12 sps:$4 sm:$0xff]   ;;  %v6304_v16 = vld [vmem:[%s9050_s1 + $0x1cc] ss:$12 sps:$4 sm:$0xff]  }
  0x1c   :  { %4089 = vmatpush1.bf16.msra.mxu0 %v6223_v27  ;;  %3931 = vmatprep.subr.bf16.mxu1 %v6224_v28  ;;  %v6307_v17 = vld [vmem:[%s9050_s1 + $0x64c] ss:$12 sps:$4 sm:$0xff]   ;;  %v6302_v18 = vld [vmem:[%s9050_s1 + $0x1c8] ss:$12 sps:$4 sm:$0xff]   ;;  %v6310_v20 = vld [vmem:[%s9050_s1 + $0x1e4] ss:$12 sps:$4 sm:$0xff]  }
  0x1d   :  { %4090 = vmatprep.subr.bf16.mxu0 %v6226_v29  ;;  %v6305_v19 = vld [vmem:[%s9050_s1 + $0x648] ss:$12 sps:$4 sm:$0xff]   ;;  %v6313_v21 = vld [vmem:[%s9050_s1 + $0x664] ss:$12 sps:$4 sm:$0xff]   ;;  %v6308_v22 = vld [vmem:[%s9050_s1 + $0x1e0] ss:$12 sps:$4 sm:$0xff]  }
  0x1e   :  { %v6311_v23 = vld [vmem:[%s9050_s1 + $0x660] ss:$12 sps:$4 sm:$0xff]   ;;  %v6316_v24 = vld [vmem:[%s9050_s1 + $0x1fc] ss:$12 sps:$4 sm:$0xff]   ;;  %v6314_v26 = vld [vmem:[%s9050_s1 + $0x1f8] ss:$12 sps:$4 sm:$0xff]  }
  0x1f   :  { %3932 = vmatpush1.bf16.msra.mxu1 %v6228_v30  ;;  %v6319_v25 = vld [vmem:[%s9050_s1 + $0x67c] ss:$12 sps:$4 sm:$0xff]   ;;  %v6317_v27 = vld [vmem:[%s9050_s1 + $0x678] ss:$12 sps:$4 sm:$0xff]   ;;  %v6322_v29 = vld [vmem:[%s9050_s1 + $0x214] ss:$12 sps:$4 sm:$0xff]  }
  0x20   :  { %4091 = vmatpush1.bf16.msra.mxu0 %v6229_v31  ;;  %3933 = vmatprep.subr.bf16.mxu1 %v6230_v32  ;;  %v6368_v28 = vld [vmem:[%s9051_s0 + $0xbc] ss:$92 sps:$4 sm:$0xff]   ;;  %v6325_v30 = vld [vmem:[%s9050_s1 + $0x694] ss:$12 sps:$4 sm:$0xff]  }
  0x21   :  { %4092 = vmatprep.subr.bf16.mxu0 %v6232_v33  ;;  %v6373_v31 = vld [vmem:[%s9051_s0 + $0xd4] ss:$92 sps:$4 sm:$0xff]   ;;  %v6338_v48 = vld [vmem:[%s9050_s1 + $0x258] ss:$12 sps:$4 sm:$0xff]  }
  0x22   :  { %v6320_v32 = vld [vmem:[%s9050_s1 + $0x210] ss:$12 sps:$4 sm:$0xff]   ;;  %v6349_v51 = vld [vmem:[%s9050_s1 + $0x6f4] ss:$12 sps:$4 sm:$0xff]  }
  0x23   :  { %3934 = vmatpush1.bf16.msra.mxu1 %v6234_v34  ;;  %v6323_v33 = vld [vmem:[%s9050_s1 + $0x690] ss:$12 sps:$4 sm:$0xff]   ;;  %v6378_v34 = vld [vmem:[%s9051_s0 + $0xb8] ss:$92 sps:$4 sm:$0xff]  }
  0x24   :  { %4093 = vmatpush1.bf16.msra.mxu0 %v6235_v35  ;;  %3935 = vmatprep.subr.bf16.mxu1 %v6236_v36  ;;  %v6379_v35 = vld [vmem:[%s9051_s0 + $0xd0] ss:$92 sps:$4 sm:$0xff]  }
  0x25   :  { %4094 = vmatprep.subr.bf16.mxu0 %v6238_v37  ;;  %v6328_v36 = vld [vmem:[%s9050_s1 + $0x22c] ss:$12 sps:$4 sm:$0xff]  }
  0x26   :  { %v6331_v37 = vld [vmem:[%s9050_s1 + $0x6ac] ss:$12 sps:$4 sm:$0xff]  }
  0x27   :  { %3936 = vmatpush1.bf16.msra.mxu1 %v6240_v38  ;;  %v6326_v38 = vld [vmem:[%s9050_s1 + $0x228] ss:$12 sps:$4 sm:$0xff]  }
  0x28   :  { %4095 = vmatpush1.bf16.msra.mxu0 %v6241_v39  ;;  %3937 = vmatprep.subr.bf16.mxu1 %v6242_v40  ;;  %v6329_v39 = vld [vmem:[%s9050_s1 + $0x6a8] ss:$12 sps:$4 sm:$0xff]  }
  0x29   :  { %4096 = vmatprep.subr.bf16.mxu0 %v6244_v41  ;;  %v6388_v40 = vld [vmem:[%s9051_s0 + $0xc] ss:$92 sps:$4 sm:$0xff]   ;;  %v6334_v41 = vld [vmem:[%s9050_s1 + $0x244] ss:$12 sps:$4 sm:$0xff]  }
  0x2b   :  { %3938 = vmatpush1.bf16.msra.mxu1 %v6246_v42  ;;  %v6337_v42 = vld [vmem:[%s9050_s1 + $0x6c4] ss:$12 sps:$4 sm:$0xff]  }
  0x2c   :  { %4097 = vmatpush1.bf16.msra.mxu0 %v6247_v43  ;;  %3939 = vmatprep.subr.bf16.mxu1 %v6248_v44  ;;  %v6394_v43 = vld [vmem:[%s9051_s0 + $0x24] ss:$92 sps:$4 sm:$0xff]  }
  0x2d   :  { %4098 = vmatprep.subr.bf16.mxu0 %v6250_v45  ;;  %v6332_v44 = vld [vmem:[%s9050_s1 + $0x240] ss:$12 sps:$4 sm:$0xff]  }
  0x2e   :  { %v6335_v45 = vld [vmem:[%s9050_s1 + $0x6c0] ss:$12 sps:$4 sm:$0xff]  }
  0x2f   :  { %3940 = vmatpush1.bf16.msra.mxu1 %v6252_v46  ;;  %v6340_v46 = vld [vmem:[%s9050_s1 + $0x25c] ss:$12 sps:$4 sm:$0xff]  }
  0x30   :  { %4099 = vmatpush1.bf16.msra.mxu0 %v6253_v47  ;;  %3941 = vmatprep.subr.bf16.mxu1 %v6254_v49  ;;  %v6343_v47 = vld [vmem:[%s9050_s1 + $0x6dc] ss:$12 sps:$4 sm:$0xff]   ;;  %v6341_v49 = vld [vmem:[%s9050_s1 + $0x6d8] ss:$12 sps:$4 sm:$0xff]  }
  0x31   :  { %4100 = vmatprep.subr.bf16.mxu0 %v6256_v50  ;;  %v6346_v50 = vld [vmem:[%s9050_s1 + $0x274] ss:$12 sps:$4 sm:$0xff]  }
  0x33   :  { %3942 = vmatpush1.bf16.msra.mxu1 %v6258_v52  ;;  %v6344_v52 = vld [vmem:[%s9050_s1 + $0x270] ss:$12 sps:$4 sm:$0xff]  }
  0x34   :  { %4101 = vmatpush1.bf16.msra.mxu0 %v6259_v53  ;;  %3943 = vmatprep.subr.bf16.mxu1 %v6260_v54  ;;  %v6347_v53 = vld [vmem:[%s9050_s1 + $0x6f0] ss:$12 sps:$4 sm:$0xff]   ;;  %v6352_v54 = vld [vmem:[%s9050_s1 + $0x28c] ss:$12 sps:$4 sm:$0xff]  }
  0x35   :  { %4102 = vmatprep.subr.bf16.mxu0 %v6262_v55  ;;  %v6355_v55 = vld [vmem:[%s9050_s1 + $0x70c] ss:$12 sps:$4 sm:$0xff]  }
  0x37   :  { %3944 = vmatpush1.bf16.msra.mxu1 %v6264_v56  ;;  %v6350_v56 = vld [vmem:[%s9050_s1 + $0x288] ss:$12 sps:$4 sm:$0xff]  }
  0x38   :  { %4103 = vmatpush1.bf16.msra.mxu0 %v6265_v57  ;;  %3945 = vmatprep.subr.bf16.mxu1 %v6266_v58  ;;  %v6353_v57 = vld [vmem:[%s9050_s1 + $0x708] ss:$12 sps:$4 sm:$0xff]   ;;  %v6358_v58 = vld [vmem:[%s9050_s1 + $0x2a4] ss:$12 sps:$4 sm:$0xff]  }
  0x39   :  { %4104 = vmatprep.subr.bf16.mxu0 %v6268_v59  ;;  %v6361_v59 = vld [vmem:[%s9050_s1 + $0x724] ss:$12 sps:$4 sm:$0xff]  }
  0x3b   :  { %3946 = vmatpush1.bf16.msra.mxu1 %v6270_v60  ;;  %v6356_v60 = vld [vmem:[%s9050_s1 + $0x2a0] ss:$12 sps:$4 sm:$0xff]  }
  0x3c   :  { %4105 = vmatpush1.bf16.msra.mxu0 %v6271_v61  ;;  %3947 = vmatprep.subr.bf16.mxu1 %v6272_v62  ;;  %v6359_v61 = vld [vmem:[%s9050_s1 + $0x720] ss:$12 sps:$4 sm:$0xff]   ;;  %v6364_v62 = vld [vmem:[%s9050_s1 + $0x2bc] ss:$12 sps:$4 sm:$0xff]  }
  0x3d   :  { %4106 = vmatprep.subr.bf16.mxu0 %v6274_v63  ;;  %v6367_v63 = vld [vmem:[%s9050_s1 + $0x73c] ss:$12 sps:$4 sm:$0xff]  }
  0x3f   :  { %3948 = vmatpush1.bf16.msra.mxu1 %v6276_v0  ;;  %v6362_v0 = vld [vmem:[%s9050_s1 + $0x2b8] ss:$12 sps:$4 sm:$0xff]  }
  0x40   :  { %4107 = vmatpush1.bf16.msra.mxu0 %v6277_v1  ;;  %3970 = vmatprep.subr.bf16.mxu1 %v6283_v2  ;;  %v6365_v1 = vld [vmem:[%s9050_s1 + $0x738] ss:$12 sps:$4 sm:$0xff]   ;;  %v6372_v2 = vld [vmem:[%s9050_s1 + $0x2d4] ss:$12 sps:$4 sm:$0xff]  }
  0x41   :  { %4129 = vmatprep.subr.bf16.mxu0 %v6289_v3  ;;  %v6377_v3 = vld [vmem:[%s9050_s1 + $0x754] ss:$12 sps:$4 sm:$0xff]  }
  0x42   :  { %3950 = vmatmul.mubr.bf16.vlgmr.msra.gmra.mrb[0].mxu1 %v6278_v4  ;;  %v6370_v4 = vld [vmem:[%s9050_s1 + $0x2d0] ss:$12 sps:$4 sm:$0xff]  }
  0x43   :  { %4109 = vmatmul.mubr.bf16.vlgmr.msra.gmra.mrb[0].mxu0 %v6284_v6  ;;  %3971 = vmatpush1.bf16.msra.mxu1 %v6281_v5  ;;  %v6375_v5 = vld [vmem:[%s9050_s1 + $0x750] ss:$12 sps:$4 sm:$0xff]   ;;  %v6382_v6 = vld [vmem:[%s9050_s1 + $0x2ec] ss:$12 sps:$4 sm:$0xff]  }
  0x44   :  { %4130 = vmatpush1.bf16.msra.mxu0 %v6287_v7  ;;  %3972 = vmatprep.subr.bf16.mxu1 %v6292_v8  ;;  %v6385_v7 = vld [vmem:[%s9050_s1 + $0x76c] ss:$12 sps:$4 sm:$0xff]   ;;  %v6380_v8 = vld [vmem:[%s9050_s1 + $0x2e8] ss:$12 sps:$4 sm:$0xff]  }
  0x45   :  { %4131 = vmatprep.subr.bf16.mxu0 %v6295_v9  ;;  %3959 = vmatprep.mubr.bf16.mxu1 %v6368_v28  ;;  %v6383_v9 = vld [vmem:[%s9050_s1 + $0x768] ss:$12 sps:$4 sm:$0xff]   ;;  %v6412_v28 = vld [vmem:[%s9050_s1 + $0x34c] ss:$12 sps:$4 sm:$0xff]  }
  0x46   :  { %4118 = vmatprep.mubr.bf16.mxu0 %v6373_v31  ;;  %v6413_v31 = vld [vmem:[%s9050_s1 + $0x7c8] ss:$12 sps:$4 sm:$0xff]  }
  0x47   :  { %3973 = vmatpush1.bf16.msra.mxu1 %v6290_v10  ;;  %v6391_v10 = vld [vmem:[%s9050_s1 + $0x304] ss:$12 sps:$4 sm:$0xff]  }
  0x48   :  { %4132 = vmatpush1.bf16.msra.mxu0 %v6293_v11  ;;  %3974 = vmatprep.subr.bf16.mxu1 %v6298_v12  ;;  %v6397_v11 = vld [vmem:[%s9050_s1 + $0x784] ss:$12 sps:$4 sm:$0xff]  }
  0x49   :  { %4133 = vmatprep.subr.bf16.mxu0 %v6301_v13  ;;  %v6386_v12 = vld [vmem:[%s9051_s0 + $0x8] ss:$92 sps:$4 sm:$0xff]   ;;  %v6389_v13 = vld [vmem:[%s9050_s1 + $0x300] ss:$12 sps:$4 sm:$0xff]  }
  0x4a   :  { %3960 = vmatmul.mubr.bf16.gmra.mrb[4].mxu1 %v6378_v34  ;;  %v6421_v34 = vld [vmem:[%s9050_s1 + $0x7e4] ss:$12 sps:$4 sm:$0xff]  }
  0x4b   :  { %3975 = vmatpush1.bf16.msra.mxu1 %v6296_v14  ;;  %4119 = vmatmul.mubr.bf16.gmra.mrb[4].mxu0 %v6379_v35  ;;  %v6392_v14 = vld [vmem:[%s9051_s0 + $0x20] ss:$92 sps:$4 sm:$0xff]   ;;  %v6499_v35 = vld [vmem:[%s9051_s0 + $0x2c] ss:$92 sps:$4 sm:$0xff]  }
  0x4c   :  { %4134 = vmatpush1.bf16.msra.mxu0 %v6299_v15  ;;  %3976 = vmatprep.subr.bf16.mxu1 %v6304_v16  ;;  %v6395_v15 = vld [vmem:[%s9050_s1 + $0x780] ss:$12 sps:$4 sm:$0xff]   ;;  %v6400_v16 = vld [vmem:[%s9050_s1 + $0x31c] ss:$12 sps:$4 sm:$0xff]  }
  0x4d   :  { %4135 = vmatprep.subr.bf16.mxu0 %v6307_v17  ;;  %4002 = vmatprep.mubr.bf16.mxu1 %v6388_v40  ;;  %v6403_v17 = vld [vmem:[%s9050_s1 + $0x79c] ss:$12 sps:$4 sm:$0xff]   ;;  %v6422_v40 = vld [vmem:[%s9050_s1 + $0x378] ss:$12 sps:$4 sm:$0xff]  }
  0x4e   :  { %4161 = vmatprep.mubr.bf16.mxu0 %v6394_v43  ;;  %v6433_v43 = vld [vmem:[%s9050_s1 + $0x814] ss:$12 sps:$4 sm:$0xff]  }
  0x4f   :  { %3977 = vmatpush1.bf16.msra.mxu1 %v6302_v18  ;;  %v6398_v18 = vld [vmem:[%s9050_s1 + $0x318] ss:$12 sps:$4 sm:$0xff]  }
  0x50   :  { %4136 = vmatpush1.bf16.msra.mxu0 %v6305_v19  ;;  %3978 = vmatprep.subr.bf16.mxu1 %v6310_v20  ;;  %v6401_v19 = vld [vmem:[%s9050_s1 + $0x798] ss:$12 sps:$4 sm:$0xff]  }
  0x51   :  { %4137 = vmatprep.subr.bf16.mxu0 %v6313_v21  ;;  %v6476_v20 = vld [vmem:[%s9051_s0 + $0xc4] ss:$92 sps:$4 sm:$0xff]  }
  0x52   :  { %v6406_v21 = vld [vmem:[%s9050_s1 + $0x334] ss:$12 sps:$4 sm:$0xff]  }
  0x53   :  { %3979 = vmatpush1.bf16.msra.mxu1 %v6308_v22  ;;  %v6409_v22 = vld [vmem:[%s9050_s1 + $0x7b4] ss:$12 sps:$4 sm:$0xff]  }
  0x54   :  { %4138 = vmatpush1.bf16.msra.mxu0 %v6311_v23  ;;  %3980 = vmatprep.subr.bf16.mxu1 %v6316_v24  ;;  %v6404_v23 = vld [vmem:[%s9050_s1 + $0x330] ss:$12 sps:$4 sm:$0xff]  }
  0x55   :  { %4139 = vmatprep.subr.bf16.mxu0 %v6319_v25  ;;  %v6482_v24 = vld [vmem:[%s9051_s0 + $0xdc] ss:$92 sps:$4 sm:$0xff]  }
  0x56   :  { %v6407_v25 = vld [vmem:[%s9050_s1 + $0x7b0] ss:$12 sps:$4 sm:$0xff]  }
  0x57   :  { %3981 = vmatpush1.bf16.msra.mxu1 %v6314_v26  ;;  %v6478_v26 = vld [vmem:[%s9051_s0 + $0xc0] ss:$92 sps:$4 sm:$0xff]  }
  0x58   :  { %4140 = vmatpush1.bf16.msra.mxu0 %v6317_v27  ;;  %3982 = vmatprep.subr.bf16.mxu1 %v6322_v29  ;;  %v6487_v27 = vld [vmem:[%s9051_s0 + $0xd8] ss:$92 sps:$4 sm:$0xff]  }
  0x59   :  { %4141 = vmatprep.subr.bf16.mxu0 %v6325_v30  ;;  %v6415_v29 = vld [vmem:[%s9050_s1 + $0x7cc] ss:$12 sps:$4 sm:$0xff]   ;;  %v6410_v30 = vld [vmem:[%s9050_s1 + $0x348] ss:$12 sps:$4 sm:$0xff]  }
  0x5b   :  { %3983 = vmatpush1.bf16.msra.mxu1 %v6320_v32  ;;  %v6418_v32 = vld [vmem:[%s9050_s1 + $0x364] ss:$12 sps:$4 sm:$0xff]  }
  0x5c   :  { %4142 = vmatpush1.bf16.msra.mxu0 %v6323_v33  ;;  %3984 = vmatprep.subr.bf16.mxu1 %v6328_v36  ;;  %v6496_v33 = vld [vmem:[%s9051_s0 + $0x14] ss:$92 sps:$4 sm:$0xff]   ;;  %v6416_v36 = vld [vmem:[%s9050_s1 + $0x360] ss:$12 sps:$4 sm:$0xff]  }
  0x5d   :  { %4143 = vmatprep.subr.bf16.mxu0 %v6331_v37  ;;  %v6419_v37 = vld [vmem:[%s9050_s1 + $0x7e0] ss:$12 sps:$4 sm:$0xff]  }
  0x5f   :  { %3985 = vmatpush1.bf16.msra.mxu1 %v6326_v38  ;;  %v6424_v38 = vld [vmem:[%s9050_s1 + $0x37c] ss:$12 sps:$4 sm:$0xff]  }
  0x60   :  { %4144 = vmatpush1.bf16.msra.mxu0 %v6329_v39  ;;  %3986 = vmatprep.subr.bf16.mxu1 %v6334_v41  ;;  %v6427_v39 = vld [vmem:[%s9050_s1 + $0x7fc] ss:$12 sps:$4 sm:$0xff]   ;;  %v6425_v41 = vld [vmem:[%s9050_s1 + $0x7f8] ss:$12 sps:$4 sm:$0xff]  }
  0x61   :  { %4145 = vmatprep.subr.bf16.mxu0 %v6337_v42  ;;  %v6430_v42 = vld [vmem:[%s9050_s1 + $0x394] ss:$12 sps:$4 sm:$0xff]  }
  0x63   :  { %3987 = vmatpush1.bf16.msra.mxu1 %v6332_v44  ;;  %v6428_v44 = vld [vmem:[%s9050_s1 + $0x390] ss:$12 sps:$4 sm:$0xff]  }
  0x64   :  { %4146 = vmatpush1.bf16.msra.mxu0 %v6335_v45  ;;  %3988 = vmatprep.subr.bf16.mxu1 %v6340_v46  ;;  %v6431_v45 = vld [vmem:[%s9050_s1 + $0x810] ss:$12 sps:$4 sm:$0xff]   ;;  %v6436_v46 = vld [vmem:[%s9050_s1 + $0x3ac] ss:$12 sps:$4 sm:$0xff]  }
  0x65   :  { %4147 = vmatprep.subr.bf16.mxu0 %v6343_v47  ;;  %v6439_v47 = vld [vmem:[%s9050_s1 + $0x82c] ss:$12 sps:$4 sm:$0xff]  }
  0x67   :  { %3989 = vmatpush1.bf16.msra.mxu1 %v6338_v48  ;;  %v6434_v48 = vld [vmem:[%s9050_s1 + $0x3a8] ss:$12 sps:$4 sm:$0xff]  }
  0x68   :  { %4148 = vmatpush1.bf16.msra.mxu0 %v6341_v49  ;;  %3990 = vmatprep.subr.bf16.mxu1 %v6346_v50  ;;  %v6437_v49 = vld [vmem:[%s9050_s1 + $0x828] ss:$12 sps:$4 sm:$0xff]   ;;  %v6442_v50 = vld [vmem:[%s9050_s1 + $0x3c4] ss:$12 sps:$4 sm:$0xff]  }
  0x69   :  { %4149 = vmatprep.subr.bf16.mxu0 %v6349_v51  ;;  %v6445_v51 = vld [vmem:[%s9050_s1 + $0x844] ss:$12 sps:$4 sm:$0xff]  }
  0x6b   :  { %3991 = vmatpush1.bf16.msra.mxu1 %v6344_v52  ;;  %v6440_v52 = vld [vmem:[%s9050_s1 + $0x3c0] ss:$12 sps:$4 sm:$0xff]  }
  0x6c   :  { %4150 = vmatpush1.bf16.msra.mxu0 %v6347_v53  ;;  %3992 = vmatprep.subr.bf16.mxu1 %v6352_v54  ;;  %v6443_v53 = vld [vmem:[%s9050_s1 + $0x840] ss:$12 sps:$4 sm:$0xff]   ;;  %v6448_v54 = vld [vmem:[%s9050_s1 + $0x3dc] ss:$12 sps:$4 sm:$0xff]  }
  0x6d   :  { %4151 = vmatprep.subr.bf16.mxu0 %v6355_v55  ;;  %v6451_v55 = vld [vmem:[%s9050_s1 + $0x85c] ss:$12 sps:$4 sm:$0xff]  }
  0x6f   :  { %3993 = vmatpush1.bf16.msra.mxu1 %v6350_v56  ;;  %v6446_v56 = vld [vmem:[%s9050_s1 + $0x3d8] ss:$12 sps:$4 sm:$0xff]  }
  0x70   :  { %4152 = vmatpush1.bf16.msra.mxu0 %v6353_v57  ;;  %3994 = vmatprep.subr.bf16.mxu1 %v6358_v58  ;;  %v6449_v57 = vld [vmem:[%s9050_s1 + $0x858] ss:$12 sps:$4 sm:$0xff]   ;;  %v6454_v58 = vld [vmem:[%s9050_s1 + $0x3f4] ss:$12 sps:$4 sm:$0xff]  }
  0x71   :  { %4153 = vmatprep.subr.bf16.mxu0 %v6361_v59  ;;  %v6457_v59 = vld [vmem:[%s9050_s1 + $0x874] ss:$12 sps:$4 sm:$0xff]  }
  0x73   :  { %3995 = vmatpush1.bf16.msra.mxu1 %v6356_v60  ;;  %v6452_v60 = vld [vmem:[%s9050_s1 + $0x3f0] ss:$12 sps:$4 sm:$0xff]  }
  0x74   :  { %4154 = vmatpush1.bf16.msra.mxu0 %v6359_v61  ;;  %3996 = vmatprep.subr.bf16.mxu1 %v6364_v62  ;;  %v6455_v61 = vld [vmem:[%s9050_s1 + $0x870] ss:$12 sps:$4 sm:$0xff]   ;;  %v6460_v62 = vld [vmem:[%s9050_s1 + $0x40c] ss:$12 sps:$4 sm:$0xff]  }
  0x75   :  { %4155 = vmatprep.subr.bf16.mxu0 %v6367_v63  ;;  %v6463_v63 = vld [vmem:[%s9050_s1 + $0x88c] ss:$12 sps:$4 sm:$0xff]  }
  0x77   :  { %3997 = vmatpush1.bf16.msra.mxu1 %v6362_v0  ;;  %v6458_v0 = vld [vmem:[%s9050_s1 + $0x408] ss:$12 sps:$4 sm:$0xff]  }
  0x78   :  { %4156 = vmatpush1.bf16.msra.mxu0 %v6365_v1  ;;  %3998 = vmatprep.subr.bf16.mxu1 %v6372_v2  ;;  %v6461_v1 = vld [vmem:[%s9050_s1 + $0x888] ss:$12 sps:$4 sm:$0xff]   ;;  %v6466_v2 = vld [vmem:[%s9050_s1 + $0x424] ss:$12 sps:$4 sm:$0xff]  }
  0x79   :  { %4157 = vmatprep.subr.bf16.mxu0 %v6377_v3  ;;  %v6469_v3 = vld [vmem:[%s9050_s1 + $0x8a4] ss:$12 sps:$4 sm:$0xff]  }
  0x7b   :  { %3999 = vmatpush1.bf16.msra.mxu1 %v6370_v4  ;;  %v6464_v4 = vld [vmem:[%s9050_s1 + $0x420] ss:$12 sps:$4 sm:$0xff]  }
  0x7c   :  { %4158 = vmatpush1.bf16.msra.mxu0 %v6375_v5  ;;  %4000 = vmatprep.subr.bf16.mxu1 %v6382_v6  ;;  %v6467_v5 = vld [vmem:[%s9050_s1 + $0x8a0] ss:$12 sps:$4 sm:$0xff]   ;;  %v6472_v6 = vld [vmem:[%s9050_s1 + $0x43c] ss:$12 sps:$4 sm:$0xff]  }
  0x7d   :  { %4159 = vmatprep.subr.bf16.mxu0 %v6385_v7  ;;  %v6475_v7 = vld [vmem:[%s9050_s1 + $0x8bc] ss:$12 sps:$4 sm:$0xff]  }
  0x7f   :  { %4001 = vmatpush1.bf16.msra.mxu1 %v6380_v8  ;;  %v6470_v8 = vld [vmem:[%s9050_s1 + $0x438] ss:$12 sps:$4 sm:$0xff]  }
  0x80   :  { %4160 = vmatpush1.bf16.msra.mxu0 %v6383_v9  ;;  %4023 = vmatprep.subr.bf16.mxu1 %v6391_v10  ;;  %v6473_v9 = vld [vmem:[%s9050_s1 + $0x8b8] ss:$12 sps:$4 sm:$0xff]   ;;  %v6481_v10 = vld [vmem:[%s9050_s1 + $0x454] ss:$12 sps:$4 sm:$0xff]  }
  0x81   :  { %4182 = vmatprep.subr.bf16.mxu0 %v6397_v11  ;;  %v6486_v11 = vld [vmem:[%s9050_s1 + $0x8d4] ss:$12 sps:$4 sm:$0xff]  }
  0x82   :  { %4003 = vmatmul.mubr.bf16.vlgmr.msra.gmra.mrb[0].mxu1 %v6386_v12  ;;  %v6479_v12 = vld [vmem:[%s9050_s1 + $0x450] ss:$12 sps:$4 sm:$0xff]  }
  0x83   :  { %4162 = vmatmul.mubr.bf16.vlgmr.msra.gmra.mrb[0].mxu0 %v6392_v14  ;;  %4024 = vmatpush1.bf16.msra.mxu1 %v6389_v13  ;;  %v6484_v13 = vld [vmem:[%s9050_s1 + $0x8d0] ss:$12 sps:$4 sm:$0xff]   ;;  %v6490_v14 = vld [vmem:[%s9050_s1 + $0x46c] ss:$12 sps:$4 sm:$0xff]  }
  0x84   :  { %4183 = vmatpush1.bf16.msra.mxu0 %v6395_v15  ;;  %4025 = vmatprep.subr.bf16.mxu1 %v6400_v16  ;;  %v6493_v15 = vld [vmem:[%s9050_s1 + $0x8ec] ss:$12 sps:$4 sm:$0xff]   ;;  %v6488_v16 = vld [vmem:[%s9050_s1 + $0x468] ss:$12 sps:$4 sm:$0xff]  }
  0x85   :  { %4184 = vmatprep.subr.bf16.mxu0 %v6403_v17  ;;  %4012 = vmatprep.mubr.bf16.mxu1 %v6476_v20  ;;  %v6491_v17 = vld [vmem:[%s9050_s1 + $0x8e8] ss:$12 sps:$4 sm:$0xff]  }
  0x86   :  { %4171 = vmatprep.mubr.bf16.mxu0 %v6482_v24  ;;  %v6503_v20 = vld [vmem:[%s9050_s1 + $0xc8] ss:$12 sps:$4 sm:$0xff]  }
  0x87   :  { %4026 = vmatpush1.bf16.msra.mxu1 %v6398_v18  ;;  %v6502_v18 = vld [vmem:[%s9050_s1 + $0x904] ss:$12 sps:$4 sm:$0xff]   ;;  %v6507_v24 = vld [vmem:[%s9050_s1 + $0x91c] ss:$12 sps:$4 sm:$0xff]  }
  0x88   :  { %4185 = vmatpush1.bf16.msra.mxu0 %v6401_v19  ;;  %4027 = vmatprep.subr.bf16.mxu1 %v6406_v21  ;;  %v7657_v19 = vld [vmem:[%s9051_s0 + $0x10] ss:$92 sps:$4 sm:$0xff]   ;;  %v6497_v21 = vld [vmem:[%s9051_s0 + $0x28] ss:$92 sps:$4 sm:$0xff]  }
  0x89   :  { %4186 = vmatprep.subr.bf16.mxu0 %v6409_v22  ;;  %v6500_v22 = vld [vmem:[%s9050_s1 + $0x900] ss:$12 sps:$4 sm:$0xff]  }
  0x8a   :  { %4013 = vmatmul.mubr.bf16.gmra.mrb[4].mxu1 %v6478_v26  ;;  %v7680_v26 = vld [vmem:[%s9051_s0 + $0xcc] ss:$92 sps:$4 sm:$0xff]  }
  0x8b   :  { %4172 = vmatmul.mubr.bf16.gmra.mrb[4].mxu0 %v6487_v27  ;;  %4028 = vmatpush1.bf16.msra.mxu1 %v6404_v23  ;;  %v6504_v23 = vld [vmem:[%s9050_s1 + $0x8] ss:$12 sps:$4 sm:$0xff]   ;;  %v6505_v27 = vld [vmem:[%s9050_s1 + $0x918] ss:$12 sps:$4 sm:$0xff]  }
  0x8c   :  { %4187 = vmatpush1.bf16.msra.mxu0 %v6407_v25  ;;  %4029 = vmatprep.subr.bf16.mxu1 %v6412_v28  ;;  %v6508_v25 = vld [vmem:[%s9050_s1 + $0xe0] ss:$12 sps:$4 sm:$0xff]  }
  0x8d   :  { %4188 = vmatprep.subr.bf16.mxu0 %v6415_v29  ;;  %4055 = vmatprep.mubr.bf16.mxu1 %v6496_v33  ;;  %v6573_v28 = vld [vmem:[%s9051_s0 + $0xe4] ss:$92 sps:$4 sm:$0xff]   ;;  %v6513_v33 = vld [vmem:[%s9050_s1 + $0x930] ss:$12 sps:$4 sm:$0xff]  }
  0x8e   :  { %4214 = vmatprep.mubr.bf16.mxu0 %v6499_v35  ;;  %v6509_v29 = vld [vmem:[%s9050_s1 + $0x20] ss:$12 sps:$4 sm:$0xff]  }
  0x8f   :  { %4030 = vmatpush1.bf16.msra.mxu1 %v6410_v30  ;;  %v6515_v30 = vld [vmem:[%s9050_s1 + $0x934] ss:$12 sps:$4 sm:$0xff]  }
  0x90   :  { %4189 = vmatpush1.bf16.msra.mxu0 %v6413_v31  ;;  %4031 = vmatprep.subr.bf16.mxu1 %v6418_v32  ;;  %v6516_v31 = vld [vmem:[%s9050_s1 + $0xf8] ss:$12 sps:$4 sm:$0xff]   ;;  %v6579_v35 = vld [vmem:[%s9051_s0 + $0xe0] ss:$92 sps:$4 sm:$0xff]  }
  0x91   :  { %4190 = vmatprep.subr.bf16.mxu0 %v6421_v34  ;;  %v7702_v32 = vld [vmem:[%s9051_s0 + $0xc8] ss:$92 sps:$4 sm:$0xff]  }
  0x92   :  { %v6517_v34 = vld [vmem:[%s9050_s1 + $0x38] ss:$12 sps:$4 sm:$0xff]  }
  0x93   :  { %4032 = vmatpush1.bf16.msra.mxu1 %v6416_v36  ;;  %v6520_v36 = vld [vmem:[%s9050_s1 + $0x94c] ss:$12 sps:$4 sm:$0xff]  }
  0x94   :  { %4191 = vmatpush1.bf16.msra.mxu0 %v6419_v37  ;;  %4033 = vmatprep.subr.bf16.mxu1 %v6424_v38  ;;  %v6521_v37 = vld [vmem:[%s9050_s1 + $0x110] ss:$12 sps:$4 sm:$0xff]   ;;  %v6518_v38 = vld [vmem:[%s9050_s1 + $0x948] ss:$12 sps:$4 sm:$0xff]  }
  0x95   :  { %4192 = vmatprep.subr.bf16.mxu0 %v6427_v39  ;;  %v6588_v39 = vld [vmem:[%s9051_s0 + $0x34] ss:$92 sps:$4 sm:$0xff]  }
  0x97   :  { %4034 = vmatpush1.bf16.msra.mxu1 %v6422_v40  ;;  %v6522_v40 = vld [vmem:[%s9050_s1 + $0x50] ss:$12 sps:$4 sm:$0xff]  }
  0x98   :  { %4193 = vmatpush1.bf16.msra.mxu0 %v6425_v41  ;;  %4035 = vmatprep.subr.bf16.mxu1 %v6430_v42  ;;  %v6525_v41 = vld [vmem:[%s9050_s1 + $0x964] ss:$12 sps:$4 sm:$0xff]   ;;  %v6526_v42 = vld [vmem:[%s9050_s1 + $0x128] ss:$12 sps:$4 sm:$0xff]  }
  0x99   :  { %4194 = vmatprep.subr.bf16.mxu0 %v6433_v43  ;;  %v6970_v43 = vld [vmem:[%s9051_s0 + $0x4] ss:$92 sps:$4 sm:$0xff]  }
  0x9b   :  { %4036 = vmatpush1.bf16.msra.mxu1 %v6428_v44  ;;  %v6523_v44 = vld [vmem:[%s9050_s1 + $0x960] ss:$12 sps:$4 sm:$0xff]  }
  0x9c   :  { %4195 = vmatpush1.bf16.msra.mxu0 %v6431_v45  ;;  %4037 = vmatprep.subr.bf16.mxu1 %v6436_v46  ;;  %v6527_v45 = vld [vmem:[%s9050_s1 + $0x68] ss:$12 sps:$4 sm:$0xff]  }
  0x9d   :  { %4196 = vmatprep.subr.bf16.mxu0 %v6439_v47  ;;  %v6530_v46 = vld [vmem:[%s9050_s1 + $0x97c] ss:$12 sps:$4 sm:$0xff]   ;;  %v6531_v47 = vld [vmem:[%s9050_s1 + $0x140] ss:$12 sps:$4 sm:$0xff]  }
  0x9f   :  { %4038 = vmatpush1.bf16.msra.mxu1 %v6434_v48  ;;  %v6528_v48 = vld [vmem:[%s9050_s1 + $0x978] ss:$12 sps:$4 sm:$0xff]  }
  0xa0   :  { %4197 = vmatpush1.bf16.msra.mxu0 %v6437_v49  ;;  %4039 = vmatprep.subr.bf16.mxu1 %v6442_v50  ;;  %v6532_v49 = vld [vmem:[%s9050_s1 + $0x80] ss:$12 sps:$4 sm:$0xff]  }
  0xa1   :  { %4198 = vmatprep.subr.bf16.mxu0 %v6445_v51  ;;  %v6535_v50 = vld [vmem:[%s9050_s1 + $0x994] ss:$12 sps:$4 sm:$0xff]   ;;  %v6536_v51 = vld [vmem:[%s9050_s1 + $0x158] ss:$12 sps:$4 sm:$0xff]  }
  0xa3   :  { %4040 = vmatpush1.bf16.msra.mxu1 %v6440_v52  ;;  %v6533_v52 = vld [vmem:[%s9050_s1 + $0x990] ss:$12 sps:$4 sm:$0xff]  }
  0xa4   :  { %4199 = vmatpush1.bf16.msra.mxu0 %v6443_v53  ;;  %4041 = vmatprep.subr.bf16.mxu1 %v6448_v54  ;;  %v6537_v53 = vld [vmem:[%s9050_s1 + $0x98] ss:$12 sps:$4 sm:$0xff]  }
  0xa5   :  { %4200 = vmatprep.subr.bf16.mxu0 %v6451_v55  ;;  %v6540_v54 = vld [vmem:[%s9050_s1 + $0x9ac] ss:$12 sps:$4 sm:$0xff]   ;;  %v6541_v55 = vld [vmem:[%s9050_s1 + $0x170] ss:$12 sps:$4 sm:$0xff]  }
  0xa7   :  { %4042 = vmatpush1.bf16.msra.mxu1 %v6446_v56  ;;  %v6538_v56 = vld [vmem:[%s9050_s1 + $0x9a8] ss:$12 sps:$4 sm:$0xff]  }
  0xa8   :  { %4201 = vmatpush1.bf16.msra.mxu0 %v6449_v57  ;;  %4043 = vmatprep.subr.bf16.mxu1 %v6454_v58  ;;  %v6542_v57 = vld [vmem:[%s9050_s1 + $0xb0] ss:$12 sps:$4 sm:$0xff]  }
  0xa9   :  { %4202 = vmatprep.subr.bf16.mxu0 %v6457_v59  ;;  %v6545_v58 = vld [vmem:[%s9050_s1 + $0x9c4] ss:$12 sps:$4 sm:$0xff]   ;;  %v6546_v59 = vld [vmem:[%s9050_s1 + $0x248] ss:$12 sps:$4 sm:$0xff]  }
  0xab   :  { %4044 = vmatpush1.bf16.msra.mxu1 %v6452_v60  ;;  %v6543_v60 = vld [vmem:[%s9050_s1 + $0x9c0] ss:$12 sps:$4 sm:$0xff]  }
  0xac   :  { %4203 = vmatpush1.bf16.msra.mxu0 %v6455_v61  ;;  %4045 = vmatprep.subr.bf16.mxu1 %v6460_v62  ;;  %v6547_v61 = vld [vmem:[%s9050_s1 + $0x188] ss:$12 sps:$4 sm:$0xff]  }
  0xad   :  { %4204 = vmatprep.subr.bf16.mxu0 %v6463_v63  ;;  %v6550_v62 = vld [vmem:[%s9050_s1 + $0x9dc] ss:$12 sps:$4 sm:$0xff]   ;;  %v6551_v63 = vld [vmem:[%s9050_s1 + $0x260] ss:$12 sps:$4 sm:$0xff]  }
  0xaf   :  { %4046 = vmatpush1.bf16.msra.mxu1 %v6458_v0  ;;  %v6971_v0 = vld [vmem:[%s9051_s0] ss:$92 sps:$4 sm:$0xff]  }
  0xb0   :  { %4205 = vmatpush1.bf16.msra.mxu0 %v6461_v1  ;;  %4047 = vmatprep.subr.bf16.mxu1 %v6466_v2  ;;  %v6548_v1 = vld [vmem:[%s9050_s1 + $0x9d8] ss:$12 sps:$4 sm:$0xff]   ;;  %v6552_v2 = vld [vmem:[%s9050_s1 + $0x1a0] ss:$12 sps:$4 sm:$0xff]  }
  0xb1   :  { %4206 = vmatprep.subr.bf16.mxu0 %v6469_v3  ;;  %v6555_v3 = vld [vmem:[%s9050_s1 + $0x9f4] ss:$12 sps:$4 sm:$0xff]  }
  0xb3   :  { %4048 = vmatpush1.bf16.msra.mxu1 %v6464_v4  ;;  %v6556_v4 = vld [vmem:[%s9050_s1 + $0x278] ss:$12 sps:$4 sm:$0xff]  }
  0xb4   :  { %4207 = vmatpush1.bf16.msra.mxu0 %v6467_v5  ;;  %4049 = vmatprep.subr.bf16.mxu1 %v6472_v6  ;;  %v6553_v5 = vld [vmem:[%s9050_s1 + $0x9f0] ss:$12 sps:$4 sm:$0xff]  }
  0xb5   :  { %4208 = vmatprep.subr.bf16.mxu0 %v6475_v7  ;;  %v6972_v6 = vld [vmem:[%s9051_s0 + $0xbc] ss:$92 sps:$4 sm:$0xff]  }
  0xb6   :  { %v6557_v7 = vld [vmem:[%s9050_s1 + $0x1b8] ss:$12 sps:$4 sm:$0xff]  }
  0xb7   :  { %4050 = vmatpush1.bf16.msra.mxu1 %v6470_v8  ;;  %v6560_v8 = vld [vmem:[%s9050_s1 + $0xa0c] ss:$12 sps:$4 sm:$0xff]  }
  0xb8   :  { %4209 = vmatpush1.bf16.msra.mxu0 %v6473_v9  ;;  %4051 = vmatprep.subr.bf16.mxu1 %v6481_v10  ;;  %v6561_v9 = vld [vmem:[%s9050_s1 + $0x290] ss:$12 sps:$4 sm:$0xff]   ;;  %v6558_v10 = vld [vmem:[%s9050_s1 + $0xa08] ss:$12 sps:$4 sm:$0xff]  }
  0xb9   :  { %4210 = vmatprep.subr.bf16.mxu0 %v6486_v11  ;;  %v6973_v11 = vld [vmem:[%s9051_s0 + $0xb8] ss:$92 sps:$4 sm:$0xff]  }
  0xbb   :  { %4052 = vmatpush1.bf16.msra.mxu1 %v6479_v12  ;;  %v6562_v12 = vld [vmem:[%s9050_s1 + $0x1d0] ss:$12 sps:$4 sm:$0xff]  }
  0xbc   :  { %4211 = vmatpush1.bf16.msra.mxu0 %v6484_v13  ;;  %4053 = vmatprep.subr.bf16.mxu1 %v6490_v14  ;;  %v6565_v13 = vld [vmem:[%s9050_s1 + $0xa24] ss:$12 sps:$4 sm:$0xff]   ;;  %v6566_v14 = vld [vmem:[%s9050_s1 + $0x2a8] ss:$12 sps:$4 sm:$0xff]  }
  0xbd   :  { %4212 = vmatprep.subr.bf16.mxu0 %v6493_v15  ;;  %v6974_v15 = vld [vmem:[%s9051_s0 + $0xc] ss:$92 sps:$4 sm:$0xff]  }
  0xbf   :  { %4054 = vmatpush1.bf16.msra.mxu1 %v6488_v16  ;;  %v6563_v16 = vld [vmem:[%s9050_s1 + $0xa20] ss:$12 sps:$4 sm:$0xff]  }
  0xc0   :  { %4213 = vmatpush1.bf16.msra.mxu0 %v6491_v17  ;;  %5759 = vmatprep.subr.bf16.mxu1 %v6503_v20  ;;  %v6567_v17 = vld [vmem:[%s9050_s1 + $0x1e8] ss:$12 sps:$4 sm:$0xff]   ;;  %v6571_v20 = vld [vmem:[%s9050_s1 + $0x2c0] ss:$12 sps:$4 sm:$0xff]  }
  0xc1   :  { %4235 = vmatprep.subr.bf16.mxu0 %v6502_v18  ;;  %v6570_v18 = vld [vmem:[%s9050_s1 + $0xa3c] ss:$12 sps:$4 sm:$0xff]  }
  0xc2   :  { %4056 = vmatmul.mubr.bf16.vlgmr.msra.gmra.mrb[0].mxu1 %v7657_v19 }
  0xc3   :  { %4215 = vmatmul.mubr.bf16.vlgmr.msra.gmra.mrb[0].mxu0 %v6497_v21  ;;  %5760 = vmatpush3.bf16.msra.mxu1 %v6504_v23  ;;  %v6568_v21 = vld [vmem:[%s9050_s1 + $0xa38] ss:$12 sps:$4 sm:$0xff]   ;;  %v6577_v23 = vld [vmem:[%s9050_s1 + $0xa54] ss:$12 sps:$4 sm:$0xff]  }
  0xc4   :  { %4236 = vmatpush1.bf16.msra.mxu0 %v6500_v22  ;;  %5761 = vmatprep.subr.bf16.mxu1 %v6508_v25  ;;  %v6572_v22 = vld [vmem:[%s9050_s1 + $0x200] ss:$12 sps:$4 sm:$0xff]   ;;  %v6575_v25 = vld [vmem:[%s9050_s1 + $0xa50] ss:$12 sps:$4 sm:$0xff]  }
  0xc5   :  { %4237 = vmatprep.subr.bf16.mxu0 %v6507_v24  ;;  %4065 = vmatprep.mubr.bf16.mxu1 %v7680_v26  ;;  %v6578_v24 = vld [vmem:[%s9050_s1 + $0x2d8] ss:$12 sps:$4 sm:$0xff]  }
  0xc6   :  { %4224 = vmatprep.mubr.bf16.mxu0 %v6573_v28  ;;  %v6583_v28 = vld [vmem:[%s9050_s1 + $0xa6c] ss:$12 sps:$4 sm:$0xff]  }
  0xc7   :  { %5762 = vmatpush3.bf16.msra.mxu1 %v6509_v29  ;;  %v6584_v29 = vld [vmem:[%s9050_s1 + $0x2f0] ss:$12 sps:$4 sm:$0xff]  }
  0xc8   :  { %4238 = vmatpush1.bf16.msra.mxu0 %v6505_v27  ;;  %5763 = vmatprep.subr.bf16.mxu1 %v6516_v31  ;;  %v6580_v27 = vld [vmem:[%s9050_s1 + $0x218] ss:$12 sps:$4 sm:$0xff]   ;;  %v6585_v31 = vld [vmem:[%s9050_s1 + $0x230] ss:$12 sps:$4 sm:$0xff]  }
  0xc9   :  { %4239 = vmatprep.subr.bf16.mxu0 %v6515_v30  ;;  %v6581_v30 = vld [vmem:[%s9050_s1 + $0xa68] ss:$12 sps:$4 sm:$0xff]  }
  0xca   :  { %4066 = vmatmul.mubr.bf16.gmra.mrb[4].mxu1 %v7702_v32 }
  0xcb   :  { %4225 = vmatmul.mubr.bf16.gmra.mrb[4].mxu0 %v6579_v35  ;;  %5764 = vmatpush3.bf16.msra.mxu1 %v6517_v34  ;;  %v6592_v34 = vld [vmem:[%s9050_s1 + $0x3c8] ss:$12 sps:$4 sm:$0xff]   ;;  %v6586_v35 = vld [vmem:[%s9051_s0 + $0x30] ss:$92 sps:$4 sm:$0xff]  }
  0xcc   :  { %4240 = vmatpush1.bf16.msra.mxu0 %v6513_v33  ;;  %5765 = vmatprep.subr.bf16.mxu1 %v6521_v37  ;;  %v6591_v33 = vld [vmem:[%s9050_s1 + $0xa84] ss:$12 sps:$4 sm:$0xff]   ;;  %v6593_v37 = vld [vmem:[%s9050_s1 + $0x308] ss:$12 sps:$4 sm:$0xff]  }
  0xcd   :  { %4241 = vmatprep.subr.bf16.mxu0 %v6520_v36  ;;  %4585 = vmatprep.mubr.bf16.mxu1 %v6970_v43  ;;  %v6589_v36 = vld [vmem:[%s9050_s1 + $0xa80] ss:$12 sps:$4 sm:$0xff]  }
  0xce   :  { %4267 = vmatprep.mubr.bf16.mxu0 %v6588_v39  ;;  %v6597_v39 = vld [vmem:[%s9050_s1 + $0x3e0] ss:$12 sps:$4 sm:$0xff]  }
  0xcf   :  { %5766 = vmatpush3.bf16.msra.mxu1 %v6522_v40  ;;  %v6594_v40 = vld [vmem:[%s9050_s1 + $0xa98] ss:$12 sps:$4 sm:$0xff]   ;;  %v6598_v43 = vld [vmem:[%s9050_s1 + $0x320] ss:$12 sps:$4 sm:$0xff]  }
  0xd0   :  { %4242 = vmatpush1.bf16.msra.mxu0 %v6518_v38  ;;  %5767 = vmatprep.subr.bf16.mxu1 %v6526_v42  ;;  %v6596_v38 = vld [vmem:[%s9050_s1 + $0xa9c] ss:$12 sps:$4 sm:$0xff]  }
  0xd1   :  { %4243 = vmatprep.subr.bf16.mxu0 %v6525_v41  ;;  %v6659_v41 = vld [vmem:[%s9051_s0 + $0xec] ss:$92 sps:$4 sm:$0xff]  }
  0xd2   :  { %v6975_v42 = vld [vmem:[%s9051_s0 + $0x8] ss:$92 sps:$4 sm:$0xff]  }
  0xd3   :  { %5768 = vmatpush3.bf16.msra.mxu1 %v6527_v45  ;;  %v6602_v45 = vld [vmem:[%s9050_s1 + $0x3f8] ss:$12 sps:$4 sm:$0xff]  }
  0xd4   :  { %4244 = vmatpush1.bf16.msra.mxu0 %v6523_v44  ;;  %5769 = vmatprep.subr.bf16.mxu1 %v6531_v47  ;;  %v6601_v44 = vld [vmem:[%s9050_s1 + $0xab4] ss:$12 sps:$4 sm:$0xff]   ;;  %v6599_v47 = vld [vmem:[%s9050_s1 + $0xab0] ss:$12 sps:$4 sm:$0xff]  }
  0xd5   :  { %4245 = vmatprep.subr.bf16.mxu0 %v6530_v46  ;;  %v6976_v46 = vld [vmem:[%s9051_s0 + $0xc4] ss:$92 sps:$4 sm:$0xff]  }
  0xd7   :  { %5770 = vmatpush3.bf16.msra.mxu1 %v6532_v49  ;;  %v6603_v49 = vld [vmem:[%s9050_s1 + $0x338] ss:$12 sps:$4 sm:$0xff]  }
  0xd8   :  { %4246 = vmatpush1.bf16.msra.mxu0 %v6528_v48  ;;  %5771 = vmatprep.subr.bf16.mxu1 %v6536_v51  ;;  %v6665_v48 = vld [vmem:[%s9051_s0 + $0xe8] ss:$92 sps:$4 sm:$0xff]   ;;  %v6607_v51 = vld [vmem:[%s9050_s1 + $0x410] ss:$12 sps:$4 sm:$0xff]  }
  0xd9   :  { %4247 = vmatprep.subr.bf16.mxu0 %v6535_v50  ;;  %v6606_v50 = vld [vmem:[%s9050_s1 + $0xacc] ss:$12 sps:$4 sm:$0xff]  }
  0xdb   :  { %5772 = vmatpush3.bf16.msra.mxu1 %v6537_v53  ;;  %v6674_v53 = vld [vmem:[%s9051_s0 + $0x3c] ss:$92 sps:$4 sm:$0xff]  }
  0xdc   :  { %4248 = vmatpush1.bf16.msra.mxu0 %v6533_v52  ;;  %5773 = vmatprep.subr.bf16.mxu1 %v6541_v55  ;;  %v6604_v52 = vld [vmem:[%s9050_s1 + $0xac8] ss:$12 sps:$4 sm:$0xff]   ;;  %v6608_v55 = vld [vmem:[%s9050_s1 + $0x350] ss:$12 sps:$4 sm:$0xff]  }
  0xdd   :  { %4249 = vmatprep.subr.bf16.mxu0 %v6540_v54  ;;  %v6977_v54 = vld [vmem:[%s9051_s0 + $0xc0] ss:$92 sps:$4 sm:$0xff]  }
  0xdf   :  { %5774 = vmatpush3.bf16.msra.mxu1 %v6542_v57  ;;  %v6612_v57 = vld [vmem:[%s9050_s1 + $0x428] ss:$12 sps:$4 sm:$0xff]  }
  0xe0   :  { %4250 = vmatpush1.bf16.msra.mxu0 %v6538_v56  ;;  %5787 = vmatprep.subr.bf16.mxu1 %v6546_v59  ;;  %v6611_v56 = vld [vmem:[%s9050_s1 + $0xae4] ss:$12 sps:$4 sm:$0xff]   ;;  %v6609_v59 = vld [vmem:[%s9050_s1 + $0xae0] ss:$12 sps:$4 sm:$0xff]  }
  0xe1   :  { %4251 = vmatprep.subr.bf16.mxu0 %v6545_v58  ;;  %v6978_v58 = vld [vmem:[%s9051_s0 + $0x14] ss:$92 sps:$4 sm:$0xff]  }
  0xe2   :  { %4586 = vmatmul.mubr.bf16.vlgmr.msra.gmra.mrb[8].mxu1 %v6971_v0  ;;  %v6618_v0 = vld [vmem:[%s9050_s1 + $0x380] ss:$12 sps:$4 sm:$0xff]  }
  0xe3   :  { %5788 = vmatpush3.bf16.msra.mxu1 %v6547_v61  ;;  %4593 = vmatprep.mubr.bf16.mxu1 %v6972_v6  ;;  %v6616_v61 = vld [vmem:[%s9050_s1 + $0xafc] ss:$12 sps:$4 sm:$0xff]  }
  0xe4   :  { %4252 = vmatpush1.bf16.msra.mxu0 %v6543_v60  ;;  %5789 = vmatprep.subr.bf16.mxu1 %v6551_v63  ;;  %v6613_v60 = vld [vmem:[%s9050_s1 + $0x368] ss:$12 sps:$4 sm:$0xff]   ;;  %v6614_v63 = vld [vmem:[%s9050_s1 + $0xaf8] ss:$12 sps:$4 sm:$0xff]   ;;  %v6627_v6 = vld [vmem:[%s9050_s1 + $0x470] ss:$12 sps:$4 sm:$0xff]  }
  0xe5   :  { %4253 = vmatprep.subr.bf16.mxu0 %v6550_v62  ;;  %v6617_v62 = vld [vmem:[%s9050_s1 + $0x440] ss:$12 sps:$4 sm:$0xff]  }
  0xe7   :  { %5790 = vmatpush3.bf16.msra.mxu1 %v6552_v2  ;;  %v6622_v2 = vld [vmem:[%s9050_s1 + $0x458] ss:$12 sps:$4 sm:$0xff]  }
  0xe8   :  { %4254 = vmatpush1.bf16.msra.mxu0 %v6548_v1  ;;  %5791 = vmatprep.subr.bf16.mxu1 %v6556_v4  ;;  %v6621_v1 = vld [vmem:[%s9050_s1 + $0xb14] ss:$12 sps:$4 sm:$0xff]   ;;  %v6623_v4 = vld [vmem:[%s9050_s1 + $0x398] ss:$12 sps:$4 sm:$0xff]  }
  0xe9   :  { %4255 = vmatprep.subr.bf16.mxu0 %v6555_v3  ;;  %v6619_v3 = vld [vmem:[%s9050_s1 + $0xb10] ss:$12 sps:$4 sm:$0xff]  }
  0xea   :  { %4594 = vmatmul.mubr.bf16.gmra.mrb[12].mxu1 %v6973_v11  ;;  %v6629_v11 = vld [vmem:[%s9050_s1 + $0xb40] ss:$12 sps:$4 sm:$0xff]  }
  0xeb   :  { %5792 = vmatpush3.bf16.msra.mxu1 %v6557_v7  ;;  %4634 = vmatprep.mubr.bf16.mxu1 %v6974_v15  ;;  %v6624_v7 = vld [vmem:[%s9050_s1 + $0xb28] ss:$12 sps:$4 sm:$0xff]   ;;  %v6634_v15 = vld [vmem:[%s9050_s1 + $0xb58] ss:$12 sps:$4 sm:$0xff]  }
  0xec   :  { %4256 = vmatpush1.bf16.msra.mxu0 %v6553_v5  ;;  %5793 = vmatprep.subr.bf16.mxu1 %v6561_v9  ;;  %v6626_v5 = vld [vmem:[%s9050_s1 + $0xb2c] ss:$12 sps:$4 sm:$0xff]   ;;  %v6631_v9 = vld [vmem:[%s9050_s1 + $0xb44] ss:$12 sps:$4 sm:$0xff]  }
  0xed   :  { %4257 = vmatprep.subr.bf16.mxu0 %v6560_v8  ;;  %v6628_v8 = vld [vmem:[%s9050_s1 + $0x3b0] ss:$12 sps:$4 sm:$0xff]  }
  0xef   :  { %5794 = vmatpush3.bf16.msra.mxu1 %v6562_v12  ;;  %v6633_v12 = vld [vmem:[%s9050_s1 + $0x488] ss:$12 sps:$4 sm:$0xff]  }
  0xf0   :  { %4258 = vmatpush1.bf16.msra.mxu0 %v6558_v10  ;;  %5795 = vmatprep.subr.bf16.mxu1 %v6566_v14  ;;  %v6632_v10 = vld [vmem:[%s9050_s1 + $0x548] ss:$12 sps:$4 sm:$0xff]   ;;  %v6637_v14 = vld [vmem:[%s9050_s1 + $0x560] ss:$12 sps:$4 sm:$0xff]  }
  0xf1   :  { %4259 = vmatprep.subr.bf16.mxu0 %v6565_v13  ;;  %v6636_v13 = vld [vmem:[%s9050_s1 + $0xb5c] ss:$12 sps:$4 sm:$0xff]  }
  0xf3   :  { %5796 = vmatpush3.bf16.msra.mxu1 %v6567_v17  ;;  %v6641_v17 = vld [vmem:[%s9050_s1 + $0xb74] ss:$12 sps:$4 sm:$0xff]  }
  0xf4   :  { %4260 = vmatpush1.bf16.msra.mxu0 %v6563_v16  ;;  %5797 = vmatprep.subr.bf16.mxu1 %v6571_v20  ;;  %v6638_v16 = vld [vmem:[%s9050_s1 + $0x4a0] ss:$12 sps:$4 sm:$0xff]   ;;  %v6643_v20 = vld [vmem:[%s9050_s1 + $0x4b8] ss:$12 sps:$4 sm:$0xff]  }
  0xf5   :  { %4261 = vmatprep.subr.bf16.mxu0 %v6570_v18  ;;  %v6639_v18 = vld [vmem:[%s9050_s1 + $0xb70] ss:$12 sps:$4 sm:$0xff]  }
  0xf7   :  { %5798 = vmatpush3.bf16.msra.mxu1 %v6572_v22  ;;  %v6644_v22 = vld [vmem:[%s9050_s1 + $0xb88] ss:$12 sps:$4 sm:$0xff]  }
  0xf8   :  { %4262 = vmatpush1.bf16.msra.mxu0 %v6568_v21  ;;  %5799 = vmatprep.subr.bf16.mxu1 %v6578_v24  ;;  %v6646_v21 = vld [vmem:[%s9050_s1 + $0xb8c] ss:$12 sps:$4 sm:$0xff]   ;;  %v6651_v24 = vld [vmem:[%s9050_s1 + $0xba4] ss:$12 sps:$4 sm:$0xff]  }
  0xf9   :  { %4263 = vmatprep.subr.bf16.mxu0 %v6577_v23  ;;  %v6648_v23 = vld [vmem:[%s9050_s1 + $0x4d0] ss:$12 sps:$4 sm:$0xff]  }
  0xfb   :  { %5800 = vmatpush3.bf16.msra.mxu1 %v6580_v27  ;;  %v6649_v27 = vld [vmem:[%s9050_s1 + $0xba0] ss:$12 sps:$4 sm:$0xff]  }
  0xfc   :  { %4264 = vmatpush1.bf16.msra.mxu0 %v6575_v25  ;;  %5801 = vmatprep.subr.bf16.mxu1 %v6584_v29  ;;  %v6652_v25 = vld [vmem:[%s9050_s1 + $0x5a8] ss:$12 sps:$4 sm:$0xff]  }
  0xfd   :  { %4265 = vmatprep.subr.bf16.mxu0 %v6583_v28  ;;  %v6653_v28 = vld [vmem:[%s9050_s1 + $0x4e8] ss:$12 sps:$4 sm:$0xff]  }
  0xfe   :  { %v6656_v29 = vld [vmem:[%s9050_s1 + $0xbbc] ss:$12 sps:$4 sm:$0xff]  }
  0xff   :  { %5802 = vmatpush3.bf16.msra.mxu1 %v6585_v31  ;;  %v6654_v31 = vld [vmem:[%s9050_s1 + $0xbb8] ss:$12 sps:$4 sm:$0xff]  }
 0x100   :  { %4266 = vmatpush1.bf16.msra.mxu0 %v6581_v30  ;;  %5815 = vmatprep.subr.bf16.mxu1 %v6592_v34  ;;  %v6657_v30 = vld [vmem:[%s9050_s1 + $0x5c0] ss:$12 sps:$4 sm:$0xff]  }
 0x101   :  { %4288 = vmatprep.subr.bf16.mxu0 %v6591_v33  ;;  %v6658_v33 = vld [vmem:[%s9050_s1 + $0x500] ss:$12 sps:$4 sm:$0xff]  }
 0x102   :  { %4635 = vmatmul.mubr.bf16.vlgmr.msra.gmra.mrb[16].mxu1 %v6975_v42  ;;  %v6663_v34 = vld [vmem:[%s9050_s1 + $0xbd4] ss:$12 sps:$4 sm:$0xff]   ;;  %v6677_v42 = vld [vmem:[%s9050_s1 + $0xc04] ss:$12 sps:$4 sm:$0xff]  }
 0x103   :  { %4268 = vmatmul.mubr.bf16.vlgmr.msra.gmra.mrb[0].mxu0 %v6586_v35  ;;  %5816 = vmatpush3.bf16.msra.mxu1 %v6593_v37  ;;  %v6664_v35 = vld [vmem:[%s9050_s1 + $0x5d8] ss:$12 sps:$4 sm:$0xff]  }
 0x104   :  { %4289 = vmatpush1.bf16.msra.mxu0 %v6589_v36  ;;  %5817 = vmatprep.subr.bf16.mxu1 %v6597_v39  ;;  %v6661_v36 = vld [vmem:[%s9050_s1 + $0xbd0] ss:$12 sps:$4 sm:$0xff]   ;;  %v6666_v37 = vld [vmem:[%s9050_s1 + $0x518] ss:$12 sps:$4 sm:$0xff]  }
 0x105   :  { %4290 = vmatprep.subr.bf16.mxu0 %v6596_v38  ;;  %4642 = vmatprep.mubr.bf16.mxu1 %v6976_v46  ;;  %v6669_v38 = vld [vmem:[%s9050_s1 + $0xbec] ss:$12 sps:$4 sm:$0xff]   ;;  %v6670_v39 = vld [vmem:[%s9050_s1 + $0x5f0] ss:$12 sps:$4 sm:$0xff]   ;;  %v6679_v46 = vld [vmem:[%s9050_s1 + $0x608] ss:$12 sps:$4 sm:$0xff]  }
 0x106   :  { %4277 = vmatprep.mubr.bf16.mxu0 %v6659_v41  ;;  %v6671_v41 = vld [vmem:[%s9050_s1 + $0x530] ss:$12 sps:$4 sm:$0xff]  }
 0x107   :  { %5818 = vmatpush3.bf16.msra.mxu1 %v6598_v43  ;;  %v6678_v43 = vld [vmem:[%s9050_s1 + $0x6c8] ss:$12 sps:$4 sm:$0xff]  }
 0x108   :  { %4291 = vmatpush1.bf16.msra.mxu0 %v6594_v40  ;;  %5819 = vmatprep.subr.bf16.mxu1 %v6602_v45  ;;  %v6667_v40 = vld [vmem:[%s9050_s1 + $0xbe8] ss:$12 sps:$4 sm:$0xff]   ;;  %v6675_v45 = vld [vmem:[%s9050_s1 + $0xc00] ss:$12 sps:$4 sm:$0xff]  }
 0x109   :  { %4292 = vmatprep.subr.bf16.mxu0 %v6601_v44  ;;  %v6672_v44 = vld [vmem:[%s9051_s0 + $0x38] ss:$92 sps:$4 sm:$0xff]  }
 0x10a   :  { %4643 = vmatmul.mubr.bf16.gmra.mrb[20].mxu1 %v6977_v54  ;;  %v6688_v54 = vld [vmem:[%s9050_s1 + $0x6f8] ss:$12 sps:$4 sm:$0xff]  }
 0x10b   :  { %4278 = vmatmul.mubr.bf16.gmra.mrb[4].mxu0 %v6665_v48  ;;  %5820 = vmatpush3.bf16.msra.mxu1 %v6603_v49  ;;  %v6683_v48 = vld [vmem:[%s9050_s1 + $0x6e0] ss:$12 sps:$4 sm:$0xff]   ;;  %v6680_v49 = vld [vmem:[%s9050_s1 + $0xc18] ss:$12 sps:$4 sm:$0xff]  }
 0x10c   :  { %4293 = vmatpush1.bf16.msra.mxu0 %v6599_v47  ;;  %5821 = vmatprep.subr.bf16.mxu1 %v6607_v51  ;;  %v6682_v47 = vld [vmem:[%s9050_s1 + $0xc1c] ss:$12 sps:$4 sm:$0xff]   ;;  %v6980_v51 = vld [vmem:[%s9051_s0 + $0x18] ss:$92 sps:$4 sm:$0xff]  }
 0x10d   :  { %4294 = vmatprep.subr.bf16.mxu0 %v6606_v50  ;;  %4683 = vmatprep.mubr.bf16.mxu1 %v6978_v58  ;;  %v6745_v50 = vld [vmem:[%s9051_s0 + $0xf4] ss:$92 sps:$4 sm:$0xff]   ;;  %v6689_v58 = vld [vmem:[%s9050_s1 + $0x638] ss:$12 sps:$4 sm:$0xff]  }
 0x10e   :  { %4320 = vmatprep.mubr.bf16.mxu0 %v6674_v53  ;;  %v6687_v53 = vld [vmem:[%s9050_s1 + $0xc34] ss:$12 sps:$4 sm:$0xff]  }
 0x10f   :  { %5822 = vmatpush3.bf16.msra.mxu1 %v6608_v55  ;;  %v6981_v55 = vld [vmem:[%s9051_s0 + $0xd4] ss:$92 sps:$4 sm:$0xff]  }
 0x110   :  { %4295 = vmatpush1.bf16.msra.mxu0 %v6604_v52  ;;  %5823 = vmatprep.subr.bf16.mxu1 %v6612_v57  ;;  %v6684_v52 = vld [vmem:[%s9050_s1 + $0x620] ss:$12 sps:$4 sm:$0xff]  }
 0x111   :  { %4296 = vmatprep.subr.bf16.mxu0 %v6611_v56  ;;  %v6685_v56 = vld [vmem:[%s9050_s1 + $0xc30] ss:$12 sps:$4 sm:$0xff]  }
 0x112   :  { %v6751_v57 = vld [vmem:[%s9051_s0 + $0xf0] ss:$92 sps:$4 sm:$0xff]  }
 0x113   :  { %5824 = vmatpush3.bf16.msra.mxu1 %v6613_v60  ;;  %v6693_v60 = vld [vmem:[%s9050_s1 + $0x710] ss:$12 sps:$4 sm:$0xff]  }
 0x114   :  { %4297 = vmatpush1.bf16.msra.mxu0 %v6609_v59  ;;  %5825 = vmatprep.subr.bf16.mxu1 %v6617_v62  ;;  %v6692_v59 = vld [vmem:[%s9050_s1 + $0xc4c] ss:$12 sps:$4 sm:$0xff]   ;;  %v6760_v62 = vld [vmem:[%s9051_s0 + $0x44] ss:$92 sps:$4 sm:$0xff]  }
 0x115   :  { %4298 = vmatprep.subr.bf16.mxu0 %v6616_v61  ;;  %v6690_v61 = vld [vmem:[%s9050_s1 + $0xc48] ss:$12 sps:$4 sm:$0xff]  }
 0x117   :  { %5826 = vmatpush3.bf16.msra.mxu1 %v6618_v0  ;;  %v6694_v0 = vld [vmem:[%s9050_s1 + $0x650] ss:$12 sps:$4 sm:$0xff]  }
 0x118   :  { %4299 = vmatpush1.bf16.msra.mxu0 %v6614_v63  ;;  %5827 = vmatprep.subr.bf16.mxu1 %v6622_v2  ;;  %v6982_v63 = vld [vmem:[%s9051_s0 + $0xd0] ss:$92 sps:$4 sm:$0xff]   ;;  %v6698_v2 = vld [vmem:[%s9050_s1 + $0x728] ss:$12 sps:$4 sm:$0xff]  }
 0x119   :  { %4300 = vmatprep.subr.bf16.mxu0 %v6621_v1  ;;  %v6697_v1 = vld [vmem:[%s9050_s1 + $0xc64] ss:$12 sps:$4 sm:$0xff]  }
 0x11b   :  { %5828 = vmatpush3.bf16.msra.mxu1 %v6623_v4  ;;  %v6695_v4 = vld [vmem:[%s9050_s1 + $0xc60] ss:$12 sps:$4 sm:$0xff]  }
 0x11c   :  { %4301 = vmatpush1.bf16.msra.mxu0 %v6619_v3  ;;  %5829 = vmatprep.subr.bf16.mxu1 %v6627_v6  ;;  %v6983_v3 = vld [vmem:[%s9051_s0 + $0x24] ss:$92 sps:$4 sm:$0xff]   ;;  %v6702_v6 = vld [vmem:[%s9050_s1 + $0xc7c] ss:$12 sps:$4 sm:$0xff]  }
 0x11d   :  { %4302 = vmatprep.subr.bf16.mxu0 %v6626_v5  ;;  %v6699_v5 = vld [vmem:[%s9050_s1 + $0x668] ss:$12 sps:$4 sm:$0xff]  }
 0x11f   :  { %5830 = vmatpush3.bf16.msra.mxu1 %v6628_v8  ;;  %v6700_v8 = vld [vmem:[%s9050_s1 + $0xc78] ss:$12 sps:$4 sm:$0xff]  }
 0x120   :  { %4303 = vmatpush1.bf16.msra.mxu0 %v6624_v7  ;;  %5843 = vmatprep.subr.bf16.mxu1 %v6632_v10  ;;  %v6703_v7 = vld [vmem:[%s9050_s1 + $0x740] ss:$12 sps:$4 sm:$0xff]  }
 0x121   :  { %4304 = vmatprep.subr.bf16.mxu0 %v6631_v9  ;;  %v6704_v9 = vld [vmem:[%s9050_s1 + $0x680] ss:$12 sps:$4 sm:$0xff]  }
 0x122   :  { %4684 = vmatmul.mubr.bf16.vlgmr.msra.gmra.mrb[24].mxu1 %v7657_v19  ;;  %v6642_v19 = vld [vmem:[%s9050_s1 + $0x578] ss:$12 sps:$4 sm:$0xff]   ;;  %v6707_v10 = vld [vmem:[%s9050_s1 + $0xc94] ss:$12 sps:$4 sm:$0xff]  }
 0x123   :  { %5844 = vmatpush3.bf16.msra.mxu1 %v6633_v12  ;;  %4691 = vmatprep.mubr.bf16.mxu1 %v7680_v26  ;;  %v6647_v26 = vld [vmem:[%s9050_s1 + $0x590] ss:$12 sps:$4 sm:$0xff]  }
 0x124   :  { %4305 = vmatpush1.bf16.msra.mxu0 %v6629_v11  ;;  %5845 = vmatprep.subr.bf16.mxu1 %v6637_v14  ;;  %v6708_v11 = vld [vmem:[%s9050_s1 + $0x758] ss:$12 sps:$4 sm:$0xff]   ;;  %v6705_v12 = vld [vmem:[%s9050_s1 + $0xc90] ss:$12 sps:$4 sm:$0xff]  }
 0x125   :  { %4306 = vmatprep.subr.bf16.mxu0 %v6636_v13  ;;  %v6709_v13 = vld [vmem:[%s9050_s1 + $0x698] ss:$12 sps:$4 sm:$0xff]  }
 0x126   :  { %v6712_v14 = vld [vmem:[%s9050_s1 + $0xcac] ss:$12 sps:$4 sm:$0xff]  }
 0x127   :  { %5846 = vmatpush3.bf16.msra.mxu1 %v6638_v16  ;;  %v6710_v16 = vld [vmem:[%s9050_s1 + $0xca8] ss:$12 sps:$4 sm:$0xff]  }
 0x128   :  { %4307 = vmatpush1.bf16.msra.mxu0 %v6634_v15  ;;  %5847 = vmatprep.subr.bf16.mxu1 %v6642_v19  ;;  %v6713_v15 = vld [vmem:[%s9050_s1 + $0x770] ss:$12 sps:$4 sm:$0xff]  }
 0x129   :  { %4308 = vmatprep.subr.bf16.mxu0 %v6641_v17  ;;  %v6714_v17 = vld [vmem:[%s9050_s1 + $0x6b0] ss:$12 sps:$4 sm:$0xff]  }
 0x12a   :  { %4692 = vmatmul.mubr.bf16.gmra.mrb[28].mxu1 %v7702_v32  ;;  %v6979_v32 = vld [vmem:[%s9051_s0 + $0x1c] ss:$92 sps:$4 sm:$0xff]   ;;  %v6717_v19 = vld [vmem:[%s9050_s1 + $0xcc4] ss:$12 sps:$4 sm:$0xff]  }
 0x12b   :  { %5848 = vmatpush3.bf16.msra.mxu1 %v6643_v20  ;;  %4732 = vmatprep.mubr.bf16.mxu1 %v6979_v32  ;;  %v6715_v20 = vld [vmem:[%s9050_s1 + $0xcc0] ss:$12 sps:$4 sm:$0xff]  }
 0x12c   :  { %4309 = vmatpush1.bf16.msra.mxu0 %v6639_v18  ;;  %5849 = vmatprep.subr.bf16.mxu1 %v6647_v26  ;;  %v6718_v18 = vld [vmem:[%s9050_s1 + $0x848] ss:$12 sps:$4 sm:$0xff]  }
 0x12d   :  { %4310 = vmatprep.subr.bf16.mxu0 %v6646_v21  ;;  %v6719_v21 = vld [vmem:[%s9050_s1 + $0x788] ss:$12 sps:$4 sm:$0xff]  }
 0x12e   :  { %v6722_v26 = vld [vmem:[%s9050_s1 + $0xcdc] ss:$12 sps:$4 sm:$0xff]   ;;  %v6727_v32 = vld [vmem:[%s9050_s1 + $0xcf4] ss:$12 sps:$4 sm:$0xff]  }
 0x12f   :  { %5850 = vmatpush3.bf16.msra.mxu1 %v6648_v23  ;;  %v6984_v23 = vld [vmem:[%s9051_s0 + $0x20] ss:$92 sps:$4 sm:$0xff]  }
 0x130   :  { %4311 = vmatpush1.bf16.msra.mxu0 %v6644_v22  ;;  %5851 = vmatprep.subr.bf16.mxu1 %v6652_v25  ;;  %v6723_v22 = vld [vmem:[%s9050_s1 + $0x860] ss:$12 sps:$4 sm:$0xff]  }
 0x131   :  { %4312 = vmatprep.subr.bf16.mxu0 %v6651_v24  ;;  %v6720_v24 = vld [vmem:[%s9050_s1 + $0xcd8] ss:$12 sps:$4 sm:$0xff]   ;;  %v6724_v25 = vld [vmem:[%s9050_s1 + $0x7a0] ss:$12 sps:$4 sm:$0xff]  }
 0x133   :  { %5852 = vmatpush3.bf16.msra.mxu1 %v6653_v28  ;;  %v6985_v28 = vld [vmem:[%s9051_s0 + $0xdc] ss:$92 sps:$4 sm:$0xff]  }
 0x134   :  { %4313 = vmatpush1.bf16.msra.mxu0 %v6649_v27  ;;  %5853 = vmatprep.subr.bf16.mxu1 %v6657_v30  ;;  %v6728_v27 = vld [vmem:[%s9050_s1 + $0x878] ss:$12 sps:$4 sm:$0xff]  }
 0x135   :  { %4314 = vmatprep.subr.bf16.mxu0 %v6656_v29  ;;  %v6725_v29 = vld [vmem:[%s9050_s1 + $0xcf0] ss:$12 sps:$4 sm:$0xff]   ;;  %v6729_v30 = vld [vmem:[%s9050_s1 + $0x7b8] ss:$12 sps:$4 sm:$0xff]  }
 0x137   :  { %5854 = vmatpush3.bf16.msra.mxu1 %v6658_v33  ;;  %v6733_v33 = vld [vmem:[%s9050_s1 + $0x890] ss:$12 sps:$4 sm:$0xff]  }
 0x138   :  { %4315 = vmatpush1.bf16.msra.mxu0 %v6654_v31  ;;  %5855 = vmatprep.subr.bf16.mxu1 %v6664_v35  ;;  %v6732_v31 = vld [vmem:[%s9050_s1 + $0xd0c] ss:$12 sps:$4 sm:$0xff]   ;;  %v6730_v35 = vld [vmem:[%s9050_s1 + $0xd08] ss:$12 sps:$4 sm:$0xff]  }
 0x139   :  { %4316 = vmatprep.subr.bf16.mxu0 %v6663_v34  ;;  %v6986_v34 = vld [vmem:[%s9051_s0 + $0xd8] ss:$92 sps:$4 sm:$0xff]  }
 0x13b   :  { %5856 = vmatpush3.bf16.msra.mxu1 %v6666_v37  ;;  %v6737_v37 = vld [vmem:[%s9050_s1 + $0xd24] ss:$12 sps:$4 sm:$0xff]  }
 0x13c   :  { %4317 = vmatpush1.bf16.msra.mxu0 %v6661_v36  ;;  %5857 = vmatprep.subr.bf16.mxu1 %v6670_v39  ;;  %v6734_v36 = vld [vmem:[%s9050_s1 + $0x7d0] ss:$12 sps:$4 sm:$0xff]   ;;  %v6735_v39 = vld [vmem:[%s9050_s1 + $0xd20] ss:$12 sps:$4 sm:$0xff]  }
 0x13d   :  { %4318 = vmatprep.subr.bf16.mxu0 %v6669_v38  ;;  %v6738_v38 = vld [vmem:[%s9050_s1 + $0x8a8] ss:$12 sps:$4 sm:$0xff]  }
 0x13f   :  { %5858 = vmatpush3.bf16.msra.mxu1 %v6671_v41  ;;  %v6739_v41 = vld [vmem:[%s9050_s1 + $0x7e8] ss:$12 sps:$4 sm:$0xff]  }
 0x140   :  { %4319 = vmatpush1.bf16.msra.mxu0 %v6667_v40  ;;  %5871 = vmatprep.subr.bf16.mxu1 %v6678_v43  ;;  %v6987_v40 = vld [vmem:[%s9051_s0 + $0x2c] ss:$92 sps:$4 sm:$0xff]  }
 0x141   :  { %4341 = vmatprep.subr.bf16.mxu0 %v6677_v42  ;;  %v6742_v42 = vld [vmem:[%s9050_s1 + $0xd3c] ss:$12 sps:$4 sm:$0xff]   ;;  %v6743_v43 = vld [vmem:[%s9050_s1 + $0x8c0] ss:$12 sps:$4 sm:$0xff]  }
 0x142   :  { %4733 = vmatmul.mubr.bf16.vlgmr.msra.gmra.mrb[32].mxu1 %v6980_v51  ;;  %v6756_v51 = vld [vmem:[%s9050_s1 + $0x8f0] ss:$12 sps:$4 sm:$0xff]  }
 0x143   :  { %4321 = vmatmul.mubr.bf16.vlgmr.msra.gmra.mrb[0].mxu0 %v6672_v44  ;;  %5872 = vmatpush3.bf16.msra.mxu1 %v6679_v46  ;;  %v6740_v44 = vld [vmem:[%s9050_s1 + $0xd38] ss:$12 sps:$4 sm:$0xff]   ;;  %v6749_v46 = vld [vmem:[%s9050_s1 + $0xd54] ss:$12 sps:$4 sm:$0xff]  }
 0x144   :  { %4342 = vmatpush1.bf16.msra.mxu0 %v6675_v45  ;;  %5873 = vmatprep.subr.bf16.mxu1 %v6683_v48  ;;  %v6744_v45 = vld [vmem:[%s9050_s1 + $0x800] ss:$12 sps:$4 sm:$0xff]   ;;  %v6747_v48 = vld [vmem:[%s9050_s1 + $0xd50] ss:$12 sps:$4 sm:$0xff]  }
 0x145   :  { %4343 = vmatprep.subr.bf16.mxu0 %v6682_v47  ;;  %4740 = vmatprep.mubr.bf16.mxu1 %v6981_v55  ;;  %v6750_v47 = vld [vmem:[%s9050_s1 + $0x8d8] ss:$12 sps:$4 sm:$0xff]   ;;  %v6764_v55 = vld [vmem:[%s9050_s1 + $0x9c8] ss:$12 sps:$4 sm:$0xff]  }
 0x146   :  { %4330 = vmatprep.mubr.bf16.mxu0 %v6745_v50  ;;  %v6755_v50 = vld [vmem:[%s9050_s1 + $0xd6c] ss:$12 sps:$4 sm:$0xff]  }
 0x147   :  { %5874 = vmatpush3.bf16.msra.mxu1 %v6684_v52  ;;  %v6753_v52 = vld [vmem:[%s9050_s1 + $0xd68] ss:$12 sps:$4 sm:$0xff]  }
 0x148   :  { %4344 = vmatpush1.bf16.msra.mxu0 %v6680_v49  ;;  %5875 = vmatprep.subr.bf16.mxu1 %v6688_v54  ;;  %v6752_v49 = vld [vmem:[%s9050_s1 + $0x818] ss:$12 sps:$4 sm:$0xff]  }
 0x149   :  { %4345 = vmatprep.subr.bf16.mxu0 %v6687_v53  ;;  %v6757_v53 = vld [vmem:[%s9050_s1 + $0x830] ss:$12 sps:$4 sm:$0xff]  }
 0x14a   :  { %4741 = vmatmul.mubr.bf16.gmra.mrb[36].mxu1 %v6982_v63  ;;  %v6763_v54 = vld [vmem:[%s9050_s1 + $0xd84] ss:$12 sps:$4 sm:$0xff]  }
 0x14b   :  { %4331 = vmatmul.mubr.bf16.gmra.mrb[4].mxu0 %v6751_v57  ;;  %5876 = vmatpush3.bf16.msra.mxu1 %v6689_v58  ;;  %v6761_v57 = vld [vmem:[%s9050_s1 + $0xd80] ss:$12 sps:$4 sm:$0xff]   ;;  %v6765_v58 = vld [vmem:[%s9050_s1 + $0x908] ss:$12 sps:$4 sm:$0xff]  }
 0x14c   :  { %4346 = vmatpush1.bf16.msra.mxu0 %v6685_v56  ;;  %5877 = vmatprep.subr.bf16.mxu1 %v6693_v60  ;;  %v8347_v56 = vld [vmem:[%s9051_s0 + $0x40] ss:$92 sps:$4 sm:$0xff]   ;;  %v6988_v63 = vld [vmem:[%s9051_s0 + $0x28] ss:$92 sps:$4 sm:$0xff]  }
 0x14d   :  { %4347 = vmatprep.subr.bf16.mxu0 %v6692_v59  ;;  %4781 = vmatprep.mubr.bf16.mxu1 %v6983_v3  ;;  %v6768_v59 = vld [vmem:[%s9050_s1 + $0xd9c] ss:$12 sps:$4 sm:$0xff]   ;;  %v6769_v60 = vld [vmem:[%s9050_s1 + $0x9e0] ss:$12 sps:$4 sm:$0xff]  }
 0x14e   :  { %4373 = vmatprep.mubr.bf16.mxu0 %v6760_v62  ;;  %v8367_v62 = vld [vmem:[%s9051_s0 + $0xfc] ss:$92 sps:$4 sm:$0xff]   ;;  %v6989_v3 = vld [vmem:[%s9051_s0 + $0xe4] ss:$92 sps:$4 sm:$0xff]  }
 0x14f   :  { %5878 = vmatpush3.bf16.msra.mxu1 %v6694_v0  ;;  %v6770_v0 = vld [vmem:[%s9050_s1 + $0x920] ss:$12 sps:$4 sm:$0xff]  }
 0x150   :  { %4348 = vmatpush1.bf16.msra.mxu0 %v6690_v61  ;;  %5879 = vmatprep.subr.bf16.mxu1 %v6698_v2  ;;  %v6766_v61 = vld [vmem:[%s9050_s1 + $0xd98] ss:$12 sps:$4 sm:$0xff]  }
 0x151   :  { %4349 = vmatprep.subr.bf16.mxu0 %v6697_v1  ;;  %v6773_v1 = vld [vmem:[%s9050_s1 + $0xdb4] ss:$12 sps:$4 sm:$0xff]   ;;  %v6774_v2 = vld [vmem:[%s9050_s1 + $0x9f8] ss:$12 sps:$4 sm:$0xff]  }
 0x153   :  { %5880 = vmatpush3.bf16.msra.mxu1 %v6699_v5  ;;  %v6775_v5 = vld [vmem:[%s9050_s1 + $0x938] ss:$12 sps:$4 sm:$0xff]  }
 0x154   :  { %4350 = vmatpush1.bf16.msra.mxu0 %v6695_v4  ;;  %5881 = vmatprep.subr.bf16.mxu1 %v6703_v7  ;;  %v6771_v4 = vld [vmem:[%s9050_s1 + $0xdb0] ss:$12 sps:$4 sm:$0xff]   ;;  %v6778_v7 = vld [vmem:[%s9050_s1 + $0xdcc] ss:$12 sps:$4 sm:$0xff]  }
 0x155   :  { %4351 = vmatprep.subr.bf16.mxu0 %v6702_v6  ;;  %v8395_v6 = vld [vmem:[%s9051_s0 + $0xf8] ss:$92 sps:$4 sm:$0xff]  }
 0x157   :  { %5882 = vmatpush3.bf16.msra.mxu1 %v6704_v9  ;;  %v6776_v9 = vld [vmem:[%s9050_s1 + $0xdc8] ss:$12 sps:$4 sm:$0xff]  }
 0x158   :  { %4352 = vmatpush1.bf16.msra.mxu0 %v6700_v8  ;;  %5883 = vmatprep.subr.bf16.mxu1 %v6708_v11  ;;  %v6779_v8 = vld [vmem:[%s9050_s1 + $0xa10] ss:$12 sps:$4 sm:$0xff]  }
 0x159   :  { %4353 = vmatprep.subr.bf16.mxu0 %v6707_v10  ;;  %v8409_v10 = vld [vmem:[%s9051_s0 + $0x4c] ss:$92 sps:$4 sm:$0xff]   ;;  %v6990_v11 = vld [vmem:[%s9051_s0 + $0xe0] ss:$92 sps:$4 sm:$0xff]  }
 0x15b   :  { %5884 = vmatpush3.bf16.msra.mxu1 %v6709_v13  ;;  %v6783_v13 = vld [vmem:[%s9050_s1 + $0xde4] ss:$12 sps:$4 sm:$0xff]  }
 0x15c   :  { %4354 = vmatpush1.bf16.msra.mxu0 %v6705_v12  ;;  %5885 = vmatprep.subr.bf16.mxu1 %v6713_v15  ;;  %v6780_v12 = vld [vmem:[%s9050_s1 + $0x950] ss:$12 sps:$4 sm:$0xff]  }
 0x15d   :  { %4355 = vmatprep.subr.bf16.mxu0 %v6712_v14  ;;  %v6784_v14 = vld [vmem:[%s9050_s1 + $0xa28] ss:$12 sps:$4 sm:$0xff]  }
 0x15e   :  { %v6991_v15 = vld [vmem:[%s9051_s0 + $0x34] ss:$92 sps:$4 sm:$0xff]  }
 0x15f   :  { %5886 = vmatpush3.bf16.msra.mxu1 %v6714_v17  ;;  %v6785_v17 = vld [vmem:[%s9050_s1 + $0x968] ss:$12 sps:$4 sm:$0xff]  }
 0x160   :  { %4356 = vmatpush1.bf16.msra.mxu0 %v6710_v16  ;;  %5899 = vmatprep.subr.bf16.mxu1 %v6718_v18  ;;  %v6781_v16 = vld [vmem:[%s9050_s1 + $0xde0] ss:$12 sps:$4 sm:$0xff]  }
 0x161   :  { %4357 = vmatprep.subr.bf16.mxu0 %v6717_v19  ;;  %v6788_v19 = vld [vmem:[%s9050_s1 + $0xdfc] ss:$12 sps:$4 sm:$0xff]   ;;  %v6789_v18 = vld [vmem:[%s9050_s1 + $0xa40] ss:$12 sps:$4 sm:$0xff]  }
 0x162   :  { %4782 = vmatmul.mubr.bf16.vlgmr.msra.gmra.mrb[40].mxu1 %v6984_v23 }
 0x163   :  { %5900 = vmatpush3.bf16.msra.mxu1 %v6719_v21  ;;  %4789 = vmatprep.mubr.bf16.mxu1 %v6985_v28  ;;  %v6790_v21 = vld [vmem:[%s9050_s1 + $0x980] ss:$12 sps:$4 sm:$0xff]  }
 0x164   :  { %4358 = vmatpush1.bf16.msra.mxu0 %v6715_v20  ;;  %5901 = vmatprep.subr.bf16.mxu1 %v6723_v22  ;;  %v6786_v20 = vld [vmem:[%s9050_s1 + $0xdf8] ss:$12 sps:$4 sm:$0xff]  }
 0x165   :  { %4359 = vmatprep.subr.bf16.mxu0 %v6722_v26  ;;  %v6793_v26 = vld [vmem:[%s9050_s1 + $0xe14] ss:$12 sps:$4 sm:$0xff]   ;;  %v6794_v22 = vld [vmem:[%s9050_s1 + $0xa58] ss:$12 sps:$4 sm:$0xff]  }
 0x166   :  { %v6798_v28 = vld [vmem:[%s9050_s1 + $0xe2c] ss:$12 sps:$4 sm:$0xff]  }
 0x167   :  { %5902 = vmatpush3.bf16.msra.mxu1 %v6724_v25  ;;  %v6791_v25 = vld [vmem:[%s9050_s1 + $0xe10] ss:$12 sps:$4 sm:$0xff]  }
 0x168   :  { %4360 = vmatpush1.bf16.msra.mxu0 %v6720_v24  ;;  %5903 = vmatprep.subr.bf16.mxu1 %v6728_v27 }
 0x169   :  { %4361 = vmatprep.subr.bf16.mxu0 %v6727_v32  ;;  %v6795_v32 = vld [vmem:[%s9050_s1 + $0x998] ss:$12 sps:$4 sm:$0xff]  }
 0x16a   :  { %4790 = vmatmul.mubr.bf16.gmra.mrb[44].mxu1 %v6986_v34  ;;  %v6803_v34 = vld [vmem:[%s9050_s1 + $0xe44] ss:$12 sps:$4 sm:$0xff]  }
 0x16b   :  { %5904 = vmatpush3.bf16.msra.mxu1 %v6729_v30  ;;  %4830 = vmatprep.mubr.bf16.mxu1 %v6987_v40  ;;  %v6799_v30 = vld [vmem:[%s9050_s1 + $0xa70] ss:$12 sps:$4 sm:$0xff]  }
 0x16c   :  { %4362 = vmatpush1.bf16.msra.mxu0 %v6725_v29  ;;  %5905 = vmatprep.subr.bf16.mxu1 %v6733_v33  ;;  %v6800_v33 = vld [vmem:[%s9050_s1 + $0x9b0] ss:$12 sps:$4 sm:$0xff]  }
 0x16d   :  { %4363 = vmatprep.subr.bf16.mxu0 %v6732_v31  ;;  %v6796_v31 = vld [vmem:[%s9050_s1 + $0xe28] ss:$12 sps:$4 sm:$0xff]  }
 0x16f   :  { %5906 = vmatpush3.bf16.msra.mxu1 %v6734_v36 }
 0x170   :  { %4364 = vmatpush1.bf16.msra.mxu0 %v6730_v35  ;;  %5907 = vmatprep.subr.bf16.mxu1 %v6738_v38  ;;  %v6804_v35 = vld [vmem:[%s9050_s1 + $0xb48] ss:$12 sps:$4 sm:$0xff]  }
 0x171   :  { %4365 = vmatprep.subr.bf16.mxu0 %v6737_v37  ;;  %v6801_v37 = vld [vmem:[%s9050_s1 + $0xe40] ss:$12 sps:$4 sm:$0xff]  }
 0x173   :  { %5908 = vmatpush3.bf16.msra.mxu1 %v6739_v41  ;;  %v6808_v41 = vld [vmem:[%s9050_s1 + $0xe5c] ss:$12 sps:$4 sm:$0xff]  }
 0x174   :  { %4366 = vmatpush1.bf16.msra.mxu0 %v6735_v39  ;;  %5909 = vmatprep.subr.bf16.mxu1 %v6743_v43  ;;  %v6805_v39 = vld [vmem:[%s9050_s1 + $0xa88] ss:$12 sps:$4 sm:$0xff]   ;;  %v6809_v43 = vld [vmem:[%s9050_s1 + $0xb60] ss:$12 sps:$4 sm:$0xff]  }
 0x175   :  { %4367 = vmatprep.subr.bf16.mxu0 %v6742_v42 }
 0x177   :  { %5910 = vmatpush3.bf16.msra.mxu1 %v6744_v45  ;;  %v6806_v45 = vld [vmem:[%s9050_s1 + $0xe58] ss:$12 sps:$4 sm:$0xff]  }
 0x178   :  { %4368 = vmatpush1.bf16.msra.mxu0 %v6740_v44  ;;  %5911 = vmatprep.subr.bf16.mxu1 %v6750_v47  ;;  %v6992_v44 = vld [vmem:[%s9051_s0 + $0x30] ss:$92 sps:$4 sm:$0xff]   ;;  %v6813_v47 = vld [vmem:[%s9050_s1 + $0xe74] ss:$12 sps:$4 sm:$0xff]  }
 0x179   :  { %4369 = vmatprep.subr.bf16.mxu0 %v6749_v46  ;;  %v6810_v46 = vld [vmem:[%s9050_s1 + $0xaa0] ss:$12 sps:$4 sm:$0xff]  }
 0x17b   :  { %5912 = vmatpush3.bf16.msra.mxu1 %v6752_v49  ;;  %v6993_v49 = vld [vmem:[%s9051_s0 + $0xec] ss:$92 sps:$4 sm:$0xff]  }
 0x17c   :  { %4370 = vmatpush1.bf16.msra.mxu0 %v6747_v48  ;;  %5913 = vmatprep.subr.bf16.mxu1 %v6756_v51  ;;  %v6814_v48 = vld [vmem:[%s9050_s1 + $0xb78] ss:$12 sps:$4 sm:$0xff]  }
 0x17d   :  { %4371 = vmatprep.subr.bf16.mxu0 %v6755_v50  ;;  %v6811_v50 = vld [vmem:[%s9050_s1 + $0xe70] ss:$12 sps:$4 sm:$0xff]   ;;  %v6815_v51 = vld [vmem:[%s9050_s1 + $0xab8] ss:$12 sps:$4 sm:$0xff]  }
 0x17f   :  { %5914 = vmatpush3.bf16.msra.mxu1 %v6757_v53  ;;  %v6819_v53 = vld [vmem:[%s9050_s1 + $0xb90] ss:$12 sps:$4 sm:$0xff]  }
 0x180   :  { %4372 = vmatpush1.bf16.msra.mxu0 %v6753_v52  ;;  %5927 = vmatprep.subr.bf16.mxu1 %v6764_v55  ;;  %v6818_v52 = vld [vmem:[%s9050_s1 + $0xe8c] ss:$12 sps:$4 sm:$0xff]   ;;  %v6816_v55 = vld [vmem:[%s9050_s1 + $0xe88] ss:$12 sps:$4 sm:$0xff]  }
 0x181   :  { %4394 = vmatprep.subr.bf16.mxu0 %v6763_v54  ;;  %v6994_v54 = vld [vmem:[%s9051_s0 + $0xe8] ss:$92 sps:$4 sm:$0xff]  }
 0x182   :  { %4831 = vmatmul.mubr.bf16.vlgmr.msra.gmra.mrb[48].mxu1 %v6988_v63  ;;  %v6825_v63 = vld [vmem:[%s9050_s1 + $0xae8] ss:$12 sps:$4 sm:$0xff]  }
 0x183   :  { %4374 = vmatmul.mubr.bf16.vlgmr.msra.gmra.mrb[0].mxu0 %v8347_v56  ;;  %5928 = vmatpush3.bf16.msra.mxu1 %v6765_v58  ;;  %v6823_v58 = vld [vmem:[%s9050_s1 + $0xea4] ss:$12 sps:$4 sm:$0xff]  }
 0x184   :  { %4395 = vmatpush1.bf16.msra.mxu0 %v6761_v57  ;;  %5929 = vmatprep.subr.bf16.mxu1 %v6769_v60  ;;  %v6820_v57 = vld [vmem:[%s9050_s1 + $0xad0] ss:$12 sps:$4 sm:$0xff]   ;;  %v6821_v60 = vld [vmem:[%s9050_s1 + $0xea0] ss:$12 sps:$4 sm:$0xff]  }
 0x185   :  { %4396 = vmatprep.subr.bf16.mxu0 %v6768_v59  ;;  %4838 = vmatprep.mubr.bf16.mxu1 %v6989_v3  ;;  %v6824_v59 = vld [vmem:[%s9050_s1 + $0xba8] ss:$12 sps:$4 sm:$0xff]   ;;  %v6830_v3 = vld [vmem:[%s9050_s1 + $0xb00] ss:$12 sps:$4 sm:$0xff]  }
 0x186   :  { %4383 = vmatprep.mubr.bf16.mxu0 %v8367_v62 }
 0x187   :  { %5930 = vmatpush3.bf16.msra.mxu1 %v6770_v0  ;;  %v6828_v0 = vld [vmem:[%s9050_s1 + $0xebc] ss:$12 sps:$4 sm:$0xff]  }
 0x188   :  { %4397 = vmatpush1.bf16.msra.mxu0 %v6766_v61  ;;  %5931 = vmatprep.subr.bf16.mxu1 %v6774_v2  ;;  %v6995_v61 = vld [vmem:[%s9051_s0 + $0x3c] ss:$92 sps:$4 sm:$0xff]  }
 0x189   :  { %4398 = vmatprep.subr.bf16.mxu0 %v6773_v1  ;;  %v6829_v1 = vld [vmem:[%s9050_s1 + $0xbc0] ss:$12 sps:$4 sm:$0xff]   ;;  %v6826_v2 = vld [vmem:[%s9050_s1 + $0xeb8] ss:$12 sps:$4 sm:$0xff]  }
 0x18a   :  { %4839 = vmatmul.mubr.bf16.gmra.mrb[52].mxu1 %v6990_v11 }
 0x18b   :  { %4384 = vmatmul.mubr.bf16.gmra.mrb[4].mxu0 %v8395_v6  ;;  %5932 = vmatpush3.bf16.msra.mxu1 %v6775_v5  ;;  %v6836_v5 = vld [vmem:[%s9050_s1 + $0xbd8] ss:$12 sps:$4 sm:$0xff]  }
 0x18c   :  { %4399 = vmatpush1.bf16.msra.mxu0 %v6771_v4  ;;  %5933 = vmatprep.subr.bf16.mxu1 %v6779_v8  ;;  %v6835_v4 = vld [vmem:[%s9050_s1 + $0xed4] ss:$12 sps:$4 sm:$0xff]   ;;  %v6833_v8 = vld [vmem:[%s9050_s1 + $0xed0] ss:$12 sps:$4 sm:$0xff]  }
 0x18d   :  { %4400 = vmatprep.subr.bf16.mxu0 %v6778_v7  ;;  %4879 = vmatprep.mubr.bf16.mxu1 %v6991_v15 }
 0x18e   :  { %4426 = vmatprep.mubr.bf16.mxu0 %v8409_v10 }
 0x18f   :  { %5934 = vmatpush3.bf16.msra.mxu1 %v6780_v12 }
 0x190   :  { %4401 = vmatpush1.bf16.msra.mxu0 %v6776_v9  ;;  %5935 = vmatprep.subr.bf16.mxu1 %v6784_v14  ;;  %v6838_v9 = vld [vmem:[%s9050_s1 + $0xb18] ss:$12 sps:$4 sm:$0xff]  }
 0x191   :  { %4402 = vmatprep.subr.bf16.mxu0 %v6783_v13  ;;  %v6841_v14 = vld [vmem:[%s9050_s1 + $0xeec] ss:$12 sps:$4 sm:$0xff]  }
 0x193   :  { %5936 = vmatpush3.bf16.msra.mxu1 %v6785_v17 }
 0x194   :  { %4403 = vmatpush1.bf16.msra.mxu0 %v6781_v16  ;;  %5937 = vmatprep.subr.bf16.mxu1 %v6789_v18  ;;  %v6842_v16 = vld [vmem:[%s9050_s1 + $0xbf0] ss:$12 sps:$4 sm:$0xff]  }
 0x195   :  { %4404 = vmatprep.subr.bf16.mxu0 %v6788_v19  ;;  %v8452_v23 = vpop.f32.mrb[0].mxu1  ;;  %v6839_v19 = vld [vmem:[%s9050_s1 + $0xee8] ss:$12 sps:$4 sm:$0xff]   ;;  %v6843_v18 = vld [vmem:[%s9050_s1 + $0xb30] ss:$12 sps:$4 sm:$0xff]  }
 0x196   :  { %v8454_v24 = vpop.f32.mrb[1].mxu1 }
 0x197   :  { %v8462_v27 = vpop.f32.mrb[2].mxu1  ;;  %5938 = vmatpush3.bf16.msra.mxu1 %v6790_v21  ;;  %v8604_v21 = vld [vmem:[%s9051_s0 + $0x48] ss:$92 sps:$4 sm:$0xff]  }
 0x198   :  { %4405 = vmatpush1.bf16.msra.mxu0 %v6786_v20  ;;  %v8467_v29 = vpop.f32.mrb[3].mxu1  ;;  %5939 = vmatprep.subr.bf16.mxu1 %v6794_v22  ;;  %v6849_v20 = vld [vmem:[%s9050_s1 + $0xf04] ss:$12 sps:$4 sm:$0xff]   ;;  %v6847_v22 = vld [vmem:[%s9050_s1 + $0xf00] ss:$12 sps:$4 sm:$0xff]  }
 0x199   :  { %4406 = vmatprep.subr.bf16.mxu0 %v6793_v26  ;;  %v6850_v26 = vld [vmem:[%s9050_s1 + $0xcc8] ss:$12 sps:$4 sm:$0xff]  }
 0x19b   :  { %5940 = vmatpush3.bf16.msra.mxu1 %v6795_v32 }
 0x19c   :  { %4407 = vmatpush1.bf16.msra.mxu0 %v6791_v25  ;;  %5941 = vmatprep.subr.bf16.mxu1 %v6799_v30  ;;  %v6851_v25 = vld [vmem:[%s9050_s1 + $0xc08] ss:$12 sps:$4 sm:$0xff]  }
 0x19d   :  { %4408 = vmatprep.subr.bf16.mxu0 %v6798_v28  ;;  %v8484_v36 = vpop.f32.mrb[4].mxu1  ;;  %v6854_v28 = vld [vmem:[%s9050_s1 + $0xf1c] ss:$12 sps:$4 sm:$0xff]  }
 0x19e   :  { %v8489_v38 = vpop.f32.mrb[5].mxu1 }
 0x19f   :  { %v8494_v40 = vpop.f32.mrb[6].mxu1  ;;  %5942 = vmatpush3.bf16.msra.mxu1 %v6800_v33 }
 0x1a0   :  { %4409 = vmatpush1.bf16.msra.mxu0 %v6796_v31  ;;  %v8499_v42 = vpop.f32.mrb[7].mxu1  ;;  %5955 = vmatprep.subr.bf16.mxu1 %v6804_v35  ;;  %v6855_v31 = vld [vmem:[%s9050_s1 + $0xce0] ss:$12 sps:$4 sm:$0xff]  }
 0x1a1   :  { %4410 = vmatprep.subr.bf16.mxu0 %v6803_v34 }
 0x1a2   :  { %4880 = vmatmul.mubr.bf16.vlgmr.msra.gmra.mrb[56].mxu1 %v6992_v44  ;;  %v6856_v44 = vld [vmem:[%s9050_s1 + $0xc20] ss:$12 sps:$4 sm:$0xff]  }
 0x1a3   :  { %5956 = vmatpush3.bf16.msra.mxu1 %v6805_v39  ;;  %4887 = vmatprep.mubr.bf16.mxu1 %v6993_v49  ;;  %v6857_v49 = vld [vmem:[%s9050_s1 + $0xf30] ss:$12 sps:$4 sm:$0xff]  }
 0x1a4   :  { %4411 = vmatpush1.bf16.msra.mxu0 %v6801_v37  ;;  %5957 = vmatprep.subr.bf16.mxu1 %v6809_v43  ;;  %v6852_v37 = vld [vmem:[%s9050_s1 + $0xf18] ss:$12 sps:$4 sm:$0xff]  }
 0x1a5   :  { %4412 = vmatprep.subr.bf16.mxu0 %v6808_v41  ;;  %v8631_v41 = vld [vmem:[%s9051_s0 + $0x104] ss:$92 sps:$4 sm:$0xff]   ;;  %v6996_v43 = vld [vmem:[%s9051_s0 + $0x38] ss:$92 sps:$4 sm:$0xff]  }
 0x1a7   :  { %5958 = vmatpush3.bf16.msra.mxu1 %v6810_v46  ;;  %v6860_v46 = vld [vmem:[%s9050_s1 + $0xcf8] ss:$12 sps:$4 sm:$0xff]  }
 0x1a8   :  { %4413 = vmatpush1.bf16.msra.mxu0 %v6806_v45  ;;  %5959 = vmatprep.subr.bf16.mxu1 %v6814_v48  ;;  %v6859_v45 = vld [vmem:[%s9050_s1 + $0xf34] ss:$12 sps:$4 sm:$0xff]  }
 0x1a9   :  { %4414 = vmatprep.subr.bf16.mxu0 %v6813_v47  ;;  %v6997_v47 = vld [vmem:[%s9051_s0 + $0xf4] ss:$92 sps:$4 sm:$0xff]   ;;  %v8653_v48 = vld [vmem:[%s9051_s0 + $0x100] ss:$92 sps:$4 sm:$0xff]  }
 0x1aa   :  { %4888 = vmatmul.mubr.bf16.gmra.mrb[60].mxu1 %v6994_v54  ;;  %v8670_v54 = vld [vmem:[%s9051_s0 + $0x54] ss:$92 sps:$4 sm:$0xff]  }
 0x1ab   :  { %5960 = vmatpush3.bf16.msra.mxu1 %v6815_v51  ;;  %4928 = vmatprep.mubr.bf16.mxu1 %v6995_v61  ;;  %v6864_v51 = vld [vmem:[%s9050_s1 + $0xf4c] ss:$12 sps:$4 sm:$0xff]  }
 0x1ac   :  { %4415 = vmatpush1.bf16.msra.mxu0 %v6811_v50  ;;  %5961 = vmatprep.subr.bf16.mxu1 %v6819_v53  ;;  %v6861_v50 = vld [vmem:[%s9050_s1 + $0xc38] ss:$12 sps:$4 sm:$0xff]   ;;  %v785_v53 = vlaneseq }
 0x1ad   :  { %4416 = vmatprep.subr.bf16.mxu0 %v6818_v52  ;;  %v6865_v52 = vld [vmem:[%s9050_s1 + $0xd10] ss:$12 sps:$4 sm:$0xff]  }
 0x1ae   :  { %v8688_v61 = vshrl.u32 %v785_v53, 7 }
 0x1af   :  { %5962 = vmatpush3.bf16.msra.mxu1 %v6820_v57  ;;  %v6862_v57 = vld [vmem:[%s9050_s1 + $0xf48] ss:$12 sps:$4 sm:$0xff]  }
 0x1b0   :  { %4417 = vmatpush1.bf16.msra.mxu0 %v6816_v55  ;;  %5963 = vmatprep.subr.bf16.mxu1 %v6824_v59  ;;  %v6998_v55 = vld [vmem:[%s9051_s0 + $0xf0] ss:$92 sps:$4 sm:$0xff]  }
 0x1b1   :  { %4418 = vmatprep.subr.bf16.mxu0 %v6823_v58  ;;  %v6866_v58 = vld [vmem:[%s9050_s1 + $0xc50] ss:$12 sps:$4 sm:$0xff]  }
 0x1b2   :  { %v6869_v59 = vld [vmem:[%s9050_s1 + $0xf64] ss:$12 sps:$4 sm:$0xff]  }
 0x1b3   :  { %5964 = vmatpush3.bf16.msra.mxu1 %v6825_v63  ;;  %v6999_v63 = vld [vmem:[%s9051_s0 + $0x44] ss:$92 sps:$4 sm:$0xff]  }
 0x1b4   :  { %4419 = vmatpush1.bf16.msra.mxu0 %v6821_v60  ;;  %5965 = vmatprep.subr.bf16.mxu1 %v6829_v1  ;;  %v6870_v60 = vld [vmem:[%s9050_s1 + $0xd28] ss:$12 sps:$4 sm:$0xff]   ;;  %v6867_v1 = vld [vmem:[%s9050_s1 + $0xf60] ss:$12 sps:$4 sm:$0xff]  }
 0x1b5   :  { %4420 = vmatprep.subr.bf16.mxu0 %v6828_v0  ;;  %v5775_v7 = vpop.f32.mrb[8].mxu1  ;;  %v795_v0 = vsub.s32 2, %v8688_v61 }
 0x1b6   :  { %v5776_v11 = vpop.f32.mrb[9].mxu1 }
 0x1b7   :  { %v8582_v12 = vadd.f32 %v5776_v11, %v5775_v7  ;;  %v5778_v13 = vpop.f32.mrb[10].mxu1  ;;  %5966 = vmatpush3.bf16.msra.mxu1 %v6830_v3  ;;  %v6874_v3 = vld [vmem:[%s9050_s1 + $0xf7c] ss:$12 sps:$4 sm:$0xff]   ;;  %v6879_v11 = vld [vmem:[%s9050_s1 + $0xf94] ss:$12 sps:$4 sm:$0xff]  }
 0x1b8   :  { %4421 = vmatpush1.bf16.msra.mxu0 %v6826_v2  ;;  %v5779_v15 = vpop.f32.mrb[11].mxu1  ;;  %5967 = vmatprep.subr.bf16.mxu1 %v6836_v5  ;;  %v6871_v2 = vld [vmem:[%s9050_s1 + $0xc68] ss:$12 sps:$4 sm:$0xff]   ;;  %v8710_v5 = vld [vmem:[%s9052_s2] sm:$0x7] }
 0x1b9   :  { %4422 = vmatprep.subr.bf16.mxu0 %v6835_v4  ;;  %v8590_v17 = vadd.f32 %v5779_v15, %v5778_v13  ;;  %v6875_v4 = vld [vmem:[%s9050_s1 + $0xd40] ss:$12 sps:$4 sm:$0xff]   ;;  %v796_v7 = vrot.slane %v8710_v5, %v795_v0  ;;  %v6880_v13 = vld [vmem:[%s9050_s1 + $0xd58] ss:$12 sps:$4 sm:$0xff]  }
 0x1ba   :  { %v6901_v0 = vld [vmem:[%s9050_s1 + $0xdb8] ss:$12 sps:$4 sm:$0xff]  }
 0x1bb   :  { %5968 = vmatpush3.bf16.msra.mxu1 %v6838_v9  ;;  %v6876_v9 = vld [vmem:[%s9050_s1 + $0xc80] ss:$12 sps:$4 sm:$0xff]  }
 0x1bc   :  { %4423 = vmatpush1.bf16.msra.mxu0 %v6833_v8  ;;  %5969 = vmatprep.subr.bf16.mxu1 %v6842_v16  ;;  %v6872_v8 = vld [vmem:[%s9050_s1 + $0xf78] ss:$12 sps:$4 sm:$0xff]   ;;  %v4588_v16 = vadd.f32 %v8582_v12, %v796_v7  ;;  %v6885_v12 = vld [vmem:[%s9050_s1 + $0xd70] ss:$12 sps:$4 sm:$0xff]  }
 0x1bd   :  { %4424 = vmatprep.subr.bf16.mxu0 %v6841_v14  ;;  %v5781_v32 = vpop.f32.mrb[12].mxu1 }
 0x1be   :  { %v5782_v30 = vpop.f32.mrb[13].mxu1 }
 0x1bf   :  { %5970 = vmatpush3.bf16.msra.mxu1 %v6843_v18  ;;  %v8621_v33 = vadd.f32 %v5782_v30, %v5781_v32  ;;  %v5784_v34 = vpop.f32.mrb[14].mxu1  ;;  %v4591_v32 = vadd.f32 %v8590_v17, %v796_v7  ;;  %v6889_v17 = vld [vmem:[%s9050_s1 + $0xfc4] ss:$12 sps:$4 sm:$0xff]  }
 0x1c0   :  { %4425 = vmatpush1.bf16.msra.mxu0 %v6839_v19  ;;  %5983 = vmatprep.subr.bf16.mxu1 %v6850_v26  ;;  %v5785_v35 = vpop.f32.mrb[15].mxu1  ;;  %v6881_v26 = vld [vmem:[%s9050_s1 + $0xc98] ss:$12 sps:$4 sm:$0xff]  }
 0x1c1   :  { %4447 = vmatprep.subr.bf16.mxu0 %v6849_v20  ;;  %v8626_v39 = vadd.f32 %v5785_v35, %v5784_v34  ;;  %v6877_v20 = vld [vmem:[%s9050_s1 + $0xf90] ss:$12 sps:$4 sm:$0xff]   ;;  %v6882_v34 = vld [vmem:[%s9050_s1 + $0xfa8] ss:$12 sps:$4 sm:$0xff]  }
 0x1c2   :  { %4929 = vmatmul.mubr.bf16.vlgmr.msra.gmra.mrb[64].mxu1 %v6996_v43  ;;  %v6886_v35 = vld [vmem:[%s9050_s1 + $0xcb0] ss:$12 sps:$4 sm:$0xff]  }
 0x1c3   :  { %4427 = vmatmul.mubr.bf16.vlgmr.msra.gmra.mrb[0].mxu0 %v8604_v21  ;;  %5984 = vmatpush3.bf16.msra.mxu1 %v6851_v25  ;;  %v6884_v25 = vld [vmem:[%s9050_s1 + $0xfac] ss:$12 sps:$4 sm:$0xff]   ;;  %v4599_v53 = vadd.f32 %v8626_v39, %v796_v7  ;;  %v6899_v39 = vld [vmem:[%s9050_s1 + $0xff4] ss:$12 sps:$4 sm:$0xff]  }
 0x1c4   :  { %4448 = vmatpush1.bf16.msra.mxu0 %v6847_v22  ;;  %5985 = vmatprep.subr.bf16.mxu1 %v6855_v31 }
 0x1c5   :  { %4449 = vmatprep.subr.bf16.mxu0 %v6854_v28  ;;  %4936 = vmatprep.mubr.bf16.mxu1 %v6997_v47 }
 0x1c6   :  { %4436 = vmatprep.mubr.bf16.mxu0 %v8631_v41 }
 0x1c7   :  { %5986 = vmatpush3.bf16.msra.mxu1 %v6856_v44 }
 0x1c8   :  { %4450 = vmatpush1.bf16.msra.mxu0 %v6852_v37  ;;  %5987 = vmatprep.subr.bf16.mxu1 %v6860_v46  ;;  %v6890_v37 = vld [vmem:[%s9050_s1 + $0xe48] ss:$12 sps:$4 sm:$0xff]  }
 0x1c9   :  { %4451 = vmatprep.subr.bf16.mxu0 %v6859_v45  ;;  %v4596_v45 = vadd.f32 %v8621_v33, %v796_v7  ;;  %v6895_v33 = vld [vmem:[%s9050_s1 + $0xe60] ss:$12 sps:$4 sm:$0xff]  }
 0x1ca   :  { %4937 = vmatmul.mubr.bf16.gmra.mrb[68].mxu1 %v6998_v55  ;;  %v6907_v7 = vld [vmem:[%s9050_s1 + $0x1020] ss:$12 sps:$4 sm:$0xff]  }
 0x1cb   :  { %4437 = vmatmul.mubr.bf16.gmra.mrb[4].mxu0 %v8653_v48  ;;  %5988 = vmatpush3.bf16.msra.mxu1 %v6861_v50  ;;  %v6891_v50 = vld [vmem:[%s9050_s1 + $0xd88] ss:$12 sps:$4 sm:$0xff]  }
 0x1cc   :  { %4452 = vmatpush1.bf16.msra.mxu0 %v6857_v49  ;;  %5989 = vmatprep.subr.bf16.mxu1 %v6865_v52  ;;  %v6887_v49 = vld [vmem:[%s9050_s1 + $0xfc0] ss:$12 sps:$4 sm:$0xff]   ;;  %v6894_v52 = vld [vmem:[%s9050_s1 + $0xfdc] ss:$12 sps:$4 sm:$0xff]  }
 0x1cd   :  { %4453 = vmatprep.subr.bf16.mxu0 %v6864_v51  ;;  %4977 = vmatprep.mubr.bf16.mxu1 %v6999_v63  ;;  %v6897_v63 = vld [vmem:[%s9050_s1 + $0xff0] ss:$12 sps:$4 sm:$0xff]  }
 0x1ce   :  { %4479 = vmatprep.mubr.bf16.mxu0 %v8670_v54 }
 0x1cf   :  { %5990 = vmatpush3.bf16.msra.mxu1 %v6866_v58 }
 0x1d0   :  { %4454 = vmatpush1.bf16.msra.mxu0 %v6862_v57  ;;  %5991 = vmatprep.subr.bf16.mxu1 %v6870_v60  ;;  %v6896_v60 = vld [vmem:[%s9050_s1 + $0xda0] ss:$12 sps:$4 sm:$0xff]  }
 0x1d1   :  { %4455 = vmatprep.subr.bf16.mxu0 %v6869_v59  ;;  %v6892_v59 = vld [vmem:[%s9050_s1 + $0xfd8] ss:$12 sps:$4 sm:$0xff]  }
 0x1d3   :  { %5992 = vmatpush3.bf16.msra.mxu1 %v6871_v2  ;;  %v6902_v2 = vld [vmem:[%s9050_s1 + $0x1008] ss:$12 sps:$4 sm:$0xff]  }
 0x1d4   :  { %4456 = vmatpush1.bf16.msra.mxu0 %v6867_v1  ;;  %5993 = vmatprep.subr.bf16.mxu1 %v6875_v4  ;;  %v6904_v1 = vld [vmem:[%s9050_s1 + $0x100c] ss:$12 sps:$4 sm:$0xff]   ;;  %v6909_v4 = vld [vmem:[%s9050_s1 + $0x1024] ss:$12 sps:$4 sm:$0xff]  }
 0x1d5   :  { %4457 = vmatprep.subr.bf16.mxu0 %v6874_v3  ;;  %v5803_v14 = vpop.f32.mrb[16].mxu1  ;;  %v6906_v3 = vld [vmem:[%s9050_s1 + $0xdd0] ss:$12 sps:$4 sm:$0xff]  }
 0x1d6   :  { %v5804_v15 = vpop.f32.mrb[17].mxu1 }
 0x1d7   :  { %v5805_v19 = vadd.f32 %v5804_v15, %v5803_v14  ;;  %v5806_v18 = vpop.f32.mrb[18].mxu1  ;;  %5994 = vmatpush3.bf16.msra.mxu1 %v6876_v9  ;;  %v6914_v9 = vld [vmem:[%s9050_s1 + $0x103c] ss:$12 sps:$4 sm:$0xff]   ;;  %v6922_v14 = vld [vmem:[%s9050_s1 + $0x1054] ss:$12 sps:$4 sm:$0xff]  }
 0x1d8   :  { %4458 = vmatpush1.bf16.msra.mxu0 %v6872_v8  ;;  %v5807_v22 = vpop.f32.mrb[19].mxu1  ;;  %5995 = vmatprep.subr.bf16.mxu1 %v6880_v13  ;;  %v6911_v8 = vld [vmem:[%s9050_s1 + $0xde8] ss:$12 sps:$4 sm:$0xff]   ;;  %v6916_v13 = vld [vmem:[%s9050_s1 + $0xe00] ss:$12 sps:$4 sm:$0xff]  }
 0x1d9   :  { %4459 = vmatprep.subr.bf16.mxu0 %v6879_v11  ;;  %v8739_v28 = vadd.f32 %v5805_v19, %v4588_v16  ;;  %v5808_v30 = vadd.f32 %v5807_v22, %v5806_v18  ;;  %v6912_v11 = vld [vmem:[%s9050_s1 + $0x1038] ss:$12 sps:$4 sm:$0xff]  }
 0x1da   :  { %v6923_v15 = vld [vmem:[%s9050_s1 + $0xed8] ss:$12 sps:$4 sm:$0xff]  }
 0x1db   :  { %v8741_v31 = vadd.f32 %v5808_v30, %v4591_v32  ;;  %5996 = vmatpush3.bf16.msra.mxu1 %v6881_v26  ;;  %v6920_v26 = vld [vmem:[%s9050_s1 + $0x1050] ss:$12 sps:$4 sm:$0xff]   ;;  %v6924_v22 = vld [vmem:[%s9050_s1 + $0xe18] ss:$12 sps:$4 sm:$0xff]  }
 0x1dc   :  { %4460 = vmatpush1.bf16.msra.mxu0 %v6877_v20  ;;  %5997 = vmatprep.subr.bf16.mxu1 %v6885_v12  ;;  %v6927_v12 = vld [vmem:[%s9050_s1 + $0x106c] ss:$12 sps:$4 sm:$0xff]   ;;  %v6928_v32 = vld [vmem:[%s9050_s1 + $0xef0] ss:$12 sps:$4 sm:$0xff]  }
 0x1dd   :  { %4461 = vmatprep.subr.bf16.mxu0 %v6884_v25  ;;  %v5809_v43 = vpop.f32.mrb[20].mxu1 }
 0x1de   :  { %v5810_v44 = vpop.f32.mrb[21].mxu1 }
 0x1df   :  { %v5811_v46 = vadd.f32 %v5810_v44, %v5809_v43  ;;  %v5812_v47 = vpop.f32.mrb[22].mxu1  ;;  %5998 = vmatpush3.bf16.msra.mxu1 %v6886_v35 }
 0x1e0   :  { %4462 = vmatpush1.bf16.msra.mxu0 %v6882_v34  ;;  %v5813_v51 = vpop.f32.mrb[23].mxu1  ;;  %6011 = vmatprep.subr.bf16.mxu1 %v6890_v37  ;;  %v6929_v37 = vld [vmem:[%s9050_s1 + $0xe30] ss:$12 sps:$4 sm:$0xff]  }
 0x1e1   :  { %4463 = vmatprep.subr.bf16.mxu0 %v6889_v17  ;;  %v8769_v55 = vadd.f32 %v5811_v46, %v4596_v45  ;;  %v5814_v57 = vadd.f32 %v5813_v51, %v5812_v47  ;;  %v6925_v17 = vld [vmem:[%s9050_s1 + $0x1068] ss:$12 sps:$4 sm:$0xff]   ;;  %v8870_v45 = vld [vmem:[%s9051_s0 + $0x50] ss:$92 sps:$4 sm:$0xff]  }
 0x1e2   :  { %4978 = vmatmul.mubr.bf16.vlgmr.msra.gmra.mrb[72].mxu1 %v8347_v56  ;;  %v6900_v56 = vld [vmem:[%s9050_s1 + $0xe78] ss:$12 sps:$4 sm:$0xff]  }
 0x1e3   :  { %v8772_v58 = vadd.f32 %v5814_v57, %v4599_v53  ;;  %6012 = vmatpush3.bf16.msra.mxu1 %v6891_v50  ;;  %4985 = vmatprep.mubr.bf16.mxu1 %v8367_v62  ;;  %v6905_v62 = vld [vmem:[%s9050_s1 + $0xe90] ss:$12 sps:$4 sm:$0xff]   ;;  %v6937_v50 = vld [vmem:[%s9050_s1 + $0xf08] ss:$12 sps:$4 sm:$0xff]  }
 0x1e4   :  { %4464 = vmatpush1.bf16.msra.mxu0 %v6887_v49  ;;  %6013 = vmatprep.subr.bf16.mxu1 %v6895_v33  ;;  %v6933_v49 = vld [vmem:[%s9050_s1 + $0x1080] ss:$12 sps:$4 sm:$0xff]  }
 0x1e5   :  { %4465 = vmatprep.subr.bf16.mxu0 %v6894_v52  ;;  %v6940_v52 = vld [vmem:[%s9050_s1 + $0x109c] ss:$12 sps:$4 sm:$0xff]   ;;  %v6941_v33 = vld [vmem:[%s9050_s1 + $0xfe0] ss:$12 sps:$4 sm:$0xff]  }
 0x1e7   :  { %6014 = vmatpush3.bf16.msra.mxu1 %v6896_v60 }
 0x1e8   :  { %4466 = vmatpush1.bf16.msra.mxu0 %v6892_v59  ;;  %6015 = vmatprep.subr.bf16.mxu1 %v6900_v56  ;;  %v8890_v59 = vld [vmem:[%s9051_s0 + $0x10c] ss:$92 sps:$4 sm:$0xff]   ;;  %v6948_v56 = vld [vmem:[%s9050_s1 + $0x10b4] ss:$12 sps:$4 sm:$0xff]  }
 0x1e9   :  { %4467 = vmatprep.subr.bf16.mxu0 %v6899_v39  ;;  %v6942_v39 = vld [vmem:[%s9050_s1 + $0xf20] ss:$12 sps:$4 sm:$0xff]  }
 0x1ea   :  { %4986 = vmatmul.mubr.bf16.gmra.mrb[76].mxu1 %v8395_v6  ;;  %v6910_v6 = vld [vmem:[%s9050_s1 + $0xea8] ss:$12 sps:$4 sm:$0xff]  }
 0x1eb   :  { %6016 = vmatpush3.bf16.msra.mxu1 %v6901_v0  ;;  %5026 = vmatprep.mubr.bf16.mxu1 %v8409_v10  ;;  %v6915_v10 = vld [vmem:[%s9050_s1 + $0xec0] ss:$12 sps:$4 sm:$0xff]   ;;  %v6950_v0 = vld [vmem:[%s9050_s1 + $0xf38] ss:$12 sps:$4 sm:$0xff]  }
 0x1ec   :  { %4468 = vmatpush1.bf16.msra.mxu0 %v6897_v63  ;;  %6017 = vmatprep.subr.bf16.mxu1 %v6905_v62  ;;  %v6946_v63 = vld [vmem:[%s9050_s1 + $0x10b0] ss:$12 sps:$4 sm:$0xff]   ;;  %v6951_v62 = vld [vmem:[%s9050_s1 + $0x10c8] ss:$12 sps:$4 sm:$0xff]  }
 0x1ed   :  { %4469 = vmatprep.subr.bf16.mxu0 %v6904_v1  ;;  %v6954_v1 = vld [vmem:[%s9050_s1 + $0x1010] ss:$12 sps:$4 sm:$0xff]  }
 0x1ef   :  { %6018 = vmatpush3.bf16.msra.mxu1 %v6906_v3  ;;  %v6957_v3 = vld [vmem:[%s9050_s1 + $0x1028] ss:$12 sps:$4 sm:$0xff]  }
 0x1f0   :  { %4470 = vmatpush1.bf16.msra.mxu0 %v6902_v2  ;;  %6019 = vmatprep.subr.bf16.mxu1 %v6910_v6  ;;  %v6955_v2 = vld [vmem:[%s9050_s1 + $0xf50] ss:$12 sps:$4 sm:$0xff]   ;;  %v6956_v6 = vld [vmem:[%s9051_s0 + $0x58] ss:$92 sps:$4 sm:$0xff]  }
 0x1f1   :  { %4471 = vmatprep.subr.bf16.mxu0 %v6909_v4  ;;  %v7000_v4 = vmov 0  }
 0x1f3   :  { %6020 = vmatpush3.bf16.msra.mxu1 %v6911_v8  ;;  %v6959_v8 = vld [vmem:[%s9050_s1 + $0x1040] ss:$12 sps:$4 sm:$0xff]  }
 0x1f4   :  { %4472 = vmatpush1.bf16.msra.mxu0 %v6907_v7  ;;  %6021 = vmatprep.subr.bf16.mxu1 %v6915_v10  ;;  %v6958_v7 = vld [vmem:[%s9050_s1 + $0xf68] ss:$12 sps:$4 sm:$0xff]   ;;  %v6963_v10 = vld [vmem:[%s9050_s1 + $0x1058] ss:$12 sps:$4 sm:$0xff]  }
 0x1f5   :  { %4473 = vmatprep.subr.bf16.mxu0 %v6914_v9  ;;  %v5831_v16 = vpop.f32.mrb[24].mxu1  ;;  %v6961_v9 = vld [vmem:[%s9050_s1 + $0xf80] ss:$12 sps:$4 sm:$0xff]  }
 0x1f6   :  { %v5832_v19 = vpop.f32.mrb[25].mxu1 }
 0x1f7   :  { %v5833_v18 = vadd.f32 %v5832_v19, %v5831_v16  ;;  %v5834_v20 = vpop.f32.mrb[26].mxu1  ;;  %6022 = vmatpush3.bf16.msra.mxu1 %v6916_v13 }
 0x1f8   :  { %4474 = vmatpush1.bf16.msra.mxu0 %v6912_v11  ;;  %v5835_v25 = vpop.f32.mrb[27].mxu1  ;;  %6023 = vmatprep.subr.bf16.mxu1 %v6923_v15  ;;  %v6967_v11 = vld [vmem:[%s9050_s1 + $0x10b8] ss:$12 sps:$4 sm:$0xff]   ;;  %v6962_v15 = vld [vmem:[%s9051_s0 + $0x110] ss:$92 sps:$4 sm:$0xff]  }
 0x1f9   :  { %4475 = vmatprep.subr.bf16.mxu0 %v6922_v14  ;;  %v8850_v30 = vadd.f32 %v5833_v18, %v8739_v28  ;;  %v5836_v34 = vadd.f32 %v5835_v25, %v5834_v20  ;;  %v6935_v28 = vld [vmem:[%s9050_s1 + $0x1084] ss:$12 sps:$4 sm:$0xff]  }
 0x1fa   :  { %v6965_v18 = vld [vmem:[%s9050_s1 + $0xf98] ss:$12 sps:$4 sm:$0xff]  }
 0x1fb   :  { %v8853_v35 = vadd.f32 %v5836_v34, %v8741_v31  ;;  %6024 = vmatpush3.bf16.msra.mxu1 %v6924_v22  ;;  %v6936_v31 = vld [vmem:[%s9050_s1 + $0xfc8] ss:$12 sps:$4 sm:$0xff]   ;;  %v6969_v22 = vld [vmem:[%s9050_s1 + $0x10d0] ss:$12 sps:$4 sm:$0xff]  }
 0x1fc   :  { %4476 = vmatpush1.bf16.msra.mxu0 %v6920_v26  ;;  %6025 = vmatprep.subr.bf16.mxu1 %v6928_v32  ;;  %v6966_v26 = vld [vmem:[%s9050_s1 + $0x1070] ss:$12 sps:$4 sm:$0xff]  }
 0x1fd   :  { %4477 = vmatprep.subr.bf16.mxu0 %v6927_v12  ;;  %v5837_v43 = vpop.f32.mrb[28].mxu1  ;;  %v6968_v34 = vld [vmem:[%s9050_s1 + $0xfb0] ss:$12 sps:$4 sm:$0xff]  }
 0x1fe   :  { %v5838_v44 = vpop.f32.mrb[29].mxu1 }
 0x1ff   :  { %v5839_v46 = vadd.f32 %v5838_v44, %v5837_v43  ;;  %v5840_v47 = vpop.f32.mrb[30].mxu1  ;;  %6026 = vmatpush3.bf16.msra.mxu1 %v6929_v37 }
 0x200   :  { %4478 = vmatpush1.bf16.msra.mxu0 %v6925_v17  ;;  %v5841_v51 = vpop.f32.mrb[31].mxu1  ;;  %6039 = vmatprep.subr.bf16.mxu1 %v6936_v31 }
 0x201   :  { %4500 = vmatprep.subr.bf16.mxu0 %v6935_v28  ;;  %v8885_v53 = vadd.f32 %v5839_v46, %v8769_v55  ;;  %v5842_v57 = vadd.f32 %v5841_v51, %v5840_v47  ;;  %v6938_v55 = vld [vmem:[%s9050_s1 + $0x1098] ss:$12 sps:$4 sm:$0xff]  }
 0x202   :  { %5027 = vmatmul.mubr.bf16.vlgmr.msra.gmra.mrb[80].mxu1 %v8604_v21  ;;  %v6949_v21 = vld [vmem:[%s9050_s1 + $0xff8] ss:$12 sps:$4 sm:$0xff]  }
 0x203   :  { %4480 = vmatmul.mubr.bf16.vlgmr.msra.gmra.mrb[0].mxu0 %v8870_v45  ;;  %v8895_v60 = vadd.f32 %v5842_v57, %v8772_v58  ;;  %6040 = vmatpush3.bf16.msra.mxu1 %v6937_v50  ;;  %v8914_v58 = vld [vmem:[%s9051_s0 + $0x108] ss:$92 sps:$4 sm:$0xff]  }
 0x204   :  { %4501 = vmatpush1.bf16.msra.mxu0 %v6933_v49  ;;  %6041 = vmatprep.subr.bf16.mxu1 %v6941_v33 }
 0x205   :  { %4502 = vmatprep.subr.bf16.mxu0 %v6940_v52  ;;  %4489 = vmatprep.mubr.bf16.mxu0 %v8890_v59 }
 0x206   :  { %5034 = vmatprep.mubr.bf16.mxu1 %v8631_v41  ;;  %v6953_v41 = vld [vmem:[%s9050_s1 + $0x10cc] ss:$12 sps:$4 sm:$0xff]  }
 0x207   :  { %6042 = vmatpush3.bf16.msra.mxu1 %v6942_v39 }
 0x208   :  { %4503 = vmatpush1.bf16.msra.mxu0 %v6938_v55  ;;  %6043 = vmatprep.subr.bf16.mxu1 %v6949_v21 }
 0x209   :  { %4504 = vmatprep.subr.bf16.mxu0 %v6948_v56 }
 0x20a   :  { %5035 = vmatmul.mubr.bf16.gmra.mrb[84].mxu1 %v8653_v48  ;;  %v6960_v48 = vld [vmem:[%s9050_s1 + $0x1088] ss:$12 sps:$4 sm:$0xff]  }
 0x20b   :  { %4490 = vmatmul.mubr.bf16.gmra.mrb[4].mxu0 %v8914_v58  ;;  %6044 = vmatpush3.bf16.msra.mxu1 %v6950_v0 }
 0x20c   :  { %4505 = vmatpush1.bf16.msra.mxu0 %v6946_v63  ;;  %6045 = vmatprep.subr.bf16.mxu1 %v6954_v1 }
 0x20d   :  { %4506 = vmatprep.subr.bf16.mxu0 %v6953_v41  ;;  %4532 = vmatprep.mubr.bf16.mxu0 %v7000_v4 }
 0x20e   :  { %5075 = vmatprep.mubr.bf16.mxu1 %v8670_v54  ;;  %v6964_v54 = vld [vmem:[%s9050_s1 + $0x10a0] ss:$12 sps:$4 sm:$0xff]  }
 0x20f   :  { %6046 = vmatpush3.bf16.msra.mxu1 %v6955_v2 }
 0x210   :  { %4507 = vmatpush1.bf16.msra.mxu0 %v6951_v62  ;;  %6047 = vmatprep.subr.bf16.mxu1 %v6957_v3 }
 0x211   :  { %6073 = vmatprep.subr.bf16.mxu0 %v6960_v48 }
 0x213   :  { %5755 = vmatmul.mubr.msk.bf16.vlgmr.msra.gmra.mrb[0].mxu0 %vm3910_vm0, %v6956_v6  ;;  %6048 = vmatpush3.bf16.msra.mxu1 %v6958_v7 }
 0x214   :  { %6074 = vmatpush3.bf16.msra.mxu0 %v6960_v48  ;;  %6049 = vmatprep.subr.bf16.mxu1 %v6959_v8 }
 0x215   :  { %4542 = vmatprep.mubr.bf16.mxu0 %v7000_v4  ;;  %v5859_v13 = vpop.f32.mrb[32].mxu1  ;;  %6075 = vmatprep.subr.bf16.mxu0 %v6964_v54 }
 0x216   :  { %v5860_v14 = vpop.f32.mrb[33].mxu1 }
 0x217   :  { %v5861_v16 = vadd.f32 %v5860_v14, %v5859_v13  ;;  %v5862_v19 = vpop.f32.mrb[34].mxu1  ;;  %6050 = vmatpush3.bf16.msra.mxu1 %v6961_v9 }
 0x218   :  { %6076 = vmatpush3.bf16.msra.mxu0 %v6964_v54  ;;  %v5863_v20 = vpop.f32.mrb[35].mxu1  ;;  %6051 = vmatprep.subr.bf16.mxu1 %v6963_v10 }
 0x219   :  { %6077 = vmatprep.subr.bf16.mxu0 %v6967_v11  ;;  %v4735_v25 = vadd.f32 %v5861_v16, %v8850_v30  ;;  %v5864_v12 = vadd.f32 %v5863_v20, %v5862_v19 }
 0x21b   :  { %5756 = vmatmul.mubr.msk.bf16.gmra.mrb[4].mxu0 %vm3910_vm0, %v6962_v15  ;;  %v4738_v32 = vadd.f32 %v5864_v12, %v8853_v35  ;;  %6052 = vmatpush3.bf16.msra.mxu1 %v6965_v18 }
 0x21c   :  { %6078 = vmatpush3.bf16.msra.mxu0 %v6967_v11  ;;  %6053 = vmatprep.subr.bf16.mxu1 %v6966_v26 }
 0x21d   :  { %6079 = vmatprep.subr.bf16.mxu0 %v6969_v22  ;;  %v5865_v17 = vpop.f32.mrb[36].mxu1  ;;  %6081 = vmatprep.mubr.msk.bf16.mxu0 %vm3910_vm0, %v6956_v6 }
 0x21e   :  { %v5866_v37 = vpop.f32.mrb[37].mxu1 }
 0x21f   :  { %v5867_v28 = vadd.f32 %v5866_v37, %v5865_v17  ;;  %v5868_v31 = vpop.f32.mrb[38].mxu1  ;;  %6054 = vmatpush3.bf16.msra.mxu1 %v6968_v34 }
 0x220   :  { %6080 = vmatpush3.bf16.msra.mxu0 %v6969_v22  ;;  %v5869_v30 = vpop.f32.mrb[39].mxu1 }
 0x221   :  { %v4743_v43 = vadd.f32 %v5867_v28, %v8885_v53  ;;  %v5870_v35 = vadd.f32 %v5869_v30, %v5868_v31 }
 0x222   :  { %5076 = vmatmul.mubr.bf16.vlgmr.msra.gmra.mrb[88].mxu1 %v8870_v45 }
 0x223   :  { %6082 = vmatmul.mubr.msk.bf16.vlgmr.msra.gmra.mrb[8].mxu0 %vm3910_vm0, %v6962_v15  ;;  %v4746_v44 = vadd.f32 %v5870_v35, %v8895_v60  ;;  %5083 = vmatprep.mubr.bf16.mxu1 %v8890_v59 }
 0x22a   :  { %5084 = vmatmul.mubr.bf16.gmra.mrb[92].mxu1 %v8914_v58 }
 0x235   :  { %v5887_v46 = vpop.f32.mrb[40].mxu1 }
 0x236   :  { %v5888_v47 = vpop.f32.mrb[41].mxu1 }
 0x237   :  { %v5889_v49 = vadd.f32 %v5888_v47, %v5887_v46  ;;  %v5890_v50 = vpop.f32.mrb[42].mxu1 }
 0x238   :  { %v5891_v51 = vpop.f32.mrb[43].mxu1 }
 0x239   :  { %v4784_v52 = vadd.f32 %v5889_v49, %v4735_v25  ;;  %v5892_v33 = vadd.f32 %v5891_v51, %v5890_v50 }
 0x23b   :  { %v4787_v57 = vadd.f32 %v5892_v33, %v4738_v32 }
 0x23d   :  { %v5893_v53 = vpop.f32.mrb[44].mxu1 }
 0x23e   :  { %v5894_v55 = vpop.f32.mrb[45].mxu1 }
 0x23f   :  { %v5895_v39 = vadd.f32 %v5894_v55, %v5893_v53  ;;  %v5896_v45 = vpop.f32.mrb[46].mxu1 }
 0x240   :  { %v5897_v56 = vpop.f32.mrb[47].mxu1 }
 0x241   :  { %v4792_v21 = vadd.f32 %v5895_v39, %v4743_v43  ;;  %v5898_v63 = vadd.f32 %v5897_v56, %v5896_v45 }
 0x243   :  { %v4795_v60 = vadd.f32 %v5898_v63, %v4746_v44 }
 0x255   :  { %v5915_v0 = vpop.f32.mrb[48].mxu1 }
 0x256   :  { %v5916_v59 = vpop.f32.mrb[49].mxu1 }
 0x257   :  { %v5917_v41 = vadd.f32 %v5916_v59, %v5915_v0  ;;  %v5918_v58 = vpop.f32.mrb[50].mxu1 }
 0x258   :  { %v5919_v1 = vpop.f32.mrb[51].mxu1 }
 0x259   :  { %v4833_v62 = vadd.f32 %v5917_v41, %v4784_v52  ;;  %v5920_v2 = vadd.f32 %v5919_v1, %v5918_v58 }
 0x25b   :  { %v4836_v3 = vadd.f32 %v5920_v2, %v4787_v57 }
 0x25d   :  { %v5921_v48 = vpop.f32.mrb[52].mxu1 }
 0x25e   :  { %v5922_v4 = vpop.f32.mrb[53].mxu1 }
 0x25f   :  { %v5923_v6 = vadd.f32 %v5922_v4, %v5921_v48  ;;  %v5924_v7 = vpop.f32.mrb[54].mxu1 }
 0x260   :  { %v5925_v8 = vpop.f32.mrb[55].mxu1 }
 0x261   :  { %v4841_v54 = vadd.f32 %v5923_v6, %v4792_v21  ;;  %v5926_v9 = vadd.f32 %v5925_v8, %v5924_v7 }
 0x263   :  { %v4844_v10 = vadd.f32 %v5926_v9, %v4795_v60 }
 0x275   :  { %v5943_v11 = vpop.f32.mrb[56].mxu1 }
 0x276   :  { %v5944_v13 = vpop.f32.mrb[57].mxu1 }
 0x277   :  { %v5945_v14 = vadd.f32 %v5944_v13, %v5943_v11  ;;  %v5946_v15 = vpop.f32.mrb[58].mxu1 }
 0x278   :  { %v5947_v16 = vpop.f32.mrb[59].mxu1 }
 0x279   :  { %v4882_v19 = vadd.f32 %v5945_v14, %v4833_v62  ;;  %v5948_v18 = vadd.f32 %v5947_v16, %v5946_v15  ;;  %v787_v14 = vsub.s32 0, %v8688_v61  ;;  %v791_v15 = vsub.s32 1, %v8688_v61 }
 0x27b   :  { %v4885_v20 = vadd.f32 %v5948_v18, %v4836_v3 }
 0x27d   :  { %v5949_v26 = vpop.f32.mrb[60].mxu1 }
 0x27e   :  { %v5950_v22 = vpop.f32.mrb[61].mxu1 }
 0x27f   :  { %v5951_v25 = vadd.f32 %v5950_v22, %v5949_v26  ;;  %v5952_v12 = vpop.f32.mrb[62].mxu1  ;;  %v788_v26 = vrot.slane %v8710_v5, %v787_v14 }
 0x280   :  { %v5953_v32 = vpop.f32.mrb[63].mxu1 }
 0x281   :  { %v4890_v34 = vadd.f32 %v5951_v25, %v4841_v54  ;;  %v5954_v17 = vadd.f32 %v5953_v32, %v5952_v12  ;;  %v792_v25 = vrot.slane %v8710_v5, %v791_v15  ;;  %v6089_v61 = vadd.f32 %v8462_v27, %v788_v26 }
 0x282   :  { %v6093_v27 = vadd.f32 %v8484_v36, %v788_v26 }
 0x283   :  { %v4893_v37 = vadd.f32 %v5954_v17, %v4844_v10  ;;  %v6085_v17 = vadd.f32 %v8452_v23, %v788_v26 }
 0x295   :  { %v5971_v28 = vpop.f32.mrb[64].mxu1 }
 0x296   :  { %v5972_v31 = vpop.f32.mrb[65].mxu1 }
 0x297   :  { %v5973_v30 = vadd.f32 %v5972_v31, %v5971_v28  ;;  %v5974_v43 = vpop.f32.mrb[66].mxu1 }
 0x298   :  { %v5975_v35 = vpop.f32.mrb[67].mxu1 }
 0x299   :  { %v4931_v44 = vadd.f32 %v5973_v30, %v4882_v19  ;;  %v5976_v46 = vadd.f32 %v5975_v35, %v5974_v43  ;;  %v6091_v43 = vadd.f32 %v8467_v29, %v792_v25  ;;  %v6095_v29 = vadd.f32 %v8489_v38, %v792_v25 }
 0x29b   :  { %v4934_v47 = vadd.f32 %v5976_v46, %v4885_v20 }
 0x29d   :  { %v5977_v49 = vpop.f32.mrb[68].mxu1 }
 0x29e   :  { %v5978_v50 = vpop.f32.mrb[69].mxu1 }
 0x29f   :  { %v5979_v51 = vadd.f32 %v5978_v50, %v5977_v49  ;;  %v5980_v52 = vpop.f32.mrb[70].mxu1 }
 0x2a0   :  { %v5981_v33 = vpop.f32.mrb[71].mxu1 }
 0x2a1   :  { %v4939_v57 = vadd.f32 %v5979_v51, %v4890_v34  ;;  %v5982_v53 = vadd.f32 %v5981_v33, %v5980_v52  ;;  %v6097_v52 = vadd.f32 %v8494_v40, %v788_v26 }
 0x2a3   :  { %v4942_v55 = vadd.f32 %v5982_v53, %v4893_v37  ;;  %v6087_v37 = vadd.f32 %v8454_v24, %v792_v25  ;;  %v6099_v53 = vadd.f32 %v8499_v42, %v792_v25 }
 0x2b5   :  { %v5999_v39 = vpop.f32.mrb[72].mxu1 }
 0x2b6   :  { %v6000_v45 = vpop.f32.mrb[73].mxu1 }
 0x2b7   :  { %v6001_v56 = vadd.f32 %v6000_v45, %v5999_v39  ;;  %v6002_v21 = vpop.f32.mrb[74].mxu1 }
 0x2b8   :  { %v6003_v63 = vpop.f32.mrb[75].mxu1 }
 0x2b9   :  { %v4980_v60 = vadd.f32 %v6001_v56, %v4931_v44  ;;  %v6004_v0 = vadd.f32 %v6003_v63, %v6002_v21 }
 0x2bb   :  { %v4983_v59 = vadd.f32 %v6004_v0, %v4934_v47 }
 0x2bd   :  { %v6005_v41 = vpop.f32.mrb[76].mxu1 }
 0x2be   :  { %v6006_v58 = vpop.f32.mrb[77].mxu1 }
 0x2bf   :  { %v6007_v1 = vadd.f32 %v6006_v58, %v6005_v41  ;;  %v6008_v62 = vpop.f32.mrb[78].mxu1 }
 0x2c0   :  { %v6009_v2 = vpop.f32.mrb[79].mxu1 }
 0x2c1   :  { %v4988_v3 = vadd.f32 %v6007_v1, %v4939_v57  ;;  %v6010_v48 = vadd.f32 %v6009_v2, %v6008_v62 }
 0x2c3   :  { %v4991_v4 = vadd.f32 %v6010_v48, %v4942_v55 }
 0x2d5   :  { %v6027_v6 = vpop.f32.mrb[80].mxu1 }
 0x2d6   :  { %v6028_v7 = vpop.f32.mrb[81].mxu1 }
 0x2d7   :  { %v6029_v8 = vadd.f32 %v6028_v7, %v6027_v6  ;;  %v6030_v54 = vpop.f32.mrb[82].mxu1 }
 0x2d8   :  { %v6031_v9 = vpop.f32.mrb[83].mxu1 }
 0x2d9   :  { %v8990_v10 = vadd.f32 %v6029_v8, %v4980_v60  ;;  %v6032_v11 = vadd.f32 %v6031_v9, %v6030_v54 }
 0x2db   :  { %v8992_v13 = vadd.f32 %v6032_v11, %v4983_v59 }
 0x2dd   :  { %v6033_v16 = vpop.f32.mrb[84].mxu1 }
 0x2de   :  { %v6034_v19 = vpop.f32.mrb[85].mxu1 }
 0x2df   :  { %v6035_v18 = vadd.f32 %v6034_v19, %v6033_v16  ;;  %v6036_v20 = vpop.f32.mrb[86].mxu1 }
 0x2e0   :  { %v6037_v22 = vpop.f32.mrb[87].mxu1 }
 0x2e1   :  { %v8998_v12 = vadd.f32 %v6035_v18, %v4988_v3  ;;  %v6038_v32 = vadd.f32 %v6037_v22, %v6036_v20 }
 0x2e3   :  { %v9000_v34 = vadd.f32 %v6038_v32, %v4991_v4 }
 0x2e6   :  { %v4534_v28 = vpop.f32.mrb[0].mxu0 }
 0x2e7   :  { %v6086_v31 = vadd.f32 %v6085_v17, %v4534_v28  ;;  %v4536_v30 = vpop.f32.mrb[1].mxu0 }
 0x2e8   :  { %v6088_v35 = vadd.f32 %v6087_v37, %v4536_v30  ;;  %v4538_v44 = vpop.f32.mrb[2].mxu0 }
 0x2e9   :  { %v5141_v46 = vmax.f32 %v6086_v31, 0.0  ;;  %v6090_v5 = vadd.f32 %v6089_v61, %v4538_v44  ;;  %v4540_v47 = vpop.f32.mrb[3].mxu0 }
 0x2ea   :  { %v5142_v49 = vmax.f32 %v6088_v35, 0.0  ;;  %v6092_v50 = vadd.f32 %v6091_v43, %v4540_v47 }
 0x2eb   :  { %5153 = vst [vmem:[%s9053_s3] sm:$0xff] %v5141_v46  ;;  %v5144_v23 = vmax.f32 %v6090_v5, 0.0 }
 0x2ec   :  { %5154 = vst [vmem:[%s9053_s3 + $0x8] sm:$0xff] %v5142_v49  ;;  %v5145_v24 = vmax.f32 %v6092_v50, 0.0 }
 0x2ed   :  { %5156 = vst [vmem:[%s9053_s3 + $0x18] sm:$0xff] %v5144_v23 }
 0x2ee   :  { %5157 = vst [vmem:[%s9053_s3 + $0x20] sm:$0xff] %v5145_v24  ;;  %v4544_v51 = vpop.f32.mrb[4].mxu0 }
 0x2ef   :  { %v6094_v33 = vadd.f32 %v6093_v27, %v4544_v51  ;;  %v4546_v57 = vpop.f32.mrb[5].mxu0 }
 0x2f0   :  { %v6096_v55 = vadd.f32 %v6095_v29, %v4546_v57  ;;  %v4548_v39 = vpop.f32.mrb[6].mxu0 }
 0x2f1   :  { %v5147_v36 = vmax.f32 %v6094_v33, 0.0  ;;  %v6098_v45 = vadd.f32 %v6097_v52, %v4548_v39  ;;  %v4550_v56 = vpop.f32.mrb[7].mxu0 }
 0x2f2   :  { %v5148_v21 = vmax.f32 %v6096_v55, 0.0  ;;  %v6100_v63 = vadd.f32 %v6099_v53, %v4550_v56 }
 0x2f3   :  { %5159 = vst [vmem:[%s9053_s3 + $0x30] sm:$0xff] %v5147_v36  ;;  %v5150_v38 = vmax.f32 %v6098_v45, 0.0 }
 0x2f4   :  { %5160 = vst [vmem:[%s9053_s3 + $0x38] sm:$0xff] %v5148_v21  ;;  %v5151_v40 = vmax.f32 %v6100_v63, 0.0 }
 0x2f5   :  { %5162 = vst [vmem:[%s9053_s3 + $0x48] sm:$0xff] %v5150_v38  ;;  %v6055_v42 = vpop.f32.mrb[88].mxu1 }
 0x2f6   :  { %5163 = vst [vmem:[%s9053_s3 + $0x50] sm:$0xff] %v5151_v40  ;;  %v6083_v60 = vpop.f32.mrb[8].mxu0  ;;  %v6056_v0 = vpop.f32.mrb[89].mxu1 }
 0x2f7   :  { %v5126_v59 = vpop.f32.mrb[9].mxu0  ;;  %v6057_v41 = vadd.f32 %v6056_v0, %v6055_v42  ;;  %v6058_v58 = vpop.f32.mrb[90].mxu1 }
 0x2f8   :  { %v6084_v1 = vpop.f32.mrb[10].mxu0  ;;  %v6059_v62 = vpop.f32.mrb[91].mxu1 }
 0x2f9   :  { %v5129_v2 = vpop.f32.mrb[11].mxu0  ;;  %v6060_v3 = vadd.f32 %v6059_v62, %v6058_v58  ;;  %v5078_v48 = vadd.f32 %v6057_v41, %v8990_v10 }
 0x2fb   :  { %v5127_v4 = vadd.f32 %v5126_v59, %v5078_v48  ;;  %v5081_v6 = vadd.f32 %v6060_v3, %v8992_v13 }
 0x2fd   :  { %v5143_v7 = vmax.f32 %v5127_v4, 0.0  ;;  %v5130_v8 = vadd.f32 %v5129_v2, %v5081_v6  ;;  %v6061_v54 = vpop.f32.mrb[92].mxu1 }
 0x2fe   :  { %v6062_v9 = vpop.f32.mrb[93].mxu1 }
 0x2ff   :  { %5155 = vst [vmem:[%s9053_s3 + $0x10] sm:$0xff] %v5143_v7  ;;  %v5146_v11 = vmax.f32 %v5130_v8, 0.0  ;;  %v6063_v14 = vadd.f32 %v6062_v9, %v6061_v54  ;;  %v6064_v15 = vpop.f32.mrb[94].mxu1 }
 0x300   :  { %v6065_v16 = vpop.f32.mrb[95].mxu1 }
 0x301   :  { %5158 = vst [vmem:[%s9053_s3 + $0x28] sm:$0xff] %v5146_v11  ;;  %v5086_v10 = vadd.f32 %v6063_v14, %v8998_v12  ;;  %v6066_v19 = vadd.f32 %v6065_v16, %v6064_v15 }
 0x303   :  { %v5135_v13 = vadd.f32 %v6083_v60, %v5086_v10  ;;  %v5089_v18 = vadd.f32 %v6066_v19, %v9000_v34 }
 0x305   :  { %v5149_v20 = vmax.f32 %v5135_v13, 0.0  ;;  %v5138_v26 = vadd.f32 %v6084_v1, %v5089_v18 }
 0x307   :  { %5161 = vst [vmem:[%s9053_s3 + $0x40] sm:$0xff] %v5149_v20  ;;  %v5152_v22 = vmax.f32 %v5138_v26, 0.0 }
 0x309   :  { %5164 = vst [vmem:[%s9053_s3 + $0x58] sm:$0xff] %v5152_v22 }

</bundles_post_ra>
